<compile_context>
chip_gen: v5e
topology: v5e:2x2
jax: 0.10.0
libtpu: 0.0.40
codegen_flags: <defaults>
</compile_context>

<pallas_src>
import jax
import jax.numpy as jnp
from jax import lax
from jax.experimental import pallas as pl
from jax.experimental.pallas import tpu as pltpu

NUM_ACTIONS = 6          # len(agent.poss_act) for the usual bomberman action set
FC4_IN = 64 * 7 * 7      # 3136  (implies a 1x17x17 input board)
FC4_OUT = 512
BT_MAX = 32              # batch tile: VMEM-safe on v7x (64 MiB), lets the two
                         # v7x TensorCores take independent batch tiles.


# ---------------------------------------------------------------------------
# Fused kernel: conv1+conv2+conv3+flatten+fc4+fc5, one grid step per batch tile
# ---------------------------------------------------------------------------
def _dqn_fused_kernel(p1_ref, w1_ref, b1_ref, w2_ref, b2_ref, w3_ref, b3_ref,
                      w4_hbm, b4_ref, w5_ref, b5_ref, o_ref,
                      w4_vmem, w4_sem, h3_ref, fcin_ref):
    bt = o_ref.shape[0]
    m = bt * 64                       # conv2-output positions in this tile

    # Kick off the dominant ~3.2 MB fc4-weight DMA immediately; the whole conv
    # stack and the flatten bridge below run while it is in flight.
    w4_copy = pltpu.make_async_copy(w4_hbm, w4_vmem, w4_sem)
    w4_copy.start()

    # conv1 (+ReLU): one block-diagonal K=16 matmul produces all 4 conv2 taps
    # (columns g*32+c) at once.
    h1 = jnp.dot(p1_ref[...], w1_ref[...], preferred_element_type=jnp.float32)
    h1 = jnp.maximum(h1 + b1_ref[...], 0.0)                      # (m, 128)

    # conv2 stride-2 (+ReLU): single K=128 matmul.
    h2 = jnp.dot(h1, w2_ref[...], preferred_element_type=jnp.float32)
    h2 = jnp.maximum(h2 + b2_ref[...], 0.0)                      # (m,64) == (bt,8,8,64)

    # conv3 (+ReLU): the 2x2 taps are row shifts of h2 by {0,1,8,9}; the
    # zero/garbage rows introduced by the shift only reach the i==7 / j==7
    # outputs, which the flatten below discards.  Taps are concatenated along
    # K so conv3 is a single (m,256)x(256,64) MXU matmul.
    def shifted(k):
        if k == 0:
            return h2
        return jnp.concatenate(
            [h2[k:], jnp.zeros((k, 64), jnp.float32)], axis=0)
    x3 = jnp.concatenate([shifted(0), shifted(1), shifted(8), shifted(9)],
                         axis=1)                                  # (m, 256)
    h3 = jnp.dot(x3, w3_ref[...], preferred_element_type=jnp.float32)
    h3 = jnp.maximum(h3 + b3_ref[...], 0.0)                      # (m, 64)

    # Flatten bridge: gather the valid 7x7 spatial positions into a lane-dense
    # (bt, 3136) fc4 input (NHWC order; w4 was pre-permuted offline to match
    # PyTorch's NCHW .view(B,-1)).  These small copies hide under the w4 DMA.
    h3_ref[...] = h3.reshape(bt, 64, 64)
    for i in range(7):
        for j in range(7):
            col = (i * 7 + j) * 64
            fcin_ref[:, col:col + 64] = h3_ref[:, i * 8 + j, :]

    # fc4 (+ReLU) and fc5, single matmuls; f32 accumulation on the MXU.
    w4_copy.wait()
    h4 = jnp.dot(fcin_ref[...].astype(jnp.bfloat16), w4_vmem[...],
                 preferred_element_type=jnp.float32)
    h4 = jnp.maximum(h4 + b4_ref[...], 0.0)                      # (bt, 512)
    q = jnp.dot(h4, w5_ref[...], preferred_element_type=jnp.float32) + b5_ref[...]
    o_ref[...] = q.astype(o_ref.dtype)


def _dqn_pallas(prep, p1, batch, bt):
    num_bt = batch // bt
    m = bt * 64
    flops = (2 * batch * 64 * (16 * 128 + 128 * 64 + 256 * 64)
             + 2 * batch * (FC4_IN * FC4_OUT + FC4_OUT * NUM_ACTIONS))
    bytes_accessed = (p1.size * 4 + prep["w1p"].size * 4 + prep["w2p"].size * 4
                      + prep["w3p"].size * 4 + prep["w4p"].size * 2
                      + prep["w5p"].size * 4 + batch * NUM_ACTIONS * 4)
    return pl.pallas_call(
        _dqn_fused_kernel,
        out_shape=jax.ShapeDtypeStruct((batch, NUM_ACTIONS), jnp.float32),
        grid=(num_bt,),
        in_specs=[
            pl.BlockSpec((m, 16), lambda b: (b, 0)),                 # conv1 patches
            pl.BlockSpec((16, 128), lambda b: (0, 0)),               # w1 (block-diag)
            pl.BlockSpec((1, 128), lambda b: (0, 0)),                # b1 (x4 tiled)
            pl.BlockSpec((128, 64), lambda b: (0, 0)),               # w2
            pl.BlockSpec((1, 64), lambda b: (0, 0)),                 # b2
            pl.BlockSpec((256, 64), lambda b: (0, 0)),               # w3 (K-concat)
            pl.BlockSpec((1, 64), lambda b: (0, 0)),                 # b3
            pl.BlockSpec(memory_space=pl.ANY),                       # w4 stays in HBM
            pl.BlockSpec((1, FC4_OUT), lambda b: (0, 0)),            # b4
            pl.BlockSpec((FC4_OUT, NUM_ACTIONS), lambda b: (0, 0)),  # w5
            pl.BlockSpec((1, NUM_ACTIONS), lambda b: (0, 0)),        # b5
        ],
        out_specs=pl.BlockSpec((bt, NUM_ACTIONS), lambda b: (b, 0)),
        scratch_shapes=[
            pltpu.VMEM((FC4_IN, FC4_OUT), jnp.bfloat16),   # w4 staging (~3.2 MB)
            pltpu.SemaphoreType.DMA,                       # its completion sem
            pltpu.VMEM((bt, 64, 64), jnp.float32),         # conv3 activations
            pltpu.VMEM((bt, FC4_IN), jnp.float32),         # lane-dense fc4 input
        ],
        compiler_params=pltpu.CompilerParams(
            dimension_semantics=("parallel",),             # batch tiles -> 2 TCs on v7x
            vmem_limit_bytes=32 * 1024 * 1024),
        cost_estimate=pl.CostEstimate(flops=flops, transcendentals=0,
                                      bytes_accessed=bytes_accessed),
    )(p1, prep["w1p"], prep["b1t"], prep["w2p"], prep["b2"],
      prep["w3p"], prep["b3"], prep["w4p"], prep["b4"],
      prep["w5p"], prep["b5"])


# ---------------------------------------------------------------------------
# Parameters (mirrors set_weights: uniform(-0.01, 0.01) weights, bias = 0.01)
# ---------------------------------------------------------------------------
def init_params(key):
    ks = jax.random.split(key, 5)
    u = lambda k, shape: jax.random.uniform(k, shape, jnp.float32, -0.01, 0.01)
    return {
        "conv1_w": u(ks[0], (32, 1, 2, 2)),  "conv1_b": jnp.full((32,), 0.01, jnp.float32),
        "conv2_w": u(ks[1], (64, 32, 2, 2)), "conv2_b": jnp.full((64,), 0.01, jnp.float32),
        "conv3_w": u(ks[2], (64, 64, 2, 2)), "conv3_b": jnp.full((64,), 0.01, jnp.float32),
        "fc4_w":   u(ks[3], (FC4_OUT, FC4_IN)),
        "fc4_b":   jnp.full((FC4_OUT,), 0.01, jnp.float32),
        "fc5_w":   u(ks[4], (NUM_ACTIONS, FC4_OUT)),
        "fc5_b":   jnp.full((NUM_ACTIONS,), 0.01, jnp.float32),
    }


def prepare_params(params):
    """One-time repack of PyTorch-layout weights into kernel-friendly layouts."""
    # conv1 as a (16,128) block-diagonal matrix: row g*4+t, col g*32+c
    w1m = params["conv1_w"].reshape(32, 4).T                          # (tap, ch)
    w1p = jnp.kron(jnp.eye(4, dtype=w1m.dtype), w1m)                  # (16, 128)
    b1t = jnp.tile(params["conv1_b"], 4).reshape(1, 128)
    # conv2/conv3 per-tap matrices concatenated along K (row = tap*Cin + cin)
    w2p = jnp.transpose(params["conv2_w"], (2, 3, 1, 0)).reshape(128, 64)
    w3p = jnp.transpose(params["conv3_w"], (2, 3, 1, 0)).reshape(256, 64)
    # fc4: (N,K)->(K,N), permute K from NCHW flatten (c*49+i*7+j) to NHWC
    # flatten ((i*7+j)*64+c); bf16 for the MXU (f32 accumulation in-kernel).
    w4p = params["fc4_w"].T.reshape(64, 7, 7, FC4_OUT)                # [c, i, j, n]
    w4p = jnp.transpose(w4p, (1, 2, 0, 3)).reshape(FC4_IN, FC4_OUT)
    w4p = w4p.astype(jnp.bfloat16)
    return {
        "w1p": w1p, "b1t": b1t,
        "w2p": w2p, "b2": params["conv2_b"].reshape(1, 64),
        "w3p": w3p, "b3": params["conv3_b"].reshape(1, 64),
        "w4p": w4p, "b4": params["fc4_b"].reshape(1, FC4_OUT),
        "w5p": params["fc5_w"].T,               # (512, NUM_ACTIONS), f32
        "b5": params["fc5_b"].reshape(1, NUM_ACTIONS),
    }


# ---------------------------------------------------------------------------
# Forward (input is NCHW, like PyTorch)
# ---------------------------------------------------------------------------
def _im2col_conv12(x_nchw):
    """(B,1,17,17) -> (B*64, 16) conv1 patches, taps packed densely on lanes.

    column = g*4 + t  (g = conv2 tap p*2+q, t = conv1 tap kh*2+kw)
    row    = b*64 + i*8 + j  (conv2 output position (i, j))
    """
    B = x_nchw.shape[0]
    x2 = x_nchw[:, 0]                                            # (B, 17, 17)
    cols = []
    for p in range(2):
        for q in range(2):
            for kh in range(2):
                for kw in range(2):
                    d, e = p + kh, q + kw
                    cols.append(x2[:, d:d + 16:2, e:e + 16:2])   # (B, 8, 8)
    return jnp.stack(cols, axis=-1).reshape(B * 64, 16)


@jax.jit
def dqn_forward(prep, x_nchw):
    """x_nchw: (B, 1, 17, 17) -> Q-values (B, NUM_ACTIONS) float32."""
    B = x_nchw.shape[0]
    bt = B if B <= BT_MAX else BT_MAX
    bp = pl.cdiv(B, bt) * bt
    x = x_nchw.astype(jnp.float32)
    if bp != B:                                  # pad batch up to a tile multiple
        x = jnp.pad(x, ((0, bp - B), (0, 0), (0, 0), (0, 0)))
    p1 = _im2col_conv12(x)                       # ~2 KB/sample of XLA glue
    q = _dqn_pallas(prep, p1, bp, bt)
    return q[:B]


# ---------------------------------------------------------------------------
# Pure-JAX reference (exact PyTorch semantics) for a sanity check
# ---------------------------------------------------------------------------
def reference_forward(params, x_nchw):
    hi = lax.Precision.HIGHEST

    def conv(x, w, b, stride):
        y = lax.conv_general_dilated(x, w, (stride, stride), "VALID",
                                     dimension_numbers=("NCHW", "OIHW", "NCHW"),
                                     precision=hi)
        return jax.nn.relu(y + b.reshape(1, -1, 1, 1))

    y = conv(x_nchw, params["conv1_w"], params["conv1_b"], 1)
    y = conv(y, params["conv2_w"], params["conv2_b"], 2)
    y = conv(y, params["conv3_w"], params["conv3_b"], 1)
    flat = y.reshape(y.shape[0], -1)                             # NCHW flatten (.view)
    h = jax.nn.relu(jnp.dot(flat, params["fc4_w"].T, precision=hi) + params["fc4_b"])
    return jnp.dot(h, params["fc5_w"].T, precision=hi) + params["fc5_b"]


if __name__ == "__main__":
    key = jax.random.PRNGKey(0)
    pkey, xkey, xkey2 = jax.random.split(key, 3)
    params = init_params(pkey)
    prep = prepare_params(params)

    # batch=2, channels=1, 17x17 board (so fc4 sees 64*7*7 = 3136 features)
    x = jax.random.uniform(xkey, (2, 1, 17, 17), jnp.float32)
    q = dqn_forward(prep, x)
    jax.block_until_ready(q)
    assert q.shape == (2, NUM_ACTIONS)
    q_ref = reference_forward(params, x)
    err = float(jnp.max(jnp.abs(q - q_ref)))
    assert err < 2e-3, f"mismatch vs reference (B=2): {err}"

    # Also exercise the batch-tiled / padded path (grid > 1, batch padding).
    x2 = jax.random.uniform(xkey2, (40, 1, 17, 17), jnp.float32)
    q2 = dqn_forward(prep, x2)
    jax.block_until_ready(q2)
    assert q2.shape == (40, NUM_ACTIONS)
    q2_ref = reference_forward(params, x2)
    err2 = float(jnp.max(jnp.abs(q2 - q2_ref)))
    assert err2 < 2e-3, f"mismatch vs reference (B=40): {err2}"

    print("KERNEL_OK")
</pallas_src>

<mosaic_0001>
module attributes {stable_mosaic.version = 11 : i64} {
  func.func @_dqn_fused_kernel(%arg0: i32, %arg1: memref<128x16xf32, #tpu.memory_space<vmem>>, %arg2: memref<16x128xf32, #tpu.memory_space<vmem>>, %arg3: memref<1x128xf32, #tpu.memory_space<vmem>>, %arg4: memref<128x64xf32, #tpu.memory_space<vmem>>, %arg5: memref<1x64xf32, #tpu.memory_space<vmem>>, %arg6: memref<256x64xf32, #tpu.memory_space<vmem>>, %arg7: memref<1x64xf32, #tpu.memory_space<vmem>>, %arg8: memref<3136x512xbf16, #tpu.memory_space<any>>, %arg9: memref<1x512xf32, #tpu.memory_space<vmem>>, %arg10: memref<512x6xf32, #tpu.memory_space<vmem>>, %arg11: memref<1x6xf32, #tpu.memory_space<vmem>>, %arg12: memref<2x6xf32, #tpu.memory_space<vmem>>, %arg13: memref<3136x512xbf16, #tpu.memory_space<vmem>>, %arg14: memref<!tpu.dma_semaphore, #tpu.memory_space<semaphore_mem>>, %arg15: memref<2x64x64xf32, #tpu.memory_space<vmem>>, %arg16: memref<2x3136xf32, #tpu.memory_space<vmem>>) attributes {dimension_semantics = [#tpu.dimension_semantics<parallel>], iteration_bounds = array<i64: 1>, scalar_prefetch = 0 : i64, scratch_operands = 4 : i64, tpu.core_type = #tpu.core_type<tc>, window_params = [{transform_indices = @transform_0, window_bounds = array<i64: 128, 16>}, {pipeline_mode = #tpu.pipeline_mode<synchronous>, transform_indices = @transform_1, window_bounds = array<i64: 16, 128>}, {pipeline_mode = #tpu.pipeline_mode<synchronous>, transform_indices = @transform_2, window_bounds = array<i64: 1, 128>}, {pipeline_mode = #tpu.pipeline_mode<synchronous>, transform_indices = @transform_3, window_bounds = array<i64: 128, 64>}, {pipeline_mode = #tpu.pipeline_mode<synchronous>, transform_indices = @transform_4, window_bounds = array<i64: 1, 64>}, {pipeline_mode = #tpu.pipeline_mode<synchronous>, transform_indices = @transform_5, window_bounds = array<i64: 256, 64>}, {pipeline_mode = #tpu.pipeline_mode<synchronous>, transform_indices = @transform_6, window_bounds = array<i64: 1, 64>}, {}, {pipeline_mode = #tpu.pipeline_mode<synchronous>, transform_indices = @transform_8, window_bounds = array<i64: 1, 512>}, {pipeline_mode = #tpu.pipeline_mode<synchronous>, transform_indices = @transform_9, window_bounds = array<i64: 512, 6>}, {pipeline_mode = #tpu.pipeline_mode<synchronous>, transform_indices = @transform_10, window_bounds = array<i64: 1, 6>}, {transform_indices = @transform_11, window_bounds = array<i64: 2, 6>}]} {
    tpu.enqueue_dma source(%arg8 : memref<3136x512xbf16, #tpu.memory_space<any>>) target(%arg13 : memref<3136x512xbf16, #tpu.memory_space<vmem>>) target_semaphore(%arg14 : memref<!tpu.dma_semaphore, #tpu.memory_space<semaphore_mem>>)
    %c0 = arith.constant 0 : index
    %c0_0 = arith.constant 0 : index
    %0 = vector.load %arg1[%c0, %c0_0] : memref<128x16xf32, #tpu.memory_space<vmem>>, vector<128x16xf32>
    %c0_1 = arith.constant 0 : index
    %c0_2 = arith.constant 0 : index
    %1 = vector.load %arg2[%c0_1, %c0_2] : memref<16x128xf32, #tpu.memory_space<vmem>>, vector<16x128xf32>
    %cst = arith.constant dense<0.000000e+00> : vector<128x128xf32>
    %2 = tpu.matmul %0, %1, %cst {dimension_numbers = #tpu.dot_dimension_numbers<[1], [0], [0], [1], [0, 0, 1, 1], [], []>} : vector<128x16xf32>, vector<16x128xf32>, vector<128x128xf32> -> vector<128x128xf32>
    %c0_3 = arith.constant 0 : index
    %c0_4 = arith.constant 0 : index
    %3 = vector.load %arg3[%c0_3, %c0_4] : memref<1x128xf32, #tpu.memory_space<vmem>>, vector<1x128xf32>
    %4 = vector.broadcast %3 : vector<1x128xf32> to vector<128x128xf32>
    %5 = arith.addf %2, %4 : vector<128x128xf32>
    %cst_5 = arith.constant 0.000000e+00 : f32
    %6 = vector.broadcast %cst_5 : f32 to vector<128x128xf32>
    %7 = arith.maximumf %5, %6 : vector<128x128xf32>
    %c0_6 = arith.constant 0 : index
    %c0_7 = arith.constant 0 : index
    %8 = vector.load %arg4[%c0_6, %c0_7] : memref<128x64xf32, #tpu.memory_space<vmem>>, vector<128x64xf32>
    %cst_8 = arith.constant dense<0.000000e+00> : vector<128x64xf32>
    %9 = tpu.matmul %7, %8, %cst_8 {dimension_numbers = #tpu.dot_dimension_numbers<[1], [0], [0], [1], [0, 0, 1, 1], [], []>} : vector<128x128xf32>, vector<128x64xf32>, vector<128x64xf32> -> vector<128x64xf32>
    %c0_9 = arith.constant 0 : index
    %c0_10 = arith.constant 0 : index
    %10 = vector.load %arg5[%c0_9, %c0_10] : memref<1x64xf32, #tpu.memory_space<vmem>>, vector<1x64xf32>
    %11 = vector.broadcast %10 : vector<1x64xf32> to vector<128x64xf32>
    %12 = arith.addf %9, %11 : vector<128x64xf32>
    %cst_11 = arith.constant 0.000000e+00 : f32
    %13 = vector.broadcast %cst_11 : f32 to vector<128x64xf32>
    %14 = arith.maximumf %12, %13 : vector<128x64xf32>
    %15 = vector.extract_strided_slice %14 {offsets = [1, 0], sizes = [127, 64], strides = [1, 1]} : vector<128x64xf32> to vector<127x64xf32>
    %cst_12 = arith.constant 0.000000e+00 : f32
    %16 = vector.broadcast %cst_12 : f32 to vector<1x64xf32>
    %17 = tpu.concatenate %15, %16 in 0 : vector<127x64xf32>, vector<1x64xf32> -> vector<128x64xf32>
    %18 = vector.extract_strided_slice %14 {offsets = [8, 0], sizes = [120, 64], strides = [1, 1]} : vector<128x64xf32> to vector<120x64xf32>
    %cst_13 = arith.constant 0.000000e+00 : f32
    %19 = vector.broadcast %cst_13 : f32 to vector<8x64xf32>
    %20 = tpu.concatenate %18, %19 in 0 : vector<120x64xf32>, vector<8x64xf32> -> vector<128x64xf32>
    %21 = vector.extract_strided_slice %14 {offsets = [9, 0], sizes = [119, 64], strides = [1, 1]} : vector<128x64xf32> to vector<119x64xf32>
    %cst_14 = arith.constant 0.000000e+00 : f32
    %22 = vector.broadcast %cst_14 : f32 to vector<9x64xf32>
    %23 = tpu.concatenate %21, %22 in 0 : vector<119x64xf32>, vector<9x64xf32> -> vector<128x64xf32>
    %24 = tpu.concatenate %14, %17, %20, %23 in 1 : vector<128x64xf32>, vector<128x64xf32>, vector<128x64xf32>, vector<128x64xf32> -> vector<128x256xf32>
    %c0_15 = arith.constant 0 : index
    %c0_16 = arith.constant 0 : index
    %25 = vector.load %arg6[%c0_15, %c0_16] : memref<256x64xf32, #tpu.memory_space<vmem>>, vector<256x64xf32>
    %cst_17 = arith.constant dense<0.000000e+00> : vector<128x64xf32>
    %26 = tpu.matmul %24, %25, %cst_17 {dimension_numbers = #tpu.dot_dimension_numbers<[1], [0], [0], [1], [0, 0, 1, 1], [], []>} : vector<128x256xf32>, vector<256x64xf32>, vector<128x64xf32> -> vector<128x64xf32>
    %c0_18 = arith.constant 0 : index
    %c0_19 = arith.constant 0 : index
    %27 = vector.load %arg7[%c0_18, %c0_19] : memref<1x64xf32, #tpu.memory_space<vmem>>, vector<1x64xf32>
    %28 = vector.broadcast %27 : vector<1x64xf32> to vector<128x64xf32>
    %29 = arith.addf %26, %28 : vector<128x64xf32>
    %cst_20 = arith.constant 0.000000e+00 : f32
    %30 = vector.broadcast %cst_20 : f32 to vector<128x64xf32>
    %31 = arith.maximumf %29, %30 : vector<128x64xf32>
    %32 = vector.shape_cast %31 : vector<128x64xf32> to vector<2x64x64xf32>
    %c0_21 = arith.constant 0 : index
    %c0_22 = arith.constant 0 : index
    %c0_23 = arith.constant 0 : index
    %33 = vector.load %arg15[%c0_21, %c0_22, %c0_23] : memref<2x64x64xf32, #tpu.memory_space<vmem>>, vector<2x64x64xf32>
    tpu.vector_store %arg15[%c0_21, %c0_22, %c0_23], %32 {strides = array<i32>} : memref<2x64x64xf32, #tpu.memory_space<vmem>>, vector<2x64x64xf32>,
    %c0_24 = arith.constant 0 : index
    %c0_25 = arith.constant 0 : index
    %c0_26 = arith.constant 0 : index
    %34 = vector.load %arg15[%c0_24, %c0_25, %c0_26] : memref<2x64x64xf32, #tpu.memory_space<vmem>>, vector<2x1x64xf32>
    %35 = vector.shape_cast %34 : vector<2x1x64xf32> to vector<2x64xf32>
    %c0_27 = arith.constant 0 : index
    %c0_28 = arith.constant 0 : index
    %36 = vector.load %arg16[%c0_27, %c0_28] : memref<2x3136xf32, #tpu.memory_space<vmem>>, vector<2x64xf32>
    tpu.vector_store %arg16[%c0_27, %c0_28], %35 {strides = array<i32>} : memref<2x3136xf32, #tpu.memory_space<vmem>>, vector<2x64xf32>,
    %c0_29 = arith.constant 0 : index
    %c1 = arith.constant 1 : index
    %c0_30 = arith.constant 0 : index
    %37 = vector.load %arg15[%c0_29, %c1, %c0_30] : memref<2x64x64xf32, #tpu.memory_space<vmem>>, vector<2x1x64xf32>
    %38 = vector.shape_cast %37 : vector<2x1x64xf32> to vector<2x64xf32>
    %c0_31 = arith.constant 0 : index
    %c64 = arith.constant 64 : index
    %39 = vector.load %arg16[%c0_31, %c64] : memref<2x3136xf32, #tpu.memory_space<vmem>>, vector<2x64xf32>
    tpu.vector_store %arg16[%c0_31, %c64], %38 {strides = array<i32>} : memref<2x3136xf32, #tpu.memory_space<vmem>>, vector<2x64xf32>,
    %c0_32 = arith.constant 0 : index
    %c2 = arith.constant 2 : index
    %c0_33 = arith.constant 0 : index
    %40 = vector.load %arg15[%c0_32, %c2, %c0_33] : memref<2x64x64xf32, #tpu.memory_space<vmem>>, vector<2x1x64xf32>
    %41 = vector.shape_cast %40 : vector<2x1x64xf32> to vector<2x64xf32>
    %c0_34 = arith.constant 0 : index
    %c128 = arith.constant 128 : index
    %42 = vector.load %arg16[%c0_34, %c128] : memref<2x3136xf32, #tpu.memory_space<vmem>>, vector<2x64xf32>
    tpu.vector_store %arg16[%c0_34, %c128], %41 {strides = array<i32>} : memref<2x3136xf32, #tpu.memory_space<vmem>>, vector<2x64xf32>,
    %c0_35 = arith.constant 0 : index
    %c3 = arith.constant 3 : index
    %c0_36 = arith.constant 0 : index
    %43 = vector.load %arg15[%c0_35, %c3, %c0_36] : memref<2x64x64xf32, #tpu.memory_space<vmem>>, vector<2x1x64xf32>
    %44 = vector.shape_cast %43 : vector<2x1x64xf32> to vector<2x64xf32>
    %c0_37 = arith.constant 0 : index
    %c192 = arith.constant 192 : index
    %45 = vector.load %arg16[%c0_37, %c192] : memref<2x3136xf32, #tpu.memory_space<vmem>>, vector<2x64xf32>
    tpu.vector_store %arg16[%c0_37, %c192], %44 {strides = array<i32>} : memref<2x3136xf32, #tpu.memory_space<vmem>>, vector<2x64xf32>,
    %c0_38 = arith.constant 0 : index
    %c4 = arith.constant 4 : index
    %c0_39 = arith.constant 0 : index
    %46 = vector.load %arg15[%c0_38, %c4, %c0_39] : memref<2x64x64xf32, #tpu.memory_space<vmem>>, vector<2x1x64xf32>
    %47 = vector.shape_cast %46 : vector<2x1x64xf32> to vector<2x64xf32>
    %c0_40 = arith.constant 0 : index
    %c256 = arith.constant 256 : index
    %48 = vector.load %arg16[%c0_40, %c256] : memref<2x3136xf32, #tpu.memory_space<vmem>>, vector<2x64xf32>
    tpu.vector_store %arg16[%c0_40, %c256], %47 {strides = array<i32>} : memref<2x3136xf32, #tpu.memory_space<vmem>>, vector<2x64xf32>,
    %c0_41 = arith.constant 0 : index
    %c5 = arith.constant 5 : index
    %c0_42 = arith.constant 0 : index
    %49 = vector.load %arg15[%c0_41, %c5, %c0_42] : memref<2x64x64xf32, #tpu.memory_space<vmem>>, vector<2x1x64xf32>
    %50 = vector.shape_cast %49 : vector<2x1x64xf32> to vector<2x64xf32>
    %c0_43 = arith.constant 0 : index
    %c320 = arith.constant 320 : index
    %51 = vector.load %arg16[%c0_43, %c320] : memref<2x3136xf32, #tpu.memory_space<vmem>>, vector<2x64xf32>
    tpu.vector_store %arg16[%c0_43, %c320], %50 {strides = array<i32>} : memref<2x3136xf32, #tpu.memory_space<vmem>>, vector<2x64xf32>,
    %c0_44 = arith.constant 0 : index
    %c6 = arith.constant 6 : index
    %c0_45 = arith.constant 0 : index
    %52 = vector.load %arg15[%c0_44, %c6, %c0_45] : memref<2x64x64xf32, #tpu.memory_space<vmem>>, vector<2x1x64xf32>
    %53 = vector.shape_cast %52 : vector<2x1x64xf32> to vector<2x64xf32>
    %c0_46 = arith.constant 0 : index
    %c384 = arith.constant 384 : index
    %54 = vector.load %arg16[%c0_46, %c384] : memref<2x3136xf32, #tpu.memory_space<vmem>>, vector<2x64xf32>
    tpu.vector_store %arg16[%c0_46, %c384], %53 {strides = array<i32>} : memref<2x3136xf32, #tpu.memory_space<vmem>>, vector<2x64xf32>,
    %c0_47 = arith.constant 0 : index
    %c8 = arith.constant 8 : index
    %c0_48 = arith.constant 0 : index
    %55 = vector.load %arg15[%c0_47, %c8, %c0_48] : memref<2x64x64xf32, #tpu.memory_space<vmem>>, vector<2x1x64xf32>
    %56 = vector.shape_cast %55 : vector<2x1x64xf32> to vector<2x64xf32>
    %c0_49 = arith.constant 0 : index
    %c448 = arith.constant 448 : index
    %57 = vector.load %arg16[%c0_49, %c448] : memref<2x3136xf32, #tpu.memory_space<vmem>>, vector<2x64xf32>
    tpu.vector_store %arg16[%c0_49, %c448], %56 {strides = array<i32>} : memref<2x3136xf32, #tpu.memory_space<vmem>>, vector<2x64xf32>,
    %c0_50 = arith.constant 0 : index
    %c9 = arith.constant 9 : index
    %c0_51 = arith.constant 0 : index
    %58 = vector.load %arg15[%c0_50, %c9, %c0_51] : memref<2x64x64xf32, #tpu.memory_space<vmem>>, vector<2x1x64xf32>
    %59 = vector.shape_cast %58 : vector<2x1x64xf32> to vector<2x64xf32>
    %c0_52 = arith.constant 0 : index
    %c512 = arith.constant 512 : index
    %60 = vector.load %arg16[%c0_52, %c512] : memref<2x3136xf32, #tpu.memory_space<vmem>>, vector<2x64xf32>
    tpu.vector_store %arg16[%c0_52, %c512], %59 {strides = array<i32>} : memref<2x3136xf32, #tpu.memory_space<vmem>>, vector<2x64xf32>,
    %c0_53 = arith.constant 0 : index
    %c10 = arith.constant 10 : index
    %c0_54 = arith.constant 0 : index
    %61 = vector.load %arg15[%c0_53, %c10, %c0_54] : memref<2x64x64xf32, #tpu.memory_space<vmem>>, vector<2x1x64xf32>
    %62 = vector.shape_cast %61 : vector<2x1x64xf32> to vector<2x64xf32>
    %c0_55 = arith.constant 0 : index
    %c576 = arith.constant 576 : index
    %63 = vector.load %arg16[%c0_55, %c576] : memref<2x3136xf32, #tpu.memory_space<vmem>>, vector<2x64xf32>
    tpu.vector_store %arg16[%c0_55, %c576], %62 {strides = array<i32>} : memref<2x3136xf32, #tpu.memory_space<vmem>>, vector<2x64xf32>,
    %c0_56 = arith.constant 0 : index
    %c11 = arith.constant 11 : index
    %c0_57 = arith.constant 0 : index
    %64 = vector.load %arg15[%c0_56, %c11, %c0_57] : memref<2x64x64xf32, #tpu.memory_space<vmem>>, vector<2x1x64xf32>
    %65 = vector.shape_cast %64 : vector<2x1x64xf32> to vector<2x64xf32>
    %c0_58 = arith.constant 0 : index
    %c640 = arith.constant 640 : index
    %66 = vector.load %arg16[%c0_58, %c640] : memref<2x3136xf32, #tpu.memory_space<vmem>>, vector<2x64xf32>
    tpu.vector_store %arg16[%c0_58, %c640], %65 {strides = array<i32>} : memref<2x3136xf32, #tpu.memory_space<vmem>>, vector<2x64xf32>,
    %c0_59 = arith.constant 0 : index
    %c12 = arith.constant 12 : index
    %c0_60 = arith.constant 0 : index
    %67 = vector.load %arg15[%c0_59, %c12, %c0_60] : memref<2x64x64xf32, #tpu.memory_space<vmem>>, vector<2x1x64xf32>
    %68 = vector.shape_cast %67 : vector<2x1x64xf32> to vector<2x64xf32>
    %c0_61 = arith.constant 0 : index
    %c704 = arith.constant 704 : index
    %69 = vector.load %arg16[%c0_61, %c704] : memref<2x3136xf32, #tpu.memory_space<vmem>>, vector<2x64xf32>
    tpu.vector_store %arg16[%c0_61, %c704], %68 {strides = array<i32>} : memref<2x3136xf32, #tpu.memory_space<vmem>>, vector<2x64xf32>,
    %c0_62 = arith.constant 0 : index
    %c13 = arith.constant 13 : index
    %c0_63 = arith.constant 0 : index
    %70 = vector.load %arg15[%c0_62, %c13, %c0_63] : memref<2x64x64xf32, #tpu.memory_space<vmem>>, vector<2x1x64xf32>
    %71 = vector.shape_cast %70 : vector<2x1x64xf32> to vector<2x64xf32>
    %c0_64 = arith.constant 0 : index
    %c768 = arith.constant 768 : index
    %72 = vector.load %arg16[%c0_64, %c768] : memref<2x3136xf32, #tpu.memory_space<vmem>>, vector<2x64xf32>
    tpu.vector_store %arg16[%c0_64, %c768], %71 {strides = array<i32>} : memref<2x3136xf32, #tpu.memory_space<vmem>>, vector<2x64xf32>,
    %c0_65 = arith.constant 0 : index
    %c14 = arith.constant 14 : index
    %c0_66 = arith.constant 0 : index
    %73 = vector.load %arg15[%c0_65, %c14, %c0_66] : memref<2x64x64xf32, #tpu.memory_space<vmem>>, vector<2x1x64xf32>
    %74 = vector.shape_cast %73 : vector<2x1x64xf32> to vector<2x64xf32>
    %c0_67 = arith.constant 0 : index
    %c832 = arith.constant 832 : index
    %75 = vector.load %arg16[%c0_67, %c832] : memref<2x3136xf32, #tpu.memory_space<vmem>>, vector<2x64xf32>
    tpu.vector_store %arg16[%c0_67, %c832], %74 {strides = array<i32>} : memref<2x3136xf32, #tpu.memory_space<vmem>>, vector<2x64xf32>,
    %c0_68 = arith.constant 0 : index
    %c16 = arith.constant 16 : index
    %c0_69 = arith.constant 0 : index
    %76 = vector.load %arg15[%c0_68, %c16, %c0_69] : memref<2x64x64xf32, #tpu.memory_space<vmem>>, vector<2x1x64xf32>
    %77 = vector.shape_cast %76 : vector<2x1x64xf32> to vector<2x64xf32>
    %c0_70 = arith.constant 0 : index
    %c896 = arith.constant 896 : index
    %78 = vector.load %arg16[%c0_70, %c896] : memref<2x3136xf32, #tpu.memory_space<vmem>>, vector<2x64xf32>
    tpu.vector_store %arg16[%c0_70, %c896], %77 {strides = array<i32>} : memref<2x3136xf32, #tpu.memory_space<vmem>>, vector<2x64xf32>,
    %c0_71 = arith.constant 0 : index
    %c17 = arith.constant 17 : index
    %c0_72 = arith.constant 0 : index
    %79 = vector.load %arg15[%c0_71, %c17, %c0_72] : memref<2x64x64xf32, #tpu.memory_space<vmem>>, vector<2x1x64xf32>
    %80 = vector.shape_cast %79 : vector<2x1x64xf32> to vector<2x64xf32>
    %c0_73 = arith.constant 0 : index
    %c960 = arith.constant 960 : index
    %81 = vector.load %arg16[%c0_73, %c960] : memref<2x3136xf32, #tpu.memory_space<vmem>>, vector<2x64xf32>
    tpu.vector_store %arg16[%c0_73, %c960], %80 {strides = array<i32>} : memref<2x3136xf32, #tpu.memory_space<vmem>>, vector<2x64xf32>,
    %c0_74 = arith.constant 0 : index
    %c18 = arith.constant 18 : index
    %c0_75 = arith.constant 0 : index
    %82 = vector.load %arg15[%c0_74, %c18, %c0_75] : memref<2x64x64xf32, #tpu.memory_space<vmem>>, vector<2x1x64xf32>
    %83 = vector.shape_cast %82 : vector<2x1x64xf32> to vector<2x64xf32>
    %c0_76 = arith.constant 0 : index
    %c1024 = arith.constant 1024 : index
    %84 = vector.load %arg16[%c0_76, %c1024] : memref<2x3136xf32, #tpu.memory_space<vmem>>, vector<2x64xf32>
    tpu.vector_store %arg16[%c0_76, %c1024], %83 {strides = array<i32>} : memref<2x3136xf32, #tpu.memory_space<vmem>>, vector<2x64xf32>,
    %c0_77 = arith.constant 0 : index
    %c19 = arith.constant 19 : index
    %c0_78 = arith.constant 0 : index
    %85 = vector.load %arg15[%c0_77, %c19, %c0_78] : memref<2x64x64xf32, #tpu.memory_space<vmem>>, vector<2x1x64xf32>
    %86 = vector.shape_cast %85 : vector<2x1x64xf32> to vector<2x64xf32>
    %c0_79 = arith.constant 0 : index
    %c1088 = arith.constant 1088 : index
    %87 = vector.load %arg16[%c0_79, %c1088] : memref<2x3136xf32, #tpu.memory_space<vmem>>, vector<2x64xf32>
    tpu.vector_store %arg16[%c0_79, %c1088], %86 {strides = array<i32>} : memref<2x3136xf32, #tpu.memory_space<vmem>>, vector<2x64xf32>,
    %c0_80 = arith.constant 0 : index
    %c20 = arith.constant 20 : index
    %c0_81 = arith.constant 0 : index
    %88 = vector.load %arg15[%c0_80, %c20, %c0_81] : memref<2x64x64xf32, #tpu.memory_space<vmem>>, vector<2x1x64xf32>
    %89 = vector.shape_cast %88 : vector<2x1x64xf32> to vector<2x64xf32>
    %c0_82 = arith.constant 0 : index
    %c1152 = arith.constant 1152 : index
    %90 = vector.load %arg16[%c0_82, %c1152] : memref<2x3136xf32, #tpu.memory_space<vmem>>, vector<2x64xf32>
    tpu.vector_store %arg16[%c0_82, %c1152], %89 {strides = array<i32>} : memref<2x3136xf32, #tpu.memory_space<vmem>>, vector<2x64xf32>,
    %c0_83 = arith.constant 0 : index
    %c21 = arith.constant 21 : index
    %c0_84 = arith.constant 0 : index
    %91 = vector.load %arg15[%c0_83, %c21, %c0_84] : memref<2x64x64xf32, #tpu.memory_space<vmem>>, vector<2x1x64xf32>
    %92 = vector.shape_cast %91 : vector<2x1x64xf32> to vector<2x64xf32>
    %c0_85 = arith.constant 0 : index
    %c1216 = arith.constant 1216 : index
    %93 = vector.load %arg16[%c0_85, %c1216] : memref<2x3136xf32, #tpu.memory_space<vmem>>, vector<2x64xf32>
    tpu.vector_store %arg16[%c0_85, %c1216], %92 {strides = array<i32>} : memref<2x3136xf32, #tpu.memory_space<vmem>>, vector<2x64xf32>,
    %c0_86 = arith.constant 0 : index
    %c22 = arith.constant 22 : index
    %c0_87 = arith.constant 0 : index
    %94 = vector.load %arg15[%c0_86, %c22, %c0_87] : memref<2x64x64xf32, #tpu.memory_space<vmem>>, vector<2x1x64xf32>
    %95 = vector.shape_cast %94 : vector<2x1x64xf32> to vector<2x64xf32>
    %c0_88 = arith.constant 0 : index
    %c1280 = arith.constant 1280 : index
    %96 = vector.load %arg16[%c0_88, %c1280] : memref<2x3136xf32, #tpu.memory_space<vmem>>, vector<2x64xf32>
    tpu.vector_store %arg16[%c0_88, %c1280], %95 {strides = array<i32>} : memref<2x3136xf32, #tpu.memory_space<vmem>>, vector<2x64xf32>,
    %c0_89 = arith.constant 0 : index
    %c24 = arith.constant 24 : index
    %c0_90 = arith.constant 0 : index
    %97 = vector.load %arg15[%c0_89, %c24, %c0_90] : memref<2x64x64xf32, #tpu.memory_space<vmem>>, vector<2x1x64xf32>
    %98 = vector.shape_cast %97 : vector<2x1x64xf32> to vector<2x64xf32>
    %c0_91 = arith.constant 0 : index
    %c1344 = arith.constant 1344 : index
    %99 = vector.load %arg16[%c0_91, %c1344] : memref<2x3136xf32, #tpu.memory_space<vmem>>, vector<2x64xf32>
    tpu.vector_store %arg16[%c0_91, %c1344], %98 {strides = array<i32>} : memref<2x3136xf32, #tpu.memory_space<vmem>>, vector<2x64xf32>,
    %c0_92 = arith.constant 0 : index
    %c25 = arith.constant 25 : index
    %c0_93 = arith.constant 0 : index
    %100 = vector.load %arg15[%c0_92, %c25, %c0_93] : memref<2x64x64xf32, #tpu.memory_space<vmem>>, vector<2x1x64xf32>
    %101 = vector.shape_cast %100 : vector<2x1x64xf32> to vector<2x64xf32>
    %c0_94 = arith.constant 0 : index
    %c1408 = arith.constant 1408 : index
    %102 = vector.load %arg16[%c0_94, %c1408] : memref<2x3136xf32, #tpu.memory_space<vmem>>, vector<2x64xf32>
    tpu.vector_store %arg16[%c0_94, %c1408], %101 {strides = array<i32>} : memref<2x3136xf32, #tpu.memory_space<vmem>>, vector<2x64xf32>,
    %c0_95 = arith.constant 0 : index
    %c26 = arith.constant 26 : index
    %c0_96 = arith.constant 0 : index
    %103 = vector.load %arg15[%c0_95, %c26, %c0_96] : memref<2x64x64xf32, #tpu.memory_space<vmem>>, vector<2x1x64xf32>
    %104 = vector.shape_cast %103 : vector<2x1x64xf32> to vector<2x64xf32>
    %c0_97 = arith.constant 0 : index
    %c1472 = arith.constant 1472 : index
    %105 = vector.load %arg16[%c0_97, %c1472] : memref<2x3136xf32, #tpu.memory_space<vmem>>, vector<2x64xf32>
    tpu.vector_store %arg16[%c0_97, %c1472], %104 {strides = array<i32>} : memref<2x3136xf32, #tpu.memory_space<vmem>>, vector<2x64xf32>,
    %c0_98 = arith.constant 0 : index
    %c27 = arith.constant 27 : index
    %c0_99 = arith.constant 0 : index
    %106 = vector.load %arg15[%c0_98, %c27, %c0_99] : memref<2x64x64xf32, #tpu.memory_space<vmem>>, vector<2x1x64xf32>
    %107 = vector.shape_cast %106 : vector<2x1x64xf32> to vector<2x64xf32>
    %c0_100 = arith.constant 0 : index
    %c1536 = arith.constant 1536 : index
    %108 = vector.load %arg16[%c0_100, %c1536] : memref<2x3136xf32, #tpu.memory_space<vmem>>, vector<2x64xf32>
    tpu.vector_store %arg16[%c0_100, %c1536], %107 {strides = array<i32>} : memref<2x3136xf32, #tpu.memory_space<vmem>>, vector<2x64xf32>,
    %c0_101 = arith.constant 0 : index
    %c28 = arith.constant 28 : index
    %c0_102 = arith.constant 0 : index
    %109 = vector.load %arg15[%c0_101, %c28, %c0_102] : memref<2x64x64xf32, #tpu.memory_space<vmem>>, vector<2x1x64xf32>
    %110 = vector.shape_cast %109 : vector<2x1x64xf32> to vector<2x64xf32>
    %c0_103 = arith.constant 0 : index
    %c1600 = arith.constant 1600 : index
    %111 = vector.load %arg16[%c0_103, %c1600] : memref<2x3136xf32, #tpu.memory_space<vmem>>, vector<2x64xf32>
    tpu.vector_store %arg16[%c0_103, %c1600], %110 {strides = array<i32>} : memref<2x3136xf32, #tpu.memory_space<vmem>>, vector<2x64xf32>,
    %c0_104 = arith.constant 0 : index
    %c29 = arith.constant 29 : index
    %c0_105 = arith.constant 0 : index
    %112 = vector.load %arg15[%c0_104, %c29, %c0_105] : memref<2x64x64xf32, #tpu.memory_space<vmem>>, vector<2x1x64xf32>
    %113 = vector.shape_cast %112 : vector<2x1x64xf32> to vector<2x64xf32>
    %c0_106 = arith.constant 0 : index
    %c1664 = arith.constant 1664 : index
    %114 = vector.load %arg16[%c0_106, %c1664] : memref<2x3136xf32, #tpu.memory_space<vmem>>, vector<2x64xf32>
    tpu.vector_store %arg16[%c0_106, %c1664], %113 {strides = array<i32>} : memref<2x3136xf32, #tpu.memory_space<vmem>>, vector<2x64xf32>,
    %c0_107 = arith.constant 0 : index
    %c30 = arith.constant 30 : index
    %c0_108 = arith.constant 0 : index
    %115 = vector.load %arg15[%c0_107, %c30, %c0_108] : memref<2x64x64xf32, #tpu.memory_space<vmem>>, vector<2x1x64xf32>
    %116 = vector.shape_cast %115 : vector<2x1x64xf32> to vector<2x64xf32>
    %c0_109 = arith.constant 0 : index
    %c1728 = arith.constant 1728 : index
    %117 = vector.load %arg16[%c0_109, %c1728] : memref<2x3136xf32, #tpu.memory_space<vmem>>, vector<2x64xf32>
    tpu.vector_store %arg16[%c0_109, %c1728], %116 {strides = array<i32>} : memref<2x3136xf32, #tpu.memory_space<vmem>>, vector<2x64xf32>,
    %c0_110 = arith.constant 0 : index
    %c32 = arith.constant 32 : index
    %c0_111 = arith.constant 0 : index
    %118 = vector.load %arg15[%c0_110, %c32, %c0_111] : memref<2x64x64xf32, #tpu.memory_space<vmem>>, vector<2x1x64xf32>
    %119 = vector.shape_cast %118 : vector<2x1x64xf32> to vector<2x64xf32>
    %c0_112 = arith.constant 0 : index
    %c1792 = arith.constant 1792 : index
    %120 = vector.load %arg16[%c0_112, %c1792] : memref<2x3136xf32, #tpu.memory_space<vmem>>, vector<2x64xf32>
    tpu.vector_store %arg16[%c0_112, %c1792], %119 {strides = array<i32>} : memref<2x3136xf32, #tpu.memory_space<vmem>>, vector<2x64xf32>,
    %c0_113 = arith.constant 0 : index
    %c33 = arith.constant 33 : index
    %c0_114 = arith.constant 0 : index
    %121 = vector.load %arg15[%c0_113, %c33, %c0_114] : memref<2x64x64xf32, #tpu.memory_space<vmem>>, vector<2x1x64xf32>
    %122 = vector.shape_cast %121 : vector<2x1x64xf32> to vector<2x64xf32>
    %c0_115 = arith.constant 0 : index
    %c1856 = arith.constant 1856 : index
    %123 = vector.load %arg16[%c0_115, %c1856] : memref<2x3136xf32, #tpu.memory_space<vmem>>, vector<2x64xf32>
    tpu.vector_store %arg16[%c0_115, %c1856], %122 {strides = array<i32>} : memref<2x3136xf32, #tpu.memory_space<vmem>>, vector<2x64xf32>,
    %c0_116 = arith.constant 0 : index
    %c34 = arith.constant 34 : index
    %c0_117 = arith.constant 0 : index
    %124 = vector.load %arg15[%c0_116, %c34, %c0_117] : memref<2x64x64xf32, #tpu.memory_space<vmem>>, vector<2x1x64xf32>
    %125 = vector.shape_cast %124 : vector<2x1x64xf32> to vector<2x64xf32>
    %c0_118 = arith.constant 0 : index
    %c1920 = arith.constant 1920 : index
    %126 = vector.load %arg16[%c0_118, %c1920] : memref<2x3136xf32, #tpu.memory_space<vmem>>, vector<2x64xf32>
    tpu.vector_store %arg16[%c0_118, %c1920], %125 {strides = array<i32>} : memref<2x3136xf32, #tpu.memory_space<vmem>>, vector<2x64xf32>,
    %c0_119 = arith.constant 0 : index
    %c35 = arith.constant 35 : index
    %c0_120 = arith.constant 0 : index
    %127 = vector.load %arg15[%c0_119, %c35, %c0_120] : memref<2x64x64xf32, #tpu.memory_space<vmem>>, vector<2x1x64xf32>
    %128 = vector.shape_cast %127 : vector<2x1x64xf32> to vector<2x64xf32>
    %c0_121 = arith.constant 0 : index
    %c1984 = arith.constant 1984 : index
    %129 = vector.load %arg16[%c0_121, %c1984] : memref<2x3136xf32, #tpu.memory_space<vmem>>, vector<2x64xf32>
    tpu.vector_store %arg16[%c0_121, %c1984], %128 {strides = array<i32>} : memref<2x3136xf32, #tpu.memory_space<vmem>>, vector<2x64xf32>,
    %c0_122 = arith.constant 0 : index
    %c36 = arith.constant 36 : index
    %c0_123 = arith.constant 0 : index
    %130 = vector.load %arg15[%c0_122, %c36, %c0_123] : memref<2x64x64xf32, #tpu.memory_space<vmem>>, vector<2x1x64xf32>
    %131 = vector.shape_cast %130 : vector<2x1x64xf32> to vector<2x64xf32>
    %c0_124 = arith.constant 0 : index
    %c2048 = arith.constant 2048 : index
    %132 = vector.load %arg16[%c0_124, %c2048] : memref<2x3136xf32, #tpu.memory_space<vmem>>, vector<2x64xf32>
    tpu.vector_store %arg16[%c0_124, %c2048], %131 {strides = array<i32>} : memref<2x3136xf32, #tpu.memory_space<vmem>>, vector<2x64xf32>,
    %c0_125 = arith.constant 0 : index
    %c37 = arith.constant 37 : index
    %c0_126 = arith.constant 0 : index
    %133 = vector.load %arg15[%c0_125, %c37, %c0_126] : memref<2x64x64xf32, #tpu.memory_space<vmem>>, vector<2x1x64xf32>
    %134 = vector.shape_cast %133 : vector<2x1x64xf32> to vector<2x64xf32>
    %c0_127 = arith.constant 0 : index
    %c2112 = arith.constant 2112 : index
    %135 = vector.load %arg16[%c0_127, %c2112] : memref<2x3136xf32, #tpu.memory_space<vmem>>, vector<2x64xf32>
    tpu.vector_store %arg16[%c0_127, %c2112], %134 {strides = array<i32>} : memref<2x3136xf32, #tpu.memory_space<vmem>>, vector<2x64xf32>,
    %c0_128 = arith.constant 0 : index
    %c38 = arith.constant 38 : index
    %c0_129 = arith.constant 0 : index
    %136 = vector.load %arg15[%c0_128, %c38, %c0_129] : memref<2x64x64xf32, #tpu.memory_space<vmem>>, vector<2x1x64xf32>
    %137 = vector.shape_cast %136 : vector<2x1x64xf32> to vector<2x64xf32>
    %c0_130 = arith.constant 0 : index
    %c2176 = arith.constant 2176 : index
    %138 = vector.load %arg16[%c0_130, %c2176] : memref<2x3136xf32, #tpu.memory_space<vmem>>, vector<2x64xf32>
    tpu.vector_store %arg16[%c0_130, %c2176], %137 {strides = array<i32>} : memref<2x3136xf32, #tpu.memory_space<vmem>>, vector<2x64xf32>,
    %c0_131 = arith.constant 0 : index
    %c40 = arith.constant 40 : index
    %c0_132 = arith.constant 0 : index
    %139 = vector.load %arg15[%c0_131, %c40, %c0_132] : memref<2x64x64xf32, #tpu.memory_space<vmem>>, vector<2x1x64xf32>
    %140 = vector.shape_cast %139 : vector<2x1x64xf32> to vector<2x64xf32>
    %c0_133 = arith.constant 0 : index
    %c2240 = arith.constant 2240 : index
    %141 = vector.load %arg16[%c0_133, %c2240] : memref<2x3136xf32, #tpu.memory_space<vmem>>, vector<2x64xf32>
    tpu.vector_store %arg16[%c0_133, %c2240], %140 {strides = array<i32>} : memref<2x3136xf32, #tpu.memory_space<vmem>>, vector<2x64xf32>,
    %c0_134 = arith.constant 0 : index
    %c41 = arith.constant 41 : index
    %c0_135 = arith.constant 0 : index
    %142 = vector.load %arg15[%c0_134, %c41, %c0_135] : memref<2x64x64xf32, #tpu.memory_space<vmem>>, vector<2x1x64xf32>
    %143 = vector.shape_cast %142 : vector<2x1x64xf32> to vector<2x64xf32>
    %c0_136 = arith.constant 0 : index
    %c2304 = arith.constant 2304 : index
    %144 = vector.load %arg16[%c0_136, %c2304] : memref<2x3136xf32, #tpu.memory_space<vmem>>, vector<2x64xf32>
    tpu.vector_store %arg16[%c0_136, %c2304], %143 {strides = array<i32>} : memref<2x3136xf32, #tpu.memory_space<vmem>>, vector<2x64xf32>,
    %c0_137 = arith.constant 0 : index
    %c42 = arith.constant 42 : index
    %c0_138 = arith.constant 0 : index
    %145 = vector.load %arg15[%c0_137, %c42, %c0_138] : memref<2x64x64xf32, #tpu.memory_space<vmem>>, vector<2x1x64xf32>
    %146 = vector.shape_cast %145 : vector<2x1x64xf32> to vector<2x64xf32>
    %c0_139 = arith.constant 0 : index
    %c2368 = arith.constant 2368 : index
    %147 = vector.load %arg16[%c0_139, %c2368] : memref<2x3136xf32, #tpu.memory_space<vmem>>, vector<2x64xf32>
    tpu.vector_store %arg16[%c0_139, %c2368], %146 {strides = array<i32>} : memref<2x3136xf32, #tpu.memory_space<vmem>>, vector<2x64xf32>,
    %c0_140 = arith.constant 0 : index
    %c43 = arith.constant 43 : index
    %c0_141 = arith.constant 0 : index
    %148 = vector.load %arg15[%c0_140, %c43, %c0_141] : memref<2x64x64xf32, #tpu.memory_space<vmem>>, vector<2x1x64xf32>
    %149 = vector.shape_cast %148 : vector<2x1x64xf32> to vector<2x64xf32>
    %c0_142 = arith.constant 0 : index
    %c2432 = arith.constant 2432 : index
    %150 = vector.load %arg16[%c0_142, %c2432] : memref<2x3136xf32, #tpu.memory_space<vmem>>, vector<2x64xf32>
    tpu.vector_store %arg16[%c0_142, %c2432], %149 {strides = array<i32>} : memref<2x3136xf32, #tpu.memory_space<vmem>>, vector<2x64xf32>,
    %c0_143 = arith.constant 0 : index
    %c44 = arith.constant 44 : index
    %c0_144 = arith.constant 0 : index
    %151 = vector.load %arg15[%c0_143, %c44, %c0_144] : memref<2x64x64xf32, #tpu.memory_space<vmem>>, vector<2x1x64xf32>
    %152 = vector.shape_cast %151 : vector<2x1x64xf32> to vector<2x64xf32>
    %c0_145 = arith.constant 0 : index
    %c2496 = arith.constant 2496 : index
    %153 = vector.load %arg16[%c0_145, %c2496] : memref<2x3136xf32, #tpu.memory_space<vmem>>, vector<2x64xf32>
    tpu.vector_store %arg16[%c0_145, %c2496], %152 {strides = array<i32>} : memref<2x3136xf32, #tpu.memory_space<vmem>>, vector<2x64xf32>,
    %c0_146 = arith.constant 0 : index
    %c45 = arith.constant 45 : index
    %c0_147 = arith.constant 0 : index
    %154 = vector.load %arg15[%c0_146, %c45, %c0_147] : memref<2x64x64xf32, #tpu.memory_space<vmem>>, vector<2x1x64xf32>
    %155 = vector.shape_cast %154 : vector<2x1x64xf32> to vector<2x64xf32>
    %c0_148 = arith.constant 0 : index
    %c2560 = arith.constant 2560 : index
    %156 = vector.load %arg16[%c0_148, %c2560] : memref<2x3136xf32, #tpu.memory_space<vmem>>, vector<2x64xf32>
    tpu.vector_store %arg16[%c0_148, %c2560], %155 {strides = array<i32>} : memref<2x3136xf32, #tpu.memory_space<vmem>>, vector<2x64xf32>,
    %c0_149 = arith.constant 0 : index
    %c46 = arith.constant 46 : index
    %c0_150 = arith.constant 0 : index
    %157 = vector.load %arg15[%c0_149, %c46, %c0_150] : memref<2x64x64xf32, #tpu.memory_space<vmem>>, vector<2x1x64xf32>
    %158 = vector.shape_cast %157 : vector<2x1x64xf32> to vector<2x64xf32>
    %c0_151 = arith.constant 0 : index
    %c2624 = arith.constant 2624 : index
    %159 = vector.load %arg16[%c0_151, %c2624] : memref<2x3136xf32, #tpu.memory_space<vmem>>, vector<2x64xf32>
    tpu.vector_store %arg16[%c0_151, %c2624], %158 {strides = array<i32>} : memref<2x3136xf32, #tpu.memory_space<vmem>>, vector<2x64xf32>,
    %c0_152 = arith.constant 0 : index
    %c48 = arith.constant 48 : index
    %c0_153 = arith.constant 0 : index
    %160 = vector.load %arg15[%c0_152, %c48, %c0_153] : memref<2x64x64xf32, #tpu.memory_space<vmem>>, vector<2x1x64xf32>
    %161 = vector.shape_cast %160 : vector<2x1x64xf32> to vector<2x64xf32>
    %c0_154 = arith.constant 0 : index
    %c2688 = arith.constant 2688 : index
    %162 = vector.load %arg16[%c0_154, %c2688] : memref<2x3136xf32, #tpu.memory_space<vmem>>, vector<2x64xf32>
    tpu.vector_store %arg16[%c0_154, %c2688], %161 {strides = array<i32>} : memref<2x3136xf32, #tpu.memory_space<vmem>>, vector<2x64xf32>,
    %c0_155 = arith.constant 0 : index
    %c49 = arith.constant 49 : index
    %c0_156 = arith.constant 0 : index
    %163 = vector.load %arg15[%c0_155, %c49, %c0_156] : memref<2x64x64xf32, #tpu.memory_space<vmem>>, vector<2x1x64xf32>
    %164 = vector.shape_cast %163 : vector<2x1x64xf32> to vector<2x64xf32>
    %c0_157 = arith.constant 0 : index
    %c2752 = arith.constant 2752 : index
    %165 = vector.load %arg16[%c0_157, %c2752] : memref<2x3136xf32, #tpu.memory_space<vmem>>, vector<2x64xf32>
    tpu.vector_store %arg16[%c0_157, %c2752], %164 {strides = array<i32>} : memref<2x3136xf32, #tpu.memory_space<vmem>>, vector<2x64xf32>,
    %c0_158 = arith.constant 0 : index
    %c50 = arith.constant 50 : index
    %c0_159 = arith.constant 0 : index
    %166 = vector.load %arg15[%c0_158, %c50, %c0_159] : memref<2x64x64xf32, #tpu.memory_space<vmem>>, vector<2x1x64xf32>
    %167 = vector.shape_cast %166 : vector<2x1x64xf32> to vector<2x64xf32>
    %c0_160 = arith.constant 0 : index
    %c2816 = arith.constant 2816 : index
    %168 = vector.load %arg16[%c0_160, %c2816] : memref<2x3136xf32, #tpu.memory_space<vmem>>, vector<2x64xf32>
    tpu.vector_store %arg16[%c0_160, %c2816], %167 {strides = array<i32>} : memref<2x3136xf32, #tpu.memory_space<vmem>>, vector<2x64xf32>,
    %c0_161 = arith.constant 0 : index
    %c51 = arith.constant 51 : index
    %c0_162 = arith.constant 0 : index
    %169 = vector.load %arg15[%c0_161, %c51, %c0_162] : memref<2x64x64xf32, #tpu.memory_space<vmem>>, vector<2x1x64xf32>
    %170 = vector.shape_cast %169 : vector<2x1x64xf32> to vector<2x64xf32>
    %c0_163 = arith.constant 0 : index
    %c2880 = arith.constant 2880 : index
    %171 = vector.load %arg16[%c0_163, %c2880] : memref<2x3136xf32, #tpu.memory_space<vmem>>, vector<2x64xf32>
    tpu.vector_store %arg16[%c0_163, %c2880], %170 {strides = array<i32>} : memref<2x3136xf32, #tpu.memory_space<vmem>>, vector<2x64xf32>,
    %c0_164 = arith.constant 0 : index
    %c52 = arith.constant 52 : index
    %c0_165 = arith.constant 0 : index
    %172 = vector.load %arg15[%c0_164, %c52, %c0_165] : memref<2x64x64xf32, #tpu.memory_space<vmem>>, vector<2x1x64xf32>
    %173 = vector.shape_cast %172 : vector<2x1x64xf32> to vector<2x64xf32>
    %c0_166 = arith.constant 0 : index
    %c2944 = arith.constant 2944 : index
    %174 = vector.load %arg16[%c0_166, %c2944] : memref<2x3136xf32, #tpu.memory_space<vmem>>, vector<2x64xf32>
    tpu.vector_store %arg16[%c0_166, %c2944], %173 {strides = array<i32>} : memref<2x3136xf32, #tpu.memory_space<vmem>>, vector<2x64xf32>,
    %c0_167 = arith.constant 0 : index
    %c53 = arith.constant 53 : index
    %c0_168 = arith.constant 0 : index
    %175 = vector.load %arg15[%c0_167, %c53, %c0_168] : memref<2x64x64xf32, #tpu.memory_space<vmem>>, vector<2x1x64xf32>
    %176 = vector.shape_cast %175 : vector<2x1x64xf32> to vector<2x64xf32>
    %c0_169 = arith.constant 0 : index
    %c3008 = arith.constant 3008 : index
    %177 = vector.load %arg16[%c0_169, %c3008] : memref<2x3136xf32, #tpu.memory_space<vmem>>, vector<2x64xf32>
    tpu.vector_store %arg16[%c0_169, %c3008], %176 {strides = array<i32>} : memref<2x3136xf32, #tpu.memory_space<vmem>>, vector<2x64xf32>,
    %c0_170 = arith.constant 0 : index
    %c54 = arith.constant 54 : index
    %c0_171 = arith.constant 0 : index
    %178 = vector.load %arg15[%c0_170, %c54, %c0_171] : memref<2x64x64xf32, #tpu.memory_space<vmem>>, vector<2x1x64xf32>
    %179 = vector.shape_cast %178 : vector<2x1x64xf32> to vector<2x64xf32>
    %c0_172 = arith.constant 0 : index
    %c3072 = arith.constant 3072 : index
    %180 = vector.load %arg16[%c0_172, %c3072] : memref<2x3136xf32, #tpu.memory_space<vmem>>, vector<2x64xf32>
    tpu.vector_store %arg16[%c0_172, %c3072], %179 {strides = array<i32>} : memref<2x3136xf32, #tpu.memory_space<vmem>>, vector<2x64xf32>,
    tpu.wait_dma2 semaphore(%arg14 : memref<!tpu.dma_semaphore, #tpu.memory_space<semaphore_mem>>) src(%arg8 : memref<3136x512xbf16, #tpu.memory_space<any>>) dst(%arg13 : memref<3136x512xbf16, #tpu.memory_space<vmem>>)
    %c0_173 = arith.constant 0 : index
    %c0_174 = arith.constant 0 : index
    %181 = vector.load %arg16[%c0_173, %c0_174] : memref<2x3136xf32, #tpu.memory_space<vmem>>, vector<2x3136xf32>
    %182 = arith.truncf %181 : vector<2x3136xf32> to vector<2x3136xbf16>
    %c0_175 = arith.constant 0 : index
    %c0_176 = arith.constant 0 : index
    %183 = vector.load %arg13[%c0_175, %c0_176] : memref<3136x512xbf16, #tpu.memory_space<vmem>>, vector<3136x512xbf16>
    %cst_177 = arith.constant dense<0.000000e+00> : vector<2x512xf32>
    %184 = tpu.matmul %182, %183, %cst_177 {dimension_numbers = #tpu.dot_dimension_numbers<[1], [0], [0], [1], [0, 0, 1, 1], [], []>} : vector<2x3136xbf16>, vector<3136x512xbf16>, vector<2x512xf32> -> vector<2x512xf32>
    %c0_178 = arith.constant 0 : index
    %c0_179 = arith.constant 0 : index
    %185 = vector.load %arg9[%c0_178, %c0_179] : memref<1x512xf32, #tpu.memory_space<vmem>>, vector<1x512xf32>
    %186 = vector.broadcast %185 : vector<1x512xf32> to vector<2x512xf32>
    %187 = arith.addf %184, %186 : vector<2x512xf32>
    %cst_180 = arith.constant 0.000000e+00 : f32
    %188 = vector.broadcast %cst_180 : f32 to vector<2x512xf32>
    %189 = arith.maximumf %187, %188 : vector<2x512xf32>
    %c0_181 = arith.constant 0 : index
    %c0_182 = arith.constant 0 : index
    %190 = vector.load %arg10[%c0_181, %c0_182] : memref<512x6xf32, #tpu.memory_space<vmem>>, vector<512x6xf32>
    %cst_183 = arith.constant dense<0.000000e+00> : vector<2x6xf32>
    %191 = tpu.matmul %189, %190, %cst_183 {dimension_numbers = #tpu.dot_dimension_numbers<[1], [0], [0], [1], [0, 0, 1, 1], [], []>} : vector<2x512xf32>, vector<512x6xf32>, vector<2x6xf32> -> vector<2x6xf32>
    %c0_184 = arith.constant 0 : index
    %c0_185 = arith.constant 0 : index
    %192 = vector.load %arg11[%c0_184, %c0_185] : memref<1x6xf32, #tpu.memory_space<vmem>>, vector<1x6xf32>
    %193 = vector.broadcast %192 : vector<1x6xf32> to vector<2x6xf32>
    %194 = arith.addf %191, %193 : vector<2x6xf32>
    %c0_186 = arith.constant 0 : index
    %c0_187 = arith.constant 0 : index
    %195 = vector.load %arg12[%c0_186, %c0_187] : memref<2x6xf32, #tpu.memory_space<vmem>>, vector<2x6xf32>
    tpu.vector_store %arg12[%c0_186, %c0_187], %194 {strides = array<i32>} : memref<2x6xf32, #tpu.memory_space<vmem>>, vector<2x6xf32>,
    return
  }
  func.func @transform_0(%arg0: i32) -> (i32, i32) {
    %c0_i32 = arith.constant 0 : i32
    %c0_i32_0 = arith.constant 0 : i32
    return %arg0, %c0_i32 : i32, i32
  }
  func.func @transform_1(%arg0: i32) -> (i32, i32) {
    %c0_i32 = arith.constant 0 : i32
    %c0_i32_0 = arith.constant 0 : i32
    %c0_i32_1 = arith.constant 0 : i32
    return %c0_i32, %c0_i32_0 : i32, i32
  }
  func.func @transform_2(%arg0: i32) -> (i32, i32) {
    %c0_i32 = arith.constant 0 : i32
    %c0_i32_0 = arith.constant 0 : i32
    %c0_i32_1 = arith.constant 0 : i32
    return %c0_i32, %c0_i32_0 : i32, i32
  }
  func.func @transform_3(%arg0: i32) -> (i32, i32) {
    %c0_i32 = arith.constant 0 : i32
    %c0_i32_0 = arith.constant 0 : i32
    %c0_i32_1 = arith.constant 0 : i32
    return %c0_i32, %c0_i32_0 : i32, i32
  }
  func.func @transform_4(%arg0: i32) -> (i32, i32) {
    %c0_i32 = arith.constant 0 : i32
    %c0_i32_0 = arith.constant 0 : i32
    %c0_i32_1 = arith.constant 0 : i32
    return %c0_i32, %c0_i32_0 : i32, i32
  }
  func.func @transform_5(%arg0: i32) -> (i32, i32) {
    %c0_i32 = arith.constant 0 : i32
    %c0_i32_0 = arith.constant 0 : i32
    %c0_i32_1 = arith.constant 0 : i32
    return %c0_i32, %c0_i32_0 : i32, i32
  }
  func.func @transform_6(%arg0: i32) -> (i32, i32) {
    %c0_i32 = arith.constant 0 : i32
    %c0_i32_0 = arith.constant 0 : i32
    %c0_i32_1 = arith.constant 0 : i32
    return %c0_i32, %c0_i32_0 : i32, i32
  }
  func.func @transform_8(%arg0: i32) -> (i32, i32) {
    %c0_i32 = arith.constant 0 : i32
    %c0_i32_0 = arith.constant 0 : i32
    %c0_i32_1 = arith.constant 0 : i32
    return %c0_i32, %c0_i32_0 : i32, i32
  }
  func.func @transform_9(%arg0: i32) -> (i32, i32) {
    %c0_i32 = arith.constant 0 : i32
    %c0_i32_0 = arith.constant 0 : i32
    %c0_i32_1 = arith.constant 0 : i32
    return %c0_i32, %c0_i32_0 : i32, i32
  }
  func.func @transform_10(%arg0: i32) -> (i32, i32) {
    %c0_i32 = arith.constant 0 : i32
    %c0_i32_0 = arith.constant 0 : i32
    %c0_i32_1 = arith.constant 0 : i32
    return %c0_i32, %c0_i32_0 : i32, i32
  }
  func.func @transform_11(%arg0: i32) -> (i32, i32) {
    %c0_i32 = arith.constant 0 : i32
    %c0_i32_0 = arith.constant 0 : i32
    return %arg0, %c0_i32 : i32, i32
  }
}

</mosaic_0001>

<bundles_post_ra>
// kernel: dqn_forward.1
= control target key start
LH: loop header
LB: loop body
LE: loop exit
PB: predicated region body
PF: predicated region fallthrough
CT: control target
= control target key end

     0   :  { %16 = vsyncpa [#allocation7], 0  ;;  %s13191_s0 = inlined_call_operand.vmem [shape: f32[128,16], index: 0, kind: input, shape index: {}]   ;;  %s13192_s1 = inlined_call_operand.hbm [shape: f32[16,128], index: 1, kind: input, shape index: {}]   ;;  %s13193_s2 = inlined_call_operand.hbm [shape: f32[1,128], index: 2, kind: input, shape index: {}]   ;;  %s13194_s3 = inlined_call_operand.vmem [shape: f32[128,64], index: 3, kind: input, shape index: {}]   ;;  %s13195_s4 = inlined_call_operand.hbm [shape: f32[1,64], index: 4, kind: input, shape index: {}]   ;;  %s13196_s5 = inlined_call_operand.vmem [shape: f32[256,64], index: 5, kind: input, shape index: {}]   ;;  %s13197_s6 = inlined_call_operand.hbm [shape: f32[1,64], index: 6, kind: input, shape index: {}]   ;;  %s13198_s7 = inlined_call_operand.hbm [shape: bf16[3136,512], index: 7, kind: input, shape index: {}]   ;;  %s13199_s8 = inlined_call_operand.hbm [shape: f32[1,512], index: 8, kind: input, shape index: {}]   ;;  %s13200_s9 = inlined_call_operand.vmem [shape: f32[512,6], index: 9, kind: input, shape index: {}]   ;;  %s13201_s10 = inlined_call_operand.hbm [shape: f32[1,6], index: 10, kind: input, shape index: {}]   ;;  %s13202_s11 = inlined_call_operand.hbm [shape: f32[2,6], index: 11, kind: output, shape index: {}]  }
   0x1   :  { %17 = vsyncpa [#allocation10], 0 }
   0x2   :  { %18 = vsyncpa [#allocation13], 0 }
   0x3   :  { %19 = vsyncpa [#allocation16], 0  ;;  %s41_s19 = sshll.u32 %s13193_s2, 4  ;;  %s42_s19 = int_to_ptr.hbm [resolvable:$true] %s41_s19 }
   0x4   :  { %20 = vsyncpa [#allocation8], 0  ;;  %s11869_s20 = smov [#allocation9]   ;;  %s67_s24 = sshll.u32 %s13197_s6, 4  ;;  %s68_s24 = int_to_ptr.hbm [resolvable:$true] %s67_s24 }
   0x5   :  { %s43_s21 = sshll.u32 %s11869_s20, 4  ;;  %s11870_s25 = smov [#allocation12]   ;;  %s44_s21 = int_to_ptr.vmem [resolvable:$true] %s43_s21 }
   0x6   :  { %46 = dma.hbm_to_vmem [thread:$0]  %s42_s19, 16, %s44_s21, [#allocation10]  }
   0x7   :  { %s69_s26 = sshll.u32 %s11870_s25, 4  ;;  %s27_s29 = sshll.u32 %s13192_s1, 4  ;;  %s70_s26 = int_to_ptr.vmem [resolvable:$true] %s69_s26  ;;  %s28_s29 = int_to_ptr.hbm [resolvable:$true] %s27_s29 }
   0x8   :  { %72 = dma.hbm_to_vmem [thread:$0]  %s68_s24, 16, %s70_s26, [#allocation13]  }
   0x9   :  { %s11871_s2 = smov [#allocation6]   ;;  %s54_s14 = sshll.u32 %s13195_s4, 4  ;;  %s55_s14 = int_to_ptr.hbm [resolvable:$true] %s54_s14 }
   0xa   :  { %s29_s30 = sshll.u32 %s11871_s2, 4  ;;  %s11872_s15 = smov 128   ;;  %s30_s30 = int_to_ptr.vmem [resolvable:$true] %s29_s30 }
   0xb   :  { %s11873_s6 = smov 8   ;;  %s11874_s16 = smov [#allocation11]  }
   0xc   :  { %35 = dma.hbm_to_vmem [thread:$0]  %s28_s29, 256, %s30_s30, [#allocation7], %s11872_s15, %s11872_s15, %s11873_s6  }
   0xd   :  { %s56_s17 = sshll.u32 %s11874_s16, 4  ;;  %s78_s1 = sshll.u32 %s13199_s8, 4  ;;  %s57_s17 = int_to_ptr.vmem [resolvable:$true] %s56_s17  ;;  %s79_s1 = int_to_ptr.hbm [resolvable:$true] %s78_s1 }
   0xe   :  { %59 = dma.hbm_to_vmem [thread:$0]  %s55_s14, 16, %s57_s17, [#allocation10]  }
   0xf   :  { %s91_s22 = sshll.u32 %s13201_s10, 4  ;;  %s11875_s23 = smov [#allocation14]   ;;  %s92_s22 = int_to_ptr.hbm [resolvable:$true] %s91_s22 }
  0x10   :  { %s80_s24 = sshll.u32 %s11875_s23, 4  ;;  %s11876_s4 = smov [#allocation15]   ;;  %s81_s24 = int_to_ptr.vmem [resolvable:$true] %s80_s24 }
  0x11   :  { %83 = dma.hbm_to_vmem [thread:$0]  %s79_s1, 64, %s81_s24, [#allocation13]  }
  0x12   :  { %s93_s25 = sshll.u32 %s11876_s4, 4  ;;  %s94_s25 = int_to_ptr.vmem [resolvable:$true] %s93_s25 }
  0x13   :  { %96 = dma.hbm_to_vmem [thread:$0]  %s92_s22, 16, %s94_s25, [#allocation16]  }
  0x14   :  { %11857 = dma.done.wait [#allocation7], 256  }
  0x15   :  { %11858 = vsyncadd [#allocation7], 4294967040 }
  0x16   :  { %11859 = dma.done.wait [#allocation10], 32  }
  0x17   :  { %11860 = vsyncadd [#allocation10], 4294967264 }
  0x18   :  { %11861 = dma.done.wait [#allocation13], 80  }
  0x19   :  { %11862 = vsyncadd [#allocation13], 4294967216 }
  0x1a   :  { %11863 = dma.done.wait [#allocation16], 16  }
  0x1b   :  { %11864 = vsyncadd [#allocation16], 4294967280  ;;  %v152_v0 = vld [vmem:[#allocation6 + $0x8] sm:$0xff]  ;;  %v151_v1 = vld [vmem:[#allocation6] sm:$0xff]  ;;  %vm157_vm0 = vcmask 130048   ;;  %vm404_vm1 = vcmask 1046528  }
  0x1c   :  { %220 = vmatpush.msra.mxu0 %v152_v0  ;;  %v135_v2 = vld [vmem:[%s13191_s0] sm:$0xff]  ;;  %v136_v3 = vld [vmem:[%s13191_s0 + $0x8] sm:$0xff]  ;;  %v137_v4 = vld [vmem:[%s13191_s0 + $0x10] sm:$0xff]  ;;  %vm491_vm2 = vcmask 523264   ;;  %vm716_vm4 = vcmask 1041409   ;;  %vm718_vm5 = vcmask 1043459  }
  0x1d   :  { %v138_v5 = vld [vmem:[%s13191_s0 + $0x18] sm:$0xff]  ;;  %v139_v6 = vld [vmem:[%s13191_s0 + $0x20] sm:$0xff]  ;;  %v140_v7 = vld [vmem:[%s13191_s0 + $0x28] sm:$0xff]  ;;  %vm720_vm6 = vcmask 1045509   ;;  %vm722_vm7 = vcmask 1047559   ;;  %vm725_vm8 = vcmask 517120  }
  0x1e   :  { %221 = vmatpush.msra.mxu0 %v151_v1  ;;  %v141_v8 = vld [vmem:[%s13191_s0 + $0x30] sm:$0xff]  ;;  %v142_v9 = vld [vmem:[%s13191_s0 + $0x38] sm:$0xff]  ;;  %v143_v10 = vld [vmem:[%s13191_s0 + $0x40] sm:$0xff]  ;;  %s129_s10 = sshll.u32 %s13198_s7, 4  ;;  %s11879_s26 = smov [#allocation2]   ;;  %vm741_vm9 = vcmask 1041920   ;;  %s130_s10 = int_to_ptr.hbm [resolvable:$true] %s129_s10 }
  0x1f   :  { %7698 = vmatmul.msk.f32.vlgmr.msra.gmra.mxu0 %vm157_vm0, %v135_v2  ;;  %v302_v11 = vld [vmem:[%s13194_s3 + $0x78] sm:$0xff]  ;;  %v301_v12 = vld [vmem:[%s13194_s3 + $0x70] sm:$0xff]  ;;  %v300_v13 = vld [vmem:[%s13194_s3 + $0x68] sm:$0xff]  ;;  %s131_s27 = sshll.u32 %s11879_s26, 4  ;;  %s132_s27 = int_to_ptr.vmem [resolvable:$true] %s131_s27 }
  0x20   :  { %307 = vmatpush.msra.mxu1 %v302_v11  ;;  %v144_v14 = vld [vmem:[%s13191_s0 + $0x48] sm:$0xff]  ;;  %v299_v15 = vld [vmem:[%s13194_s3 + $0x60] sm:$0xff]  ;;  %v298_v16 = vld [vmem:[%s13194_s3 + $0x58] sm:$0xff]  ;;  %134 = dma.hbm_to_vmem [thread:$0]  %s130_s10, 100352, %s132_s27, [#allocation3] }
  0x21   :  { %v297_v17 = vld [vmem:[%s13194_s3 + $0x50] sm:$0xff]  ;;  %v296_v18 = vld [vmem:[%s13194_s3 + $0x48] sm:$0xff]  ;;  %v295_v20 = vld [vmem:[%s13194_s3 + $0x40] sm:$0xff] }
  0x22   :  { %308 = vmatpush.msra.mxu1 %v301_v12  ;;  %v145_v19 = vld [vmem:[%s13191_s0 + $0x50] sm:$0xff]  ;;  %v294_v21 = vld [vmem:[%s13194_s3 + $0x38] sm:$0xff]  ;;  %v292_v23 = vld [vmem:[%s13194_s3 + $0x28] sm:$0xff] }
  0x23   :  { %v293_v22 = vld [vmem:[%s13194_s3 + $0x30] sm:$0xff]  ;;  %v146_v24 = vld [vmem:[%s13191_s0 + $0x58] sm:$0xff]  ;;  %v291_v25 = vld [vmem:[%s13194_s3 + $0x20] sm:$0xff] }
  0x24   :  { %309 = vmatpush.msra.mxu1 %v300_v13  ;;  %v290_v26 = vld [vmem:[%s13194_s3 + $0x18] sm:$0xff]  ;;  %v289_v27 = vld [vmem:[%s13194_s3 + $0x10] sm:$0xff]  ;;  %v147_v28 = vld [vmem:[%s13191_s0 + $0x60] sm:$0xff] }
  0x25   :  { %v288_v29 = vld [vmem:[%s13194_s3 + $0x8] sm:$0xff]  ;;  %v287_v30 = vld [vmem:[%s13194_s3] sm:$0xff]  ;;  %v149_v32 = vld [vmem:[%s13191_s0 + $0x70] sm:$0xff] }
  0x26   :  { %310 = vmatpush.msra.mxu1 %v299_v15  ;;  %v148_v31 = vld [vmem:[%s13191_s0 + $0x68] sm:$0xff]  ;;  %v150_v33 = vld [vmem:[%s13191_s0 + $0x78] sm:$0xff]  ;;  %s11877_s0 = smov 64   ;;  %vm7714_vm3 = vmneg %vm491_vm2 }
  0x27   :  { %7699 = vmatmul.msk.f32.gmra.mxu0 %vm157_vm0, %v136_v3  ;;  %v11658_v34 = vld [vmem:[#allocation9] ss:$0 sm:$0xff] }
  0x28   :  { %311 = vmatpush.msra.mxu1 %v298_v16 }
  0x2a   :  { %312 = vmatpush.msra.mxu1 %v297_v17 }
  0x2c   :  { %313 = vmatpush.msra.mxu1 %v296_v18 }
  0x2e   :  { %314 = vmatpush.msra.mxu1 %v295_v20 }
  0x2f   :  { %7700 = vmatmul.msk.f32.gmra.mxu0 %vm157_vm0, %v137_v4 }
  0x30   :  { %315 = vmatpush.msra.mxu1 %v294_v21  ;;  %v12071_v21 = vld [vmem:[#allocation11] ss:$0 sm:$0xff] }
  0x32   :  { %316 = vmatpush.msra.mxu1 %v293_v22 }
  0x34   :  { %317 = vmatpush.msra.mxu1 %v292_v23 }
  0x36   :  { %318 = vmatpush.msra.mxu1 %v291_v25 }
  0x37   :  { %7701 = vmatmul.msk.f32.gmra.mxu0 %vm157_vm0, %v138_v5 }
  0x38   :  { %319 = vmatpush.msra.mxu1 %v290_v26 }
  0x3a   :  { %320 = vmatpush.msra.mxu1 %v289_v27 }
  0x3c   :  { %321 = vmatpush.msra.mxu1 %v288_v29 }
  0x3e   :  { %322 = vmatpush.msra.mxu1 %v287_v30 }
  0x3f   :  { %7702 = vmatmul.msk.f32.gmra.mxu0 %vm157_vm0, %v139_v6 }
  0x47   :  { %7703 = vmatmul.msk.f32.gmra.mxu0 %vm157_vm0, %v140_v7 }
  0x4f   :  { %7704 = vmatmul.msk.f32.gmra.mxu0 %vm157_vm0, %v141_v8 }
  0x57   :  { %7705 = vmatmul.msk.f32.gmra.mxu0 %vm157_vm0, %v142_v9 }
  0x5f   :  { %7706 = vmatmul.msk.f32.gmra.mxu0 %vm157_vm0, %v143_v10 }
  0x67   :  { %7707 = vmatmul.msk.f32.gmra.mxu0 %vm157_vm0, %v144_v14 }
  0x6f   :  { %7708 = vmatmul.msk.f32.gmra.mxu0 %vm157_vm0, %v145_v19 }
  0x77   :  { %7709 = vmatmul.msk.f32.gmra.mxu0 %vm157_vm0, %v146_v24 }
  0x7f   :  { %7710 = vmatmul.msk.f32.gmra.mxu0 %vm157_vm0, %v147_v28 }
  0x87   :  { %7711 = vmatmul.msk.f32.gmra.mxu0 %vm157_vm0, %v148_v31 }
  0x8f   :  { %7712 = vmatmul.msk.f32.gmra.mxu0 %vm157_vm0, %v149_v32 }
  0x97   :  { %7713 = vmatmul.msk.f32.gmra.mxu0 %vm157_vm0, %v150_v33 }
  0x9c   :  { %v223_v35 = vpop.f32.mrf.mxu0 }
  0x9d   :  { %v224_v36 = vadd.f32 %v11658_v34, %v223_v35 }
  0x9f   :  { %v271_v37 = vmax.f32 %v224_v36, 0.0 }
  0xa1   :  { %323 = vmatmul.f32.vlgmr.msra.gmra.mxu1 %v271_v37 }
  0xa4   :  { %v226_v38 = vpop.f32.mrf.mxu0 }
  0xa5   :  { %v227_v39 = vadd.f32 %v11658_v34, %v226_v38 }
  0xa7   :  { %v272_v40 = vmax.f32 %v227_v39, 0.0 }
  0xa9   :  { %326 = vmatmul.f32.gmra.mxu1 %v272_v40 }
  0xac   :  { %v229_v41 = vpop.f32.mrf.mxu0 }
  0xad   :  { %v230_v42 = vadd.f32 %v11658_v34, %v229_v41 }
  0xaf   :  { %v273_v43 = vmax.f32 %v230_v42, 0.0 }
  0xb1   :  { %329 = vmatmul.f32.gmra.mxu1 %v273_v43 }
  0xb4   :  { %v232_v44 = vpop.f32.mrf.mxu0 }
  0xb5   :  { %v233_v45 = vadd.f32 %v11658_v34, %v232_v44 }
  0xb7   :  { %v274_v46 = vmax.f32 %v233_v45, 0.0 }
  0xb9   :  { %332 = vmatmul.f32.gmra.mxu1 %v274_v46 }
  0xbc   :  { %v235_v47 = vpop.f32.mrf.mxu0 }
  0xbd   :  { %v236_v48 = vadd.f32 %v11658_v34, %v235_v47 }
  0xbf   :  { %v275_v49 = vmax.f32 %v236_v48, 0.0 }
  0xc1   :  { %335 = vmatmul.f32.gmra.mxu1 %v275_v49 }
  0xc4   :  { %v238_v50 = vpop.f32.mrf.mxu0 }
  0xc5   :  { %v239_v51 = vadd.f32 %v11658_v34, %v238_v50 }
  0xc7   :  { %v276_v52 = vmax.f32 %v239_v51, 0.0 }
  0xc9   :  { %338 = vmatmul.f32.gmra.mxu1 %v276_v52 }
  0xcc   :  { %v241_v53 = vpop.f32.mrf.mxu0 }
  0xcd   :  { %v242_v54 = vadd.f32 %v11658_v34, %v241_v53 }
  0xcf   :  { %v277_v55 = vmax.f32 %v242_v54, 0.0 }
  0xd1   :  { %341 = vmatmul.f32.gmra.mxu1 %v277_v55 }
  0xd4   :  { %v244_v56 = vpop.f32.mrf.mxu0 }
  0xd5   :  { %v245_v57 = vadd.f32 %v11658_v34, %v244_v56 }
  0xd7   :  { %v278_v58 = vmax.f32 %v245_v57, 0.0 }
  0xd9   :  { %344 = vmatmul.f32.gmra.mxu1 %v278_v58 }
  0xdc   :  { %v247_v59 = vpop.f32.mrf.mxu0 }
  0xdd   :  { %v248_v60 = vadd.f32 %v11658_v34, %v247_v59 }
  0xdf   :  { %v279_v61 = vmax.f32 %v248_v60, 0.0 }
  0xe1   :  { %347 = vmatmul.f32.gmra.mxu1 %v279_v61 }
  0xe4   :  { %v250_v62 = vpop.f32.mrf.mxu0 }
  0xe5   :  { %v251_v63 = vadd.f32 %v11658_v34, %v250_v62 }
  0xe7   :  { %v280_v0 = vmax.f32 %v251_v63, 0.0 }
  0xe9   :  { %350 = vmatmul.f32.gmra.mxu1 %v280_v0 }
  0xec   :  { %v253_v1 = vpop.f32.mrf.mxu0 }
  0xed   :  { %v254_v2 = vadd.f32 %v11658_v34, %v253_v1 }
  0xef   :  { %v281_v3 = vmax.f32 %v254_v2, 0.0 }
  0xf1   :  { %353 = vmatmul.f32.gmra.mxu1 %v281_v3 }
  0xf4   :  { %v256_v4 = vpop.f32.mrf.mxu0 }
  0xf5   :  { %v257_v5 = vadd.f32 %v11658_v34, %v256_v4 }
  0xf7   :  { %v282_v6 = vmax.f32 %v257_v5, 0.0 }
  0xf9   :  { %356 = vmatmul.f32.gmra.mxu1 %v282_v6 }
  0xfc   :  { %v259_v7 = vpop.f32.mrf.mxu0 }
  0xfd   :  { %v260_v8 = vadd.f32 %v11658_v34, %v259_v7  ;;  %v524_v7 = vld [vmem:[%s13196_s5 + $0x78] sm:$0xff] }
  0xfe   :  { %545 = vmatpush.msra.mxu2 %v524_v7 }
  0xff   :  { %v283_v9 = vmax.f32 %v260_v8, 0.0  ;;  %v540_v8 = vld [vmem:[%s13196_s5 + $0xf8] sm:$0xff] }
 0x100   :  { %610 = vmatpush.msra.mxu3 %v540_v8 }
 0x101   :  { %359 = vmatmul.f32.gmra.mxu1 %v283_v9 }
 0x104   :  { %v262_v10 = vpop.f32.mrf.mxu0 }
 0x105   :  { %v263_v11 = vadd.f32 %v11658_v34, %v262_v10  ;;  %v523_v10 = vld [vmem:[%s13196_s5 + $0x70] sm:$0xff] }
 0x106   :  { %546 = vmatpush.msra.mxu2 %v523_v10  ;;  %v510_v10 = vld [vmem:[%s13196_s5 + $0x8] sm:$0xff] }
 0x107   :  { %v284_v12 = vmax.f32 %v263_v11, 0.0  ;;  %v539_v11 = vld [vmem:[%s13196_s5 + $0xf0] sm:$0xff] }
 0x108   :  { %611 = vmatpush.msra.mxu3 %v539_v11  ;;  %v526_v11 = vld [vmem:[%s13196_s5 + $0x88] sm:$0xff] }
 0x109   :  { %362 = vmatmul.f32.gmra.mxu1 %v284_v12 }
 0x10c   :  { %v265_v13 = vpop.f32.mrf.mxu0 }
 0x10d   :  { %v266_v14 = vadd.f32 %v11658_v34, %v265_v13  ;;  %v522_v13 = vld [vmem:[%s13196_s5 + $0x68] sm:$0xff] }
 0x10e   :  { %547 = vmatpush.msra.mxu2 %v522_v13 }
 0x10f   :  { %v285_v15 = vmax.f32 %v266_v14, 0.0  ;;  %v538_v14 = vld [vmem:[%s13196_s5 + $0xe8] sm:$0xff] }
 0x110   :  { %612 = vmatpush.msra.mxu3 %v538_v14  ;;  %v509_v14 = vld [vmem:[%s13196_s5] sm:$0xff] }
 0x111   :  { %365 = vmatmul.f32.gmra.mxu1 %v285_v15 }
 0x114   :  { %v268_v16 = vpop.f32.mrf.mxu0 }
 0x115   :  { %v269_v17 = vadd.f32 %v11658_v34, %v268_v16  ;;  %v521_v16 = vld [vmem:[%s13196_s5 + $0x60] sm:$0xff] }
 0x116   :  { %548 = vmatpush.msra.mxu2 %v521_v16 }
 0x117   :  { %v286_v18 = vmax.f32 %v269_v17, 0.0  ;;  %v537_v17 = vld [vmem:[%s13196_s5 + $0xe0] sm:$0xff] }
 0x118   :  { %613 = vmatpush.msra.mxu3 %v537_v17 }
 0x119   :  { %368 = vmatmul.f32.gmra.mxu1 %v286_v18 }
 0x11e   :  { %v324_v19 = vpop.f32.mrf.mxu1 }
 0x11f   :  { %v12077_v23 = vadd.f32 %v12071_v21, %v324_v19 }
 0x121   :  { %v372_v26 = vmax.f32 %v12077_v23, 0.0 }
 0x123   :  { %v405_v30 = vrot.slane %v372_v26, 1 }
 0x126   :  { %v327_v20 = vpop.f32.mrf.mxu1 }
 0x127   :  { %v12074_v22 = vadd.f32 %v12071_v21, %v327_v20  ;;  %v520_v20 = vld [vmem:[%s13196_s5 + $0x58] sm:$0xff] }
 0x128   :  { %549 = vmatpush.msra.mxu2 %v520_v20 }
 0x129   :  { %v373_v24 = vmax.f32 %v12074_v22, 0.0 }
 0x12b   :  { %v406_v28 = vrot.slane %v373_v24, 1 }
 0x12d   :  { %v407_v32 = vsel %vm404_vm1, %v405_v30, %v406_v28  ;;  %v519_v30 = vld [vmem:[%s13196_s5 + $0x50] sm:$0xff] }
 0x12e   :  { %v330_v25 = vpop.f32.mrf.mxu1  ;;  %550 = vmatpush.msra.mxu2 %v519_v30 }
 0x12f   :  { %v12082_v27 = vadd.f32 %v12071_v21, %v330_v25  ;;  %v536_v25 = vld [vmem:[%s13196_s5 + $0xd8] sm:$0xff] }
 0x130   :  { %614 = vmatpush.msra.mxu3 %v536_v25 }
 0x131   :  { %v374_v29 = vmax.f32 %v12082_v27, 0.0 }
 0x133   :  { %v408_v31 = vrot.slane %v374_v29, 1 }
 0x135   :  { %v409_v33 = vsel %vm404_vm1, %v406_v28, %v408_v31 }
 0x136   :  { %v333_v34 = vpop.f32.mrf.mxu1  ;;  %v11653_v35 = vpack.i.bf16 %v409_v33, %v407_v32  ;;  %v518_v33 = vld [vmem:[%s13196_s5 + $0x48] sm:$0xff] }
 0x137   :  { %v12094_v36 = vadd.f32 %v12071_v21, %v333_v34  ;;  %v534_v34 = vld [vmem:[%s13196_s5 + $0xc8] sm:$0xff]  ;;  %551 = vmatpush.msra.mxu2 %v518_v33 }
 0x138   :  { %11654 = vrot.lane.b32.xlu0 %v11653_v35, %s11877_s0 }
 0x139   :  { %v375_v37 = vmax.f32 %v12094_v36, 0.0 }
 0x13b   :  { %v410_v38 = vrot.slane %v375_v37, 1 }
 0x13d   :  { %v411_v41 = vsel %vm404_vm1, %v408_v31, %v410_v38  ;;  %v535_v31 = vld [vmem:[%s13196_s5 + $0xd0] sm:$0xff] }
 0x13e   :  { %v336_v39 = vpop.f32.mrf.mxu1  ;;  %615 = vmatpush.msra.mxu3 %v535_v31 }
 0x13f   :  { %v12101_v40 = vadd.f32 %v12071_v21, %v336_v39  ;;  %v533_v39 = vld [vmem:[%s13196_s5 + $0xc0] sm:$0xff] }
 0x140   :  { %443 = vrot.lane.b32.xlu0 %v411_v41, %s11877_s0  ;;  %616 = vmatpush.msra.mxu3 %v534_v34 }
 0x141   :  { %v376_v42 = vmax.f32 %v12101_v40, 0.0 }
 0x142   :  { %617 = vmatpush.msra.mxu3 %v533_v39  ;;  %v11878_v39 = vmov 0.0  }
 0x143   :  { %v412_v43 = vrot.slane %v376_v42, 1 }
 0x145   :  { %v413_v44 = vsel %vm404_vm1, %v410_v38, %v412_v43  ;;  %v517_v38 = vld [vmem:[%s13196_s5 + $0x40] sm:$0xff] }
 0x146   :  { %v339_v45 = vpop.f32.mrf.mxu1  ;;  %445 = vrot.lane.b32.xlu1 %v413_v44, %s11877_s0  ;;  %552 = vmatpush.msra.mxu2 %v517_v38  ;;  %v516_v44 = vld [vmem:[%s13196_s5 + $0x38] sm:$0xff] }
 0x147   :  { %v12111_v46 = vadd.f32 %v12071_v21, %v339_v45  ;;  %v532_v45 = vld [vmem:[%s13196_s5 + $0xb8] sm:$0xff] }
 0x148   :  { %553 = vmatpush.msra.mxu2 %v516_v44  ;;  %618 = vmatpush.msra.mxu3 %v532_v45 }
 0x149   :  { %v377_v47 = vmax.f32 %v12111_v46, 0.0 }
 0x14b   :  { %v414_v48 = vrot.slane %v377_v47, 1 }
 0x14d   :  { %v415_v49 = vsel %vm404_vm1, %v412_v43, %v414_v48 }
 0x14e   :  { %v342_v50 = vpop.f32.mrf.mxu1  ;;  %447 = vrot.lane.b32.xlu1 %v415_v49, %s11877_s0 }
 0x14f   :  { %v12119_v51 = vadd.f32 %v12071_v21, %v342_v50  ;;  %v531_v50 = vld [vmem:[%s13196_s5 + $0xb0] sm:$0xff] }
 0x150   :  { %619 = vmatpush.msra.mxu3 %v531_v50 }
 0x151   :  { %v378_v52 = vmax.f32 %v12119_v51, 0.0 }
 0x153   :  { %v416_v53 = vrot.slane %v378_v52, 1 }
 0x155   :  { %v417_v54 = vsel %vm404_vm1, %v414_v48, %v416_v53  ;;  %v515_v48 = vld [vmem:[%s13196_s5 + $0x30] sm:$0xff] }
 0x156   :  { %v345_v55 = vpop.f32.mrf.mxu1  ;;  %449 = vrot.lane.b32.xlu2 %v417_v54, %s11877_s0  ;;  %v530_v54 = vld [vmem:[%s13196_s5 + $0xa8] sm:$0xff]  ;;  %554 = vmatpush.msra.mxu2 %v515_v48 }
 0x157   :  { %v12127_v56 = vadd.f32 %v12071_v21, %v345_v55  ;;  %620 = vmatpush.msra.mxu3 %v530_v54 }
 0x159   :  { %v379_v57 = vmax.f32 %v12127_v56, 0.0 }
 0x15b   :  { %v418_v58 = vrot.slane %v379_v57, 1 }
 0x15d   :  { %v419_v59 = vsel %vm404_vm1, %v416_v53, %v418_v58  ;;  %v514_v53 = vld [vmem:[%s13196_s5 + $0x28] sm:$0xff] }
 0x15e   :  { %v348_v60 = vpop.f32.mrf.mxu1  ;;  %451 = vrot.lane.b32.xlu2 %v419_v59, %s11877_s0  ;;  %v529_v59 = vld [vmem:[%s13196_s5 + $0xa0] sm:$0xff]  ;;  %555 = vmatpush.msra.mxu2 %v514_v53 }
 0x15f   :  { %v12135_v61 = vadd.f32 %v12071_v21, %v348_v60  ;;  %621 = vmatpush.msra.mxu3 %v529_v59 }
 0x161   :  { %v380_v62 = vmax.f32 %v12135_v61, 0.0 }
 0x163   :  { %v420_v63 = vrot.slane %v380_v62, 1 }
 0x165   :  { %v421_v0 = vsel %vm404_vm1, %v418_v58, %v420_v63  ;;  %v513_v58 = vld [vmem:[%s13196_s5 + $0x20] sm:$0xff] }
 0x166   :  { %v351_v1 = vpop.f32.mrf.mxu1  ;;  %453 = vrot.lane.b32.xlu0 %v421_v0, %s11877_s0  ;;  %v528_v0 = vld [vmem:[%s13196_s5 + $0x98] sm:$0xff]  ;;  %556 = vmatpush.msra.mxu2 %v513_v58 }
 0x167   :  { %v12143_v2 = vadd.f32 %v12071_v21, %v351_v1  ;;  %622 = vmatpush.msra.mxu3 %v528_v0 }
 0x169   :  { %v381_v3 = vmax.f32 %v12143_v2, 0.0 }
 0x16b   :  { %v422_v4 = vrot.slane %v381_v3, 1 }
 0x16d   :  { %v423_v5 = vsel %vm404_vm1, %v420_v63, %v422_v4  ;;  %v512_v63 = vld [vmem:[%s13196_s5 + $0x18] sm:$0xff] }
 0x16e   :  { %v354_v6 = vpop.f32.mrf.mxu1  ;;  %455 = vrot.lane.b32.xlu1 %v423_v5, %s11877_s0  ;;  %v511_v5 = vld [vmem:[%s13196_s5 + $0x10] sm:$0xff]  ;;  %557 = vmatpush.msra.mxu2 %v512_v63 }
 0x16f   :  { %v12157_v9 = vadd.f32 %v12071_v21, %v354_v6  ;;  %v527_v6 = vld [vmem:[%s13196_s5 + $0x90] sm:$0xff] }
 0x170   :  { %558 = vmatpush.msra.mxu2 %v511_v5  ;;  %623 = vmatpush.msra.mxu3 %v527_v6 }
 0x171   :  { %v382_v12 = vmax.f32 %v12157_v9, 0.0 }
 0x172   :  { %559 = vmatpush.msra.mxu2 %v510_v10  ;;  %624 = vmatpush.msra.mxu3 %v526_v11 }
 0x173   :  { %v424_v15 = vrot.slane %v382_v12, 1 }
 0x174   :  { %560 = vmatpush.msra.mxu2 %v509_v14 }
 0x175   :  { %v425_v18 = vsel %vm404_vm1, %v422_v4, %v424_v15 }
 0x176   :  { %v357_v19 = vpop.f32.mrf.mxu1  ;;  %457 = vrot.lane.b32.xlu2 %v425_v18, %s11877_s0 }
 0x177   :  { %v12189_v28 = vadd.f32 %v12071_v21, %v357_v19 }
 0x179   :  { %v383_v32 = vmax.f32 %v12189_v28, 0.0 }
 0x17b   :  { %v426_v35 = vrot.slane %v383_v32, 1 }
 0x17d   :  { %v427_v41 = vsel %vm404_vm1, %v424_v15, %v426_v35  ;;  %v525_v15 = vld [vmem:[%s13196_s5 + $0x80] sm:$0xff] }
 0x17e   :  { %v360_v43 = vpop.f32.mrf.mxu1  ;;  %459 = vrot.lane.b32.xlu0 %v427_v41, %s11877_s0  ;;  %625 = vmatpush.msra.mxu3 %v525_v15 }
 0x17f   :  { %v12224_v49 = vadd.f32 %v12071_v21, %v360_v43 }
 0x181   :  { %v384_v55 = vmax.f32 %v12224_v49, 0.0 }
 0x183   :  { %v428_v60 = vrot.slane %v384_v55, 1 }
 0x185   :  { %v429_v1 = vsel %vm404_vm1, %v426_v35, %v428_v60 }
 0x186   :  { %v363_v4 = vpop.f32.mrf.mxu1  ;;  %461 = vrot.lane.b32.xlu1 %v429_v1, %s11877_s0 }
 0x187   :  { %v12259_v7 = vadd.f32 %v12071_v21, %v363_v4 }
 0x189   :  { %v385_v8 = vmax.f32 %v12259_v7, 0.0 }
 0x18b   :  { %v430_v13 = vrot.slane %v385_v8, 1 }
 0x18d   :  { %v431_v16 = vsel %vm404_vm1, %v428_v60, %v430_v13 }
 0x18e   :  { %v366_v17 = vpop.f32.mrf.mxu1  ;;  %463 = vrot.lane.b32.xlu2 %v431_v16, %s11877_s0 }
 0x18f   :  { %v12279_v18 = vadd.f32 %v12071_v21, %v366_v17 }
 0x191   :  { %v386_v19 = vmax.f32 %v12279_v18, 0.0 }
 0x193   :  { %v432_v20 = vrot.slane %v386_v19, 1 }
 0x195   :  { %v433_v25 = vsel %vm404_vm1, %v430_v13, %v432_v20 }
 0x196   :  { %v369_v30 = vpop.f32.mrf.mxu1  ;;  %465 = vrot.lane.b32.xlu0 %v433_v25, %s11877_s0 }
 0x197   :  { %v12287_v31 = vadd.f32 %v12071_v21, %v369_v30 }
 0x199   :  { %v387_v33 = vmax.f32 %v12287_v31, 0.0 }
 0x19b   :  { %v434_v34 = vrot.slane %v387_v33, 1 }
 0x19d   :  { %v437_v35 = vsel %vm404_vm1, %v434_v34, 0.0  ;;  %v435_v38 = vsel %vm404_vm1, %v432_v20, %v434_v34 }
 0x19e   :  { %469 = vrot.lane.b32.xlu2 %v437_v35, %s11877_s0  ;;  %467 = vrot.lane.b32.xlu1 %v435_v38, %s11877_s0 }
 0x19f   :  { %488 = vrot.lane.b32.xlu0 %v11878_v39, %s11877_s0 }
 0x1aa   :  { %v11655_v41 = vpop.permute.xlu0 %11654 }
 0x1ab   :  { %v11657_v21 = vunpack.i.h.bf16 %v11655_v41  ;;  %v11656_v43 = vunpack.i.l.bf16 %v11655_v41 }
 0x1ad   :  { %v492_v44 = vsel %vm491_vm2, %v372_v26, %v11656_v43  ;;  %v493_v45 = vsel %vm491_vm2, %v373_v24, %v11657_v21 }
 0x1ae   :  { %561 = vmatmul.f32.vlgmr.msra.gmra.mxu2 %v492_v44  ;;  %626 = vmatmul.f32.vlgmr.msra.gmra.mxu3 %v493_v45 }
 0x1b0   :  { %v450_v24 = vpop.permute.xlu2 %449 }
 0x1b1   :  { %v497_v27 = vsel %vm491_vm2, %v377_v47, %v450_v24 }
 0x1b2   :  { %v444_v48 = vpop.permute.xlu0 %443 }
 0x1b3   :  { %v494_v50 = vsel %vm491_vm2, %v374_v29, %v444_v48 }
 0x1b6   :  { %564 = vmatmul.f32.gmra.mxu2 %v493_v45  ;;  %629 = vmatmul.f32.gmra.mxu3 %v494_v50 }
 0x1b8   :  { %v446_v53 = vpop.permute.xlu1 %445  ;;  %v452_v29 = vpop.permute.xlu2 %451 }
 0x1b9   :  { %v495_v23 = vsel %vm491_vm2, %v375_v37, %v446_v53  ;;  %v498_v36 = vsel %vm491_vm2, %v378_v52, %v452_v29 }
 0x1be   :  { %567 = vmatmul.f32.gmra.mxu2 %v494_v50  ;;  %632 = vmatmul.f32.gmra.mxu3 %v495_v23 }
 0x1c0   :  { %v448_v26 = vpop.permute.xlu1 %447 }
 0x1c1   :  { %v496_v22 = vsel %vm491_vm2, %v376_v42, %v448_v26 }
 0x1c6   :  { %570 = vmatmul.f32.gmra.mxu2 %v495_v23  ;;  %635 = vmatmul.f32.gmra.mxu3 %v496_v22 }
 0x1ce   :  { %573 = vmatmul.f32.gmra.mxu2 %v496_v22  ;;  %638 = vmatmul.f32.gmra.mxu3 %v497_v27 }
 0x1d0   :  { %v458_v47 = vpop.permute.xlu2 %457 }
 0x1d1   :  { %v501_v51 = vsel %vm491_vm2, %v381_v3, %v458_v47 }
 0x1d6   :  { %576 = vmatmul.f32.gmra.mxu2 %v497_v27  ;;  %641 = vmatmul.f32.gmra.mxu3 %v498_v36 }
 0x1d8   :  { %v454_v37 = vpop.permute.xlu0 %453 }
 0x1d9   :  { %v499_v40 = vsel %vm491_vm2, %v379_v57, %v454_v37 }
 0x1de   :  { %579 = vmatmul.f32.gmra.mxu2 %v498_v36  ;;  %644 = vmatmul.f32.gmra.mxu3 %v499_v40 }
 0x1e0   :  { %v456_v42 = vpop.permute.xlu1 %455 }
 0x1e1   :  { %v500_v46 = vsel %vm491_vm2, %v380_v62, %v456_v42 }
 0x1e6   :  { %582 = vmatmul.f32.gmra.mxu2 %v499_v40  ;;  %647 = vmatmul.f32.gmra.mxu3 %v500_v46 }
 0x1e8   :  { %v464_v62 = vpop.permute.xlu2 %463 }
 0x1e9   :  { %v504_v2 = vsel %vm491_vm2, %v384_v55, %v464_v62  ;;  %v12346_v55 = vld [vmem:[#allocation12] ss:$0 sm:$0xff] }
 0x1ee   :  { %585 = vmatmul.f32.gmra.mxu2 %v500_v46  ;;  %650 = vmatmul.f32.gmra.mxu3 %v501_v51 }
 0x1f0   :  { %v460_v52 = vpop.permute.xlu0 %459 }
 0x1f1   :  { %v502_v56 = vsel %vm491_vm2, %v382_v12, %v460_v52 }
 0x1f6   :  { %588 = vmatmul.f32.gmra.mxu2 %v501_v51  ;;  %653 = vmatmul.f32.gmra.mxu3 %v502_v56 }
 0x1f8   :  { %v462_v57 = vpop.permute.xlu1 %461 }
 0x1f9   :  { %v503_v61 = vsel %vm491_vm2, %v383_v32, %v462_v57  ;;  %v470_v32 = vpop.permute.xlu2 %469 }
 0x1fa   :  { %v507_v49 = vsel %vm491_vm2, %v387_v33, %v470_v32 }
 0x1fe   :  { %591 = vmatmul.f32.gmra.mxu2 %v502_v56  ;;  %656 = vmatmul.f32.gmra.mxu3 %v503_v61 }
 0x206   :  { %594 = vmatmul.f32.gmra.mxu2 %v503_v61  ;;  %659 = vmatmul.f32.gmra.mxu3 %v504_v2 }
 0x208   :  { %v466_v3 = vpop.permute.xlu0 %465 }
 0x209   :  { %v505_v9 = vsel %vm491_vm2, %v385_v8, %v466_v3 }
 0x20e   :  { %597 = vmatmul.f32.gmra.mxu2 %v504_v2  ;;  %662 = vmatmul.f32.gmra.mxu3 %v505_v9 }
 0x210   :  { %v468_v12 = vpop.permute.xlu1 %467 }
 0x211   :  { %v506_v28 = vsel %vm491_vm2, %v386_v19, %v468_v12  ;;  %v489_v54 = vpop.permute.xlu0 %488 }
 0x216   :  { %600 = vmatmul.f32.gmra.mxu2 %v505_v9  ;;  %665 = vmatmul.f32.gmra.mxu3 %v506_v28 }
 0x21e   :  { %603 = vmatmul.f32.gmra.mxu2 %v506_v28  ;;  %668 = vmatmul.f32.gmra.mxu3 %v507_v49 }
 0x226   :  { %606 = vmatmul.f32.gmra.mxu2 %v507_v49  ;;  %7715 = vmatmul.msk.f32.gmra.mxu3 %vm7714_vm3, %v489_v54 }
 0x231   :  { %v562_v58 = vpop.f32.mrf.mxu2  ;;  %v627_v59 = vpop.f32.mrf.mxu3 }
 0x232   :  { %v563_v60 = vadd.f32 %v12346_v55, %v562_v58 }
 0x234   :  { %v628_v63 = vadd.f32 %v627_v59, %v563_v60 }
 0x236   :  { %v675_v0 = vmax.f32 %v628_v63, 0.0 }
 0x238   :  { %691 = vst.msk [vmem:[#allocation4] sm:$0xff] %vm491_vm2, %v675_v0 }
 0x239   :  { %v565_v1 = vpop.f32.mrf.mxu2  ;;  %v630_v4 = vpop.f32.mrf.mxu3 }
 0x23a   :  { %v566_v5 = vadd.f32 %v12346_v55, %v565_v1 }
 0x23c   :  { %v631_v6 = vadd.f32 %v630_v4, %v566_v5 }
 0x23e   :  { %v676_v7 = vmax.f32 %v631_v6, 0.0 }
 0x23f   :  { %v784_v46 = vld [vmem:[#allocation4 + $0x5] sm:$0x1]  ;;  %v756_v51 = vld [vmem:[#allocation4 + $0x3] sm:$0x1]  ;;  %v727_v12 = vld [vmem:[#allocation4 + $0x1] sm:$0x1] }
 0x240   :  { %692 = vst.msk [vmem:[#allocation4 + $0x8] sm:$0xff] %vm491_vm2, %v676_v7  ;;  %v743_v59 = vld [vmem:[#allocation4 + $0x2] sm:$0x1] }
 0x241   :  { %v568_v8 = vpop.f32.mrf.mxu2  ;;  %v633_v10 = vpop.f32.mrf.mxu3 }
 0x242   :  { %v569_v11 = vadd.f32 %v12346_v55, %v568_v8 }
 0x244   :  { %v634_v13 = vadd.f32 %v633_v10, %v569_v11 }
 0x246   :  { %v677_v14 = vmax.f32 %v634_v13, 0.0 }
 0x248   :  { %693 = vst.msk [vmem:[#allocation4 + $0x10] sm:$0xff] %vm491_vm2, %v677_v14 }
 0x249   :  { %v571_v15 = vpop.f32.mrf.mxu2  ;;  %v636_v16 = vpop.f32.mrf.mxu3 }
 0x24a   :  { %v572_v17 = vadd.f32 %v12346_v55, %v571_v15 }
 0x24c   :  { %v637_v18 = vadd.f32 %v636_v16, %v572_v17  ;;  %v771_v16 = vld [vmem:[#allocation4 + $0x4] sm:$0x1] }
 0x24e   :  { %v678_v19 = vmax.f32 %v637_v18, 0.0 }
 0x250   :  { %694 = vst.msk [vmem:[#allocation4 + $0x18] sm:$0xff] %vm491_vm2, %v678_v19 }
 0x251   :  { %v574_v20 = vpop.f32.mrf.mxu2  ;;  %v639_v25 = vpop.f32.mrf.mxu3 }
 0x252   :  { %v575_v30 = vadd.f32 %v12346_v55, %v574_v20 }
 0x254   :  { %v640_v31 = vadd.f32 %v639_v25, %v575_v30  ;;  %v707_v25 = vld [vmem:[#allocation4] sm:$0x1] }
 0x256   :  { %v679_v33 = vmax.f32 %v640_v31, 0.0  ;;  %v868_v31 = vld [vmem:[#allocation4 + $0xc] sm:$0x1] }
 0x258   :  { %695 = vst.msk [vmem:[#allocation4 + $0x20] sm:$0xff] %vm491_vm2, %v679_v33 }
 0x259   :  { %v577_v34 = vpop.f32.mrf.mxu2  ;;  %v642_v35 = vpop.f32.mrf.mxu3 }
 0x25a   :  { %v578_v38 = vadd.f32 %v12346_v55, %v577_v34  ;;  %v840_v34 = vld [vmem:[#allocation4 + $0xa] sm:$0x1] }
 0x25c   :  { %v643_v39 = vadd.f32 %v642_v35, %v578_v38 }
 0x25e   :  { %v680_v41 = vmax.f32 %v643_v39, 0.0 }
 0x260   :  { %696 = vst.msk [vmem:[#allocation4 + $0x28] sm:$0xff] %vm491_vm2, %v680_v41 }
 0x261   :  { %v580_v21 = vpop.f32.mrf.mxu2  ;;  %v645_v43 = vpop.f32.mrf.mxu3 }
 0x262   :  { %v581_v44 = vadd.f32 %v12346_v55, %v580_v21 }
 0x264   :  { %v646_v45 = vadd.f32 %v645_v43, %v581_v44 }
 0x266   :  { %v681_v48 = vmax.f32 %v646_v45, 0.0 }
 0x268   :  { %697 = vst.msk [vmem:[#allocation4 + $0x30] sm:$0xff] %vm491_vm2, %v681_v48 }
 0x269   :  { %v583_v50 = vpop.f32.mrf.mxu2  ;;  %v648_v53 = vpop.f32.mrf.mxu3 }
 0x26a   :  { %v812_v53 = vld [vmem:[#allocation4 + $0x8] sm:$0x1] }
 0x271   :  { %v586_v23 = vpop.f32.mrf.mxu2  ;;  %v651_v26 = vpop.f32.mrf.mxu3 }
 0x272   :  { %v587_v22 = vadd.f32 %v12346_v55, %v586_v23 }
 0x274   :  { %v652_v24 = vadd.f32 %v651_v26, %v587_v22 }
 0x276   :  { %v683_v27 = vmax.f32 %v652_v24, 0.0 }
 0x278   :  { %699 = vst.msk [vmem:[#allocation4 + $0x40] sm:$0xff] %vm491_vm2, %v683_v27 }
 0x279   :  { %v589_v29 = vpop.f32.mrf.mxu2  ;;  %v654_v36 = vpop.f32.mrf.mxu3 }
 0x27a   :  { %v590_v37 = vadd.f32 %v12346_v55, %v589_v29 }
 0x27c   :  { %v655_v40 = vadd.f32 %v654_v36, %v590_v37 }
 0x27e   :  { %v684_v42 = vmax.f32 %v655_v40, 0.0  ;;  %v896_v40 = vld [vmem:[#allocation4 + $0xe] sm:$0x1] }
 0x27f   :  { %v785_v47 = vld [vmem:[#allocation4 + $0x45] sm:$0x1]  ;;  %v757_v52 = vld [vmem:[#allocation4 + $0x43] sm:$0x1]  ;;  %v728_v56 = vld [vmem:[#allocation4 + $0x41] sm:$0x1] }
 0x280   :  { %700 = vst.msk [vmem:[#allocation4 + $0x48] sm:$0xff] %vm491_vm2, %v684_v42  ;;  %v790_v57 = vrot.slane %v785_v47, 7  ;;  %v762_v61 = vrot.slane %v757_v52, 7  ;;  %v733_v62 = vrot.slane %v728_v56, 7  ;;  %v744_v2 = vld [vmem:[#allocation4 + $0x42] sm:$0x1] }
 0x281   :  { %v592_v3 = vpop.f32.mrf.mxu2  ;;  %v657_v9 = vpop.f32.mrf.mxu3  ;;  %v749_v28 = vrot.slane %v744_v2, 7  ;;  %v772_v4 = vld [vmem:[#allocation4 + $0x44] sm:$0x1]  ;;  %v708_v5 = vld [vmem:[#allocation4 + $0x40] sm:$0x1] }
 0x282   :  { %v593_v32 = vadd.f32 %v12346_v55, %v592_v3  ;;  %v791_v49 = vsel %vm716_vm4, %v790_v57, %v784_v46  ;;  %v763_v54 = vsel %vm716_vm4, %v762_v61, %v756_v51  ;;  %v734_v58 = vsel %vm716_vm4, %v733_v62, %v727_v12  ;;  %v800_v30 = vld [vmem:[#allocation4 + $0x46] sm:$0x1] }
 0x283   :  { %v792_v60 = vsel %vm718_vm5, %v790_v57, %v791_v49  ;;  %v764_v63 = vsel %vm718_vm5, %v762_v61, %v763_v54  ;;  %v735_v0 = vsel %vm718_vm5, %v733_v62, %v734_v58  ;;  %v750_v1 = vsel %vm716_vm4, %v749_v28, %v743_v59  ;;  %v827_v49 = vld [vmem:[#allocation4 + $0x9] sm:$0x1] }
 0x284   :  { %v658_v6 = vadd.f32 %v657_v9, %v593_v32  ;;  %v793_v7 = vsel %vm720_vm6, %v790_v57, %v792_v60  ;;  %v765_v8 = vsel %vm720_vm6, %v762_v61, %v764_v63  ;;  %v736_v10 = vsel %vm720_vm6, %v733_v62, %v735_v0  ;;  %v952_v60 = vld [vmem:[#allocation4 + $0x13] sm:$0x1]  ;;  %v924_v0 = vld [vmem:[#allocation4 + $0x11] sm:$0x1] }
 0x285   :  { %v794_v11 = vsel %vm722_vm7, %v790_v57, %v793_v7  ;;  %v766_v13 = vsel %vm722_vm7, %v762_v61, %v765_v8  ;;  %v737_v14 = vsel %vm722_vm7, %v733_v62, %v736_v10  ;;  %v751_v15 = vsel %vm718_vm5, %v749_v28, %v750_v1 }
 0x286   :  { %v685_v17 = vmax.f32 %v658_v6, 0.0  ;;  %795 = vrot.lane.b32.xlu0 %v794_v11, %s11877_s0  ;;  %767 = vrot.lane.b32.xlu2 %v766_v13, %s11877_s0  ;;  %v752_v18 = vsel %vm720_vm6, %v749_v28, %v751_v15  ;;  %v777_v19 = vrot.slane %v772_v4, 7  ;;  %v12384_v20 = vrot.slane %v708_v5, 7 }
 0x287   :  { %738 = vrot.lane.b32.xlu1 %v737_v14, %s11877_s0  ;;  %v869_v33 = vld [vmem:[#allocation4 + $0x4c] sm:$0x1]  ;;  %v841_v35 = vld [vmem:[#allocation4 + $0x4a] sm:$0x1]  ;;  %v813_v38 = vld [vmem:[#allocation4 + $0x48] sm:$0x1]  ;;  %v753_v39 = vsel %vm722_vm7, %v749_v28, %v752_v18 }
 0x288   :  { %701 = vst.msk [vmem:[#allocation4 + $0x50] sm:$0xff] %vm491_vm2, %v685_v17  ;;  %v874_v41 = vrot.slane %v869_v33, 7  ;;  %v846_v21 = vrot.slane %v841_v35, 7  ;;  %v818_v43 = vrot.slane %v813_v38, 7  ;;  %v897_v44 = vld [vmem:[#allocation4 + $0x4e] sm:$0x1]  ;;  %v778_v45 = vsel %vm716_vm4, %v777_v19, %v771_v16 }
 0x289   :  { %v595_v48 = vpop.f32.mrf.mxu2  ;;  %v660_v50 = vpop.f32.mrf.mxu3  ;;  %v902_v23 = vrot.slane %v897_v44, 7  ;;  %755 = vst.msk [vmem:[#allocation5 + $0x2] sm:$0x3] %vm725_vm8, %v753_v39  ;;  %v779_v26 = vsel %vm718_vm5, %v777_v19, %v778_v45  ;;  %v717_v22 = vsel %vm716_vm4, %v12384_v20, %v707_v25  ;;  %v12394_v24 = vrot.slane %v800_v30, 7  ;;  %v828_v52 = vld [vmem:[#allocation4 + $0x49] sm:$0x1] }
 0x28a   :  { %v596_v27 = vadd.f32 %v12346_v55, %v595_v48  ;;  %v875_v29 = vsel %vm716_vm4, %v874_v41, %v868_v31  ;;  %v847_v36 = vsel %vm716_vm4, %v846_v21, %v840_v34  ;;  %v819_v37 = vsel %vm716_vm4, %v818_v43, %v812_v53  ;;  %v856_v59 = vld [vmem:[#allocation4 + $0x4b] sm:$0x1]  ;;  %v980_v17 = vld [vmem:[#allocation4 + $0x15] sm:$0x1] }
 0x28b   :  { %v876_v42 = vsel %vm718_vm5, %v874_v41, %v875_v29  ;;  %v848_v46 = vsel %vm718_vm5, %v846_v21, %v847_v36  ;;  %v820_v47 = vsel %vm718_vm5, %v818_v43, %v819_v37  ;;  %v903_v51 = vsel %vm716_vm4, %v902_v23, %v896_v40  ;;  %v995_v40 = vld [vmem:[#allocation4 + $0x16] sm:$0x1] }
 0x28c   :  { %v661_v56 = vadd.f32 %v660_v50, %v596_v27  ;;  %v877_v57 = vsel %vm720_vm6, %v874_v41, %v876_v42  ;;  %v849_v61 = vsel %vm720_vm6, %v846_v21, %v848_v46  ;;  %v821_v62 = vsel %vm720_vm6, %v818_v43, %v820_v47  ;;  %v799_v50 = vld [vmem:[#allocation4 + $0x6] sm:$0x1]  ;;  %v855_v27 = vld [vmem:[#allocation4 + $0xb] sm:$0x1]  ;;  %v1036_v47 = vld [vmem:[#allocation4 + $0x1a] sm:$0x1] }
 0x28d   :  { %v878_v2 = vsel %vm722_vm7, %v874_v41, %v877_v57  ;;  %v850_v3 = vsel %vm722_vm7, %v846_v21, %v849_v61  ;;  %v822_v9 = vsel %vm722_vm7, %v818_v43, %v821_v62  ;;  %v904_v12 = vsel %vm718_vm5, %v902_v23, %v903_v51 }
 0x28e   :  { %v686_v28 = vmax.f32 %v661_v56, 0.0  ;;  %879 = vrot.lane.b32.xlu0 %v878_v2, %s11877_s0  ;;  %851 = vrot.lane.b32.xlu2 %v850_v3, %s11877_s0  ;;  %v905_v32 = vsel %vm720_vm6, %v902_v23, %v904_v12  ;;  %v833_v54 = vrot.slane %v828_v52, 7  ;;  %v780_v58 = vsel %vm720_vm6, %v777_v19, %v779_v26  ;;  %v1008_v52 = vld [vmem:[#allocation4 + $0x18] sm:$0x1] }
 0x28f   :  { %823 = vrot.lane.b32.xlu1 %v822_v9, %s11877_s0  ;;  %v953_v63 = vld [vmem:[#allocation4 + $0x53] sm:$0x1]  ;;  %v925_v1 = vld [vmem:[#allocation4 + $0x51] sm:$0x1]  ;;  %v981_v4 = vld [vmem:[#allocation4 + $0x55] sm:$0x1]  ;;  %v781_v5 = vsel %vm722_vm7, %v777_v19, %v780_v58  ;;  %v719_v6 = vsel %vm718_vm5, %v12384_v20, %v717_v22  ;;  %v906_v16 = vsel %vm722_vm7, %v902_v23, %v905_v32  ;;  %v806_v29 = vsel %vm716_vm4, %v12394_v24, %v799_v50 }
 0x290   :  { %702 = vst.msk [vmem:[#allocation4 + $0x58] sm:$0xff] %vm491_vm2, %v686_v28  ;;  %v958_v7 = vrot.slane %v953_v63, 7  ;;  %v930_v8 = vrot.slane %v925_v1, 7  ;;  %v12420_v10 = vrot.slane %v981_v4, 7  ;;  %v834_v11 = vsel %vm716_vm4, %v833_v54, %v827_v49  ;;  %v912_v13 = vld [vmem:[#allocation4 + $0x50] sm:$0x1] }
 0x291   :  { %v598_v14 = vpop.f32.mrf.mxu2  ;;  %v663_v15 = vpop.f32.mrf.mxu3  ;;  %v835_v18 = vsel %vm718_vm5, %v833_v54, %v834_v11  ;;  %v917_v19 = vrot.slane %v912_v13, 7  ;;  %783 = vst.msk [vmem:[#allocation5 + $0x4] sm:$0x3] %vm725_vm8, %v781_v5  ;;  %v721_v25 = vsel %vm720_vm6, %v12384_v20, %v719_v6  ;;  %v996_v41 = vld [vmem:[#allocation4 + $0x56] sm:$0x1]  ;;  %v12436_v21 = vrot.slane %v856_v59, 7 }
 0x292   :  { %v599_v30 = vadd.f32 %v12346_v55, %v598_v14  ;;  %v959_v31 = vsel %vm716_vm4, %v958_v7, %v952_v60  ;;  %v931_v33 = vsel %vm716_vm4, %v930_v8, %v924_v0  ;;  %v987_v34 = vsel %vm716_vm4, %v12420_v10, %v980_v17  ;;  %v911_v22 = vld [vmem:[#allocation4 + $0x10] sm:$0x1]  ;;  %v1064_v6 = vld [vmem:[#allocation4 + $0x1c] sm:$0x1] }
 0x293   :  { %v960_v35 = vsel %vm718_vm5, %v958_v7, %v959_v31  ;;  %v932_v38 = vsel %vm718_vm5, %v930_v8, %v931_v33  ;;  %v836_v39 = vsel %vm720_vm6, %v833_v54, %v835_v18  ;;  %v988_v48 = vsel %vm718_vm5, %v12420_v10, %v987_v34 }
 0x294   :  { %v664_v43 = vadd.f32 %v663_v15, %v599_v30  ;;  %v961_v44 = vsel %vm720_vm6, %v958_v7, %v960_v35  ;;  %v933_v45 = vsel %vm720_vm6, %v930_v8, %v932_v38  ;;  %v837_v26 = vsel %vm722_vm7, %v833_v54, %v836_v39  ;;  %v1092_v54 = vld [vmem:[#allocation4 + $0x1e] sm:$0x1]  ;;  %v940_v38 = vld [vmem:[#allocation4 + $0x52] sm:$0x1]  ;;  %v1120_v39 = vld [vmem:[#allocation4 + $0x21] sm:$0x1] }
 0x295   :  { %v962_v53 = vsel %vm722_vm7, %v958_v7, %v961_v44  ;;  %v934_v23 = vsel %vm722_vm7, %v930_v8, %v933_v45  ;;  %839 = vst.msk [vmem:[#allocation5 + $0x8] sm:$0x3] %vm725_vm8, %v837_v26  ;;  %v918_v37 = vsel %vm716_vm4, %v917_v19, %v911_v22  ;;  %v12451_v42 = vrot.slane %v996_v41, 7  ;;  %v1176_v26 = vld [vmem:[#allocation4 + $0x25] sm:$0x1] }
 0x296   :  { %v687_v36 = vmax.f32 %v664_v43, 0.0  ;;  %963 = vrot.lane.b32.xlu0 %v962_v53, %s11877_s0  ;;  %935 = vrot.lane.b32.xlu2 %v934_v23, %s11877_s0  ;;  %v723_v46 = vsel %vm722_vm7, %v12384_v20, %v721_v25  ;;  %v989_v57 = vsel %vm720_vm6, %v12420_v10, %v988_v48  ;;  %v919_v62 = vsel %vm718_vm5, %v917_v19, %v918_v37  ;;  %v1148_v37 = vld [vmem:[#allocation4 + $0x23] sm:$0x1] }
 0x297   :  { %907 = vrot.lane.b32.xlu1 %v906_v16, %s11877_s0  ;;  %v1037_v51 = vld [vmem:[#allocation4 + $0x5a] sm:$0x1]  ;;  %v1009_v56 = vld [vmem:[#allocation4 + $0x58] sm:$0x1]  ;;  %v1093_v61 = vld [vmem:[#allocation4 + $0x5e] sm:$0x1]  ;;  %v862_v2 = vsel %vm716_vm4, %v12436_v21, %v855_v27  ;;  %v920_v28 = vsel %vm720_vm6, %v917_v19, %v919_v62  ;;  %v1002_v60 = vsel %vm716_vm4, %v12451_v42, %v995_v40  ;;  %v807_v63 = vsel %vm718_vm5, %v12394_v24, %v806_v29 }
 0x298   :  { %703 = vst.msk [vmem:[#allocation4 + $0x60] sm:$0xff] %vm491_vm2, %v687_v36  ;;  %v1042_v3 = vrot.slane %v1037_v51, 7  ;;  %v1014_v9 = vrot.slane %v1009_v56, 7  ;;  %v12462_v20 = vrot.slane %v1093_v61, 7  ;;  %v1065_v12 = vld [vmem:[#allocation4 + $0x5c] sm:$0x1]  ;;  %v921_v59 = vsel %vm722_vm7, %v917_v19, %v920_v28 }
 0x299   :  { %v601_v32 = vpop.f32.mrf.mxu2  ;;  %v666_v49 = vpop.f32.mrf.mxu3  ;;  %v12465_v58 = vrot.slane %v1065_v12, 7  ;;  %726 = vst.msk [vmem:[#allocation5] sm:$0x3] %vm725_vm8, %v723_v46  ;;  %v863_v13 = vsel %vm718_vm5, %v12436_v21, %v862_v2  ;;  %v990_v31 = vsel %vm722_vm7, %v12420_v10, %v989_v57  ;;  %v1003_v33 = vsel %vm718_vm5, %v12451_v42, %v1002_v60  ;;  %v1080_v35 = vld [vmem:[#allocation4 + $0x5d] sm:$0x1] }
 0x29a   :  { %v602_v0 = vadd.f32 %v12346_v55, %v601_v32  ;;  %v1043_v1 = vsel %vm716_vm4, %v1042_v3, %v1036_v47  ;;  %v1015_v4 = vsel %vm716_vm4, %v1014_v9, %v1008_v52  ;;  %v1099_v5 = vsel %vm716_vm4, %v12462_v20, %v1092_v54  ;;  %923 = vst.msk [vmem:[#allocation5 + $0xe] sm:$0x3] %vm725_vm8, %v921_v59  ;;  %v939_v54 = vld [vmem:[#allocation4 + $0x12] sm:$0x1] }
 0x29b   :  { %v1044_v7 = vsel %vm718_vm5, %v1042_v3, %v1043_v1  ;;  %v1016_v8 = vsel %vm718_vm5, %v1014_v9, %v1015_v4  ;;  %v1071_v11 = vsel %vm716_vm4, %v12465_v58, %v1064_v6  ;;  %v1100_v17 = vsel %vm718_vm5, %v12462_v20, %v1099_v5  ;;  %v884_v4 = vld [vmem:[#allocation4 + $0x4d] sm:$0x1] }
 0x29c   :  { %v667_v14 = vadd.f32 %v666_v49, %v602_v0  ;;  %v1045_v15 = vsel %vm720_vm6, %v1042_v3, %v1044_v7  ;;  %v1017_v16 = vsel %vm720_vm6, %v1014_v9, %v1016_v8  ;;  %v1072_v25 = vsel %vm718_vm5, %v12465_v58, %v1071_v11  ;;  %v1163_v0 = vld [vmem:[#allocation4 + $0x24] sm:$0x1]  ;;  %v1288_v7 = vld [vmem:[#allocation4 + $0x2e] sm:$0x1] }
 0x29d   :  { %v1046_v18 = vsel %vm722_vm7, %v1042_v3, %v1045_v15  ;;  %v1018_v19 = vsel %vm722_vm7, %v1014_v9, %v1017_v16  ;;  %v864_v34 = vsel %vm720_vm6, %v12436_v21, %v863_v13  ;;  %v1101_v43 = vsel %vm720_vm6, %v12462_v20, %v1100_v17 }
 0x29e   :  { %v688_v30 = vmax.f32 %v667_v14, 0.0  ;;  %1047 = vrot.lane.b32.xlu0 %v1046_v18, %s11877_s0  ;;  %1019 = vrot.lane.b32.xlu2 %v1018_v19, %s11877_s0  ;;  %v1004_v10 = vsel %vm720_vm6, %v12451_v42, %v1003_v33  ;;  %v865_v48 = vsel %vm722_vm7, %v12436_v21, %v864_v34  ;;  %v808_v50 = vsel %vm720_vm6, %v12394_v24, %v807_v63 }
 0x29f   :  { %991 = vrot.lane.b32.xlu1 %v990_v31, %s11877_s0  ;;  %v1121_v41 = vld [vmem:[#allocation4 + $0x61] sm:$0x1]  ;;  %v1177_v44 = vld [vmem:[#allocation4 + $0x65] sm:$0x1]  ;;  %v1149_v45 = vld [vmem:[#allocation4 + $0x63] sm:$0x1]  ;;  %v1073_v23 = vsel %vm720_vm6, %v12465_v58, %v1072_v25  ;;  %v1005_v21 = vsel %vm722_vm7, %v12451_v42, %v1004_v10  ;;  %v809_v46 = vsel %vm722_vm7, %v12394_v24, %v808_v50  ;;  %v1102_v28 = vsel %vm722_vm7, %v12462_v20, %v1101_v43 }
 0x2a0   :  { %704 = vst.msk [vmem:[#allocation4 + $0x68] sm:$0xff] %vm491_vm2, %v688_v30  ;;  %v1126_v53 = vrot.slane %v1121_v41, 7  ;;  %v12513_v22 = vrot.slane %v1177_v44, 7  ;;  %v12515_v27 = vrot.slane %v1149_v45, 7  ;;  %v1085_v40 = vrot.slane %v1080_v35, 7 }
 0x2a1   :  { %v604_v29 = vpop.f32.mrf.mxu2  ;;  %v669_v36 = vpop.f32.mrf.mxu3  ;;  %867 = vst.msk [vmem:[#allocation5 + $0xa] sm:$0x3] %vm725_vm8, %v865_v48  ;;  %v945_v47 = vrot.slane %v940_v38, 7  ;;  %v1079_v42 = vld [vmem:[#allocation4 + $0x1d] sm:$0x1]  ;;  %v1074_v32 = vsel %vm722_vm7, %v12465_v58, %v1073_v23  ;;  %v889_v38 = vrot.slane %v884_v4, 7 }
 0x2a2   :  { %v605_v51 = vadd.f32 %v12346_v55, %v604_v29  ;;  %v1127_v52 = vsel %vm716_vm4, %v1126_v53, %v1120_v39  ;;  %v1183_v56 = vsel %vm716_vm4, %v12513_v22, %v1176_v26  ;;  %v1155_v57 = vsel %vm716_vm4, %v12515_v27, %v1148_v37  ;;  %1007 = vst.msk [vmem:[#allocation5 + $0x14] sm:$0x3] %vm725_vm8, %v1005_v21  ;;  %v1164_v24 = vld [vmem:[#allocation4 + $0x64] sm:$0x1]  ;;  %v1204_v20 = vld [vmem:[#allocation4 + $0x28] sm:$0x1] }
 0x2a3   :  { %v1128_v61 = vsel %vm718_vm5, %v1126_v53, %v1127_v52  ;;  %v1086_v62 = vsel %vm716_vm4, %v1085_v40, %v1079_v42  ;;  %811 = vst.msk [vmem:[#allocation5 + $0x6] sm:$0x3] %vm725_vm8, %v809_v46  ;;  %v1184_v3 = vsel %vm718_vm5, %v12513_v22, %v1183_v56  ;;  %v1156_v9 = vsel %vm718_vm5, %v12515_v27, %v1155_v57  ;;  %v1260_v31 = vld [vmem:[#allocation4 + $0x2c] sm:$0x1]  ;;  %v1232_v44 = vld [vmem:[#allocation4 + $0x2a] sm:$0x1] }
 0x2a4   :  { %v670_v2 = vadd.f32 %v669_v36, %v605_v51  ;;  %v1129_v55 = vsel %vm720_vm6, %v1126_v53, %v1128_v61  ;;  %v1087_v49 = vsel %vm718_vm5, %v1085_v40, %v1086_v62  ;;  %v946_v63 = vsel %vm716_vm4, %v945_v47, %v939_v54  ;;  %v1024_v52 = vld [vmem:[#allocation4 + $0x59] sm:$0x1]  ;;  %v1387_v56 = vld [vmem:[#allocation4 + $0x36] sm:$0x1]  ;;  %v1372_v61 = vld [vmem:[#allocation4 + $0x35] sm:$0x1] }
 0x2a5   :  { %v1130_v12 = vsel %vm722_vm7, %v1126_v53, %v1129_v55  ;;  %v1088_v60 = vsel %vm720_vm6, %v1085_v40, %v1087_v49  ;;  %v12547_v1 = vrot.slane %v1164_v24, 7  ;;  %v1185_v5 = vsel %vm720_vm6, %v12513_v22, %v1184_v3  ;;  %v1344_v24 = vld [vmem:[#allocation4 + $0x33] sm:$0x1] }
 0x2a6   :  { %v689_v59 = vmax.f32 %v670_v2, 0.0  ;;  %1131 = vrot.lane.b32.xlu0 %v1130_v12, %s11877_s0  ;;  %1103 = vrot.lane.b32.xlu2 %v1102_v28, %s11877_s0  ;;  %v1157_v6 = vsel %vm720_vm6, %v12515_v27, %v1156_v9  ;;  %v1089_v13 = vsel %vm722_vm7, %v1085_v40, %v1088_v60  ;;  %v947_v14 = vsel %vm718_vm5, %v945_v47, %v946_v63  ;;  %v883_v40 = vld [vmem:[#allocation4 + $0xd] sm:$0x1] }
 0x2a7   :  { %1075 = vrot.lane.b32.xlu1 %v1074_v32, %s11877_s0  ;;  %v1205_v58 = vld [vmem:[#allocation4 + $0x68] sm:$0x1]  ;;  %v1289_v8 = vld [vmem:[#allocation4 + $0x6e] sm:$0x1]  ;;  %v1261_v11 = vld [vmem:[#allocation4 + $0x6c] sm:$0x1]  ;;  %v948_v19 = vsel %vm720_vm6, %v945_v47, %v947_v14  ;;  %v1170_v35 = vsel %vm716_vm4, %v12547_v1, %v1163_v0  ;;  %v1186_v36 = vsel %vm722_vm7, %v12513_v22, %v1185_v5  ;;  %v1158_v37 = vsel %vm722_vm7, %v12515_v27, %v1157_v6 }
 0x2a8   :  { %705 = vst.msk [vmem:[#allocation4 + $0x70] sm:$0xff] %vm491_vm2, %v689_v59  ;;  %v1210_v15 = vrot.slane %v1205_v58, 7  ;;  %v1294_v16 = vrot.slane %v1289_v8, 7  ;;  %v1266_v17 = vrot.slane %v1261_v11, 7  ;;  %v1233_v18 = vld [vmem:[#allocation4 + $0x6a] sm:$0x1]  ;;  %v949_v34 = vsel %vm722_vm7, %v945_v47, %v948_v19 }
 0x2a9   :  { %v607_v25 = vpop.f32.mrf.mxu2  ;;  %v672_v30 = vpop.f32.mrf.mxu3  ;;  %v12558_v33 = vrot.slane %v1233_v18, 7  ;;  %1091 = vst.msk [vmem:[#allocation5 + $0x1a] sm:$0x3] %vm725_vm8, %v1089_v13  ;;  %v1171_v47 = vsel %vm718_vm5, %v12547_v1, %v1170_v35  ;;  %v890_v51 = vsel %vm716_vm4, %v889_v38, %v883_v40  ;;  %v1248_v22 = vld [vmem:[#allocation4 + $0x6b] sm:$0x1]  ;;  %v1029_v60 = vrot.slane %v1024_v52, 7 }
 0x2aa   :  { %v1211_v39 = vsel %vm716_vm4, %v1210_v15, %v1204_v20  ;;  %v1295_v41 = vsel %vm716_vm4, %v1294_v16, %v1288_v7  ;;  %v1267_v43 = vsel %vm716_vm4, %v1266_v17, %v1260_v31  ;;  %951 = vst.msk [vmem:[#allocation5 + $0x10] sm:$0x3] %vm725_vm8, %v949_v34  ;;  %v1172_v55 = vsel %vm720_vm6, %v12547_v1, %v1171_v47  ;;  %v1316_v58 = vld [vmem:[#allocation4 + $0x31] sm:$0x1]  ;;  %v1108_v18 = vld [vmem:[#allocation4 + $0x60] sm:$0x1] }
 0x2ab   :  { %v1212_v45 = vsel %vm718_vm5, %v1210_v15, %v1211_v39  ;;  %v1296_v10 = vsel %vm718_vm5, %v1294_v16, %v1295_v41  ;;  %v1268_v48 = vsel %vm718_vm5, %v1266_v17, %v1267_v43  ;;  %v1239_v50 = vsel %vm716_vm4, %v12558_v33, %v1232_v44  ;;  %v1247_v34 = vld [vmem:[#allocation4 + $0x2b] sm:$0x1]  ;;  %v1052_v35 = vld [vmem:[#allocation4 + $0x5b] sm:$0x1] }
 0x2ac   :  { %v1213_v53 = vsel %vm720_vm6, %v1210_v15, %v1212_v45  ;;  %v1297_v23 = vsel %vm720_vm6, %v1294_v16, %v1296_v10  ;;  %v1269_v26 = vsel %vm720_vm6, %v1266_v17, %v1268_v48  ;;  %v1240_v21 = vsel %vm718_vm5, %v12558_v33, %v1239_v50  ;;  %v1051_v47 = vld [vmem:[#allocation4 + $0x1b] sm:$0x1] }
 0x2ad   :  { %v1214_v29 = vsel %vm722_vm7, %v1210_v15, %v1213_v53  ;;  %v1298_v46 = vsel %vm722_vm7, %v1294_v16, %v1297_v23  ;;  %v1270_v27 = vsel %vm722_vm7, %v1266_v17, %v1269_v26  ;;  %v1241_v42 = vsel %vm720_vm6, %v12558_v33, %v1240_v21  ;;  %v1023_v16 = vld [vmem:[#allocation4 + $0x19] sm:$0x1]  ;;  %v968_v17 = vld [vmem:[#allocation4 + $0x54] sm:$0x1]  ;;  %v1107_v23 = vld [vmem:[#allocation4 + $0x20] sm:$0x1] }
 0x2ae   :  { %1215 = vrot.lane.b32.xlu0 %v1214_v29, %s11877_s0  ;;  %1187 = vrot.lane.b32.xlu2 %v1186_v36, %s11877_s0  ;;  %v891_v3 = vsel %vm718_vm5, %v889_v38, %v890_v51  ;;  %v1173_v49 = vsel %vm722_vm7, %v12547_v1, %v1172_v55  ;;  %v1253_v63 = vrot.slane %v1248_v22, 7  ;;  %v1242_v25 = vsel %vm722_vm7, %v12558_v33, %v1241_v42  ;;  %v967_v53 = vld [vmem:[#allocation4 + $0x14] sm:$0x1]  ;;  %v1220_v55 = vld [vmem:[#allocation4 + $0x69] sm:$0x1] }
 0x2af   :  { %v1388_v57 = vld [vmem:[#allocation4 + $0x76] sm:$0x1]  ;;  %1159 = vrot.lane.b32.xlu1 %v1158_v37, %s11877_s0  ;;  %v1373_v62 = vld [vmem:[#allocation4 + $0x75] sm:$0x1]  ;;  %v1345_v2 = vld [vmem:[#allocation4 + $0x73] sm:$0x1]  ;;  %v892_v59 = vsel %vm720_vm6, %v889_v38, %v891_v3  ;;  %v1030_v39 = vsel %vm716_vm4, %v1029_v60, %v1023_v16 }
 0x2b0   :  { %v1393_v9 = vrot.slane %v1388_v57, 7  ;;  %v1378_v12 = vrot.slane %v1373_v62, 7  ;;  %v1350_v28 = vrot.slane %v1345_v2, 7  ;;  %v1317_v32 = vld [vmem:[#allocation4 + $0x71] sm:$0x1]  ;;  %v893_v5 = vsel %vm722_vm7, %v889_v38, %v892_v59 }
 0x2b1   :  { %v12598_v54 = vrot.slane %v1317_v32, 7  ;;  %1175 = vst.msk [vmem:[#allocation5 + $0x20] sm:$0x3] %vm725_vm8, %v1173_v49  ;;  %v1254_v33 = vsel %vm716_vm4, %v1253_v63, %v1247_v34  ;;  %v1332_v41 = vld [vmem:[#allocation4 + $0x72] sm:$0x1]  ;;  %v1031_v43 = vsel %vm718_vm5, %v1029_v60, %v1030_v39  ;;  %v973_v45 = vrot.slane %v968_v17, 7 }
 0x2b2   :  { %v1394_v0 = vsel %vm716_vm4, %v1393_v9, %v1387_v56  ;;  %v1379_v4 = vsel %vm716_vm4, %v1378_v12, %v1372_v61  ;;  %v1351_v20 = vsel %vm716_vm4, %v1350_v28, %v1344_v24  ;;  %895 = vst.msk [vmem:[#allocation5 + $0xc] sm:$0x3] %vm725_vm8, %v893_v5  ;;  %v1255_v44 = vsel %vm718_vm5, %v1253_v63, %v1254_v33  ;;  %v1192_v57 = vld [vmem:[#allocation4 + $0x66] sm:$0x1]  ;;  %v1276_v2 = vld [vmem:[#allocation4 + $0x6d] sm:$0x1] }
 0x2b3   :  { %v1395_v1 = vsel %vm718_vm5, %v1393_v9, %v1394_v0  ;;  %v1380_v6 = vsel %vm718_vm5, %v1378_v12, %v1379_v4  ;;  %v1352_v7 = vsel %vm718_vm5, %v1350_v28, %v1351_v20  ;;  %v1323_v8 = vsel %vm716_vm4, %v12598_v54, %v1316_v58  ;;  %v1191_v32 = vld [vmem:[#allocation4 + $0x26] sm:$0x1]  ;;  %v1360_v49 = vld [vmem:[#allocation4 + $0x74] sm:$0x1]  ;;  %v1304_v59 = vld [vmem:[#allocation4 + $0x70] sm:$0x1] }
 0x2b4   :  { %v1396_v11 = vsel %vm720_vm6, %v1393_v9, %v1395_v1  ;;  %v1381_v13 = vsel %vm720_vm6, %v1378_v12, %v1380_v6  ;;  %v1353_v14 = vsel %vm720_vm6, %v1350_v28, %v1352_v7  ;;  %v1324_v15 = vsel %vm718_vm5, %v12598_v54, %v1323_v8  ;;  %v1135_v4 = vld [vmem:[#allocation4 + $0x22] sm:$0x1]  ;;  %v1275_v5 = vld [vmem:[#allocation4 + $0x2d] sm:$0x1]  ;;  %v1359_v39 = vld [vmem:[#allocation4 + $0x34] sm:$0x1] }
 0x2b5   :  { %v1397_v19 = vsel %vm722_vm7, %v1393_v9, %v1396_v11  ;;  %v1382_v30 = vsel %vm722_vm7, %v1378_v12, %v1381_v13  ;;  %v1354_v31 = vsel %vm722_vm7, %v1350_v28, %v1353_v14  ;;  %v1325_v38 = vsel %vm720_vm6, %v12598_v54, %v1324_v15  ;;  %v1219_v11 = vld [vmem:[#allocation4 + $0x29] sm:$0x1]  ;;  %v1303_v33 = vld [vmem:[#allocation4 + $0x30] sm:$0x1] }
 0x2b6   :  { %1399 = vst.msk [vmem:[#allocation5 + $0x30] sm:$0x3] %vm725_vm8, %v1397_v19  ;;  %1299 = vrot.lane.b32.xlu0 %v1298_v46, %s11877_s0  ;;  %1271 = vrot.lane.b32.xlu2 %v1270_v27, %s11877_s0  ;;  %v1113_v10 = vrot.slane %v1108_v18, 7  ;;  %v1032_v48 = vsel %vm720_vm6, %v1029_v60, %v1031_v43  ;;  %v1256_v50 = vsel %vm720_vm6, %v1253_v63, %v1255_v44  ;;  %v1337_v26 = vrot.slane %v1332_v41, 7  ;;  %v1331_v46 = vld [vmem:[#allocation4 + $0x32] sm:$0x1] }
 0x2b7   :  { %1243 = vrot.lane.b32.xlu1 %v1242_v25, %s11877_s0  ;;  %v1057_v29 = vrot.slane %v1052_v35, 7  ;;  %v1033_v36 = vsel %vm722_vm7, %v1029_v60, %v1032_v48  ;;  %v1257_v37 = vsel %vm722_vm7, %v1253_v63, %v1256_v50  ;;  %v974_v21 = vsel %vm716_vm4, %v973_v45, %v967_v53  ;;  %v1136_v27 = vld [vmem:[#allocation4 + $0x62] sm:$0x1] }
 0x2b8   :  { %v1114_v40 = vsel %vm716_vm4, %v1113_v10, %v1107_v23  ;;  %1035 = vst.msk [vmem:[#allocation5 + $0x16] sm:$0x3] %vm725_vm8, %v1033_v36  ;;  %v975_v51 = vsel %vm718_vm5, %v973_v45, %v974_v21  ;;  %v1338_v22 = vsel %vm716_vm4, %v1337_v26, %v1331_v46  ;;  %v1197_v0 = vrot.slane %v1192_v57, 7 }
 0x2b9   :  { %v1115_v52 = vsel %vm718_vm5, %v1113_v10, %v1114_v40  ;;  %v1058_v56 = vsel %vm716_vm4, %v1057_v29, %v1051_v47  ;;  %1259 = vst.msk [vmem:[#allocation5 + $0x26] sm:$0x3] %vm725_vm8, %v1257_v37  ;;  %v976_v42 = vsel %vm720_vm6, %v973_v45, %v975_v51  ;;  %v1339_v62 = vsel %vm718_vm5, %v1337_v26, %v1338_v22 }
 0x2ba   :  { %v1116_v61 = vsel %vm720_vm6, %v1113_v10, %v1115_v52  ;;  %v1059_v24 = vsel %vm718_vm5, %v1057_v29, %v1058_v56  ;;  %v977_v3 = vsel %vm722_vm7, %v973_v45, %v976_v42  ;;  %v1340_v12 = vsel %vm720_vm6, %v1337_v26, %v1339_v62 }
 0x2bb   :  { %v1117_v9 = vsel %vm722_vm7, %v1113_v10, %v1116_v61  ;;  %v1060_v28 = vsel %vm720_vm6, %v1057_v29, %v1059_v24  ;;  %979 = vst.msk [vmem:[#allocation5 + $0x12] sm:$0x3] %vm725_vm8, %v977_v3  ;;  %v1341_v60 = vsel %vm722_vm7, %v1337_v26, %v1340_v12  ;;  %v1141_v20 = vrot.slane %v1136_v27, 7 }
 0x2bc   :  { %v1061_v63 = vsel %vm722_vm7, %v1057_v29, %v1060_v28  ;;  %v1326_v58 = vsel %vm722_vm7, %v12598_v54, %v1325_v38  ;;  %1119 = vst.msk [vmem:[#allocation5 + $0x1c] sm:$0x3] %vm725_vm8, %v1117_v9  ;;  %v1281_v1 = vrot.slane %v1276_v2, 7  ;;  %v1225_v6 = vrot.slane %v1220_v55, 7 }
 0x2bd   :  { %1343 = vst.msk [vmem:[#allocation5 + $0x2c] sm:$0x3] %vm725_vm8, %v1341_v60  ;;  %v1198_v7 = vsel %vm716_vm4, %v1197_v0, %v1191_v32  ;;  %v1142_v8 = vsel %vm716_vm4, %v1141_v20, %v1135_v4  ;;  %v1365_v13 = vrot.slane %v1360_v49, 7  ;;  %v1309_v14 = vrot.slane %v1304_v59, 7 }
 0x2be   :  { %1383 = vrot.lane.b32.xlu0 %v1382_v30, %s11877_s0  ;;  %1355 = vrot.lane.b32.xlu2 %v1354_v31, %s11877_s0  ;;  %1063 = vst.msk [vmem:[#allocation5 + $0x18] sm:$0x3] %vm725_vm8, %v1061_v63  ;;  %v1199_v54 = vsel %vm718_vm5, %v1197_v0, %v1198_v7  ;;  %v1143_v15 = vsel %vm718_vm5, %v1141_v20, %v1142_v8 }
 0x2bf   :  { %1327 = vrot.lane.b32.xlu1 %v1326_v58, %s11877_s0  ;;  %v1282_v16 = vsel %vm716_vm4, %v1281_v1, %v1275_v5  ;;  %v1226_v17 = vsel %vm716_vm4, %v1225_v6, %v1219_v11  ;;  %v1200_v18 = vsel %vm720_vm6, %v1197_v0, %v1199_v54  ;;  %v1144_v19 = vsel %vm720_vm6, %v1141_v20, %v1143_v15 }
 0x2c0   :  { %v1283_v25 = vsel %vm718_vm5, %v1281_v1, %v1282_v16  ;;  %v1227_v30 = vsel %vm718_vm5, %v1225_v6, %v1226_v17  ;;  %v1201_v31 = vsel %vm722_vm7, %v1197_v0, %v1200_v18  ;;  %v1145_v34 = vsel %vm722_vm7, %v1141_v20, %v1144_v19 }
 0x2c1   :  { %v1284_v35 = vsel %vm720_vm6, %v1281_v1, %v1283_v25  ;;  %v1228_v38 = vsel %vm720_vm6, %v1225_v6, %v1227_v30  ;;  %1203 = vst.msk [vmem:[#allocation5 + $0x22] sm:$0x3] %vm725_vm8, %v1201_v31  ;;  %v1366_v44 = vsel %vm716_vm4, %v1365_v13, %v1359_v39  ;;  %v1310_v45 = vsel %vm716_vm4, %v1309_v14, %v1303_v33 }
 0x2c2   :  { %v1285_v41 = vsel %vm722_vm7, %v1281_v1, %v1284_v35  ;;  %v1229_v43 = vsel %vm722_vm7, %v1225_v6, %v1228_v38  ;;  %1147 = vst.msk [vmem:[#allocation5 + $0x1e] sm:$0x3] %vm725_vm8, %v1145_v34  ;;  %v1367_v10 = vsel %vm718_vm5, %v1365_v13, %v1366_v44  ;;  %v1311_v48 = vsel %vm718_vm5, %v1309_v14, %v1310_v45 }
 0x2c3   :  { %1287 = vst.msk [vmem:[#allocation5 + $0x28] sm:$0x3] %vm725_vm8, %v1285_v41  ;;  %v1368_v50 = vsel %vm720_vm6, %v1365_v13, %v1367_v10  ;;  %v1312_v53 = vsel %vm720_vm6, %v1309_v14, %v1311_v48 }
 0x2c4   :  { %1231 = vst.msk [vmem:[#allocation5 + $0x24] sm:$0x3] %vm725_vm8, %v1229_v43  ;;  %v1369_v23 = vsel %vm722_vm7, %v1365_v13, %v1368_v50  ;;  %v1313_v26 = vsel %vm722_vm7, %v1309_v14, %v1312_v53 }
 0x2c5   :  { %1371 = vst.msk [vmem:[#allocation5 + $0x2e] sm:$0x3] %vm725_vm8, %v1369_v23 }
 0x2c6   :  { %1315 = vst.msk [vmem:[#allocation5 + $0x2a] sm:$0x3] %vm725_vm8, %v1313_v26 }
 0x2e0   :  { %v768_v29 = vpop.permute.xlu2 %767 }
 0x2e1   :  { %770 = vst.msk [vmem:[#allocation5 + $0x2] sm:$0x3] %vm741_vm9, %v768_v29 }
 0x2e8   :  { %v852_v36 = vpop.permute.xlu2 %851 }
 0x2e9   :  { %854 = vst.msk [vmem:[#allocation5 + $0x8] sm:$0x3] %vm741_vm9, %v852_v36 }
 0x2f0   :  { %v936_v37 = vpop.permute.xlu2 %935 }
 0x2f1   :  { %938 = vst.msk [vmem:[#allocation5 + $0xe] sm:$0x3] %vm741_vm9, %v936_v37 }
 0x2f8   :  { %v796_v21 = vpop.permute.xlu0 %795  ;;  %v1020_v40 = vpop.permute.xlu2 %1019 }
 0x2f9   :  { %798 = vst.msk [vmem:[#allocation5 + $0x4] sm:$0x3] %vm741_vm9, %v796_v21  ;;  %v739_v46 = vpop.permute.xlu1 %738 }
 0x2fa   :  { %1022 = vst.msk [vmem:[#allocation5 + $0x14] sm:$0x3] %vm741_vm9, %v1020_v40 }
 0x2fb   :  { %742 = vst.msk [vmem:[#allocation5] sm:$0x3] %vm741_vm9, %v739_v46 }
 0x300   :  { %v880_v47 = vpop.permute.xlu0 %879  ;;  %v1104_v51 = vpop.permute.xlu2 %1103 }
 0x301   :  { %882 = vst.msk [vmem:[#allocation5 + $0xa] sm:$0x3] %vm741_vm9, %v880_v47  ;;  %v824_v52 = vpop.permute.xlu1 %823 }
 0x302   :  { %1106 = vst.msk [vmem:[#allocation5 + $0x1a] sm:$0x3] %vm741_vm9, %v1104_v51 }
 0x303   :  { %826 = vst.msk [vmem:[#allocation5 + $0x6] sm:$0x3] %vm741_vm9, %v824_v52 }
 0x308   :  { %v964_v22 = vpop.permute.xlu0 %963  ;;  %v1188_v56 = vpop.permute.xlu2 %1187 }
 0x309   :  { %966 = vst.msk [vmem:[#allocation5 + $0x10] sm:$0x3] %vm741_vm9, %v964_v22  ;;  %v908_v57 = vpop.permute.xlu1 %907 }
 0x30a   :  { %1190 = vst.msk [vmem:[#allocation5 + $0x20] sm:$0x3] %vm741_vm9, %v1188_v56 }
 0x30b   :  { %910 = vst.msk [vmem:[#allocation5 + $0xc] sm:$0x3] %vm741_vm9, %v908_v57 }
 0x310   :  { %v1048_v27 = vpop.permute.xlu0 %1047  ;;  %v1272_v42 = vpop.permute.xlu2 %1271 }
 0x311   :  { %1050 = vst.msk [vmem:[#allocation5 + $0x16] sm:$0x3] %vm741_vm9, %v1048_v27  ;;  %v992_v61 = vpop.permute.xlu1 %991 }
 0x312   :  { %1274 = vst.msk [vmem:[#allocation5 + $0x26] sm:$0x3] %vm741_vm9, %v1272_v42 }
 0x313   :  { %994 = vst.msk [vmem:[#allocation5 + $0x12] sm:$0x3] %vm741_vm9, %v992_v61 }
 0x318   :  { %v1132_v62 = vpop.permute.xlu0 %1131  ;;  %v1356_v24 = vpop.permute.xlu2 %1355 }
 0x319   :  { %1134 = vst.msk [vmem:[#allocation5 + $0x1c] sm:$0x3] %vm741_vm9, %v1132_v62  ;;  %v1076_v2 = vpop.permute.xlu1 %1075 }
 0x31a   :  { %1358 = vst.msk [vmem:[#allocation5 + $0x2c] sm:$0x3] %vm741_vm9, %v1356_v24 }
 0x31b   :  { %1078 = vst.msk [vmem:[#allocation5 + $0x18] sm:$0x3] %vm741_vm9, %v1076_v2 }
 0x320   :  { %v1216_v55 = vpop.permute.xlu0 %1215 }
 0x321   :  { %1218 = vst.msk [vmem:[#allocation5 + $0x22] sm:$0x3] %vm741_vm9, %v1216_v55  ;;  %v1160_v3 = vpop.permute.xlu1 %1159 }
 0x322   :  { %1162 = vst.msk [vmem:[#allocation5 + $0x1e] sm:$0x3] %vm741_vm9, %v1160_v3 }
 0x328   :  { %v1300_v9 = vpop.permute.xlu0 %1299 }
 0x329   :  { %1302 = vst.msk [vmem:[#allocation5 + $0x28] sm:$0x3] %vm741_vm9, %v1300_v9  ;;  %v1244_v12 = vpop.permute.xlu1 %1243 }
 0x32a   :  { %1246 = vst.msk [vmem:[#allocation5 + $0x24] sm:$0x3] %vm741_vm9, %v1244_v12 }
 0x330   :  { %v1384_v28 = vpop.permute.xlu0 %1383 }
 0x331   :  { %1386 = vst.msk [vmem:[#allocation5 + $0x2e] sm:$0x3] %vm741_vm9, %v1384_v28  ;;  %v1328_v32 = vpop.permute.xlu1 %1327 }
 0x332   :  { %1330 = vst.msk [vmem:[#allocation5 + $0x2a] sm:$0x3] %vm741_vm9, %v1328_v32 }
 0x333   :  { %11865 = dma.done.wait [#allocation3], 100352 }
 0x334   :  { %11866 = vsyncadd [#allocation3], 4294866944  ;;  %v7830_v49 = vld [vmem:[#allocation2 + $0xe0] sm:$0xf]  ;;  %v10887_v59 = vld [vmem:[#allocation2 + $0xec] sm:$0xf0] }
 0x335   :  { %v7958_v60 = vld [vmem:[#allocation2 + $0x1e0] sm:$0xf]  ;;  %v7831_v63 = vor.u32 %v10887_v59, %v7830_v49  ;;  %v10919_v0 = vld [vmem:[#allocation2 + $0x1ec] sm:$0xf0]  ;;  %s7679_s19 = sshll.u32 %s13202_s11, 4  ;;  %vm7670_vm10 = vcmask 41984   ;;  %s7680_s19 = int_to_ptr.hbm [resolvable:$true] %s7679_s19 }
 0x336   :  { %v8086_v4 = vld [vmem:[#allocation2 + $0x2e0] sm:$0xf]  ;;  %v10951_v20 = vld [vmem:[#allocation2 + $0x2ec] sm:$0xf0]  ;;  %v7959_v58 = vor.u32 %v10919_v0, %v7958_v60 }
 0x337   :  { %v8087_v5 = vor.u32 %v10951_v20, %v8086_v4  ;;  %v8214_v1 = vld [vmem:[#allocation2 + $0x3e0] sm:$0xf]  ;;  %v10983_v6 = vld [vmem:[#allocation2 + $0x3ec] sm:$0xf0]  ;;  %6218 = vmatpush.bf16.msrb.mxu0 %v7831_v63 }
 0x338   :  { %v7814_v7 = vld [vmem:[#allocation2 + $0xc0] sm:$0xf]  ;;  %v8215_v8 = vor.u32 %v10983_v6, %v8214_v1  ;;  %v10883_v11 = vld [vmem:[#allocation2 + $0xcc] sm:$0xf0]  ;;  %6231 = vmatpush.bf16.msrb.mxu1 %v7959_v58 }
 0x339   :  { %v7942_v13 = vld [vmem:[#allocation2 + $0x1c0] sm:$0xf]  ;;  %v10915_v14 = vld [vmem:[#allocation2 + $0x1cc] sm:$0xf0]  ;;  %6244 = vmatpush.bf16.msrb.mxu2 %v8087_v5  ;;  %v7815_v54 = vor.u32 %v10883_v11, %v7814_v7 }
 0x33a   :  { %v7943_v15 = vor.u32 %v10915_v14, %v7942_v13  ;;  %v8070_v16 = vld [vmem:[#allocation2 + $0x2c0] sm:$0xf]  ;;  %v10947_v17 = vld [vmem:[#allocation2 + $0x2cc] sm:$0xf0]  ;;  %6257 = vmatpush.bf16.msrb.mxu3 %v8215_v8 }
 0x33b   :  { %v8198_v18 = vld [vmem:[#allocation2 + $0x3c0] sm:$0xf]  ;;  %v8071_v19 = vor.u32 %v10947_v17, %v8070_v16  ;;  %v10979_v25 = vld [vmem:[#allocation2 + $0x3cc] sm:$0xf0]  ;;  %6219 = vmatpush.bf16.msrb.mxu0 %v7815_v54 }
 0x33c   :  { %v7798_v30 = vld [vmem:[#allocation2 + $0xa0] sm:$0xf]  ;;  %v10879_v31 = vld [vmem:[#allocation2 + $0xac] sm:$0xf0]  ;;  %v8199_v34 = vor.u32 %v10979_v25, %v8198_v18  ;;  %6232 = vmatpush.bf16.msrb.mxu1 %v7943_v15 }
 0x33d   :  { %v7926_v35 = vld [vmem:[#allocation2 + $0x1a0] sm:$0xf]  ;;  %v10911_v38 = vld [vmem:[#allocation2 + $0x1ac] sm:$0xf0]  ;;  %v7799_v33 = vor.u32 %v10879_v31, %v7798_v30  ;;  %6245 = vmatpush.bf16.msrb.mxu2 %v8071_v19 }
 0x33e   :  { %v8054_v39 = vld [vmem:[#allocation2 + $0x2a0] sm:$0xf]  ;;  %v10943_v41 = vld [vmem:[#allocation2 + $0x2ac] sm:$0xf0]  ;;  %v7927_v45 = vor.u32 %v10911_v38, %v7926_v35  ;;  %6258 = vmatpush.bf16.msrb.mxu3 %v8199_v34 }
 0x33f   :  { %v8182_v43 = vld [vmem:[#allocation2 + $0x3a0] sm:$0xf]  ;;  %v10975_v44 = vld [vmem:[#allocation2 + $0x3ac] sm:$0xf0]  ;;  %v8055_v10 = vor.u32 %v10943_v41, %v8054_v39  ;;  %6220 = vmatpush.bf16.msrb.mxu0 %v7799_v33 }
 0x340   :  { %v7782_v48 = vld [vmem:[#allocation2 + $0x80] sm:$0xf]  ;;  %v10875_v50 = vld [vmem:[#allocation2 + $0x8c] sm:$0xf0]  ;;  %v8183_v23 = vor.u32 %v10975_v44, %v8182_v43  ;;  %6233 = vmatpush.bf16.msrb.mxu1 %v7927_v45 }
 0x341   :  { %v7910_v53 = vld [vmem:[#allocation2 + $0x180] sm:$0xf]  ;;  %v10907_v26 = vld [vmem:[#allocation2 + $0x18c] sm:$0xf0]  ;;  %v7783_v40 = vor.u32 %v10875_v50, %v7782_v48  ;;  %6246 = vmatpush.bf16.msrb.mxu2 %v8055_v10 }
 0x342   :  { %v8038_v29 = vld [vmem:[#allocation2 + $0x280] sm:$0xf]  ;;  %v10939_v36 = vld [vmem:[#allocation2 + $0x28c] sm:$0xf0]  ;;  %v7911_v46 = vor.u32 %v10907_v26, %v7910_v53  ;;  %6259 = vmatpush.bf16.msrb.mxu3 %v8183_v23 }
 0x343   :  { %v8166_v37 = vld [vmem:[#allocation2 + $0x380] sm:$0xf]  ;;  %v10971_v21 = vld [vmem:[#allocation2 + $0x38c] sm:$0xf0]  ;;  %v8039_v47 = vor.u32 %v10939_v36, %v8038_v29  ;;  %6221 = vmatpush.bf16.msrb.mxu0 %v7783_v40 }
 0x344   :  { %v7766_v51 = vld [vmem:[#allocation2 + $0x60] sm:$0xf]  ;;  %v10871_v52 = vld [vmem:[#allocation2 + $0x6c] sm:$0xf0]  ;;  %v8167_v56 = vor.u32 %v10971_v21, %v8166_v37  ;;  %6234 = vmatpush.bf16.msrb.mxu1 %v7911_v46 }
 0x345   :  { %v7894_v22 = vld [vmem:[#allocation2 + $0x160] sm:$0xf]  ;;  %v10903_v57 = vld [vmem:[#allocation2 + $0x16c] sm:$0xf0]  ;;  %v7767_v24 = vor.u32 %v10871_v52, %v7766_v51  ;;  %6247 = vmatpush.bf16.msrb.mxu2 %v8039_v47 }
 0x346   :  { %v8022_v27 = vld [vmem:[#allocation2 + $0x260] sm:$0xf]  ;;  %v10935_v42 = vld [vmem:[#allocation2 + $0x26c] sm:$0xf0]  ;;  %v7895_v2 = vor.u32 %v10903_v57, %v7894_v22  ;;  %6260 = vmatpush.bf16.msrb.mxu3 %v8167_v56 }
 0x347   :  { %v8150_v61 = vld [vmem:[#allocation2 + $0x360] sm:$0xf]  ;;  %v10967_v62 = vld [vmem:[#allocation2 + $0x36c] sm:$0xf0]  ;;  %v8023_v55 = vor.u32 %v10935_v42, %v8022_v27  ;;  %6222 = vmatpush.bf16.msrb.mxu0 %v7767_v24 }
 0x348   :  { %v7750_v3 = vld [vmem:[#allocation2 + $0x40] sm:$0xf]  ;;  %v10867_v9 = vld [vmem:[#allocation2 + $0x4c] sm:$0xf0]  ;;  %v8151_v28 = vor.u32 %v10967_v62, %v8150_v61  ;;  %6235 = vmatpush.bf16.msrb.mxu1 %v7895_v2 }
 0x349   :  { %v7878_v12 = vld [vmem:[#allocation2 + $0x140] sm:$0xf]  ;;  %v10899_v32 = vld [vmem:[#allocation2 + $0x14c] sm:$0xf0]  ;;  %v7751_v0 = vor.u32 %v10867_v9, %v7750_v3  ;;  %6248 = vmatpush.bf16.msrb.mxu2 %v8023_v55 }
 0x34a   :  { %v8006_v49 = vld [vmem:[#allocation2 + $0x240] sm:$0xf]  ;;  %v10931_v59 = vld [vmem:[#allocation2 + $0x24c] sm:$0xf0]  ;;  %v7879_v4 = vor.u32 %v10899_v32, %v7878_v12  ;;  %6261 = vmatpush.bf16.msrb.mxu3 %v8151_v28 }
 0x34b   :  { %v8134_v60 = vld [vmem:[#allocation2 + $0x340] sm:$0xf]  ;;  %v10963_v63 = vld [vmem:[#allocation2 + $0x34c] sm:$0xf0]  ;;  %v8007_v20 = vor.u32 %v10931_v59, %v8006_v49  ;;  %6223 = vmatpush.bf16.msrb.mxu0 %v7751_v0 }
 0x34c   :  { %v7734_v58 = vld [vmem:[#allocation2 + $0x20] sm:$0xf]  ;;  %v10863_v5 = vld [vmem:[#allocation2 + $0x2c] sm:$0xf0]  ;;  %v8135_v6 = vor.u32 %v10963_v63, %v8134_v60  ;;  %6236 = vmatpush.bf16.msrb.mxu1 %v7879_v4 }
 0x34d   :  { %v7862_v1 = vld [vmem:[#allocation2 + $0x120] sm:$0xf]  ;;  %v10895_v7 = vld [vmem:[#allocation2 + $0x12c] sm:$0xf0]  ;;  %v7735_v54 = vor.u32 %v10863_v5, %v7734_v58  ;;  %6249 = vmatpush.bf16.msrb.mxu2 %v8007_v20 }
 0x34e   :  { %v7990_v8 = vld [vmem:[#allocation2 + $0x220] sm:$0xf]  ;;  %v10927_v11 = vld [vmem:[#allocation2 + $0x22c] sm:$0xf0]  ;;  %v7863_v17 = vor.u32 %v10895_v7, %v7862_v1  ;;  %6262 = vmatpush.bf16.msrb.mxu3 %v8135_v6 }
 0x34f   :  { %v8118_v13 = vld [vmem:[#allocation2 + $0x320] sm:$0xf]  ;;  %v10959_v14 = vld [vmem:[#allocation2 + $0x32c] sm:$0xf0]  ;;  %v7991_v18 = vor.u32 %v10927_v11, %v7990_v8  ;;  %6224 = vmatpush.bf16.msrb.mxu0 %v7735_v54 }
 0x350   :  { %v7718_v15 = vld [vmem:[#allocation2] sm:$0xf]  ;;  %v10859_v16 = vld [vmem:[#allocation2 + $0xc] sm:$0xf0]  ;;  %v8119_v31 = vor.u32 %v10959_v14, %v8118_v13  ;;  %6237 = vmatpush.bf16.msrb.mxu1 %v7863_v17 }
 0x351   :  { %v7846_v19 = vld [vmem:[#allocation2 + $0x100] sm:$0xf]  ;;  %v10891_v25 = vld [vmem:[#allocation2 + $0x10c] sm:$0xf0]  ;;  %v7719_v43 = vor.u32 %v10859_v16, %v7718_v15  ;;  %6250 = vmatpush.bf16.msrb.mxu2 %v7991_v18 }
 0x352   :  { %v7974_v30 = vld [vmem:[#allocation2 + $0x200] sm:$0xf]  ;;  %v10923_v34 = vld [vmem:[#allocation2 + $0x20c] sm:$0xf0]  ;;  %v7847_v48 = vor.u32 %v10891_v25, %v7846_v19  ;;  %6263 = vmatpush.bf16.msrb.mxu3 %v8119_v31 }
 0x353   :  { %v8102_v35 = vld [vmem:[#allocation2 + $0x300] sm:$0xf]  ;;  %v10955_v38 = vld [vmem:[#allocation2 + $0x30c] sm:$0xf0]  ;;  %v7975_v50 = vor.u32 %v10923_v34, %v7974_v30  ;;  %6225 = vmatpush.bf16.msrb.mxu0 %v7719_v43 }
 0x354   :  { %v8342_v39 = vld [vmem:[#allocation2 + $0x4e0] sm:$0xf]  ;;  %v11015_v33 = vld [vmem:[#allocation2 + $0x4ec] sm:$0xf0]  ;;  %v8103_v26 = vor.u32 %v10955_v38, %v8102_v35  ;;  %6238 = vmatpush.bf16.msrb.mxu1 %v7847_v48 }
 0x355   :  { %v8470_v41 = vld [vmem:[#allocation2 + $0x5e0] sm:$0xf]  ;;  %v11047_v44 = vld [vmem:[#allocation2 + $0x5ec] sm:$0xf0]  ;;  %v8343_v29 = vor.u32 %v11015_v33, %v8342_v39  ;;  %6251 = vmatpush.bf16.msrb.mxu2 %v7975_v50 }
 0x356   :  { %v8598_v45 = vld [vmem:[#allocation2 + $0x6e0] sm:$0xf]  ;;  %v11079_v10 = vld [vmem:[#allocation2 + $0x6ec] sm:$0xf0]  ;;  %v8471_v36 = vor.u32 %v11047_v44, %v8470_v41  ;;  %6264 = vmatpush.bf16.msrb.mxu3 %v8103_v26 }
 0x357   :  { %v8726_v53 = vld [vmem:[#allocation2 + $0x7e0] sm:$0xf]  ;;  %v11111_v23 = vld [vmem:[#allocation2 + $0x7ec] sm:$0xf0]  ;;  %v8599_v37 = vor.u32 %v11079_v10, %v8598_v45  ;;  %6270 = vmatpush.bf16.msra.mxu0 %v8343_v29 }
 0x358   :  { %v8326_v21 = vld [vmem:[#allocation2 + $0x4c0] sm:$0xf]  ;;  %v11011_v40 = vld [vmem:[#allocation2 + $0x4cc] sm:$0xf0]  ;;  %v8727_v47 = vor.u32 %v11111_v23, %v8726_v53  ;;  %6283 = vmatpush.bf16.msra.mxu1 %v8471_v36 }
 0x359   :  { %v8454_v46 = vld [vmem:[#allocation2 + $0x5c0] sm:$0xf]  ;;  %v11043_v51 = vld [vmem:[#allocation2 + $0x5cc] sm:$0xf0]  ;;  %v8327_v27 = vor.u32 %v11011_v40, %v8326_v21  ;;  %6296 = vmatpush.bf16.msra.mxu2 %v8599_v37 }
 0x35a   :  { %v8582_v52 = vld [vmem:[#allocation2 + $0x6c0] sm:$0xf]  ;;  %v11075_v22 = vld [vmem:[#allocation2 + $0x6cc] sm:$0xf0]  ;;  %v8455_v62 = vor.u32 %v11043_v51, %v8454_v46  ;;  %6309 = vmatpush.bf16.msra.mxu3 %v8727_v47 }
 0x35b   :  { %v8710_v56 = vld [vmem:[#allocation2 + $0x7c0] sm:$0xf]  ;;  %v11107_v57 = vld [vmem:[#allocation2 + $0x7cc] sm:$0xf0]  ;;  %v8583_v24 = vor.u32 %v11075_v22, %v8582_v52  ;;  %6271 = vmatpush.bf16.msra.mxu0 %v8327_v27 }
 0x35c   :  { %v8310_v42 = vld [vmem:[#allocation2 + $0x4a0] sm:$0xf]  ;;  %v11007_v61 = vld [vmem:[#allocation2 + $0x4ac] sm:$0xf0]  ;;  %v8711_v9 = vor.u32 %v11107_v57, %v8710_v56  ;;  %6284 = vmatpush.bf16.msra.mxu1 %v8455_v62 }
 0x35d   :  { %v8438_v2 = vld [vmem:[#allocation2 + $0x5a0] sm:$0xf]  ;;  %v11039_v55 = vld [vmem:[#allocation2 + $0x5ac] sm:$0xf0]  ;;  %v8311_v59 = vor.u32 %v11007_v61, %v8310_v42  ;;  %6297 = vmatpush.bf16.msra.mxu2 %v8583_v24 }
 0x35e   :  { %v1404_v3 = vld [vmem:[#allocation5] sm:$0xff]  ;;  %v11071_v28 = vld [vmem:[#allocation2 + $0x6ac] sm:$0xf0]  ;;  %v8439_v63 = vor.u32 %v11039_v55, %v8438_v2  ;;  %6310 = vmatpush.bf16.msra.mxu3 %v8711_v9  ;;  %v1405_v2 = vld [vmem:[#allocation5 + $0x8] sm:$0xff] }
 0x35f   :  { %v8566_v12 = vld [vmem:[#allocation2 + $0x6a0] sm:$0xf]  ;;  %1418 = vst [vmem:[#allocation1] ss:$4 sm:$0xff] %v1404_v3  ;;  %v11103_v49 = vld [vmem:[#allocation2 + $0x7ac] sm:$0xf0]  ;;  %6272 = vmatpush.bf16.msra.mxu0 %v8311_v59 }
 0x360   :  { %v8694_v32 = vld [vmem:[#allocation2 + $0x7a0] sm:$0xf]  ;;  %v8567_v0 = vor.u32 %v11071_v28, %v8566_v12  ;;  %v11003_v4 = vld [vmem:[#allocation2 + $0x48c] sm:$0xf0]  ;;  %6285 = vmatpush.bf16.msra.mxu1 %v8439_v63  ;;  %1420 = vst [vmem:[#allocation1 + $0x20] ss:$4 sm:$0xff] %v1405_v2 }
 0x361   :  { %v8294_v60 = vld [vmem:[#allocation2 + $0x480] sm:$0xf]  ;;  %v11035_v58 = vld [vmem:[#allocation2 + $0x58c] sm:$0xf0]  ;;  %v8695_v5 = vor.u32 %v11103_v49, %v8694_v32 }
 0x362   :  { %v8422_v20 = vld [vmem:[#allocation2 + $0x580] sm:$0xf]  ;;  %v11067_v6 = vld [vmem:[#allocation2 + $0x68c] sm:$0xf0]  ;;  %v8295_v14 = vor.u32 %v11003_v4, %v8294_v60  ;;  %6298 = vmatpush.bf16.msra.mxu2 %v8567_v0 }
 0x363   :  { %v8550_v1 = vld [vmem:[#allocation2 + $0x680] sm:$0xf]  ;;  %v11099_v8 = vld [vmem:[#allocation2 + $0x78c] sm:$0xf0]  ;;  %v8423_v19 = vor.u32 %v11035_v58, %v8422_v20  ;;  %6311 = vmatpush.bf16.msra.mxu3 %v8695_v5 }
 0x364   :  { %v8678_v7 = vld [vmem:[#allocation2 + $0x780] sm:$0xf]  ;;  %v10999_v13 = vld [vmem:[#allocation2 + $0x46c] sm:$0xf0]  ;;  %v8551_v25 = vor.u32 %v11067_v6, %v8550_v1  ;;  %6273 = vmatpush.bf16.msra.mxu0 %v8295_v14 }
 0x365   :  { %v8278_v11 = vld [vmem:[#allocation2 + $0x460] sm:$0xf]  ;;  %v11031_v15 = vld [vmem:[#allocation2 + $0x56c] sm:$0xf0]  ;;  %v8679_v34 = vor.u32 %v11099_v8, %v8678_v7  ;;  %6286 = vmatpush.bf16.msra.mxu1 %v8423_v19 }
 0x366   :  { %v8406_v54 = vld [vmem:[#allocation2 + $0x560] sm:$0xf]  ;;  %v11063_v17 = vld [vmem:[#allocation2 + $0x66c] sm:$0xf0]  ;;  %v8279_v10 = vor.u32 %v10999_v13, %v8278_v11  ;;  %6299 = vmatpush.bf16.msra.mxu2 %v8551_v25 }
 0x367   :  { %v8534_v16 = vld [vmem:[#allocation2 + $0x660] sm:$0xf]  ;;  %v1406_v18 = vld [vmem:[#allocation5 + $0x10] sm:$0xff]  ;;  %v1423_v30 = vld.sshfl [vmem:[#allocation1 + $0x10] sm:$0xff pattern:$0x73625140]  ;;  %v8407_v48 = vor.u32 %v11031_v15, %v8406_v54  ;;  %6312 = vmatpush.bf16.msra.mxu3 %v8679_v34 }
 0x368   :  { %v1421_v31 = vld.sshfl [vmem:[#allocation1] sm:$0xff pattern:$0x73625140]  ;;  %v12720_v35 = vpack.c.bf16 %v1423_v30, %v1423_v30  ;;  %v1424_v39 = vld.sshfl [vmem:[#allocation1 + $0x18] sm:$0xff pattern:$0x73625140]  ;;  %v8535_v50 = vor.u32 %v11063_v17, %v8534_v16  ;;  %6274 = vmatpush.bf16.msra.mxu0 %v8279_v10 }
 0x369   :  { %v12722_v38 = vpack.c.bf16 %v1421_v31, %v1421_v31  ;;  %v1422_v33 = vld.sshfl [vmem:[#allocation1 + $0x8] sm:$0xff pattern:$0x73625140]  ;;  %v11095_v43 = vld [vmem:[#allocation2 + $0x76c] sm:$0xf0]  ;;  %v12724_v44 = vpack.c.bf16 %v1424_v39, %v1424_v39  ;;  %6287 = vmatpush.bf16.msra.mxu1 %v8407_v48 }
 0x36a   :  { %v8662_v41 = vld [vmem:[#allocation2 + $0x760] sm:$0xf]  ;;  %1429 = vst [vmem:[#allocation1] ss:$4 sm:$0xff] %v1406_v18  ;;  %v12726_v45 = vpack.c.bf16 %v1422_v33, %v1422_v33  ;;  %6252 = vmatmul.bf16.vlgmr.msrb.gmra.mxu2 %v12720_v35  ;;  %v10995_v23 = vld [vmem:[#allocation2 + $0x44c] sm:$0xf0] }
 0x36b   :  { %v8262_v53 = vld [vmem:[#allocation2 + $0x440] sm:$0xf]  ;;  %v8663_v29 = vor.u32 %v11095_v43, %v8662_v41  ;;  %v11027_v36 = vld [vmem:[#allocation2 + $0x54c] sm:$0xf0]  ;;  %6226 = vmatmul.bf16.vlgmr.msrb.gmra.mxu0 %v12722_v38  ;;  %6265 = vmatmul.bf16.vlgmr.msrb.gmra.mxu3 %v12724_v44  ;;  %v1407_v18 = vld [vmem:[#allocation5 + $0x18] sm:$0xff] }
 0x36c   :  { %v8390_v26 = vld [vmem:[#allocation2 + $0x540] sm:$0xf]  ;;  %v11059_v21 = vld [vmem:[#allocation2 + $0x64c] sm:$0xf0]  ;;  %6239 = vmatmul.bf16.vlgmr.msrb.gmra.mxu1 %v12726_v45  ;;  %v8263_v47 = vor.u32 %v10995_v23, %v8262_v53  ;;  %6300 = vmatpush.bf16.msra.mxu2 %v8535_v50 }
 0x36d   :  { %v8518_v37 = vld [vmem:[#allocation2 + $0x640] sm:$0xf]  ;;  %v11091_v46 = vld [vmem:[#allocation2 + $0x74c] sm:$0xf0]  ;;  %v8391_v22 = vor.u32 %v11027_v36, %v8390_v26  ;;  %6313 = vmatpush.bf16.msra.mxu3 %v8663_v29 }
 0x36e   :  { %v8646_v40 = vld [vmem:[#allocation2 + $0x740] sm:$0xf]  ;;  %v10991_v52 = vld [vmem:[#allocation2 + $0x42c] sm:$0xf0]  ;;  %v8519_v56 = vor.u32 %v11059_v21, %v8518_v37  ;;  %6275 = vmatpush.bf16.msra.mxu0 %v8263_v47 }
 0x36f   :  { %v8246_v51 = vld [vmem:[#allocation2 + $0x420] sm:$0xf]  ;;  %v11023_v27 = vld [vmem:[#allocation2 + $0x52c] sm:$0xf0]  ;;  %v8647_v61 = vor.u32 %v11091_v46, %v8646_v40  ;;  %6288 = vmatpush.bf16.msra.mxu1 %v8391_v22 }
 0x370   :  { %v8374_v57 = vld [vmem:[#allocation2 + $0x520] sm:$0xf]  ;;  %v11055_v62 = vld [vmem:[#allocation2 + $0x62c] sm:$0xf0]  ;;  %v8247_v9 = vor.u32 %v10991_v52, %v8246_v51  ;;  %6301 = vmatpush.bf16.msra.mxu2 %v8519_v56 }
 0x371   :  { %v8502_v42 = vld [vmem:[#allocation2 + $0x620] sm:$0xf]  ;;  %v11087_v55 = vld [vmem:[#allocation2 + $0x72c] sm:$0xf0]  ;;  %v8375_v49 = vor.u32 %v11023_v27, %v8374_v57  ;;  %6314 = vmatpush.bf16.msra.mxu3 %v8647_v61 }
 0x372   :  { %v8630_v24 = vld [vmem:[#allocation2 + $0x720] sm:$0xf]  ;;  %v10987_v12 = vld [vmem:[#allocation2 + $0x40c] sm:$0xf0]  ;;  %v8503_v59 = vor.u32 %v11055_v62, %v8502_v42  ;;  %6276 = vmatpush.bf16.msra.mxu0 %v8247_v9 }
 0x373   :  { %v8230_v3 = vld [vmem:[#allocation2 + $0x400] sm:$0xf]  ;;  %v11019_v32 = vld [vmem:[#allocation2 + $0x50c] sm:$0xf0]  ;;  %v8631_v4 = vor.u32 %v11087_v55, %v8630_v24  ;;  %6289 = vmatpush.bf16.msra.mxu1 %v8375_v49 }
 0x374   :  { %v8358_v28 = vld [vmem:[#allocation2 + $0x500] sm:$0xf]  ;;  %v11051_v63 = vld [vmem:[#allocation2 + $0x60c] sm:$0xf0]  ;;  %v8231_v8 = vor.u32 %v10987_v12, %v8230_v3  ;;  %6302 = vmatpush.bf16.msra.mxu2 %v8503_v59 }
 0x375   :  { %v8486_v60 = vld [vmem:[#allocation2 + $0x600] sm:$0xf]  ;;  %v11083_v20 = vld [vmem:[#allocation2 + $0x70c] sm:$0xf0]  ;;  %v8359_v54 = vor.u32 %v11019_v32, %v8358_v28  ;;  %6315 = vmatpush.bf16.msra.mxu3 %v8631_v4 }
 0x376   :  { %v8614_v0 = vld [vmem:[#allocation2 + $0x700] sm:$0xf]  ;;  %v11143_v5 = vld [vmem:[#allocation2 + $0x8ec] sm:$0xf0]  ;;  %v8487_v15 = vor.u32 %v11051_v63, %v8486_v60  ;;  %6277 = vmatpush.bf16.msra.mxu0 %v8231_v8 }
 0x377   :  { %v8854_v58 = vld [vmem:[#allocation2 + $0x8e0] sm:$0xf]  ;;  %v11175_v6 = vld [vmem:[#allocation2 + $0x9ec] sm:$0xf0]  ;;  %v8615_v19 = vor.u32 %v11083_v20, %v8614_v0  ;;  %6290 = vmatpush.bf16.msra.mxu1 %v8359_v54 }
 0x378   :  { %v8982_v1 = vld [vmem:[#allocation2 + $0x9e0] sm:$0xf]  ;;  %v11207_v11 = vld [vmem:[#allocation2 + $0xaec] sm:$0xf0]  ;;  %v8855_v25 = vor.u32 %v11143_v5, %v8854_v58  ;;  %6303 = vmatpush.bf16.msra.mxu2 %v8487_v15 }
 0x379   :  { %v9110_v7 = vld [vmem:[#allocation2 + $0xae0] sm:$0xf]  ;;  %v11239_v14 = vld [vmem:[#allocation2 + $0xbec] sm:$0xf0]  ;;  %v8983_v33 = vor.u32 %v11175_v6, %v8982_v1  ;;  %6316 = vmatpush.bf16.msra.mxu3 %v8615_v19 }
 0x37a   :  { %v9238_v13 = vld [vmem:[#allocation2 + $0xbe0] sm:$0xf]  ;;  %v11139_v17 = vld [vmem:[#allocation2 + $0x8cc] sm:$0xf0]  ;;  %v9111_v41 = vor.u32 %v11207_v11, %v9110_v7  ;;  %6322 = vmatpush.bf16.msrb.mxu0 %v8855_v25 }
 0x37b   :  { %v8838_v16 = vld [vmem:[#allocation2 + $0x8c0] sm:$0xf]  ;;  %v11171_v31 = vld [vmem:[#allocation2 + $0x9cc] sm:$0xf0]  ;;  %v9239_v48 = vor.u32 %v11239_v14, %v9238_v13  ;;  %6335 = vmatpush.bf16.msrb.mxu1 %v8983_v33 }
 0x37c   :  { %v8966_v30 = vld [vmem:[#allocation2 + $0x9c0] sm:$0xf]  ;;  %v1427_v34 = vld.sshfl [vmem:[#allocation1 + $0x30] sm:$0xff pattern:$0x73625140]  ;;  %v8839_v21 = vor.u32 %v11139_v17, %v8838_v16  ;;  %6348 = vmatpush.bf16.msrb.mxu2 %v9111_v41 }
 0x37d   :  { %v1425_v39 = vld.sshfl [vmem:[#allocation1 + $0x20] sm:$0xff pattern:$0x73625140]  ;;  %v1428_v43 = vld.sshfl [vmem:[#allocation1 + $0x38] sm:$0xff pattern:$0x73625140]  ;;  %v12732_v23 = vpack.c.bf16 %v1427_v34, %v1427_v34  ;;  %v8967_v46 = vor.u32 %v11171_v31, %v8966_v30  ;;  %6361 = vmatpush.bf16.msrb.mxu3 %v9239_v48 }
 0x37e   :  { %v1426_v10 = vld.sshfl [vmem:[#allocation1 + $0x28] sm:$0xff pattern:$0x73625140]  ;;  %v11203_v53 = vld [vmem:[#allocation2 + $0xacc] sm:$0xf0]  ;;  %v12734_v36 = vpack.c.bf16 %v1425_v39, %v1425_v39  ;;  %v12736_v37 = vpack.c.bf16 %v1428_v43, %v1428_v43  ;;  %6323 = vmatpush.bf16.msrb.mxu0 %v8839_v21 }
 0x37f   :  { %v9094_v50 = vld [vmem:[#allocation2 + $0xac0] sm:$0xf]  ;;  %1430 = vst [vmem:[#allocation1 + $0x20] ss:$4 sm:$0xff] %v1407_v18  ;;  %v11235_v29 = vld [vmem:[#allocation2 + $0xbcc] sm:$0xf0]  ;;  %v12738_v40 = vpack.c.bf16 %v1426_v10, %v1426_v10  ;;  %6304 = vmatmul.bf16.vlgmr.msra.gmra.mxu2 %v12732_v23  ;;  %6336 = vmatpush.bf16.msrb.mxu1 %v8967_v46 }
 0x380   :  { %v9222_v26 = vld [vmem:[#allocation2 + $0xbc0] sm:$0xf]  ;;  %v9095_v47 = vor.u32 %v11203_v53, %v9094_v50  ;;  %v11135_v52 = vld [vmem:[#allocation2 + $0x8ac] sm:$0xf0]  ;;  %6278 = vmatmul.bf16.vlgmr.msra.gmra.mxu0 %v12734_v36  ;;  %6317 = vmatmul.bf16.vlgmr.msra.gmra.mxu3 %v12736_v37 }
 0x381   :  { %v8822_v51 = vld [vmem:[#allocation2 + $0x8a0] sm:$0xf]  ;;  %v9223_v56 = vor.u32 %v11235_v29, %v9222_v26  ;;  %v11167_v57 = vld [vmem:[#allocation2 + $0x9ac] sm:$0xf0]  ;;  %6291 = vmatmul.bf16.vlgmr.msra.gmra.mxu1 %v12738_v40 }
 0x382   :  { %v8950_v22 = vld [vmem:[#allocation2 + $0x9a0] sm:$0xf]  ;;  %v11199_v42 = vld [vmem:[#allocation2 + $0xaac] sm:$0xf0]  ;;  %v8823_v24 = vor.u32 %v11135_v52, %v8822_v51  ;;  %6349 = vmatpush.bf16.msrb.mxu2 %v9095_v47 }
 0x383   :  { %v9078_v27 = vld [vmem:[#allocation2 + $0xaa0] sm:$0xf]  ;;  %v11231_v62 = vld [vmem:[#allocation2 + $0xbac] sm:$0xf0]  ;;  %v8951_v2 = vor.u32 %v11167_v57, %v8950_v22  ;;  %6362 = vmatpush.bf16.msrb.mxu3 %v9223_v56 }
 0x384   :  { %v9206_v61 = vld [vmem:[#allocation2 + $0xba0] sm:$0xf]  ;;  %v9079_v55 = vor.u32 %v11199_v42, %v9078_v27  ;;  %v11131_v9 = vld [vmem:[#allocation2 + $0x88c] sm:$0xf0]  ;;  %6324 = vmatpush.bf16.msrb.mxu0 %v8823_v24 }
 0x385   :  { %v8806_v3 = vld [vmem:[#allocation2 + $0x880] sm:$0xf]  ;;  %v9207_v28 = vor.u32 %v11231_v62, %v9206_v61  ;;  %v11163_v32 = vld [vmem:[#allocation2 + $0x98c] sm:$0xf0]  ;;  %6337 = vmatpush.bf16.msrb.mxu1 %v8951_v2 }
 0x386   :  { %v8934_v12 = vld [vmem:[#allocation2 + $0x980] sm:$0xf]  ;;  %v11195_v59 = vld [vmem:[#allocation2 + $0xa8c] sm:$0xf0]  ;;  %v8807_v0 = vor.u32 %v11131_v9, %v8806_v3  ;;  %6350 = vmatpush.bf16.msrb.mxu2 %v9079_v55 }
 0x387   :  { %v9062_v49 = vld [vmem:[#allocation2 + $0xa80] sm:$0xf]  ;;  %v11227_v63 = vld [vmem:[#allocation2 + $0xb8c] sm:$0xf0]  ;;  %v8935_v5 = vor.u32 %v11163_v32, %v8934_v12  ;;  %6363 = vmatpush.bf16.msrb.mxu3 %v9207_v28 }
 0x388   :  { %v9190_v60 = vld [vmem:[#allocation2 + $0xb80] sm:$0xf]  ;;  %v11127_v20 = vld [vmem:[#allocation2 + $0x86c] sm:$0xf0]  ;;  %v9063_v1 = vor.u32 %v11195_v59, %v9062_v49  ;;  %6325 = vmatpush.bf16.msrb.mxu0 %v8807_v0 }
 0x389   :  { %v8790_v4 = vld [vmem:[#allocation2 + $0x860] sm:$0xf]  ;;  %v11159_v6 = vld [vmem:[#allocation2 + $0x96c] sm:$0xf0]  ;;  %v9191_v11 = vor.u32 %v11227_v63, %v9190_v60  ;;  %6338 = vmatpush.bf16.msrb.mxu1 %v8935_v5 }
 0x38a   :  { %v8918_v58 = vld [vmem:[#allocation2 + $0x960] sm:$0xf]  ;;  %v11191_v8 = vld [vmem:[#allocation2 + $0xa6c] sm:$0xf0]  ;;  %v8791_v18 = vor.u32 %v11127_v20, %v8790_v4  ;;  %6351 = vmatpush.bf16.msrb.mxu2 %v9063_v1 }
 0x38b   :  { %v9046_v7 = vld [vmem:[#allocation2 + $0xa60] sm:$0xf]  ;;  %v11223_v14 = vld [vmem:[#allocation2 + $0xb6c] sm:$0xf0]  ;;  %v8919_v30 = vor.u32 %v11159_v6, %v8918_v58  ;;  %6364 = vmatpush.bf16.msrb.mxu3 %v9191_v11 }
 0x38c   :  { %v9174_v13 = vld [vmem:[#allocation2 + $0xb60] sm:$0xf]  ;;  %v12744_v16 = vld.sshfl [vmem:[#allocation1] sm:$0xff pattern:$0x73625140]  ;;  %v9047_v31 = vor.u32 %v11191_v8, %v9046_v7  ;;  %6326 = vmatpush.bf16.msrb.mxu0 %v8791_v18 }
 0x38d   :  { %v1408_v54 = vld [vmem:[#allocation5 + $0x20] sm:$0xff]  ;;  %v12746_v17 = vld.sshfl [vmem:[#allocation1 + $0x10] sm:$0xff pattern:$0x73625140]  ;;  %v11123_v34 = vld [vmem:[#allocation2 + $0x84c] sm:$0xf0]  ;;  %v9175_v33 = vor.u32 %v11223_v14, %v9174_v13  ;;  %6339 = vmatpush.bf16.msrb.mxu1 %v8919_v30 }
 0x38e   :  { %v8774_v15 = vld [vmem:[#allocation2 + $0x840] sm:$0xf]  ;;  %v12750_v25 = vld.sshfl [vmem:[#allocation1 + $0x18] sm:$0xff pattern:$0x73625140]  ;;  %6352 = vmatpush.bf16.msrb.mxu2 %v9047_v31  ;;  %v12754_v31 = vpack.c.bf16 %v12744_v16, %v12744_v16 }
 0x38f   :  { %v12748_v19 = vld.sshfl [vmem:[#allocation1 + $0x8] sm:$0xff pattern:$0x73625140]  ;;  %v11155_v41 = vld [vmem:[#allocation2 + $0x94c] sm:$0xf0]  ;;  %v8775_v53 = vor.u32 %v11123_v34, %v8774_v15  ;;  %6365 = vmatpush.bf16.msrb.mxu3 %v9175_v33  ;;  %v12766_v16 = vpack.c.bf16 %v12750_v25, %v12750_v25 }
 0x390   :  { %v8902_v39 = vld [vmem:[#allocation2 + $0x940] sm:$0xf]  ;;  %1439 = vst [vmem:[#allocation1] ss:$4 sm:$0xff] %v1408_v54  ;;  %v11187_v10 = vld [vmem:[#allocation2 + $0xa4c] sm:$0xf0] }
 0x391   :  { %v9030_v43 = vld [vmem:[#allocation2 + $0xa40] sm:$0xf]  ;;  %v11219_v50 = vld [vmem:[#allocation2 + $0xb4c] sm:$0xf0]  ;;  %v8903_v26 = vor.u32 %v11155_v41, %v8902_v39  ;;  %6327 = vmatpush.bf16.msrb.mxu0 %v8775_v53  ;;  %v12758_v41 = vpack.c.bf16 %v12746_v17, %v12746_v17 }
 0x392   :  { %v9158_v48 = vld [vmem:[#allocation2 + $0xb40] sm:$0xf]  ;;  %v9031_v29 = vor.u32 %v11187_v10, %v9030_v43  ;;  %v11119_v46 = vld [vmem:[#allocation2 + $0x82c] sm:$0xf0]  ;;  %v12762_v43 = vpack.c.bf16 %v12748_v19, %v12748_v19 }
 0x393   :  { %v8758_v21 = vld [vmem:[#allocation2 + $0x820] sm:$0xf]  ;;  %v9159_v51 = vor.u32 %v11219_v50, %v9158_v48  ;;  %v11151_v52 = vld [vmem:[#allocation2 + $0x92c] sm:$0xf0]  ;;  %6340 = vmatpush.bf16.msrb.mxu1 %v8903_v26 }
 0x394   :  { %v8886_v47 = vld [vmem:[#allocation2 + $0x920] sm:$0xf]  ;;  %v11183_v56 = vld [vmem:[#allocation2 + $0xa2c] sm:$0xf0]  ;;  %v8759_v42 = vor.u32 %v11119_v46, %v8758_v21  ;;  %6353 = vmatpush.bf16.msrb.mxu2 %v9031_v29 }
 0x395   :  { %v9014_v22 = vld [vmem:[#allocation2 + $0xa20] sm:$0xf]  ;;  %v11215_v27 = vld [vmem:[#allocation2 + $0xb2c] sm:$0xf0]  ;;  %v8887_v24 = vor.u32 %v11151_v52, %v8886_v47  ;;  %6366 = vmatpush.bf16.msrb.mxu3 %v9159_v51 }
 0x396   :  { %v9142_v57 = vld [vmem:[#allocation2 + $0xb20] sm:$0xf]  ;;  %v11115_v62 = vld [vmem:[#allocation2 + $0x80c] sm:$0xf0]  ;;  %v9015_v2 = vor.u32 %v11183_v56, %v9014_v22  ;;  %6328 = vmatpush.bf16.msrb.mxu0 %v8759_v42 }
 0x397   :  { %v8742_v61 = vld [vmem:[#allocation2 + $0x800] sm:$0xf]  ;;  %v11147_v3 = vld [vmem:[#allocation2 + $0x90c] sm:$0xf0]  ;;  %v9143_v12 = vor.u32 %v11215_v27, %v9142_v57  ;;  %6341 = vmatpush.bf16.msrb.mxu1 %v8887_v24  ;;  %v1409_v24 = vld [vmem:[#allocation5 + $0x28] sm:$0xff] }
 0x398   :  { %v8870_v55 = vld [vmem:[#allocation2 + $0x900] sm:$0xf]  ;;  %v11179_v28 = vld [vmem:[#allocation2 + $0xa0c] sm:$0xf0]  ;;  %v8743_v0 = vor.u32 %v11115_v62, %v8742_v61  ;;  %6354 = vmatpush.bf16.msrb.mxu2 %v9015_v2 }
 0x399   :  { %v8998_v9 = vld [vmem:[#allocation2 + $0xa00] sm:$0xf]  ;;  %v11211_v49 = vld [vmem:[#allocation2 + $0xb0c] sm:$0xf0]  ;;  %v8871_v5 = vor.u32 %v11147_v3, %v8870_v55  ;;  %6367 = vmatpush.bf16.msrb.mxu3 %v9143_v12 }
 0x39a   :  { %v9126_v32 = vld [vmem:[#allocation2 + $0xb00] sm:$0xf]  ;;  %v11271_v60 = vld [vmem:[#allocation2 + $0xcec] sm:$0xf0]  ;;  %v8999_v1 = vor.u32 %v11179_v28, %v8998_v9  ;;  %6329 = vmatpush.bf16.msrb.mxu0 %v8743_v0 }
 0x39b   :  { %v9366_v59 = vld [vmem:[#allocation2 + $0xce0] sm:$0xf]  ;;  %v11303_v4 = vld [vmem:[#allocation2 + $0xdec] sm:$0xf0]  ;;  %v9127_v8 = vor.u32 %v11211_v49, %v9126_v32  ;;  %6342 = vmatpush.bf16.msrb.mxu1 %v8871_v5 }
 0x39c   :  { %v9494_v63 = vld [vmem:[#allocation2 + $0xde0] sm:$0xf]  ;;  %v11335_v58 = vld [vmem:[#allocation2 + $0xeec] sm:$0xf0]  ;;  %v9367_v11 = vor.u32 %v11271_v60, %v9366_v59  ;;  %6355 = vmatpush.bf16.msrb.mxu2 %v8999_v1 }
 0x39d   :  { %v9622_v20 = vld [vmem:[#allocation2 + $0xee0] sm:$0xf]  ;;  %v11367_v7 = vld [vmem:[#allocation2 + $0xfec] sm:$0xf0]  ;;  %v9495_v13 = vor.u32 %v11303_v4, %v9494_v63  ;;  %6368 = vmatpush.bf16.msrb.mxu3 %v9127_v8  ;;  %6330 = vmatmul.bf16.vlgmr.msrb.gmra.mxu0 %v12754_v31 }
 0x39e   :  { %v9750_v6 = vld [vmem:[#allocation2 + $0xfe0] sm:$0xf]  ;;  %v9623_v14 = vor.u32 %v11335_v58, %v9622_v20  ;;  %v11267_v15 = vld [vmem:[#allocation2 + $0xccc] sm:$0xf0]  ;;  %6374 = vmatpush.bf16.msra.mxu0 %v9367_v11  ;;  %6343 = vmatmul.bf16.vlgmr.msrb.gmra.mxu1 %v12762_v43 }
 0x39f   :  { %v9350_v54 = vld [vmem:[#allocation2 + $0xcc0] sm:$0xf]  ;;  %v9751_v30 = vor.u32 %v11367_v7, %v9750_v6  ;;  %v11299_v34 = vld [vmem:[#allocation2 + $0xdcc] sm:$0xf0]  ;;  %6387 = vmatpush.bf16.msra.mxu1 %v9495_v13  ;;  %6356 = vmatmul.bf16.vlgmr.msrb.gmra.mxu2 %v12758_v41 }
 0x3a0   :  { %v9478_v18 = vld [vmem:[#allocation2 + $0xdc0] sm:$0xf]  ;;  %v11331_v33 = vld [vmem:[#allocation2 + $0xecc] sm:$0xf0]  ;;  %v9351_v50 = vor.u32 %v11267_v15, %v9350_v54  ;;  %6400 = vmatpush.bf16.msra.mxu2 %v9623_v14  ;;  %6369 = vmatmul.bf16.vlgmr.msrb.gmra.mxu3 %v12766_v16 }
 0x3a1   :  { %v9606_v39 = vld [vmem:[#allocation2 + $0xec0] sm:$0xf]  ;;  %v11363_v48 = vld [vmem:[#allocation2 + $0xfcc] sm:$0xf0]  ;;  %v9479_v26 = vor.u32 %v11299_v34, %v9478_v18  ;;  %6413 = vmatpush.bf16.msra.mxu3 %v9751_v30 }
 0x3a2   :  { %v9734_v10 = vld [vmem:[#allocation2 + $0xfc0] sm:$0xf]  ;;  %v9607_v29 = vor.u32 %v11331_v33, %v9606_v39  ;;  %v11263_v17 = vld [vmem:[#allocation2 + $0xcac] sm:$0xf0]  ;;  %6375 = vmatpush.bf16.msra.mxu0 %v9351_v50 }
 0x3a3   :  { %v9334_v53 = vld [vmem:[#allocation2 + $0xca0] sm:$0xf]  ;;  %v11295_v46 = vld [vmem:[#allocation2 + $0xdac] sm:$0xf0]  ;;  %v9735_v19 = vor.u32 %v11363_v48, %v9734_v10  ;;  %6388 = vmatpush.bf16.msra.mxu1 %v9479_v26 }
 0x3a4   :  { %v9462_v21 = vld [vmem:[#allocation2 + $0xda0] sm:$0xf]  ;;  %v11327_v51 = vld [vmem:[#allocation2 + $0xeac] sm:$0xf0]  ;;  %v9335_v57 = vor.u32 %v11263_v17, %v9334_v53  ;;  %6401 = vmatpush.bf16.msra.mxu2 %v9607_v29 }
 0x3a5   :  { %v9590_v47 = vld [vmem:[#allocation2 + $0xea0] sm:$0xf]  ;;  %v11359_v25 = vld [vmem:[#allocation2 + $0xfac] sm:$0xf0]  ;;  %v9463_v2 = vor.u32 %v11295_v46, %v9462_v21  ;;  %6414 = vmatpush.bf16.msra.mxu3 %v9735_v19 }
 0x3a6   :  { %v9718_v52 = vld [vmem:[#allocation2 + $0xfa0] sm:$0xf]  ;;  %v11259_v56 = vld [vmem:[#allocation2 + $0xc8c] sm:$0xf0]  ;;  %v9591_v55 = vor.u32 %v11327_v51, %v9590_v47  ;;  %6376 = vmatpush.bf16.msra.mxu0 %v9335_v57 }
 0x3a7   :  { %v9318_v22 = vld [vmem:[#allocation2 + $0xc80] sm:$0xf]  ;;  %v11291_v42 = vld [vmem:[#allocation2 + $0xd8c] sm:$0xf0]  ;;  %v9719_v12 = vor.u32 %v11359_v25, %v9718_v52  ;;  %6389 = vmatpush.bf16.msra.mxu1 %v9463_v2 }
 0x3a8   :  { %v9446_v27 = vld [vmem:[#allocation2 + $0xd80] sm:$0xf]  ;;  %v11323_v62 = vld [vmem:[#allocation2 + $0xe8c] sm:$0xf0]  ;;  %v9319_v60 = vor.u32 %v11259_v56, %v9318_v22  ;;  %6402 = vmatpush.bf16.msra.mxu2 %v9591_v55 }
 0x3a9   :  { %v9574_v61 = vld [vmem:[#allocation2 + $0xe80] sm:$0xf]  ;;  %v12772_v3 = vld.sshfl [vmem:[#allocation1 + $0x20] sm:$0xff pattern:$0x73625140]  ;;  %v9447_v63 = vor.u32 %v11291_v42, %v9446_v27  ;;  %6415 = vmatpush.bf16.msra.mxu3 %v9719_v12 }
 0x3aa   :  { %v12774_v9 = vld.sshfl [vmem:[#allocation1 + $0x30] sm:$0xff pattern:$0x73625140]  ;;  %v12776_v28 = vld.sshfl [vmem:[#allocation1 + $0x28] sm:$0xff pattern:$0x73625140]  ;;  %v9575_v0 = vor.u32 %v11323_v62, %v9574_v61  ;;  %6377 = vmatpush.bf16.msra.mxu0 %v9319_v60 }
 0x3ab   :  { %v12778_v32 = vld.sshfl [vmem:[#allocation1 + $0x38] sm:$0xff pattern:$0x73625140]  ;;  %v9702_v49 = vld [vmem:[#allocation2 + $0xf80] sm:$0xf]  ;;  %6390 = vmatpush.bf16.msra.mxu1 %v9447_v63 }
 0x3ac   :  { %v11355_v59 = vld [vmem:[#allocation2 + $0xf8c] sm:$0xf0]  ;;  %1440 = vst [vmem:[#allocation1 + $0x20] ss:$4 sm:$0xff] %v1409_v24  ;;  %v9302_v4 = vld [vmem:[#allocation2 + $0xc60] sm:$0xf]  ;;  %6403 = vmatpush.bf16.msra.mxu2 %v9575_v0 }
 0x3ad   :  { %v11255_v20 = vld [vmem:[#allocation2 + $0xc6c] sm:$0xf0]  ;;  %v9430_v58 = vld [vmem:[#allocation2 + $0xd60] sm:$0xf]  ;;  %v9703_v5 = vor.u32 %v11355_v59, %v9702_v49 }
 0x3ae   :  { %v11287_v1 = vld [vmem:[#allocation2 + $0xd6c] sm:$0xf0]  ;;  %v9558_v6 = vld [vmem:[#allocation2 + $0xe60] sm:$0xf]  ;;  %v9303_v13 = vor.u32 %v11255_v20, %v9302_v4 }
 0x3af   :  { %v11319_v7 = vld [vmem:[#allocation2 + $0xe6c] sm:$0xf0]  ;;  %v9686_v8 = vld [vmem:[#allocation2 + $0xf60] sm:$0xf]  ;;  %v9431_v14 = vor.u32 %v11287_v1, %v9430_v58  ;;  %6416 = vmatpush.bf16.msra.mxu3 %v9703_v5 }
 0x3b0   :  { %v11351_v11 = vld [vmem:[#allocation2 + $0xf6c] sm:$0xf0]  ;;  %v9559_v54 = vor.u32 %v11319_v7, %v9558_v6  ;;  %v9286_v15 = vld [vmem:[#allocation2 + $0xc40] sm:$0xf]  ;;  %6378 = vmatpush.bf16.msra.mxu0 %v9303_v13 }
 0x3b1   :  { %v11251_v18 = vld [vmem:[#allocation2 + $0xc4c] sm:$0xf0]  ;;  %v9414_v30 = vld [vmem:[#allocation2 + $0xd40] sm:$0xf]  ;;  %v9687_v34 = vor.u32 %v11351_v11, %v9686_v8  ;;  %6391 = vmatpush.bf16.msra.mxu1 %v9431_v14 }
 0x3b2   :  { %v11283_v39 = vld [vmem:[#allocation2 + $0xd4c] sm:$0xf0]  ;;  %v9542_v33 = vld [vmem:[#allocation2 + $0xe40] sm:$0xf]  ;;  %v9287_v53 = vor.u32 %v11251_v18, %v9286_v15  ;;  %6404 = vmatpush.bf16.msra.mxu2 %v9559_v54 }
 0x3b3   :  { %v11315_v10 = vld [vmem:[#allocation2 + $0xe4c] sm:$0xf0]  ;;  %v9670_v48 = vld [vmem:[#allocation2 + $0xf40] sm:$0xf]  ;;  %v9415_v26 = vor.u32 %v11283_v39, %v9414_v30  ;;  %6417 = vmatpush.bf16.msra.mxu3 %v9687_v34  ;;  %v12782_v39 = vpack.c.bf16 %v12772_v3, %v12772_v3  ;;  %v12794_v3 = vpack.c.bf16 %v12778_v32, %v12778_v32 }
 0x3b4   :  { %v11347_v50 = vld [vmem:[#allocation2 + $0xf4c] sm:$0xf0]  ;;  %v9543_v29 = vor.u32 %v11315_v10, %v9542_v33  ;;  %v9270_v17 = vld [vmem:[#allocation2 + $0xc20] sm:$0xf]  ;;  %6379 = vmatpush.bf16.msra.mxu0 %v9287_v53  ;;  %v12790_v53 = vpack.c.bf16 %v12776_v28, %v12776_v28 }
 0x3b5   :  { %v11247_v21 = vld [vmem:[#allocation2 + $0xc2c] sm:$0xf0]  ;;  %v9398_v46 = vld [vmem:[#allocation2 + $0xd20] sm:$0xf]  ;;  %v9671_v19 = vor.u32 %v11347_v50, %v9670_v48  ;;  %6392 = vmatpush.bf16.msra.mxu1 %v9415_v26  ;;  %v12786_v50 = vpack.c.bf16 %v12774_v9, %v12774_v9 }
 0x3b6   :  { %v11279_v47 = vld [vmem:[#allocation2 + $0xd2c] sm:$0xf0]  ;;  %v9526_v51 = vld [vmem:[#allocation2 + $0xe20] sm:$0xf]  ;;  %v9271_v56 = vor.u32 %v11247_v21, %v9270_v17  ;;  %6405 = vmatpush.bf16.msra.mxu2 %v9543_v29 }
 0x3b7   :  { %v11311_v52 = vld [vmem:[#allocation2 + $0xe2c] sm:$0xf0]  ;;  %v9654_v25 = vld [vmem:[#allocation2 + $0xf20] sm:$0xf]  ;;  %v9399_v61 = vor.u32 %v11279_v47, %v9398_v46  ;;  %6418 = vmatpush.bf16.msra.mxu3 %v9671_v19 }
 0x3b8   :  { %v11343_v22 = vld [vmem:[#allocation2 + $0xf2c] sm:$0xf0]  ;;  %v9254_v57 = vld [vmem:[#allocation2 + $0xc00] sm:$0xf]  ;;  %v9527_v62 = vor.u32 %v11311_v52, %v9526_v51  ;;  %6380 = vmatpush.bf16.msra.mxu0 %v9271_v56 }
 0x3b9   :  { %v11243_v27 = vld [vmem:[#allocation2 + $0xc0c] sm:$0xf0]  ;;  %v9382_v42 = vld [vmem:[#allocation2 + $0xd00] sm:$0xf]  ;;  %v9655_v12 = vor.u32 %v11343_v22, %v9654_v25  ;;  %6393 = vmatpush.bf16.msra.mxu1 %v9399_v61 }
 0x3ba   :  { %v11275_v24 = vld [vmem:[#allocation2 + $0xd0c] sm:$0xf0]  ;;  %v9510_v2 = vld [vmem:[#allocation2 + $0xe00] sm:$0xf]  ;;  %v9255_v4 = vor.u32 %v11243_v27, %v9254_v57  ;;  %6406 = vmatpush.bf16.msra.mxu2 %v9527_v62 }
 0x3bb   :  { %v11307_v55 = vld [vmem:[#allocation2 + $0xe0c] sm:$0xf0]  ;;  %v9638_v49 = vld [vmem:[#allocation2 + $0xf00] sm:$0xf]  ;;  %v9383_v1 = vor.u32 %v11275_v24, %v9382_v42  ;;  %6419 = vmatpush.bf16.msra.mxu3 %v9655_v12 }
 0x3bc   :  { %v11339_v59 = vld [vmem:[#allocation2 + $0xf0c] sm:$0xf0]  ;;  %v9878_v60 = vld [vmem:[#allocation2 + $0x10e0] sm:$0xf]  ;;  %v9511_v6 = vor.u32 %v11307_v55, %v9510_v2  ;;  %6381 = vmatpush.bf16.msra.mxu0 %v9255_v4 }
 0x3bd   :  { %v11399_v63 = vld [vmem:[#allocation2 + $0x10ec] sm:$0xf0]  ;;  %v10006_v0 = vld [vmem:[#allocation2 + $0x11e0] sm:$0xf]  ;;  %v9639_v11 = vor.u32 %v11339_v59, %v9638_v49  ;;  %6394 = vmatpush.bf16.msra.mxu1 %v9383_v1 }
 0x3be   :  { %v11431_v20 = vld [vmem:[#allocation2 + $0x11ec] sm:$0xf0]  ;;  %v10134_v58 = vld [vmem:[#allocation2 + $0x12e0] sm:$0xf]  ;;  %v9879_v13 = vor.u32 %v11399_v63, %v9878_v60  ;;  %6407 = vmatpush.bf16.msra.mxu2 %v9511_v6 }
 0x3bf   :  { %v11463_v5 = vld [vmem:[#allocation2 + $0x12ec] sm:$0xf0]  ;;  %v10262_v7 = vld [vmem:[#allocation2 + $0x13e0] sm:$0xf]  ;;  %v10007_v14 = vor.u32 %v11431_v20, %v10006_v0  ;;  %6420 = vmatpush.bf16.msra.mxu3 %v9639_v11  ;;  %6382 = vmatmul.bf16.vlgmr.msra.gmra.mxu0 %v12782_v39 }
 0x3c0   :  { %v11495_v8 = vld [vmem:[#allocation2 + $0x13ec] sm:$0xf0]  ;;  %v10135_v54 = vor.u32 %v11463_v5, %v10134_v58  ;;  %v9862_v15 = vld [vmem:[#allocation2 + $0x10c0] sm:$0xf]  ;;  %6426 = vmatpush.bf16.msrb.mxu0 %v9879_v13  ;;  %6395 = vmatmul.bf16.vlgmr.msra.gmra.mxu1 %v12790_v53 }
 0x3c1   :  { %v11395_v18 = vld [vmem:[#allocation2 + $0x10cc] sm:$0xf0]  ;;  %v9990_v30 = vld [vmem:[#allocation2 + $0x11c0] sm:$0xf]  ;;  %v10263_v34 = vor.u32 %v11495_v8, %v10262_v7  ;;  %6439 = vmatpush.bf16.msrb.mxu1 %v10007_v14  ;;  %6408 = vmatmul.bf16.vlgmr.msra.gmra.mxu2 %v12786_v50 }
 0x3c2   :  { %v11427_v33 = vld [vmem:[#allocation2 + $0x11cc] sm:$0xf0]  ;;  %v10118_v10 = vld [vmem:[#allocation2 + $0x12c0] sm:$0xf]  ;;  %v9863_v17 = vor.u32 %v11395_v18, %v9862_v15  ;;  %6452 = vmatpush.bf16.msrb.mxu2 %v10135_v54  ;;  %6421 = vmatmul.bf16.vlgmr.msra.gmra.mxu3 %v12794_v3 }
 0x3c3   :  { %v11459_v48 = vld [vmem:[#allocation2 + $0x12cc] sm:$0xf0]  ;;  %v10246_v26 = vld [vmem:[#allocation2 + $0x13c0] sm:$0xf]  ;;  %v9991_v21 = vor.u32 %v11427_v33, %v9990_v30  ;;  %6465 = vmatpush.bf16.msrb.mxu3 %v10263_v34 }
 0x3c4   :  { %v11491_v29 = vld [vmem:[#allocation2 + $0x13cc] sm:$0xf0]  ;;  %v10119_v46 = vor.u32 %v11459_v48, %v10118_v10  ;;  %v9846_v19 = vld [vmem:[#allocation2 + $0x10a0] sm:$0xf]  ;;  %6427 = vmatpush.bf16.msrb.mxu0 %v9863_v17 }
 0x3c5   :  { %v11391_v9 = vld [vmem:[#allocation2 + $0x10ac] sm:$0xf0]  ;;  %v9974_v47 = vld [vmem:[#allocation2 + $0x11a0] sm:$0xf]  ;;  %v10247_v28 = vor.u32 %v11491_v29, %v10246_v26  ;;  %6440 = vmatpush.bf16.msrb.mxu1 %v9991_v21 }
 0x3c6   :  { %v11423_v51 = vld [vmem:[#allocation2 + $0x11ac] sm:$0xf0]  ;;  %v10102_v52 = vld [vmem:[#allocation2 + $0x12a0] sm:$0xf]  ;;  %v9847_v56 = vor.u32 %v11391_v9, %v9846_v19  ;;  %6453 = vmatpush.bf16.msrb.mxu2 %v10119_v46 }
 0x3c7   :  { %v11455_v25 = vld [vmem:[#allocation2 + $0x12ac] sm:$0xf0]  ;;  %v10230_v32 = vld [vmem:[#allocation2 + $0x13a0] sm:$0xf]  ;;  %v9975_v57 = vor.u32 %v11423_v51, %v9974_v47  ;;  %6466 = vmatpush.bf16.msrb.mxu3 %v10247_v28 }
 0x3c8   :  { %v11487_v22 = vld [vmem:[#allocation2 + $0x13ac] sm:$0xf0]  ;;  %v10103_v27 = vor.u32 %v11455_v25, %v10102_v52  ;;  %v9830_v42 = vld [vmem:[#allocation2 + $0x1080] sm:$0xf]  ;;  %6428 = vmatpush.bf16.msrb.mxu0 %v9847_v56 }
 0x3c9   :  { %v11387_v61 = vld [vmem:[#allocation2 + $0x108c] sm:$0xf0]  ;;  %v9958_v62 = vld [vmem:[#allocation2 + $0x1180] sm:$0xf]  ;;  %v10231_v24 = vor.u32 %v11487_v22, %v10230_v32  ;;  %6441 = vmatpush.bf16.msrb.mxu1 %v9975_v57 }
 0x3ca   :  { %v11419_v2 = vld [vmem:[#allocation2 + $0x118c] sm:$0xf0]  ;;  %v10086_v55 = vld [vmem:[#allocation2 + $0x1280] sm:$0xf]  ;;  %v9831_v60 = vor.u32 %v11387_v61, %v9830_v42  ;;  %6454 = vmatpush.bf16.msrb.mxu2 %v10103_v27 }
 0x3cb   :  { %v11451_v12 = vld [vmem:[#allocation2 + $0x128c] sm:$0xf0]  ;;  %v10214_v49 = vld [vmem:[#allocation2 + $0x1380] sm:$0xf]  ;;  %v9959_v63 = vor.u32 %v11419_v2, %v9958_v62  ;;  %6467 = vmatpush.bf16.msrb.mxu3 %v10231_v24 }
 0x3cc   :  { %v11483_v59 = vld [vmem:[#allocation2 + $0x138c] sm:$0xf0]  ;;  %v10087_v0 = vor.u32 %v11451_v12, %v10086_v55  ;;  %v9814_v4 = vld [vmem:[#allocation2 + $0x1060] sm:$0xf]  ;;  %6429 = vmatpush.bf16.msrb.mxu0 %v9831_v60 }
 0x3cd   :  { %v11383_v20 = vld [vmem:[#allocation2 + $0x106c] sm:$0xf0]  ;;  %v9942_v58 = vld [vmem:[#allocation2 + $0x1160] sm:$0xf]  ;;  %v10215_v5 = vor.u32 %v11483_v59, %v10214_v49  ;;  %6442 = vmatpush.bf16.msrb.mxu1 %v9959_v63 }
 0x3ce   :  { %v11415_v1 = vld [vmem:[#allocation2 + $0x116c] sm:$0xf0]  ;;  %v10070_v6 = vld [vmem:[#allocation2 + $0x1260] sm:$0xf]  ;;  %v9815_v13 = vor.u32 %v11383_v20, %v9814_v4  ;;  %6455 = vmatpush.bf16.msrb.mxu2 %v10087_v0 }
 0x3cf   :  { %v11447_v7 = vld [vmem:[#allocation2 + $0x126c] sm:$0xf0]  ;;  %v10198_v8 = vld [vmem:[#allocation2 + $0x1360] sm:$0xf]  ;;  %v9943_v14 = vor.u32 %v11415_v1, %v9942_v58  ;;  %6468 = vmatpush.bf16.msrb.mxu3 %v10215_v5 }
 0x3d0   :  { %v11479_v11 = vld [vmem:[#allocation2 + $0x136c] sm:$0xf0]  ;;  %v10071_v54 = vor.u32 %v11447_v7, %v10070_v6  ;;  %v9798_v15 = vld [vmem:[#allocation2 + $0x1040] sm:$0xf]  ;;  %6430 = vmatpush.bf16.msrb.mxu0 %v9815_v13 }
 0x3d1   :  { %v11379_v18 = vld [vmem:[#allocation2 + $0x104c] sm:$0xf0]  ;;  %v9926_v30 = vld [vmem:[#allocation2 + $0x1140] sm:$0xf]  ;;  %v10199_v34 = vor.u32 %v11479_v11, %v10198_v8  ;;  %6443 = vmatpush.bf16.msrb.mxu1 %v9943_v14 }
 0x3d2   :  { %v11411_v33 = vld [vmem:[#allocation2 + $0x114c] sm:$0xf0]  ;;  %v10054_v10 = vld [vmem:[#allocation2 + $0x1240] sm:$0xf]  ;;  %v9799_v17 = vor.u32 %v11379_v18, %v9798_v15  ;;  %6456 = vmatpush.bf16.msrb.mxu2 %v10071_v54 }
 0x3d3   :  { %v11443_v48 = vld [vmem:[#allocation2 + $0x124c] sm:$0xf0]  ;;  %v10182_v26 = vld [vmem:[#allocation2 + $0x1340] sm:$0xf]  ;;  %v9927_v21 = vor.u32 %v11411_v33, %v9926_v30  ;;  %6469 = vmatpush.bf16.msrb.mxu3 %v10199_v34 }
 0x3d4   :  { %v11475_v29 = vld [vmem:[#allocation2 + $0x134c] sm:$0xf0]  ;;  %v10055_v46 = vor.u32 %v11443_v48, %v10054_v10  ;;  %v9782_v19 = vld [vmem:[#allocation2 + $0x1020] sm:$0xf]  ;;  %6431 = vmatpush.bf16.msrb.mxu0 %v9799_v17 }
 0x3d5   :  { %v11375_v9 = vld [vmem:[#allocation2 + $0x102c] sm:$0xf0]  ;;  %v9910_v47 = vld [vmem:[#allocation2 + $0x1120] sm:$0xf]  ;;  %v10183_v28 = vor.u32 %v11475_v29, %v10182_v26  ;;  %6444 = vmatpush.bf16.msrb.mxu1 %v9927_v21 }
 0x3d6   :  { %v11407_v51 = vld [vmem:[#allocation2 + $0x112c] sm:$0xf0]  ;;  %v10038_v52 = vld [vmem:[#allocation2 + $0x1220] sm:$0xf]  ;;  %v9783_v57 = vor.u32 %v11375_v9, %v9782_v19  ;;  %6457 = vmatpush.bf16.msrb.mxu2 %v10055_v46 }
 0x3d7   :  { %v11439_v25 = vld [vmem:[#allocation2 + $0x122c] sm:$0xf0]  ;;  %v10166_v32 = vld [vmem:[#allocation2 + $0x1320] sm:$0xf]  ;;  %v9911_v62 = vor.u32 %v11407_v51, %v9910_v47  ;;  %6470 = vmatpush.bf16.msrb.mxu3 %v10183_v28 }
 0x3d8   :  { %v11471_v22 = vld [vmem:[#allocation2 + $0x132c] sm:$0xf0]  ;;  %v9766_v56 = vld [vmem:[#allocation2 + $0x1000] sm:$0xf]  ;;  %v10039_v24 = vor.u32 %v11439_v25, %v10038_v52  ;;  %6432 = vmatpush.bf16.msrb.mxu0 %v9783_v57 }
 0x3d9   :  { %v11371_v27 = vld [vmem:[#allocation2 + $0x100c] sm:$0xf0]  ;;  %v9894_v42 = vld [vmem:[#allocation2 + $0x1100] sm:$0xf]  ;;  %v10167_v49 = vor.u32 %v11471_v22, %v10166_v32  ;;  %6445 = vmatpush.bf16.msrb.mxu1 %v9911_v62 }
 0x3da   :  { %v11403_v61 = vld [vmem:[#allocation2 + $0x110c] sm:$0xf0]  ;;  %v10022_v2 = vld [vmem:[#allocation2 + $0x1200] sm:$0xf]  ;;  %v9767_v58 = vor.u32 %v11371_v27, %v9766_v56  ;;  %6458 = vmatpush.bf16.msrb.mxu2 %v10039_v24 }
 0x3db   :  { %v11435_v55 = vld [vmem:[#allocation2 + $0x120c] sm:$0xf0]  ;;  %v10150_v12 = vld [vmem:[#allocation2 + $0x1300] sm:$0xf]  ;;  %v9895_v7 = vor.u32 %v11403_v61, %v9894_v42  ;;  %6471 = vmatpush.bf16.msrb.mxu3 %v10167_v49 }
 0x3dc   :  { %v11467_v59 = vld [vmem:[#allocation2 + $0x130c] sm:$0xf0]  ;;  %v10390_v60 = vld [vmem:[#allocation2 + $0x14e0] sm:$0xf]  ;;  %v10023_v8 = vor.u32 %v11435_v55, %v10022_v2  ;;  %6433 = vmatpush.bf16.msrb.mxu0 %v9767_v58 }
 0x3dd   :  { %v11527_v63 = vld [vmem:[#allocation2 + $0x14ec] sm:$0xf0]  ;;  %v10518_v0 = vld [vmem:[#allocation2 + $0x15e0] sm:$0xf]  ;;  %v10151_v14 = vor.u32 %v11467_v59, %v10150_v12  ;;  %6446 = vmatpush.bf16.msrb.mxu1 %v9895_v7 }
 0x3de   :  { %v11559_v4 = vld [vmem:[#allocation2 + $0x15ec] sm:$0xf0]  ;;  %v10646_v20 = vld [vmem:[#allocation2 + $0x16e0] sm:$0xf]  ;;  %v10391_v54 = vor.u32 %v11527_v63, %v10390_v60  ;;  %6459 = vmatpush.bf16.msrb.mxu2 %v10023_v8 }
 0x3df   :  { %v11591_v5 = vld [vmem:[#allocation2 + $0x16ec] sm:$0xf0]  ;;  %v10774_v1 = vld [vmem:[#allocation2 + $0x17e0] sm:$0xf]  ;;  %v10519_v30 = vor.u32 %v11559_v4, %v10518_v0  ;;  %6472 = vmatpush.bf16.msrb.mxu3 %v10151_v14 }
 0x3e0   :  { %v11623_v6 = vld [vmem:[#allocation2 + $0x17ec] sm:$0xf0]  ;;  %v1441_v11 = vld.sshfl [vmem:[#allocation1] sm:$0xff pattern:$0x73625140]  ;;  %v10647_v34 = vor.u32 %v11591_v5, %v10646_v20  ;;  %6478 = vmatpush.bf16.msra.mxu0 %v10391_v54 }
 0x3e1   :  { %v1443_v13 = vld.sshfl [vmem:[#allocation1 + $0x10] sm:$0xff pattern:$0x73625140]  ;;  %v1442_v15 = vld.sshfl [vmem:[#allocation1 + $0x8] sm:$0xff pattern:$0x73625140]  ;;  %v10775_v26 = vor.u32 %v11623_v6, %v10774_v1  ;;  %v12800_v29 = vpack.c.bf16 %v1441_v11, %v1441_v11  ;;  %6491 = vmatpush.bf16.msra.mxu1 %v10519_v30 }
 0x3e2   :  { %v1444_v18 = vld.sshfl [vmem:[#allocation1 + $0x18] sm:$0xff pattern:$0x73625140]  ;;  %v10374_v33 = vld [vmem:[#allocation2 + $0x14c0] sm:$0xf]  ;;  %v12802_v19 = vpack.c.bf16 %v1443_v13, %v1443_v13  ;;  %v12804_v9 = vpack.c.bf16 %v1442_v15, %v1442_v15  ;;  %6504 = vmatpush.bf16.msra.mxu2 %v10647_v34 }
 0x3e3   :  { %v11523_v10 = vld [vmem:[#allocation2 + $0x14cc] sm:$0xf0]  ;;  %v10502_v48 = vld [vmem:[#allocation2 + $0x15c0] sm:$0xf]  ;;  %v12806_v51 = vpack.c.bf16 %v1444_v18, %v1444_v18  ;;  %6517 = vmatpush.bf16.msra.mxu3 %v10775_v26  ;;  %6434 = vmatmul.bf16.vlgmr.msrb.gmra.mxu0 %v12800_v29 }
 0x3e4   :  { %v11555_v17 = vld [vmem:[#allocation2 + $0x15cc] sm:$0xf0]  ;;  %v10630_v21 = vld [vmem:[#allocation2 + $0x16c0] sm:$0xf]  ;;  %v10375_v52 = vor.u32 %v11523_v10, %v10374_v33  ;;  %6460 = vmatmul.bf16.vlgmr.msrb.gmra.mxu2 %v12802_v19  ;;  %6447 = vmatmul.bf16.vlgmr.msrb.gmra.mxu1 %v12804_v9 }
 0x3e5   :  { %v11587_v46 = vld [vmem:[#allocation2 + $0x16cc] sm:$0xf0]  ;;  %v10758_v47 = vld [vmem:[#allocation2 + $0x17c0] sm:$0xf]  ;;  %v10503_v25 = vor.u32 %v11555_v17, %v10502_v48  ;;  %6473 = vmatmul.bf16.vlgmr.msrb.gmra.mxu3 %v12806_v51 }
 0x3e6   :  { %v11619_v28 = vld [vmem:[#allocation2 + $0x17cc] sm:$0xf0]  ;;  %v10631_v32 = vor.u32 %v11587_v46, %v10630_v21  ;;  %v10358_v22 = vld [vmem:[#allocation2 + $0x14a0] sm:$0xf]  ;;  %6479 = vmatpush.bf16.msra.mxu0 %v10375_v52 }
 0x3e7   :  { %v11519_v56 = vld [vmem:[#allocation2 + $0x14ac] sm:$0xf0]  ;;  %v10486_v57 = vld [vmem:[#allocation2 + $0x15a0] sm:$0xf]  ;;  %v10759_v27 = vor.u32 %v11619_v28, %v10758_v47  ;;  %6492 = vmatpush.bf16.msra.mxu1 %v10503_v25  ;;  %v2285_v28 = vld [vmem:[#allocation14] sm:$0xf] }
 0x3e8   :  { %v11551_v42 = vld [vmem:[#allocation2 + $0x15ac] sm:$0xf0]  ;;  %v10614_v61 = vld [vmem:[#allocation2 + $0x16a0] sm:$0xf]  ;;  %v10359_v55 = vor.u32 %v11519_v56, %v10358_v22  ;;  %6505 = vmatpush.bf16.msra.mxu2 %v10631_v32 }
 0x3e9   :  { %v11583_v62 = vld [vmem:[#allocation2 + $0x16ac] sm:$0xf0]  ;;  %v10742_v24 = vld [vmem:[#allocation2 + $0x17a0] sm:$0xf]  ;;  %v10487_v12 = vor.u32 %v11551_v42, %v10486_v57  ;;  %6518 = vmatpush.bf16.msra.mxu3 %v10759_v27  ;;  %v2287_v42 = vperm.slane %v2285_v28, 0 }
 0x3ea   :  { %v11615_v2 = vld [vmem:[#allocation2 + $0x17ac] sm:$0xf0]  ;;  %v10615_v49 = vor.u32 %v11583_v62, %v10614_v61  ;;  %v10342_v59 = vld [vmem:[#allocation2 + $0x1480] sm:$0xf]  ;;  %6480 = vmatpush.bf16.msra.mxu0 %v10359_v55  ;;  %v10981_v28 = vld [vmem:[#allocation2 + $0x3e4] sm:$0xf] }
 0x3eb   :  { %v11515_v60 = vld [vmem:[#allocation2 + $0x148c] sm:$0xf0]  ;;  %v10470_v63 = vld [vmem:[#allocation2 + $0x1580] sm:$0xf]  ;;  %v10743_v0 = vor.u32 %v11615_v2, %v10742_v24  ;;  %6493 = vmatpush.bf16.msra.mxu1 %v10487_v12 }
 0x3ec   :  { %v11547_v4 = vld [vmem:[#allocation2 + $0x158c] sm:$0xf0]  ;;  %v10598_v20 = vld [vmem:[#allocation2 + $0x1680] sm:$0xf]  ;;  %v10343_v6 = vor.u32 %v11515_v60, %v10342_v59  ;;  %6506 = vmatpush.bf16.msra.mxu2 %v10615_v49 }
 0x3ed   :  { %v11579_v58 = vld [vmem:[#allocation2 + $0x168c] sm:$0xf0]  ;;  %v10726_v5 = vld [vmem:[#allocation2 + $0x1780] sm:$0xf]  ;;  %v10471_v8 = vor.u32 %v11547_v4, %v10470_v63  ;;  %6519 = vmatpush.bf16.msra.mxu3 %v10743_v0 }
 0x3ee   :  { %v11611_v1 = vld [vmem:[#allocation2 + $0x178c] sm:$0xf0]  ;;  %v10599_v11 = vor.u32 %v11579_v58, %v10598_v20  ;;  %v10326_v13 = vld [vmem:[#allocation2 + $0x1460] sm:$0xf]  ;;  %6481 = vmatpush.bf16.msra.mxu0 %v10343_v6  ;;  %v6227_v20 = vpop.f32.mrf.mxu0 }
 0x3ef   :  { %v1410_v7 = vld [vmem:[#allocation5 + $0x30] sm:$0x3]  ;;  %v10454_v54 = vld [vmem:[#allocation2 + $0x1560] sm:$0xf]  ;;  %v10727_v15 = vor.u32 %v11611_v1, %v10726_v5  ;;  %6494 = vmatpush.bf16.msra.mxu1 %v10471_v8  ;;  %v6240_v8 = vpop.f32.mrf.mxu1 }
 0x3f0   :  { %v11511_v14 = vld [vmem:[#allocation2 + $0x146c] sm:$0xf0]  ;;  %v10582_v30 = vld [vmem:[#allocation2 + $0x1660] sm:$0xf]  ;;  %1449 = vst [vmem:[#allocation1] ss:$4 sm:$0xff] %v1410_v7  ;;  %6507 = vmatpush.bf16.msra.mxu2 %v10599_v11  ;;  %v6228_v7 = vadd.f32 %v6227_v20, %v2287_v42 }
 0x3f1   :  { %v11543_v18 = vld [vmem:[#allocation2 + $0x156c] sm:$0xf0]  ;;  %v10710_v33 = vld [vmem:[#allocation2 + $0x1760] sm:$0xf]  ;;  %v10327_v48 = vor.u32 %v11511_v14, %v10326_v13  ;;  %6520 = vmatpush.bf16.msra.mxu3 %v10727_v15  ;;  %v7944_v20 = vld [vmem:[#allocation2 + $0x1d0] sm:$0xf0] }
 0x3f2   :  { %v11575_v34 = vld [vmem:[#allocation2 + $0x166c] sm:$0xf0]  ;;  %v10310_v26 = vld [vmem:[#allocation2 + $0x1440] sm:$0xf]  ;;  %v10455_v17 = vor.u32 %v11543_v18, %v10454_v54 }
 0x3f3   :  { %v11607_v10 = vld [vmem:[#allocation2 + $0x176c] sm:$0xf0]  ;;  %v10583_v21 = vor.u32 %v11575_v34, %v10582_v30  ;;  %v10438_v47 = vld [vmem:[#allocation2 + $0x1540] sm:$0xf]  ;;  %6482 = vmatpush.bf16.msra.mxu0 %v10327_v48  ;;  %v10917_v48 = vld [vmem:[#allocation2 + $0x1e4] sm:$0xf] }
 0x3f4   :  { %v11507_v46 = vld [vmem:[#allocation2 + $0x144c] sm:$0xf0]  ;;  %v10711_v52 = vor.u32 %v11607_v10, %v10710_v33  ;;  %v10566_v32 = vld [vmem:[#allocation2 + $0x1640] sm:$0xf]  ;;  %6495 = vmatpush.bf16.msra.mxu1 %v10455_v17  ;;  %v6241_v10 = vadd.f32 %v6240_v8, %v6228_v7  ;;  %v10949_v17 = vld [vmem:[#allocation2 + $0x2e4] sm:$0xf] }
 0x3f5   :  { %v11539_v25 = vld [vmem:[#allocation2 + $0x154c] sm:$0xf0]  ;;  %v10694_v56 = vld [vmem:[#allocation2 + $0x1740] sm:$0xf]  ;;  %v10311_v27 = vor.u32 %v11507_v46, %v10310_v26  ;;  %6508 = vmatpush.bf16.msra.mxu2 %v10583_v21  ;;  %v7960_v26 = vld [vmem:[#allocation2 + $0x1f0] sm:$0xf0]  ;;  %v6253_v21 = vpop.f32.mrf.mxu2 }
 0x3f6   :  { %v11571_v22 = vld [vmem:[#allocation2 + $0x164c] sm:$0xf0]  ;;  %v10439_v61 = vor.u32 %v11539_v25, %v10438_v47  ;;  %v10294_v24 = vld [vmem:[#allocation2 + $0x1420] sm:$0xf]  ;;  %6521 = vmatpush.bf16.msra.mxu3 %v10711_v52  ;;  %v8088_v47 = vld [vmem:[#allocation2 + $0x2f0] sm:$0xf0]  ;;  %v6254_v25 = vadd.f32 %v6253_v21, %v6241_v10 }
 0x3f7   :  { %v11603_v57 = vld [vmem:[#allocation2 + $0x174c] sm:$0xf0]  ;;  %v10567_v62 = vor.u32 %v11571_v22, %v10566_v32  ;;  %v10422_v55 = vld [vmem:[#allocation2 + $0x1520] sm:$0xf]  ;;  %6483 = vmatpush.bf16.msra.mxu0 %v10311_v27  ;;  %v8216_v52 = vld [vmem:[#allocation2 + $0x3f0] sm:$0xf0] }
 0x3f8   :  { %v11503_v2 = vld [vmem:[#allocation2 + $0x142c] sm:$0xf0]  ;;  %v10695_v12 = vor.u32 %v11603_v57, %v10694_v56  ;;  %v10550_v59 = vld [vmem:[#allocation2 + $0x1620] sm:$0xf]  ;;  %6496 = vmatpush.bf16.msra.mxu1 %v10439_v61  ;;  %v10977_v8 = vld [vmem:[#allocation2 + $0x3c4] sm:$0xf] }
 0x3f9   :  { %v11535_v49 = vld [vmem:[#allocation2 + $0x152c] sm:$0xf0]  ;;  %v10678_v63 = vld [vmem:[#allocation2 + $0x1720] sm:$0xf]  ;;  %v10295_v58 = vor.u32 %v11503_v2, %v10294_v24  ;;  %6509 = vmatpush.bf16.msra.mxu2 %v10567_v62  ;;  %v6266_v24 = vpop.f32.mrf.mxu3  ;;  %v7963_v2 = vor.u32 %v10917_v48, %v7960_v26  ;;  %v7928_v48 = vld [vmem:[#allocation2 + $0x1b0] sm:$0xf0] }
 0x3fa   :  { %v11567_v60 = vld [vmem:[#allocation2 + $0x162c] sm:$0xf0]  ;;  %v10278_v4 = vld [vmem:[#allocation2 + $0x1400] sm:$0xf]  ;;  %v10423_v11 = vor.u32 %v11535_v49, %v10422_v55  ;;  %6522 = vmatpush.bf16.msra.mxu3 %v10695_v12  ;;  %v8091_v55 = vor.u32 %v10949_v17, %v8088_v47  ;;  %v10941_v26 = vld [vmem:[#allocation2 + $0x2a4] sm:$0xf] }
 0x3fb   :  { %v11599_v0 = vld [vmem:[#allocation2 + $0x172c] sm:$0xf0]  ;;  %v10406_v1 = vld [vmem:[#allocation2 + $0x1500] sm:$0xf]  ;;  %v10551_v13 = vor.u32 %v11567_v60, %v10550_v59  ;;  %6484 = vmatpush.bf16.msra.mxu0 %v10295_v58  ;;  %v10913_v59 = vld [vmem:[#allocation2 + $0x1c4] sm:$0xf]  ;;  %v12812_v60 = vadd.f32 %v6266_v24, %v6254_v25 }
 0x3fc   :  { %v11499_v5 = vld [vmem:[#allocation2 + $0x140c] sm:$0xf0]  ;;  %v10534_v14 = vld [vmem:[#allocation2 + $0x1600] sm:$0xf]  ;;  %v10679_v18 = vor.u32 %v11599_v0, %v10678_v63  ;;  %6497 = vmatpush.bf16.msra.mxu1 %v10423_v11  ;;  %v6229_v63 = vpop.f32.mrf.mxu0  ;;  %v8219_v0 = vor.u32 %v10981_v28, %v8216_v52  ;;  %v10945_v58 = vld [vmem:[#allocation2 + $0x2c4] sm:$0xf] }
 0x3fd   :  { %v11531_v6 = vld [vmem:[#allocation2 + $0x150c] sm:$0xf0]  ;;  %v10662_v15 = vld [vmem:[#allocation2 + $0x1700] sm:$0xf]  ;;  %v10279_v46 = vor.u32 %v11499_v5, %v10278_v4  ;;  %6510 = vmatpush.bf16.msra.mxu2 %v10551_v13  ;;  %v8072_v5 = vld [vmem:[#allocation2 + $0x2d0] sm:$0xf0] }
 0x3fe   :  { %v11563_v54 = vld [vmem:[#allocation2 + $0x160c] sm:$0xf0]  ;;  %v10838_v34 = vld [vmem:[#allocation2 + $0x1860] sm:$0xf]  ;;  %v10407_v32 = vor.u32 %v11531_v6, %v10406_v1  ;;  %6523 = vmatpush.bf16.msra.mxu3 %v10679_v18  ;;  %v6242_v1 = vpop.f32.mrf.mxu1  ;;  %v8200_v11 = vld [vmem:[#allocation2 + $0x3d0] sm:$0xf0] }
 0x3ff   :  { %v11595_v30 = vld [vmem:[#allocation2 + $0x170c] sm:$0xf0]  ;;  %v10535_v22 = vor.u32 %v11563_v54, %v10534_v14  ;;  %v1445_v56 = vld.sshfl [vmem:[#allocation1 + $0x20] sm:$0xff pattern:$0x73625140]  ;;  %6485 = vmatpush.bf16.msra.mxu0 %v10279_v46  ;;  %v7947_v54 = vor.u32 %v10913_v59, %v7944_v20  ;;  %v8203_v10 = vor.u32 %v10977_v8, %v8200_v11 }
 0x400   :  { %v11639_v33 = vld [vmem:[#allocation2 + $0x186c] sm:$0xf0]  ;;  %v1447_v57 = vld.sshfl [vmem:[#allocation1 + $0x30] sm:$0xff pattern:$0x73625140]  ;;  %v10663_v27 = vor.u32 %v11595_v30, %v10662_v15  ;;  %v12814_v4 = vpack.c.bf16 %v1445_v56, %v1445_v56  ;;  %6498 = vmatpush.bf16.msra.mxu1 %v10407_v32  ;;  %v8075_v15 = vor.u32 %v10945_v58, %v8072_v5 }
 0x401   :  { %v10839_v42 = vor.u32 %v11639_v33, %v10838_v34  ;;  %v1446_v61 = vld.sshfl [vmem:[#allocation1 + $0x28] sm:$0xff pattern:$0x73625140]  ;;  %v1448_v62 = vld.sshfl [vmem:[#allocation1 + $0x38] sm:$0xff pattern:$0x73625140]  ;;  %6511 = vmatpush.bf16.msra.mxu2 %v10535_v22  ;;  %v12816_v6 = vpack.c.bf16 %v1447_v57, %v1447_v57  ;;  %v6255_v33 = vpop.f32.mrf.mxu2  ;;  %v6268_v52 = vpop.f32.mrf.mxu3 }
 0x402   :  { %v10822_v12 = vld [vmem:[#allocation2 + $0x1840] sm:$0xf]  ;;  %v11635_v49 = vld [vmem:[#allocation2 + $0x184c] sm:$0xf0]  ;;  %v12818_v7 = vpack.c.bf16 %v1446_v61, %v1446_v61  ;;  %6524 = vmatpush.bf16.msra.mxu3 %v10663_v27  ;;  %v12820_v13 = vpack.c.bf16 %v1448_v62, %v1448_v62  ;;  %v10909_v34 = vld [vmem:[#allocation2 + $0x1a4] sm:$0xf]  ;;  %6486 = vmatmul.bf16.vlgmr.msra.gmra.mxu0 %v12814_v4 }
 0x403   :  { %6534 = vmatpush.bf16.msrb.mxu0 %v10839_v42  ;;  %v10823_v14 = vor.u32 %v11635_v49, %v10822_v12  ;;  %v10806_v18 = vld [vmem:[#allocation2 + $0x1820] sm:$0xf]  ;;  %v11631_v30 = vld [vmem:[#allocation2 + $0x182c] sm:$0xf0]  ;;  %v8056_v17 = vld [vmem:[#allocation2 + $0x2b0] sm:$0xf0]  ;;  %v7931_v25 = vor.u32 %v10909_v34, %v7928_v48 }
 0x404   :  { %6556 = vmatpush.bf16.msrb.mxu1 %v7963_v2  ;;  %6512 = vmatmul.bf16.vlgmr.msra.gmra.mxu2 %v12816_v6  ;;  %v10973_v21 = vld [vmem:[#allocation2 + $0x3a4] sm:$0xf]  ;;  %v8184_v46 = vld [vmem:[#allocation2 + $0x3b0] sm:$0xf0]  ;;  %v10807_v47 = vor.u32 %v11631_v30, %v10806_v18  ;;  %v10790_v28 = vld [vmem:[#allocation2 + $0x1800] sm:$0xf]  ;;  %v8059_v32 = vor.u32 %v10941_v26, %v8056_v17  ;;  %v6279_v49 = vpop.f32.mrf.mxu0 }
 0x405   :  { %6569 = vmatpush.bf16.msrb.mxu2 %v8091_v55  ;;  %6499 = vmatmul.bf16.vlgmr.msra.gmra.mxu1 %v12818_v7  ;;  %v11627_v22 = vld [vmem:[#allocation2 + $0x180c] sm:$0xf0]  ;;  %v10905_v56 = vld [vmem:[#allocation2 + $0x184] sm:$0xf]  ;;  %v7912_v57 = vld [vmem:[#allocation2 + $0x190] sm:$0xf0]  ;;  %v8187_v27 = vor.u32 %v10973_v21, %v8184_v46  ;;  %v6280_v58 = vadd.f32 %v6279_v49, %v12812_v60 }
 0x406   :  { %6582 = vmatpush.bf16.msrb.mxu3 %v8219_v0  ;;  %v10937_v42 = vld [vmem:[#allocation2 + $0x284] sm:$0xf]  ;;  %v8040_v61 = vld [vmem:[#allocation2 + $0x290] sm:$0xf0]  ;;  %v10791_v12 = vor.u32 %v11627_v22, %v10790_v28  ;;  %v7915_v59 = vor.u32 %v10905_v56, %v7912_v57  ;;  %v6292_v5 = vpop.f32.mrf.mxu1 }
 0x407   :  { %6525 = vmatmul.bf16.vlgmr.msra.gmra.mxu3 %v12820_v13  ;;  %6535 = vmatpush.bf16.msrb.mxu0 %v10823_v14  ;;  %v10969_v62 = vld [vmem:[#allocation2 + $0x384] sm:$0xf]  ;;  %v8168_v24 = vld [vmem:[#allocation2 + $0x390] sm:$0xf0]  ;;  %v8043_v63 = vor.u32 %v10937_v42, %v8040_v61  ;;  %v6293_v34 = vadd.f32 %v6292_v5, %v6280_v58 }
 0x408   :  { %6557 = vmatpush.bf16.msrb.mxu1 %v7947_v54  ;;  %v10885_v2 = vld [vmem:[#allocation2 + $0xe4] sm:$0xf]  ;;  %v7832_v55 = vld [vmem:[#allocation2 + $0xf0] sm:$0xf0]  ;;  %v8171_v1 = vor.u32 %v10969_v62, %v8168_v24 }
 0x409   :  { %6570 = vmatpush.bf16.msrb.mxu2 %v8075_v15  ;;  %v10901_v0 = vld [vmem:[#allocation2 + $0x164] sm:$0xf]  ;;  %v7896_v20 = vld [vmem:[#allocation2 + $0x170] sm:$0xf0]  ;;  %v7835_v8 = vor.u32 %v10885_v2, %v7832_v55  ;;  %v6305_v60 = vpop.f32.mrf.mxu2 }
 0x40a   :  { %6583 = vmatpush.bf16.msrb.mxu3 %v8203_v10  ;;  %v10933_v11 = vld [vmem:[#allocation2 + $0x264] sm:$0xf]  ;;  %v8024_v14 = vld [vmem:[#allocation2 + $0x270] sm:$0xf0]  ;;  %v7899_v10 = vor.u32 %v10901_v0, %v7896_v20 }
 0x40b   :  { %6536 = vmatpush.bf16.msrb.mxu0 %v10807_v47  ;;  %v10965_v54 = vld [vmem:[#allocation2 + $0x364] sm:$0xf]  ;;  %v8152_v15 = vld [vmem:[#allocation2 + $0x370] sm:$0xf0]  ;;  %v8027_v48 = vor.u32 %v10933_v11, %v8024_v14 }
 0x40c   :  { %6558 = vmatpush.bf16.msrb.mxu1 %v7931_v25  ;;  %v10881_v18 = vld [vmem:[#allocation2 + $0xc4] sm:$0xf]  ;;  %v7816_v30 = vld [vmem:[#allocation2 + $0xd0] sm:$0xf0]  ;;  %v8155_v21 = vor.u32 %v10965_v54, %v8152_v15  ;;  %v6306_v25 = vadd.f32 %v6305_v60, %v6293_v34  ;;  %v6281_v61 = vpop.f32.mrf.mxu0 }
 0x40d   :  { %6571 = vmatpush.bf16.msrb.mxu2 %v8059_v32  ;;  %v1450_v33 = vld.sshfl [vmem:[#allocation1] sm:$0xff pattern:$0x73625140]  ;;  %v10897_v26 = vld [vmem:[#allocation2 + $0x144] sm:$0xf]  ;;  %v7819_v46 = vor.u32 %v10881_v18, %v7816_v30  ;;  %v6318_v32 = vpop.f32.mrf.mxu3 }
 0x40e   :  { %6584 = vmatpush.bf16.msrb.mxu3 %v8187_v27  ;;  %v7880_v17 = vld [vmem:[#allocation2 + $0x150] sm:$0xf0]  ;;  %v10929_v47 = vld [vmem:[#allocation2 + $0x244] sm:$0xf]  ;;  %v12827_v22 = vpack.c.bf16 %v1450_v33, %v1450_v33  ;;  %v12829_v42 = vadd.f32 %v6318_v32, %v6306_v25 }
 0x40f   :  { %6537 = vmatpush.bf16.msrb.mxu0 %v10791_v12  ;;  %v8008_v28 = vld [vmem:[#allocation2 + $0x250] sm:$0xf0]  ;;  %v10961_v52 = vld [vmem:[#allocation2 + $0x344] sm:$0xf]  ;;  %v7883_v62 = vor.u32 %v10897_v26, %v7880_v17  ;;  %v6294_v12 = vpop.f32.mrf.mxu1 }
 0x410   :  { %6559 = vmatpush.bf16.msrb.mxu1 %v7915_v59  ;;  %v8136_v56 = vld [vmem:[#allocation2 + $0x350] sm:$0xf0]  ;;  %v10877_v57 = vld [vmem:[#allocation2 + $0xa4] sm:$0xf]  ;;  %v8011_v24 = vor.u32 %v10929_v47, %v8008_v28 }
 0x411   :  { %6572 = vmatpush.bf16.msrb.mxu2 %v8043_v63  ;;  %v7800_v27 = vld [vmem:[#allocation2 + $0xb0] sm:$0xf0]  ;;  %v10893_v2 = vld [vmem:[#allocation2 + $0x124] sm:$0xf]  ;;  %v8139_v49 = vor.u32 %v10961_v52, %v8136_v56  ;;  %v6307_v18 = vpop.f32.mrf.mxu2 }
 0x412   :  { %6585 = vmatpush.bf16.msrb.mxu3 %v8171_v1  ;;  %v7864_v55 = vld [vmem:[#allocation2 + $0x130] sm:$0xf0]  ;;  %v7803_v59 = vor.u32 %v10877_v57, %v7800_v27  ;;  %v10925_v63 = vld [vmem:[#allocation2 + $0x224] sm:$0xf]  ;;  %10852 = vmatmul.msk.bf16.vlgmr.msrb.gmra.mxu0 %vm491_vm2, %v12827_v22 }
 0x413   :  { %6543 = vmatpush.bf16.msra.mxu0 %v7835_v8  ;;  %v7992_v0 = vld [vmem:[#allocation2 + $0x230] sm:$0xf0]  ;;  %v10957_v20 = vld [vmem:[#allocation2 + $0x324] sm:$0xf]  ;;  %v7867_v8 = vor.u32 %v10893_v2, %v7864_v55 }
 0x414   :  { %6560 = vmatpush.bf16.msrb.mxu1 %v7899_v10  ;;  %v8120_v58 = vld [vmem:[#allocation2 + $0x330] sm:$0xf0]  ;;  %v10873_v5 = vld [vmem:[#allocation2 + $0x84] sm:$0xf]  ;;  %v7995_v11 = vor.u32 %v10925_v63, %v7992_v0 }
 0x415   :  { %6573 = vmatpush.bf16.msrb.mxu2 %v8027_v48  ;;  %v7784_v1 = vld [vmem:[#allocation2 + $0x90] sm:$0xf0]  ;;  %v10889_v14 = vld [vmem:[#allocation2 + $0x104] sm:$0xf]  ;;  %v8123_v30 = vor.u32 %v10957_v20, %v8120_v58  ;;  %v6320_v26 = vpop.f32.mrf.mxu3 }
 0x416   :  { %6586 = vmatpush.bf16.msrb.mxu3 %v8155_v21  ;;  %v7848_v54 = vld [vmem:[#allocation2 + $0x110] sm:$0xf0]  ;;  %v10921_v15 = vld [vmem:[#allocation2 + $0x204] sm:$0xf]  ;;  %v7787_v34 = vor.u32 %v10873_v5, %v7784_v1 }
 0x417   :  { %6544 = vmatpush.bf16.msra.mxu0 %v7819_v46  ;;  %v7976_v33 = vld [vmem:[#allocation2 + $0x210] sm:$0xf0]  ;;  %v10953_v10 = vld [vmem:[#allocation2 + $0x304] sm:$0xf]  ;;  %v7851_v52 = vor.u32 %v10889_v14, %v7848_v54 }
 0x418   :  { %6561 = vmatpush.bf16.msrb.mxu1 %v7883_v62  ;;  %v8104_v48 = vld [vmem:[#allocation2 + $0x310] sm:$0xf0]  ;;  %v10869_v17 = vld [vmem:[#allocation2 + $0x64] sm:$0xf]  ;;  %v7979_v25 = vor.u32 %v10921_v15, %v7976_v33 }
 0x419   :  { %6574 = vmatpush.bf16.msrb.mxu2 %v8011_v24  ;;  %v7768_v60 = vld [vmem:[#allocation2 + $0x70] sm:$0xf0]  ;;  %v11045_v21 = vld [vmem:[#allocation2 + $0x5e4] sm:$0xf]  ;;  %v8107_v57 = vor.u32 %v10953_v10, %v8104_v48 }
 0x41a   :  { %6587 = vmatpush.bf16.msrb.mxu3 %v8139_v49  ;;  %v8472_v46 = vld [vmem:[#allocation2 + $0x5f0] sm:$0xf0]  ;;  %v11077_v47 = vld [vmem:[#allocation2 + $0x6e4] sm:$0xf]  ;;  %v7771_v27 = vor.u32 %v10869_v17, %v7768_v60 }
 0x41b   :  { %6545 = vmatpush.bf16.msra.mxu0 %v7803_v59  ;;  %v8600_v28 = vld [vmem:[#allocation2 + $0x6f0] sm:$0xf0]  ;;  %v11109_v32 = vld [vmem:[#allocation2 + $0x7e4] sm:$0xf]  ;;  %v8475_v61 = vor.u32 %v11045_v21, %v8472_v46 }
 0x41c   :  { %6562 = vmatpush.bf16.msrb.mxu1 %v7867_v8  ;;  %v8728_v56 = vld [vmem:[#allocation2 + $0x7f0] sm:$0xf0]  ;;  %v8603_v62 = vor.u32 %v11077_v47, %v8600_v28  ;;  %v10865_v24 = vld [vmem:[#allocation2 + $0x44] sm:$0xf] }
 0x41d   :  { %6575 = vmatpush.bf16.msrb.mxu2 %v7995_v11  ;;  %v7752_v2 = vld [vmem:[#allocation2 + $0x50] sm:$0xf0]  ;;  %v11041_v55 = vld [vmem:[#allocation2 + $0x5c4] sm:$0xf]  ;;  %v8731_v12 = vor.u32 %v11109_v32, %v8728_v56  ;;  %v6331_v32 = vpop.f32.mrf.mxu0 }
 0x41e   :  { %6588 = vmatpush.bf16.msrb.mxu3 %v8123_v30  ;;  %v8456_v49 = vld [vmem:[#allocation2 + $0x5d0] sm:$0xf0]  ;;  %v11073_v59 = vld [vmem:[#allocation2 + $0x6c4] sm:$0xf]  ;;  %v7755_v58 = vor.u32 %v10865_v24, %v7752_v2  ;;  %v6344_v24 = vpop.f32.mrf.mxu1 }
 0x41f   :  { %6546 = vmatpush.bf16.msra.mxu0 %v7787_v34  ;;  %v8584_v63 = vld [vmem:[#allocation2 + $0x6d0] sm:$0xf0]  ;;  %v11105_v0 = vld [vmem:[#allocation2 + $0x7c4] sm:$0xf]  ;;  %v8459_v5 = vor.u32 %v11041_v55, %v8456_v49 }
 0x420   :  { %6563 = vmatpush.bf16.msrb.mxu1 %v7851_v52  ;;  %v8712_v20 = vld [vmem:[#allocation2 + $0x7d0] sm:$0xf0]  ;;  %v8587_v1 = vor.u32 %v11073_v59, %v8584_v63  ;;  %v10861_v8 = vld [vmem:[#allocation2 + $0x24] sm:$0xf] }
 0x421   :  { %6576 = vmatpush.bf16.msrb.mxu2 %v7979_v25  ;;  %v7736_v11 = vld [vmem:[#allocation2 + $0x30] sm:$0xf0]  ;;  %v11037_v14 = vld [vmem:[#allocation2 + $0x5a4] sm:$0xf]  ;;  %v8715_v54 = vor.u32 %v11105_v0, %v8712_v20 }
 0x422   :  { %6589 = vmatpush.bf16.msrb.mxu3 %v8107_v57  ;;  %v8440_v15 = vld [vmem:[#allocation2 + $0x5b0] sm:$0xf0]  ;;  %v11069_v18 = vld [vmem:[#allocation2 + $0x6a4] sm:$0xf]  ;;  %v7739_v10 = vor.u32 %v10861_v8, %v7736_v11 }
 0x423   :  { %6547 = vmatpush.bf16.msra.mxu0 %v7771_v27  ;;  %v8568_v30 = vld [vmem:[#allocation2 + $0x6b0] sm:$0xf0]  ;;  %6564 = vmatmul.bf16.vlgmr.msrb.gmra.mxu1 %v12726_v45  ;;  %v11101_v34 = vld [vmem:[#allocation2 + $0x7a4] sm:$0xf]  ;;  %v8443_v26 = vor.u32 %v11037_v14, %v8440_v15 }
 0x424   :  { %6608 = vmatpush.bf16.msra.mxu1 %v8475_v61  ;;  %v8696_v33 = vld [vmem:[#allocation2 + $0x7b0] sm:$0xf0]  ;;  %6577 = vmatmul.bf16.vlgmr.msrb.gmra.mxu2 %v12720_v35  ;;  %v10857_v48 = vld [vmem:[#allocation2 + $0x4] sm:$0xf]  ;;  %v8571_v17 = vor.u32 %v11069_v18, %v8568_v30  ;;  %v6332_v61 = vadd.f32 %v6331_v32, %v12829_v42  ;;  %v6357_v30 = vpop.f32.mrf.mxu2 }
 0x425   :  { %6621 = vmatpush.bf16.msra.mxu2 %v8603_v62  ;;  %6590 = vmatmul.bf16.vlgmr.msrb.gmra.mxu3 %v12724_v44  ;;  %v7720_v60 = vld [vmem:[#allocation2 + $0x10] sm:$0xf0]  ;;  %v11033_v21 = vld [vmem:[#allocation2 + $0x584] sm:$0xf]  ;;  %v8699_v47 = vor.u32 %v11101_v34, %v8696_v33 }
 0x426   :  { %6634 = vmatpush.bf16.msra.mxu3 %v8731_v12  ;;  %v8424_v46 = vld [vmem:[#allocation2 + $0x590] sm:$0xf0]  ;;  %v11065_v28 = vld [vmem:[#allocation2 + $0x684] sm:$0xf]  ;;  %v7723_v62 = vor.u32 %v10857_v48, %v7720_v60  ;;  %v6345_v63 = vadd.f32 %v6344_v24, %v6332_v61 }
 0x427   :  { %6548 = vmatpush.bf16.msra.mxu0 %v7755_v58  ;;  %v8552_v52 = vld [vmem:[#allocation2 + $0x690] sm:$0xf0]  ;;  %v11097_v25 = vld [vmem:[#allocation2 + $0x784] sm:$0xf]  ;;  %v8427_v2 = vor.u32 %v11033_v21, %v8424_v46 }
 0x428   :  { %6609 = vmatpush.bf16.msra.mxu1 %v8459_v5  ;;  %v8680_v56 = vld [vmem:[#allocation2 + $0x790] sm:$0xf0]  ;;  %v11013_v57 = vld [vmem:[#allocation2 + $0x4e4] sm:$0xf]  ;;  %v8555_v55 = vor.u32 %v11065_v28, %v8552_v52  ;;  %v6346_v28 = vpop.f32.mrf.mxu1 }
 0x429   :  { %6622 = vmatpush.bf16.msra.mxu2 %v8587_v1  ;;  %v8344_v27 = vld [vmem:[#allocation2 + $0x4f0] sm:$0xf0]  ;;  %v11029_v12 = vld [vmem:[#allocation2 + $0x564] sm:$0xf]  ;;  %v8683_v59 = vor.u32 %v11097_v25, %v8680_v56 }
 0x42a   :  { %6635 = vmatpush.bf16.msra.mxu3 %v8715_v54  ;;  %v8408_v49 = vld [vmem:[#allocation2 + $0x570] sm:$0xf0]  ;;  %v8347_v0 = vor.u32 %v11013_v57, %v8344_v27  ;;  %v11061_v20 = vld [vmem:[#allocation2 + $0x664] sm:$0xf] }
 0x42b   :  { %6549 = vmatpush.bf16.msra.mxu0 %v7739_v10  ;;  %v8536_v58 = vld [vmem:[#allocation2 + $0x670] sm:$0xf0]  ;;  %v11093_v5 = vld [vmem:[#allocation2 + $0x764] sm:$0xf]  ;;  %v8411_v42 = vor.u32 %v11029_v12, %v8408_v49 }
 0x42c   :  { %6610 = vmatpush.bf16.msra.mxu1 %v8443_v26  ;;  %v8664_v1 = vld [vmem:[#allocation2 + $0x770] sm:$0xf0]  ;;  %v11009_v8 = vld [vmem:[#allocation2 + $0x4c4] sm:$0xf]  ;;  %v8539_v14 = vor.u32 %v11061_v20, %v8536_v58  ;;  %v6358_v26 = vadd.f32 %v6357_v30, %v6345_v63 }
 0x42d   :  { %6623 = vmatpush.bf16.msra.mxu2 %v8571_v17  ;;  %v8328_v11 = vld [vmem:[#allocation2 + $0x4d0] sm:$0xf0]  ;;  %v11025_v54 = vld [vmem:[#allocation2 + $0x544] sm:$0xf]  ;;  %v8667_v18 = vor.u32 %v11093_v5, %v8664_v1  ;;  %v6370_v17 = vpop.f32.mrf.mxu3 }
 0x42e   :  { %6636 = vmatpush.bf16.msra.mxu3 %v8699_v47  ;;  %v8392_v15 = vld [vmem:[#allocation2 + $0x550] sm:$0xf0]  ;;  %v8331_v34 = vor.u32 %v11009_v8, %v8328_v11  ;;  %v11057_v33 = vld [vmem:[#allocation2 + $0x644] sm:$0xf]  ;;  %v6333_v47 = vpop.f32.mrf.mxu0  ;;  %v12838_v52 = vadd.f32 %v6370_v17, %v6358_v26 }
 0x42f   :  { %6550 = vmatpush.bf16.msra.mxu0 %v7723_v62  ;;  %v8520_v10 = vld [vmem:[#allocation2 + $0x650] sm:$0xf0]  ;;  %v11089_v48 = vld [vmem:[#allocation2 + $0x744] sm:$0xf]  ;;  %v8395_v25 = vor.u32 %v11025_v54, %v8392_v15 }
 0x430   :  { %6611 = vmatpush.bf16.msra.mxu1 %v8427_v2  ;;  %v8648_v60 = vld [vmem:[#allocation2 + $0x750] sm:$0xf0]  ;;  %v11005_v21 = vld [vmem:[#allocation2 + $0x4a4] sm:$0xf]  ;;  %v8523_v32 = vor.u32 %v11057_v33, %v8520_v10 }
 0x431   :  { %6624 = vmatpush.bf16.msra.mxu2 %v8555_v55  ;;  %v8312_v46 = vld [vmem:[#allocation2 + $0x4b0] sm:$0xf0]  ;;  %v11021_v56 = vld [vmem:[#allocation2 + $0x524] sm:$0xf]  ;;  %v8651_v27 = vor.u32 %v11089_v48, %v8648_v60 }
 0x432   :  { %6637 = vmatpush.bf16.msra.mxu3 %v8683_v59  ;;  %6551 = vmatmul.bf16.vlgmr.msra.gmra.mxu0 %v12722_v38  ;;  %v8376_v57 = vld [vmem:[#allocation2 + $0x530] sm:$0xf0]  ;;  %v8315_v61 = vor.u32 %v11005_v21, %v8312_v46  ;;  %v11053_v62 = vld [vmem:[#allocation2 + $0x624] sm:$0xf] }
 0x433   :  { %6595 = vmatpush.bf16.msrb.mxu0 %v8347_v0  ;;  %v8504_v24 = vld [vmem:[#allocation2 + $0x630] sm:$0xf0]  ;;  %v11085_v2 = vld [vmem:[#allocation2 + $0x724] sm:$0xf]  ;;  %v8379_v59 = vor.u32 %v11021_v56, %v8376_v57 }
 0x434   :  { %6612 = vmatpush.bf16.msra.mxu1 %v8411_v42  ;;  %v8632_v55 = vld [vmem:[#allocation2 + $0x730] sm:$0xf0]  ;;  %v11001_v12 = vld [vmem:[#allocation2 + $0x484] sm:$0xf]  ;;  %v8507_v63 = vor.u32 %v11053_v62, %v8504_v24 }
 0x435   :  { %6625 = vmatpush.bf16.msra.mxu2 %v8539_v14  ;;  %v8296_v49 = vld [vmem:[#allocation2 + $0x490] sm:$0xf0]  ;;  %v11017_v0 = vld [vmem:[#allocation2 + $0x504] sm:$0xf]  ;;  %v8635_v5 = vor.u32 %v11085_v2, %v8632_v55  ;;  %v6359_v14 = vpop.f32.mrf.mxu2  ;;  %v6372_v30 = vpop.f32.mrf.mxu3 }
 0x436   :  { %6638 = vmatpush.bf16.msra.mxu3 %v8667_v18  ;;  %v8360_v20 = vld [vmem:[#allocation2 + $0x510] sm:$0xf0]  ;;  %v11049_v58 = vld [vmem:[#allocation2 + $0x604] sm:$0xf]  ;;  %v8299_v1 = vor.u32 %v11001_v12, %v8296_v49 }
 0x437   :  { %6596 = vmatpush.bf16.msrb.mxu0 %v8331_v34  ;;  %v8488_v8 = vld [vmem:[#allocation2 + $0x610] sm:$0xf0]  ;;  %v11081_v11 = vld [vmem:[#allocation2 + $0x704] sm:$0xf]  ;;  %v8363_v48 = vor.u32 %v11017_v0, %v8360_v20 }
 0x438   :  { %6613 = vmatpush.bf16.msra.mxu1 %v8395_v25  ;;  %v8616_v42 = vld [vmem:[#allocation2 + $0x710] sm:$0xf0]  ;;  %v10997_v54 = vld [vmem:[#allocation2 + $0x464] sm:$0xf]  ;;  %v8491_v26 = vor.u32 %v11049_v58, %v8488_v8 }
 0x439   :  { %6626 = vmatpush.bf16.msra.mxu2 %v8523_v32  ;;  %v8280_v15 = vld [vmem:[#allocation2 + $0x470] sm:$0xf0]  ;;  %v11173_v18 = vld [vmem:[#allocation2 + $0x9e4] sm:$0xf]  ;;  %v8619_v21 = vor.u32 %v11081_v11, %v8616_v42 }
 0x43a   :  { %6639 = vmatpush.bf16.msra.mxu3 %v8651_v27  ;;  %v8984_v34 = vld [vmem:[#allocation2 + $0x9f0] sm:$0xf0]  ;;  %v11205_v33 = vld [vmem:[#allocation2 + $0xae4] sm:$0xf]  ;;  %v8283_v46 = vor.u32 %v10997_v54, %v8280_v15 }
 0x43b   :  { %6597 = vmatpush.bf16.msrb.mxu0 %v8315_v61  ;;  %v9112_v10 = vld [vmem:[#allocation2 + $0xaf0] sm:$0xf0]  ;;  %v11237_v17 = vld [vmem:[#allocation2 + $0xbe4] sm:$0xf]  ;;  %v8987_v47 = vor.u32 %v11173_v18, %v8984_v34 }
 0x43c   :  { %6614 = vmatpush.bf16.msra.mxu1 %v8379_v59  ;;  %v9240_v60 = vld [vmem:[#allocation2 + $0xbf0] sm:$0xf0]  ;;  %v9115_v28 = vor.u32 %v11205_v33, %v9112_v10  ;;  %v10993_v25 = vld [vmem:[#allocation2 + $0x444] sm:$0xf] }
 0x43d   :  { %6627 = vmatpush.bf16.msra.mxu2 %v8507_v63  ;;  %v8264_v32 = vld [vmem:[#allocation2 + $0x450] sm:$0xf0]  ;;  %v11169_v56 = vld [vmem:[#allocation2 + $0x9c4] sm:$0xf]  ;;  %v9243_v57 = vor.u32 %v11237_v17, %v9240_v60  ;;  %v6383_v17 = vpop.f32.mrf.mxu0 }
 0x43e   :  { %6640 = vmatpush.bf16.msra.mxu3 %v8635_v5  ;;  %v8968_v27 = vld [vmem:[#allocation2 + $0x9d0] sm:$0xf0]  ;;  %v11201_v61 = vld [vmem:[#allocation2 + $0xac4] sm:$0xf]  ;;  %v8267_v55 = vor.u32 %v10993_v25, %v8264_v32  ;;  %v6396_v25 = vpop.f32.mrf.mxu1 }
 0x43f   :  { %6598 = vmatpush.bf16.msrb.mxu0 %v8299_v1  ;;  %v9096_v62 = vld [vmem:[#allocation2 + $0xad0] sm:$0xf0]  ;;  %v11233_v24 = vld [vmem:[#allocation2 + $0xbc4] sm:$0xf]  ;;  %v8971_v12 = vor.u32 %v11169_v56, %v8968_v27 }
 0x440   :  { %6615 = vmatpush.bf16.msra.mxu1 %v8363_v48  ;;  %v9224_v2 = vld [vmem:[#allocation2 + $0xbd0] sm:$0xf0]  ;;  %v9099_v49 = vor.u32 %v11201_v61, %v9096_v62  ;;  %v10989_v59 = vld [vmem:[#allocation2 + $0x424] sm:$0xf] }
 0x441   :  { %6628 = vmatpush.bf16.msra.mxu2 %v8491_v26  ;;  %v8248_v63 = vld [vmem:[#allocation2 + $0x430] sm:$0xf0]  ;;  %v11165_v0 = vld [vmem:[#allocation2 + $0x9a4] sm:$0xf]  ;;  %v9227_v20 = vor.u32 %v11233_v24, %v9224_v2 }
 0x442   :  { %6641 = vmatpush.bf16.msra.mxu3 %v8619_v21  ;;  %v8952_v58 = vld [vmem:[#allocation2 + $0x9b0] sm:$0xf0]  ;;  %v11197_v5 = vld [vmem:[#allocation2 + $0xaa4] sm:$0xf]  ;;  %v8251_v42 = vor.u32 %v10989_v59, %v8248_v63 }
 0x443   :  { %6599 = vmatpush.bf16.msrb.mxu0 %v8283_v46  ;;  %v9080_v1 = vld [vmem:[#allocation2 + $0xab0] sm:$0xf0]  ;;  %v11229_v8 = vld [vmem:[#allocation2 + $0xba4] sm:$0xf]  ;;  %6616 = vmatmul.bf16.vlgmr.msra.gmra.mxu1 %v12738_v40  ;;  %v8955_v54 = vor.u32 %v11165_v0, %v8952_v58 }
 0x444   :  { %6660 = vmatpush.bf16.msrb.mxu1 %v8987_v47  ;;  %6629 = vmatmul.bf16.vlgmr.msra.gmra.mxu2 %v12732_v23  ;;  %v9208_v11 = vld [vmem:[#allocation2 + $0xbb0] sm:$0xf0]  ;;  %v10985_v14 = vld [vmem:[#allocation2 + $0x404] sm:$0xf]  ;;  %v9083_v15 = vor.u32 %v11197_v5, %v9080_v1  ;;  %v6384_v47 = vadd.f32 %v6383_v17, %v12838_v52  ;;  %v6409_v1 = vpop.f32.mrf.mxu2 }
 0x445   :  { %6673 = vmatpush.bf16.msrb.mxu2 %v9115_v28  ;;  %6642 = vmatmul.bf16.vlgmr.msra.gmra.mxu3 %v12736_v37  ;;  %v8232_v18 = vld [vmem:[#allocation2 + $0x410] sm:$0xf0]  ;;  %v11161_v30 = vld [vmem:[#allocation2 + $0x984] sm:$0xf]  ;;  %v9211_v33 = vor.u32 %v11229_v8, %v9208_v11 }
 0x446   :  { %6686 = vmatpush.bf16.msrb.mxu3 %v9243_v57  ;;  %v8936_v34 = vld [vmem:[#allocation2 + $0x990] sm:$0xf0]  ;;  %v11193_v10 = vld [vmem:[#allocation2 + $0xa84] sm:$0xf]  ;;  %v8235_v28 = vor.u32 %v10985_v14, %v8232_v18  ;;  %v6397_v62 = vadd.f32 %v6396_v25, %v6384_v47 }
 0x447   :  { %6600 = vmatpush.bf16.msrb.mxu0 %v8267_v55  ;;  %v9064_v48 = vld [vmem:[#allocation2 + $0xa90] sm:$0xf0]  ;;  %v11225_v26 = vld [vmem:[#allocation2 + $0xb84] sm:$0xf]  ;;  %v8939_v32 = vor.u32 %v11161_v30, %v8936_v34 }
 0x448   :  { %6661 = vmatpush.bf16.msrb.mxu1 %v8971_v12  ;;  %v9192_v60 = vld [vmem:[#allocation2 + $0xb90] sm:$0xf0]  ;;  %v11141_v21 = vld [vmem:[#allocation2 + $0x8e4] sm:$0xf]  ;;  %v9067_v56 = vor.u32 %v11193_v10, %v9064_v48  ;;  %v6398_v10 = vpop.f32.mrf.mxu1 }
 0x449   :  { %6674 = vmatpush.bf16.msrb.mxu2 %v9099_v49  ;;  %v8856_v46 = vld [vmem:[#allocation2 + $0x8f0] sm:$0xf0]  ;;  %v11157_v57 = vld [vmem:[#allocation2 + $0x964] sm:$0xf]  ;;  %v9195_v61 = vor.u32 %v11225_v26, %v9192_v60 }
 0x44a   :  { %6687 = vmatpush.bf16.msrb.mxu3 %v9227_v20  ;;  %v8920_v27 = vld [vmem:[#allocation2 + $0x970] sm:$0xf0]  ;;  %v8859_v24 = vor.u32 %v11141_v21, %v8856_v46  ;;  %v11189_v2 = vld [vmem:[#allocation2 + $0xa64] sm:$0xf] }
 0x44b   :  { %6601 = vmatpush.bf16.msrb.mxu0 %v8251_v42  ;;  %v9048_v55 = vld [vmem:[#allocation2 + $0xa70] sm:$0xf0]  ;;  %v11221_v12 = vld [vmem:[#allocation2 + $0xb64] sm:$0xf]  ;;  %v8923_v52 = vor.u32 %v11157_v57, %v8920_v27 }
 0x44c   :  { %6662 = vmatpush.bf16.msrb.mxu1 %v8955_v54  ;;  %v9176_v49 = vld [vmem:[#allocation2 + $0xb70] sm:$0xf0]  ;;  %v11137_v59 = vld [vmem:[#allocation2 + $0x8c4] sm:$0xf]  ;;  %v9051_v0 = vor.u32 %v11189_v2, %v9048_v55  ;;  %v6410_v54 = vadd.f32 %v6409_v1, %v6397_v62 }
 0x44d   :  { %6675 = vmatpush.bf16.msrb.mxu2 %v9083_v15  ;;  %v8840_v63 = vld [vmem:[#allocation2 + $0x8d0] sm:$0xf0]  ;;  %v11153_v20 = vld [vmem:[#allocation2 + $0x944] sm:$0xf]  ;;  %v9179_v5 = vor.u32 %v11221_v12, %v9176_v49  ;;  %v6422_v15 = vpop.f32.mrf.mxu3 }
 0x44e   :  { %6688 = vmatpush.bf16.msrb.mxu3 %v9211_v33  ;;  %v8904_v58 = vld [vmem:[#allocation2 + $0x950] sm:$0xf0]  ;;  %v8843_v8 = vor.u32 %v11137_v59, %v8840_v63  ;;  %v11185_v11 = vld [vmem:[#allocation2 + $0xa44] sm:$0xf]  ;;  %v6385_v33 = vpop.f32.mrf.mxu0  ;;  %v12845_v48 = vadd.f32 %v6422_v15, %v6410_v54 }
 0x44f   :  { %6602 = vmatpush.bf16.msrb.mxu0 %v8235_v28  ;;  %v9032_v42 = vld [vmem:[#allocation2 + $0xa50] sm:$0xf0]  ;;  %v11217_v14 = vld [vmem:[#allocation2 + $0xb44] sm:$0xf]  ;;  %v8907_v26 = vor.u32 %v11153_v20, %v8904_v58 }
 0x450   :  { %6663 = vmatpush.bf16.msrb.mxu1 %v8939_v32  ;;  %v9160_v18 = vld [vmem:[#allocation2 + $0xb50] sm:$0xf0]  ;;  %v11133_v30 = vld [vmem:[#allocation2 + $0x8a4] sm:$0xf]  ;;  %v9035_v17 = vor.u32 %v11185_v11, %v9032_v42 }
 0x451   :  { %6676 = vmatpush.bf16.msrb.mxu2 %v9067_v56  ;;  %v8824_v34 = vld [vmem:[#allocation2 + $0x8b0] sm:$0xf0]  ;;  %v11149_v60 = vld [vmem:[#allocation2 + $0x924] sm:$0xf]  ;;  %v9163_v46 = vor.u32 %v11217_v14, %v9160_v18 }
 0x452   :  { %6689 = vmatpush.bf16.msrb.mxu3 %v9195_v61  ;;  %6603 = vmatmul.bf16.vlgmr.msrb.gmra.mxu0 %v12734_v36  ;;  %v8888_v21 = vld [vmem:[#allocation2 + $0x930] sm:$0xf0]  ;;  %v8827_v47 = vor.u32 %v11133_v30, %v8824_v34  ;;  %v11181_v28 = vld [vmem:[#allocation2 + $0xa24] sm:$0xf] }
 0x453   :  { %6647 = vmatpush.bf16.msra.mxu0 %v8859_v24  ;;  %v9016_v25 = vld [vmem:[#allocation2 + $0xa30] sm:$0xf0]  ;;  %v11213_v32 = vld [vmem:[#allocation2 + $0xb24] sm:$0xf]  ;;  %v8891_v61 = vor.u32 %v11149_v60, %v8888_v21 }
 0x454   :  { %6664 = vmatpush.bf16.msrb.mxu1 %v8923_v52  ;;  %v9144_v56 = vld [vmem:[#allocation2 + $0xb30] sm:$0xf0]  ;;  %v11129_v57 = vld [vmem:[#allocation2 + $0x884] sm:$0xf]  ;;  %v9019_v62 = vor.u32 %v11181_v28, %v9016_v25 }
 0x455   :  { %6677 = vmatpush.bf16.msrb.mxu2 %v9051_v0  ;;  %v8808_v27 = vld [vmem:[#allocation2 + $0x890] sm:$0xf0]  ;;  %v11145_v24 = vld [vmem:[#allocation2 + $0x904] sm:$0xf]  ;;  %v9147_v12 = vor.u32 %v11213_v32, %v9144_v56  ;;  %v6411_v0 = vpop.f32.mrf.mxu2  ;;  %v6424_v1 = vpop.f32.mrf.mxu3 }
 0x456   :  { %6690 = vmatpush.bf16.msrb.mxu3 %v9179_v5  ;;  %v8872_v2 = vld [vmem:[#allocation2 + $0x910] sm:$0xf0]  ;;  %v11177_v55 = vld [vmem:[#allocation2 + $0xa04] sm:$0xf]  ;;  %v8811_v49 = vor.u32 %v11129_v57, %v8808_v27 }
 0x457   :  { %6648 = vmatpush.bf16.msra.mxu0 %v8843_v8  ;;  %v9000_v59 = vld [vmem:[#allocation2 + $0xa10] sm:$0xf0]  ;;  %v11209_v63 = vld [vmem:[#allocation2 + $0xb04] sm:$0xf]  ;;  %v8875_v14 = vor.u32 %v11145_v24, %v8872_v2 }
 0x458   :  { %6665 = vmatpush.bf16.msrb.mxu1 %v8907_v26  ;;  %v9128_v52 = vld [vmem:[#allocation2 + $0xb10] sm:$0xf0]  ;;  %v11125_v20 = vld [vmem:[#allocation2 + $0x864] sm:$0xf]  ;;  %v9003_v54 = vor.u32 %v11177_v55, %v9000_v59 }
 0x459   :  { %6678 = vmatpush.bf16.msrb.mxu2 %v9035_v17  ;;  %v8792_v58 = vld [vmem:[#allocation2 + $0x870] sm:$0xf0]  ;;  %v11301_v5 = vld [vmem:[#allocation2 + $0xde4] sm:$0xf]  ;;  %v9131_v30 = vor.u32 %v11209_v63, %v9128_v52 }
 0x45a   :  { %6691 = vmatpush.bf16.msrb.mxu3 %v9163_v46  ;;  %v9496_v8 = vld [vmem:[#allocation2 + $0xdf0] sm:$0xf0]  ;;  %v11333_v11 = vld [vmem:[#allocation2 + $0xee4] sm:$0xf]  ;;  %v8795_v34 = vor.u32 %v11125_v20, %v8792_v58 }
 0x45b   :  { %6649 = vmatpush.bf16.msra.mxu0 %v8827_v47  ;;  %v9624_v42 = vld [vmem:[#allocation2 + $0xef0] sm:$0xf0]  ;;  %v11365_v15 = vld [vmem:[#allocation2 + $0xfe4] sm:$0xf]  ;;  %v9499_v33 = vor.u32 %v11301_v5, %v9496_v8 }
 0x45c   :  { %6666 = vmatpush.bf16.msrb.mxu1 %v8891_v61  ;;  %v9752_v18 = vld [vmem:[#allocation2 + $0xff0] sm:$0xf0]  ;;  %v9627_v10 = vor.u32 %v11333_v11, %v9624_v42  ;;  %v11121_v26 = vld [vmem:[#allocation2 + $0x844] sm:$0xf] }
 0x45d   :  { %6679 = vmatpush.bf16.msrb.mxu2 %v9019_v62  ;;  %v8776_v17 = vld [vmem:[#allocation2 + $0x850] sm:$0xf0]  ;;  %v11297_v60 = vld [vmem:[#allocation2 + $0xdc4] sm:$0xf]  ;;  %v9755_v21 = vor.u32 %v11365_v15, %v9752_v18 }
 0x45e   :  { %6692 = vmatpush.bf16.msrb.mxu3 %v9147_v12  ;;  %v9480_v46 = vld [vmem:[#allocation2 + $0xdd0] sm:$0xf0]  ;;  %v11329_v47 = vld [vmem:[#allocation2 + $0xec4] sm:$0xf]  ;;  %v8779_v56 = vor.u32 %v11121_v26, %v8776_v17 }
 0x45f   :  { %6650 = vmatpush.bf16.msra.mxu0 %v8811_v49  ;;  %v9608_v28 = vld [vmem:[#allocation2 + $0xed0] sm:$0xf0]  ;;  %v11361_v25 = vld [vmem:[#allocation2 + $0xfc4] sm:$0xf]  ;;  %v9483_v57 = vor.u32 %v11297_v60, %v9480_v46 }
 0x460   :  { %6667 = vmatpush.bf16.msrb.mxu1 %v8875_v14  ;;  %v9736_v32 = vld [vmem:[#allocation2 + $0xfd0] sm:$0xf0]  ;;  %v9611_v27 = vor.u32 %v11329_v47, %v9608_v28  ;;  %v11117_v61 = vld [vmem:[#allocation2 + $0x824] sm:$0xf]  ;;  %v6435_v15 = vpop.f32.mrf.mxu0 }
 0x461   :  { %6680 = vmatpush.bf16.msrb.mxu2 %v9003_v54  ;;  %v8760_v62 = vld [vmem:[#allocation2 + $0x830] sm:$0xf0]  ;;  %v11293_v24 = vld [vmem:[#allocation2 + $0xda4] sm:$0xf]  ;;  %v9739_v2 = vor.u32 %v11361_v25, %v9736_v32  ;;  %v6448_v26 = vpop.f32.mrf.mxu1 }
 0x462   :  { %6693 = vmatpush.bf16.msrb.mxu3 %v9131_v30  ;;  %v9464_v55 = vld [vmem:[#allocation2 + $0xdb0] sm:$0xf0]  ;;  %v11325_v12 = vld [vmem:[#allocation2 + $0xea4] sm:$0xf]  ;;  %v8763_v52 = vor.u32 %v11117_v61, %v8760_v62 }
 0x463   :  { %6651 = vmatpush.bf16.msra.mxu0 %v8795_v34  ;;  %v9592_v49 = vld [vmem:[#allocation2 + $0xeb0] sm:$0xf0]  ;;  %v11357_v59 = vld [vmem:[#allocation2 + $0xfa4] sm:$0xf]  ;;  %6668 = vmatmul.bf16.vlgmr.msrb.gmra.mxu1 %v12762_v43  ;;  %v9467_v20 = vor.u32 %v11293_v24, %v9464_v55 }
 0x464   :  { %6712 = vmatpush.bf16.msra.mxu1 %v9499_v33  ;;  %6681 = vmatmul.bf16.vlgmr.msrb.gmra.mxu2 %v12758_v41  ;;  %v9720_v63 = vld [vmem:[#allocation2 + $0xfb0] sm:$0xf0]  ;;  %v11113_v0 = vld [vmem:[#allocation2 + $0x804] sm:$0xf]  ;;  %v9595_v58 = vor.u32 %v11325_v12, %v9592_v49  ;;  %v6436_v33 = vadd.f32 %v6435_v15, %v12845_v48 }
 0x465   :  { %6725 = vmatpush.bf16.msra.mxu2 %v9627_v10  ;;  %6694 = vmatmul.bf16.vlgmr.msrb.gmra.mxu3 %v12766_v16  ;;  %v8744_v5 = vld [vmem:[#allocation2 + $0x810] sm:$0xf0]  ;;  %v11289_v1 = vld [vmem:[#allocation2 + $0xd84] sm:$0xf]  ;;  %v9723_v11 = vor.u32 %v11357_v59, %v9720_v63 }
 0x466   :  { %6738 = vmatpush.bf16.msra.mxu3 %v9755_v21  ;;  %v9448_v8 = vld [vmem:[#allocation2 + $0xd90] sm:$0xf0]  ;;  %v11321_v42 = vld [vmem:[#allocation2 + $0xe84] sm:$0xf]  ;;  %v8747_v10 = vor.u32 %v11113_v0, %v8744_v5  ;;  %v6449_v28 = vadd.f32 %v6448_v26, %v6436_v33 }
 0x467   :  { %6652 = vmatpush.bf16.msra.mxu0 %v8779_v56  ;;  %v9576_v14 = vld [vmem:[#allocation2 + $0xe90] sm:$0xf0]  ;;  %v11353_v54 = vld [vmem:[#allocation2 + $0xf84] sm:$0xf]  ;;  %v9451_v17 = vor.u32 %v11289_v1, %v9448_v8  ;;  %v6461_v49 = vpop.f32.mrf.mxu2 }
 0x468   :  { %6713 = vmatpush.bf16.msra.mxu1 %v9483_v57  ;;  %v9704_v18 = vld [vmem:[#allocation2 + $0xf90] sm:$0xf0]  ;;  %v11269_v30 = vld [vmem:[#allocation2 + $0xce4] sm:$0xf]  ;;  %v9579_v60 = vor.u32 %v11321_v42, %v9576_v14 }
 0x469   :  { %6726 = vmatpush.bf16.msra.mxu2 %v9611_v27  ;;  %v9368_v34 = vld [vmem:[#allocation2 + $0xcf0] sm:$0xf0]  ;;  %v11285_v21 = vld [vmem:[#allocation2 + $0xd64] sm:$0xf]  ;;  %v9707_v47 = vor.u32 %v11353_v54, %v9704_v18  ;;  %v6450_v42 = vpop.f32.mrf.mxu1 }
 0x46a   :  { %6739 = vmatpush.bf16.msra.mxu3 %v9739_v2  ;;  %v9432_v46 = vld [vmem:[#allocation2 + $0xd70] sm:$0xf0]  ;;  %v9371_v25 = vor.u32 %v11269_v30, %v9368_v34  ;;  %v11317_v32 = vld [vmem:[#allocation2 + $0xe64] sm:$0xf] }
 0x46b   :  { %6653 = vmatpush.bf16.msra.mxu0 %v8763_v52  ;;  %v9560_v56 = vld [vmem:[#allocation2 + $0xe70] sm:$0xf0]  ;;  %v11349_v57 = vld [vmem:[#allocation2 + $0xf64] sm:$0xf]  ;;  %v9435_v48 = vor.u32 %v11285_v21, %v9432_v46 }
 0x46c   :  { %6714 = vmatpush.bf16.msra.mxu1 %v9467_v20  ;;  %v9688_v27 = vld [vmem:[#allocation2 + $0xf70] sm:$0xf0]  ;;  %v11265_v61 = vld [vmem:[#allocation2 + $0xcc4] sm:$0xf]  ;;  %v9563_v24 = vor.u32 %v11317_v32, %v9560_v56  ;;  %v6462_v20 = vadd.f32 %v6461_v49, %v6449_v28 }
 0x46d   :  { %6727 = vmatpush.bf16.msra.mxu2 %v9595_v58  ;;  %v9352_v62 = vld [vmem:[#allocation2 + $0xcd0] sm:$0xf0]  ;;  %v11281_v2 = vld [vmem:[#allocation2 + $0xd44] sm:$0xf]  ;;  %v9691_v12 = vor.u32 %v11349_v57, %v9688_v27  ;;  %v6474_v58 = vpop.f32.mrf.mxu3 }
 0x46e   :  { %6740 = vmatpush.bf16.msra.mxu3 %v9723_v11  ;;  %v9416_v55 = vld [vmem:[#allocation2 + $0xd50] sm:$0xf0]  ;;  %v9355_v59 = vor.u32 %v11265_v61, %v9352_v62  ;;  %v11313_v63 = vld [vmem:[#allocation2 + $0xe44] sm:$0xf]  ;;  %v6437_v11 = vpop.f32.mrf.mxu0  ;;  %v12852_v14 = vadd.f32 %v6474_v58, %v6462_v20 }
 0x46f   :  { %6654 = vmatpush.bf16.msra.mxu0 %v8747_v10  ;;  %v9544_v52 = vld [vmem:[#allocation2 + $0xe50] sm:$0xf0]  ;;  %v11345_v0 = vld [vmem:[#allocation2 + $0xf44] sm:$0xf]  ;;  %v9419_v54 = vor.u32 %v11281_v2, %v9416_v55 }
 0x470   :  { %6715 = vmatpush.bf16.msra.mxu1 %v9451_v17  ;;  %v9672_v5 = vld [vmem:[#allocation2 + $0xf50] sm:$0xf0]  ;;  %v11261_v1 = vld [vmem:[#allocation2 + $0xca4] sm:$0xf]  ;;  %v9547_v15 = vor.u32 %v11313_v63, %v9544_v52 }
 0x471   :  { %6728 = vmatpush.bf16.msra.mxu2 %v9579_v60  ;;  %v9336_v8 = vld [vmem:[#allocation2 + $0xcb0] sm:$0xf0]  ;;  %v11277_v18 = vld [vmem:[#allocation2 + $0xd24] sm:$0xf]  ;;  %v9675_v34 = vor.u32 %v11345_v0, %v9672_v5 }
 0x472   :  { %6741 = vmatpush.bf16.msra.mxu3 %v9707_v47  ;;  %6655 = vmatmul.bf16.vlgmr.msra.gmra.mxu0 %v12754_v31  ;;  %v9400_v30 = vld [vmem:[#allocation2 + $0xd30] sm:$0xf0]  ;;  %v9339_v33 = vor.u32 %v11261_v1, %v9336_v8  ;;  %v11309_v10 = vld [vmem:[#allocation2 + $0xe24] sm:$0xf] }
 0x473   :  { %6699 = vmatpush.bf16.msrb.mxu0 %v9371_v25  ;;  %v9528_v26 = vld [vmem:[#allocation2 + $0xe30] sm:$0xf0]  ;;  %v11341_v17 = vld [vmem:[#allocation2 + $0xf24] sm:$0xf]  ;;  %v9403_v47 = vor.u32 %v11277_v18, %v9400_v30 }
 0x474   :  { %6716 = vmatpush.bf16.msra.mxu1 %v9435_v48  ;;  %v9656_v60 = vld [vmem:[#allocation2 + $0xf30] sm:$0xf0]  ;;  %v11257_v21 = vld [vmem:[#allocation2 + $0xc84] sm:$0xf]  ;;  %v9531_v28 = vor.u32 %v11309_v10, %v9528_v26 }
 0x475   :  { %6729 = vmatpush.bf16.msra.mxu2 %v9563_v24  ;;  %v9320_v46 = vld [vmem:[#allocation2 + $0xc90] sm:$0xf0]  ;;  %v11273_v25 = vld [vmem:[#allocation2 + $0xd04] sm:$0xf]  ;;  %v9659_v57 = vor.u32 %v11341_v17, %v9656_v60  ;;  %v6463_v24 = vpop.f32.mrf.mxu2  ;;  %v6476_v49 = vpop.f32.mrf.mxu3 }
 0x476   :  { %6742 = vmatpush.bf16.msra.mxu3 %v9691_v12  ;;  %v9384_v32 = vld [vmem:[#allocation2 + $0xd10] sm:$0xf0]  ;;  %v11305_v56 = vld [vmem:[#allocation2 + $0xe04] sm:$0xf]  ;;  %v9323_v27 = vor.u32 %v11257_v21, %v9320_v46 }
 0x477   :  { %6700 = vmatpush.bf16.msrb.mxu0 %v9355_v59  ;;  %v9512_v61 = vld [vmem:[#allocation2 + $0xe10] sm:$0xf0]  ;;  %v11337_v62 = vld [vmem:[#allocation2 + $0xf04] sm:$0xf]  ;;  %v9387_v0 = vor.u32 %v11273_v25, %v9384_v32 }
 0x478   :  { %6717 = vmatpush.bf16.msra.mxu1 %v9419_v54  ;;  %v9640_v48 = vld [vmem:[#allocation2 + $0xf10] sm:$0xf0]  ;;  %v11253_v2 = vld [vmem:[#allocation2 + $0xc64] sm:$0xf]  ;;  %v9515_v20 = vor.u32 %v11305_v56, %v9512_v61 }
 0x479   :  { %6730 = vmatpush.bf16.msra.mxu2 %v9547_v15  ;;  %v9304_v55 = vld [vmem:[#allocation2 + $0xc70] sm:$0xf0]  ;;  %v11429_v12 = vld [vmem:[#allocation2 + $0x11e4] sm:$0xf]  ;;  %v9643_v1 = vor.u32 %v11337_v62, %v9640_v48 }
 0x47a   :  { %6743 = vmatpush.bf16.msra.mxu3 %v9675_v34  ;;  %v10008_v59 = vld [vmem:[#allocation2 + $0x11f0] sm:$0xf0]  ;;  %v11461_v63 = vld [vmem:[#allocation2 + $0x12e4] sm:$0xf]  ;;  %v9307_v8 = vor.u32 %v11253_v2, %v9304_v55 }
 0x47b   :  { %6701 = vmatpush.bf16.msrb.mxu0 %v9339_v33  ;;  %v10136_v52 = vld [vmem:[#allocation2 + $0x12f0] sm:$0xf0]  ;;  %v11493_v58 = vld [vmem:[#allocation2 + $0x13e4] sm:$0xf]  ;;  %v10011_v11 = vor.u32 %v11429_v12, %v10008_v59 }
 0x47c   :  { %6718 = vmatpush.bf16.msra.mxu1 %v9403_v47  ;;  %v10264_v5 = vld [vmem:[#allocation2 + $0x13f0] sm:$0xf0]  ;;  %v10139_v42 = vor.u32 %v11461_v63, %v10136_v52  ;;  %v11249_v54 = vld [vmem:[#allocation2 + $0xc44] sm:$0xf] }
 0x47d   :  { %6731 = vmatpush.bf16.msra.mxu2 %v9531_v28  ;;  %v9288_v15 = vld [vmem:[#allocation2 + $0xc50] sm:$0xf0]  ;;  %v11425_v18 = vld [vmem:[#allocation2 + $0x11c4] sm:$0xf]  ;;  %v10267_v30 = vor.u32 %v11493_v58, %v10264_v5 }
 0x47e   :  { %6744 = vmatpush.bf16.msra.mxu3 %v9659_v57  ;;  %v9992_v34 = vld [vmem:[#allocation2 + $0x11d0] sm:$0xf0]  ;;  %v11457_v33 = vld [vmem:[#allocation2 + $0x12c4] sm:$0xf]  ;;  %v9291_v60 = vor.u32 %v11249_v54, %v9288_v15 }
 0x47f   :  { %6702 = vmatpush.bf16.msrb.mxu0 %v9323_v27  ;;  %v10120_v10 = vld [vmem:[#allocation2 + $0x12d0] sm:$0xf0]  ;;  %v11489_v26 = vld [vmem:[#allocation2 + $0x13c4] sm:$0xf]  ;;  %v9995_v21 = vor.u32 %v11425_v18, %v9992_v34  ;;  %v6487_v58 = vpop.f32.mrf.mxu0 }
 0x480   :  { %6719 = vmatpush.bf16.msra.mxu1 %v9387_v0  ;;  %v10248_v17 = vld [vmem:[#allocation2 + $0x13d0] sm:$0xf0]  ;;  %v10123_v46 = vor.u32 %v11457_v33, %v10120_v10  ;;  %v11245_v47 = vld [vmem:[#allocation2 + $0xc24] sm:$0xf] }
 0x481   :  { %6732 = vmatpush.bf16.msra.mxu2 %v9515_v20  ;;  %v9272_v28 = vld [vmem:[#allocation2 + $0xc30] sm:$0xf0]  ;;  %v11421_v25 = vld [vmem:[#allocation2 + $0x11a4] sm:$0xf]  ;;  %v10251_v32 = vor.u32 %v11489_v26, %v10248_v17 }
 0x482   :  { %6745 = vmatpush.bf16.msra.mxu3 %v9643_v1  ;;  %v9976_v56 = vld [vmem:[#allocation2 + $0x11b0] sm:$0xf0]  ;;  %v11453_v57 = vld [vmem:[#allocation2 + $0x12a4] sm:$0xf]  ;;  %v9275_v48 = vor.u32 %v11245_v47, %v9272_v28  ;;  %v6500_v54 = vpop.f32.mrf.mxu1 }
 0x483   :  { %6703 = vmatpush.bf16.msrb.mxu0 %v9307_v8  ;;  %v10104_v27 = vld [vmem:[#allocation2 + $0x12b0] sm:$0xf0]  ;;  %v11485_v61 = vld [vmem:[#allocation2 + $0x13a4] sm:$0xf]  ;;  %6720 = vmatmul.bf16.vlgmr.msra.gmra.mxu1 %v12790_v53  ;;  %v9979_v2 = vor.u32 %v11421_v25, %v9976_v56 }
 0x484   :  { %6764 = vmatpush.bf16.msrb.mxu1 %v10011_v11  ;;  %6733 = vmatmul.bf16.vlgmr.msra.gmra.mxu2 %v12786_v50  ;;  %v10232_v62 = vld [vmem:[#allocation2 + $0x13b0] sm:$0xf0]  ;;  %v11241_v24 = vld [vmem:[#allocation2 + $0xc04] sm:$0xf]  ;;  %v10107_v55 = vor.u32 %v11453_v57, %v10104_v27  ;;  %v6488_v11 = vadd.f32 %v6487_v58, %v12852_v14 }
 0x485   :  { %6777 = vmatpush.bf16.msrb.mxu2 %v10139_v42  ;;  %6746 = vmatmul.bf16.vlgmr.msra.gmra.mxu3 %v12794_v3  ;;  %v9256_v12 = vld [vmem:[#allocation2 + $0xc10] sm:$0xf0]  ;;  %v11417_v49 = vld [vmem:[#allocation2 + $0x1184] sm:$0xf]  ;;  %v10235_v63 = vor.u32 %v11485_v61, %v10232_v62 }
 0x486   :  { %6790 = vmatpush.bf16.msrb.mxu3 %v10267_v30  ;;  %v9960_v59 = vld [vmem:[#allocation2 + $0x1190] sm:$0xf0]  ;;  %v11449_v52 = vld [vmem:[#allocation2 + $0x1284] sm:$0xf]  ;;  %v9259_v42 = vor.u32 %v11241_v24, %v9256_v12  ;;  %v6501_v10 = vadd.f32 %v6500_v54, %v6488_v11 }
 0x487   :  { %6704 = vmatpush.bf16.msrb.mxu0 %v9291_v60  ;;  %v10088_v0 = vld [vmem:[#allocation2 + $0x1290] sm:$0xf0]  ;;  %v11481_v20 = vld [vmem:[#allocation2 + $0x1384] sm:$0xf]  ;;  %v9963_v15 = vor.u32 %v11417_v49, %v9960_v59  ;;  %v6513_v27 = vpop.f32.mrf.mxu2 }
 0x488   :  { %6765 = vmatpush.bf16.msrb.mxu1 %v9995_v21  ;;  %v10216_v5 = vld [vmem:[#allocation2 + $0x1390] sm:$0xf0]  ;;  %v11397_v1 = vld [vmem:[#allocation2 + $0x10e4] sm:$0xf]  ;;  %v10091_v18 = vor.u32 %v11449_v52, %v10088_v0 }
 0x489   :  { %6778 = vmatpush.bf16.msrb.mxu2 %v10123_v46  ;;  %v9880_v8 = vld [vmem:[#allocation2 + $0x10f0] sm:$0xf0]  ;;  %v11413_v30 = vld [vmem:[#allocation2 + $0x1164] sm:$0xf]  ;;  %v10219_v33 = vor.u32 %v11481_v20, %v10216_v5 }
 0x48a   :  { %6791 = vmatpush.bf16.msrb.mxu3 %v10251_v32  ;;  %v9944_v34 = vld [vmem:[#allocation2 + $0x1170] sm:$0xf0]  ;;  %v9883_v26 = vor.u32 %v11397_v1, %v9880_v8  ;;  %v11445_v17 = vld [vmem:[#allocation2 + $0x1264] sm:$0xf]  ;;  %v6526_v12 = vpop.f32.mrf.mxu3  ;;  %v6502_v52 = vpop.f32.mrf.mxu1 }
 0x48b   :  { %6705 = vmatpush.bf16.msrb.mxu0 %v9275_v48  ;;  %v10072_v60 = vld [vmem:[#allocation2 + $0x1270] sm:$0xf0]  ;;  %v11477_v21 = vld [vmem:[#allocation2 + $0x1364] sm:$0xf]  ;;  %v9947_v14 = vor.u32 %v11413_v30, %v9944_v34 }
 0x48c   :  { %6766 = vmatpush.bf16.msrb.mxu1 %v9979_v2  ;;  %v10200_v46 = vld [vmem:[#allocation2 + $0x1370] sm:$0xf0]  ;;  %v11393_v47 = vld [vmem:[#allocation2 + $0x10c4] sm:$0xf]  ;;  %v10075_v25 = vor.u32 %v11445_v17, %v10072_v60  ;;  %v6514_v2 = vadd.f32 %v6513_v27, %v6501_v10 }
 0x48d   :  { %6779 = vmatpush.bf16.msrb.mxu2 %v10107_v55  ;;  %v9864_v28 = vld [vmem:[#allocation2 + $0x10d0] sm:$0xf0]  ;;  %v11409_v32 = vld [vmem:[#allocation2 + $0x1144] sm:$0xf]  ;;  %v10203_v57 = vor.u32 %v11477_v21, %v10200_v46  ;;  %v6489_v55 = vpop.f32.mrf.mxu0 }
 0x48e   :  { %6792 = vmatpush.bf16.msrb.mxu3 %v10235_v63  ;;  %v9928_v56 = vld [vmem:[#allocation2 + $0x1150] sm:$0xf0]  ;;  %v9867_v61 = vor.u32 %v11393_v47, %v9864_v28  ;;  %v11441_v62 = vld [vmem:[#allocation2 + $0x1244] sm:$0xf]  ;;  %v6527_v0 = vadd.f32 %v6526_v12, %v6514_v2 }
 0x48f   :  { %6706 = vmatpush.bf16.msrb.mxu0 %v9259_v42  ;;  %v10056_v48 = vld [vmem:[#allocation2 + $0x1250] sm:$0xf0]  ;;  %v11473_v24 = vld [vmem:[#allocation2 + $0x1344] sm:$0xf]  ;;  %v9931_v20 = vor.u32 %v11409_v32, %v9928_v56 }
 0x490   :  { %6767 = vmatpush.bf16.msrb.mxu1 %v9963_v15  ;;  %v10184_v49 = vld [vmem:[#allocation2 + $0x1350] sm:$0xf0]  ;;  %v11389_v59 = vld [vmem:[#allocation2 + $0x10a4] sm:$0xf]  ;;  %v10059_v58 = vor.u32 %v11441_v62, %v10056_v48 }
 0x491   :  { %6780 = vmatpush.bf16.msrb.mxu2 %v10091_v18  ;;  %v9848_v63 = vld [vmem:[#allocation2 + $0x10b0] sm:$0xf0]  ;;  %v11405_v5 = vld [vmem:[#allocation2 + $0x1124] sm:$0xf]  ;;  %v10187_v8 = vor.u32 %v11473_v24, %v10184_v49 }
 0x492   :  { %6793 = vmatpush.bf16.msrb.mxu3 %v10219_v33  ;;  %6707 = vmatmul.bf16.vlgmr.msrb.gmra.mxu0 %v12782_v39  ;;  %v9912_v1 = vld [vmem:[#allocation2 + $0x1130] sm:$0xf0]  ;;  %v9851_v11 = vor.u32 %v11389_v59, %v9848_v63  ;;  %v11437_v42 = vld [vmem:[#allocation2 + $0x1224] sm:$0xf]  ;;  %v6528_v27 = vpop.f32.mrf.mxu3 }
 0x493   :  { %6751 = vmatpush.bf16.msra.mxu0 %v9883_v26  ;;  %v10040_v54 = vld [vmem:[#allocation2 + $0x1230] sm:$0xf0]  ;;  %v11469_v15 = vld [vmem:[#allocation2 + $0x1324] sm:$0xf]  ;;  %v9915_v33 = vor.u32 %v11405_v5, %v9912_v1 }
 0x494   :  { %6768 = vmatpush.bf16.msrb.mxu1 %v9947_v14  ;;  %v10168_v18 = vld [vmem:[#allocation2 + $0x1330] sm:$0xf0]  ;;  %v11385_v30 = vld [vmem:[#allocation2 + $0x1084] sm:$0xf]  ;;  %v10043_v10 = vor.u32 %v11437_v42, %v10040_v54 }
 0x495   :  { %6781 = vmatpush.bf16.msrb.mxu2 %v10075_v25  ;;  %v9832_v34 = vld [vmem:[#allocation2 + $0x1090] sm:$0xf0]  ;;  %v11401_v26 = vld [vmem:[#allocation2 + $0x1104] sm:$0xf]  ;;  %v10171_v21 = vor.u32 %v11469_v15, %v10168_v18  ;;  %v6515_v25 = vpop.f32.mrf.mxu2 }
 0x496   :  { %6794 = vmatpush.bf16.msrb.mxu3 %v10203_v57  ;;  %v9896_v17 = vld [vmem:[#allocation2 + $0x1110] sm:$0xf0]  ;;  %v11433_v60 = vld [vmem:[#allocation2 + $0x1204] sm:$0xf]  ;;  %v9835_v46 = vor.u32 %v11385_v30, %v9832_v34 }
 0x497   :  { %6752 = vmatpush.bf16.msra.mxu0 %v9867_v61  ;;  %v10024_v47 = vld [vmem:[#allocation2 + $0x1210] sm:$0xf0]  ;;  %v11465_v28 = vld [vmem:[#allocation2 + $0x1304] sm:$0xf]  ;;  %v6539_v61 = vpop.f32.mrf.mxu0  ;;  %v9899_v55 = vor.u32 %v11401_v26, %v9896_v17 }
 0x498   :  { %6769 = vmatpush.bf16.msrb.mxu1 %v9931_v20  ;;  %v10152_v14 = vld [vmem:[#allocation2 + $0x1310] sm:$0xf0]  ;;  %v11381_v32 = vld [vmem:[#allocation2 + $0x1064] sm:$0xf]  ;;  %v12859_v2 = vadd.f32 %v6539_v61, %v6527_v0  ;;  %v10027_v12 = vor.u32 %v11433_v60, %v10024_v47 }
 0x499   :  { %6782 = vmatpush.bf16.msrb.mxu2 %v10059_v58  ;;  %v9816_v56 = vld [vmem:[#allocation2 + $0x1070] sm:$0xf0]  ;;  %v11557_v57 = vld [vmem:[#allocation2 + $0x15e4] sm:$0xf]  ;;  %v10155_v63 = vor.u32 %v11465_v28, %v10152_v14 }
 0x49a   :  { %6795 = vmatpush.bf16.msrb.mxu3 %v10187_v8  ;;  %v10520_v62 = vld [vmem:[#allocation2 + $0x15f0] sm:$0xf0]  ;;  %v11589_v48 = vld [vmem:[#allocation2 + $0x16e4] sm:$0xf]  ;;  %v9819_v52 = vor.u32 %v11381_v32, %v9816_v56 }
 0x49b   :  { %6753 = vmatpush.bf16.msra.mxu0 %v9851_v11  ;;  %v10648_v24 = vld [vmem:[#allocation2 + $0x16f0] sm:$0xf0]  ;;  %v11621_v49 = vld [vmem:[#allocation2 + $0x17e4] sm:$0xf]  ;;  %v10523_v20 = vor.u32 %v11557_v57, %v10520_v62 }
 0x49c   :  { %6770 = vmatpush.bf16.msrb.mxu1 %v9915_v33  ;;  %v10776_v59 = vld [vmem:[#allocation2 + $0x17f0] sm:$0xf0]  ;;  %v10651_v58 = vor.u32 %v11589_v48, %v10648_v24  ;;  %v11377_v5 = vld [vmem:[#allocation2 + $0x1044] sm:$0xf] }
 0x49d   :  { %6783 = vmatpush.bf16.msrb.mxu2 %v10043_v10  ;;  %v9800_v1 = vld [vmem:[#allocation2 + $0x1050] sm:$0xf0]  ;;  %v11553_v8 = vld [vmem:[#allocation2 + $0x15c4] sm:$0xf]  ;;  %v10779_v11 = vor.u32 %v11621_v49, %v10776_v59 }
 0x49e   :  { %6796 = vmatpush.bf16.msrb.mxu3 %v10171_v21  ;;  %v10504_v42 = vld [vmem:[#allocation2 + $0x15d0] sm:$0xf0]  ;;  %v11585_v54 = vld [vmem:[#allocation2 + $0x16c4] sm:$0xf]  ;;  %v9803_v30 = vor.u32 %v11377_v5, %v9800_v1 }
 0x49f   :  { %6754 = vmatpush.bf16.msra.mxu0 %v9835_v46  ;;  %v10632_v15 = vld [vmem:[#allocation2 + $0x16d0] sm:$0xf0]  ;;  %v11617_v0 = vld [vmem:[#allocation2 + $0x17c4] sm:$0xf]  ;;  %v10507_v34 = vor.u32 %v11553_v8, %v10504_v42  ;;  %v6541_v28 = vpop.f32.mrf.mxu0 }
 0x4a0   :  { %6771 = vmatpush.bf16.msrb.mxu1 %v9899_v55  ;;  %v10760_v18 = vld [vmem:[#allocation2 + $0x17d0] sm:$0xf0]  ;;  %v10635_v33 = vor.u32 %v11585_v54, %v10632_v15  ;;  %v11373_v10 = vld [vmem:[#allocation2 + $0x1024] sm:$0xf] }
 0x4a1   :  { %6784 = vmatpush.bf16.msrb.mxu2 %v10027_v12  ;;  %v9784_v26 = vld [vmem:[#allocation2 + $0x1030] sm:$0xf0]  ;;  %v11549_v17 = vld [vmem:[#allocation2 + $0x15a4] sm:$0xf]  ;;  %v10763_v60 = vor.u32 %v11617_v0, %v10760_v18 }
 0x4a2   :  { %6797 = vmatpush.bf16.msrb.mxu3 %v10155_v63  ;;  %v10488_v21 = vld [vmem:[#allocation2 + $0x15b0] sm:$0xf0]  ;;  %v11581_v46 = vld [vmem:[#allocation2 + $0x16a4] sm:$0xf]  ;;  %v9787_v32 = vor.u32 %v11373_v10, %v9784_v26 }
 0x4a3   :  { %6755 = vmatpush.bf16.msra.mxu0 %v9819_v52  ;;  %v10616_v47 = vld [vmem:[#allocation2 + $0x16b0] sm:$0xf0]  ;;  %v11613_v14 = vld [vmem:[#allocation2 + $0x17a4] sm:$0xf]  ;;  %6772 = vmatmul.bf16.vlgmr.msrb.gmra.mxu1 %v12804_v9  ;;  %v10491_v57 = vor.u32 %v11549_v17, %v10488_v21 }
 0x4a4   :  { %6816 = vmatpush.bf16.msra.mxu1 %v10523_v20  ;;  %6785 = vmatmul.bf16.vlgmr.msrb.gmra.mxu2 %v12802_v19  ;;  %v10744_v25 = vld [vmem:[#allocation2 + $0x17b0] sm:$0xf0]  ;;  %v11369_v56 = vld [vmem:[#allocation2 + $0x1004] sm:$0xf]  ;;  %v10619_v27 = vor.u32 %v11581_v46, %v10616_v47 }
 0x4a5   :  { %6829 = vmatpush.bf16.msra.mxu2 %v10651_v58  ;;  %6798 = vmatmul.bf16.vlgmr.msrb.gmra.mxu3 %v12806_v51  ;;  %v9768_v61 = vld [vmem:[#allocation2 + $0x1010] sm:$0xf0]  ;;  %v11545_v62 = vld [vmem:[#allocation2 + $0x1584] sm:$0xf]  ;;  %v10747_v24 = vor.u32 %v11613_v14, %v10744_v25 }
 0x4a6   :  { %6842 = vmatpush.bf16.msra.mxu3 %v10779_v11  ;;  %v10472_v48 = vld [vmem:[#allocation2 + $0x1590] sm:$0xf0]  ;;  %v11577_v55 = vld [vmem:[#allocation2 + $0x1684] sm:$0xf]  ;;  %v9771_v20 = vor.u32 %v11369_v56, %v9768_v61 }
 0x4a7   :  { %6756 = vmatpush.bf16.msra.mxu0 %v9803_v30  ;;  %v10600_v12 = vld [vmem:[#allocation2 + $0x1690] sm:$0xf0]  ;;  %v11609_v49 = vld [vmem:[#allocation2 + $0x1784] sm:$0xf]  ;;  %v10475_v58 = vor.u32 %v11545_v62, %v10472_v48  ;;  %v6578_v25 = vpop.f32.mrf.mxu2 }
 0x4a8   :  { %6817 = vmatpush.bf16.msra.mxu1 %v10507_v34  ;;  %v10728_v59 = vld [vmem:[#allocation2 + $0x1790] sm:$0xf0]  ;;  %v11525_v63 = vld [vmem:[#allocation2 + $0x14e4] sm:$0xf]  ;;  %v10603_v5 = vor.u32 %v11577_v55, %v10600_v12  ;;  %v11662_v55 = vld [vmem:[#allocation14] sm:$0xf] }
 0x4a9   :  { %6830 = vmatpush.bf16.msra.mxu2 %v10635_v33  ;;  %v10392_v52 = vld [vmem:[#allocation2 + $0x14f0] sm:$0xf0]  ;;  %v11541_v1 = vld [vmem:[#allocation2 + $0x1564] sm:$0xf]  ;;  %v10731_v11 = vor.u32 %v11609_v49, %v10728_v59  ;;  %v6565_v33 = vpop.f32.mrf.mxu1  ;;  %v2288_v12 = vperm.slane %v11662_v55, 1 }
 0x4aa   :  { %6843 = vmatpush.bf16.msra.mxu3 %v10763_v60  ;;  %v10456_v8 = vld [vmem:[#allocation2 + $0x1570] sm:$0xf0]  ;;  %v10395_v42 = vor.u32 %v11525_v63, %v10392_v52  ;;  %v11573_v54 = vld [vmem:[#allocation2 + $0x1664] sm:$0xf]  ;;  %v10952_v55 = vld [vmem:[#allocation2 + $0x2f4] sm:$0xf0] }
 0x4ab   :  { %6757 = vmatpush.bf16.msra.mxu0 %v9787_v32  ;;  %v10584_v15 = vld [vmem:[#allocation2 + $0x1670] sm:$0xf0]  ;;  %v11605_v0 = vld [vmem:[#allocation2 + $0x1764] sm:$0xf]  ;;  %v10459_v10 = vor.u32 %v11541_v1, %v10456_v8 }
 0x4ac   :  { %6818 = vmatpush.bf16.msra.mxu1 %v10491_v57  ;;  %v10712_v18 = vld [vmem:[#allocation2 + $0x1770] sm:$0xf0]  ;;  %v11521_v30 = vld [vmem:[#allocation2 + $0x14c4] sm:$0xf]  ;;  %v10587_v26 = vor.u32 %v11573_v54, %v10584_v15 }
 0x4ad   :  { %6831 = vmatpush.bf16.msra.mxu2 %v10619_v27  ;;  %v10376_v34 = vld [vmem:[#allocation2 + $0x14d0] sm:$0xf0]  ;;  %v11537_v17 = vld [vmem:[#allocation2 + $0x1544] sm:$0xf]  ;;  %v10715_v21 = vor.u32 %v11605_v0, %v10712_v18  ;;  %v6591_v27 = vpop.f32.mrf.mxu3 }
 0x4ae   :  { %6844 = vmatpush.bf16.msra.mxu3 %v10747_v24  ;;  %v10440_v60 = vld [vmem:[#allocation2 + $0x1550] sm:$0xf0]  ;;  %v10379_v46 = vor.u32 %v11521_v30, %v10376_v34  ;;  %v11569_v47 = vld [vmem:[#allocation2 + $0x1644] sm:$0xf] }
 0x4af   :  { %6758 = vmatpush.bf16.msra.mxu0 %v9771_v20  ;;  %v10568_v28 = vld [vmem:[#allocation2 + $0x1650] sm:$0xf0]  ;;  %v11601_v14 = vld [vmem:[#allocation2 + $0x1744] sm:$0xf]  ;;  %v10443_v61 = vor.u32 %v11537_v17, %v10440_v60  ;;  %v6552_v8 = vpop.f32.mrf.mxu0 }
 0x4b0   :  { %6819 = vmatpush.bf16.msra.mxu1 %v10475_v58  ;;  %v10696_v32 = vld [vmem:[#allocation2 + $0x1750] sm:$0xf0]  ;;  %v11517_v56 = vld [vmem:[#allocation2 + $0x14a4] sm:$0xf]  ;;  %v10571_v62 = vor.u32 %v11569_v47, %v10568_v28  ;;  %v6553_v30 = vadd.f32 %v6552_v8, %v2288_v12  ;;  %v7838_v28 = vld [vmem:[#allocation2 + $0xe8] sm:$0xf] }
 0x4b1   :  { %6832 = vmatpush.bf16.msra.mxu2 %v10603_v5  ;;  %v10360_v57 = vld [vmem:[#allocation2 + $0x14b0] sm:$0xf0]  ;;  %v11533_v48 = vld [vmem:[#allocation2 + $0x1524] sm:$0xf]  ;;  %v10699_v49 = vor.u32 %v11601_v14, %v10696_v32  ;;  %v10888_v32 = vld [vmem:[#allocation2 + $0xf4] sm:$0xf0] }
 0x4b2   :  { %6845 = vmatpush.bf16.msra.mxu3 %v10731_v11  ;;  %6759 = vmatmul.bf16.vlgmr.msra.gmra.mxu0 %v12800_v29  ;;  %v10424_v24 = vld [vmem:[#allocation2 + $0x1530] sm:$0xf0]  ;;  %v10363_v59 = vor.u32 %v11517_v56, %v10360_v57  ;;  %v11565_v63 = vld [vmem:[#allocation2 + $0x1624] sm:$0xf]  ;;  %v6567_v11 = vpop.f32.mrf.mxu1  ;;  %v6566_v14 = vadd.f32 %v6565_v33, %v6553_v30  ;;  %v7966_v56 = vld [vmem:[#allocation2 + $0x1e8] sm:$0xf] }
 0x4b3   :  { %6803 = vmatpush.bf16.msrb.mxu0 %v10395_v42  ;;  %v10552_v52 = vld [vmem:[#allocation2 + $0x1630] sm:$0xf0]  ;;  %v11597_v20 = vld [vmem:[#allocation2 + $0x1724] sm:$0xf]  ;;  %v10427_v42 = vor.u32 %v11533_v48, %v10424_v24  ;;  %v10920_v57 = vld [vmem:[#allocation2 + $0x1f4] sm:$0xf0] }
 0x4b4   :  { %6820 = vmatpush.bf16.msra.mxu1 %v10459_v10  ;;  %v10680_v58 = vld [vmem:[#allocation2 + $0x1730] sm:$0xf0]  ;;  %v11513_v5 = vld [vmem:[#allocation2 + $0x1484] sm:$0xf]  ;;  %v10555_v54 = vor.u32 %v11565_v63, %v10552_v52  ;;  %v8094_v24 = vld [vmem:[#allocation2 + $0x2e8] sm:$0xf]  ;;  %v6579_v12 = vadd.f32 %v6578_v25, %v6566_v14  ;;  %v7839_v63 = vor.u32 %v10888_v32, %v7838_v28  ;;  %v7967_v52 = vor.u32 %v10920_v57, %v7966_v56 }
 0x4b5   :  { %6833 = vmatpush.bf16.msra.mxu2 %v10587_v26  ;;  %v10344_v1 = vld [vmem:[#allocation2 + $0x1490] sm:$0xf0]  ;;  %v11529_v15 = vld [vmem:[#allocation2 + $0x1504] sm:$0xf]  ;;  %v10683_v34 = vor.u32 %v11597_v20, %v10680_v58  ;;  %v7822_v33 = vld [vmem:[#allocation2 + $0xc8] sm:$0xf] }
 0x4b6   :  { %6846 = vmatpush.bf16.msra.mxu3 %v10715_v21  ;;  %v10408_v0 = vld [vmem:[#allocation2 + $0x1510] sm:$0xf0]  ;;  %v11561_v18 = vld [vmem:[#allocation2 + $0x1604] sm:$0xf]  ;;  %v10347_v10 = vor.u32 %v11513_v5, %v10344_v1  ;;  %v6580_v21 = vpop.f32.mrf.mxu2  ;;  %v12865_v5 = vadd.f32 %v6591_v27, %v6579_v12  ;;  %v8095_v1 = vor.u32 %v10952_v55, %v8094_v24  ;;  %v10884_v8 = vld [vmem:[#allocation2 + $0xd4] sm:$0xf0] }
 0x4b7   :  { %6804 = vmatpush.bf16.msrb.mxu0 %v10379_v46  ;;  %v10536_v26 = vld [vmem:[#allocation2 + $0x1610] sm:$0xf0]  ;;  %v11593_v17 = vld [vmem:[#allocation2 + $0x1704] sm:$0xf]  ;;  %v7950_v11 = vld [vmem:[#allocation2 + $0x1c8] sm:$0xf] }
 0x4b8   :  { %6821 = vmatpush.bf16.msra.mxu1 %v10443_v61  ;;  %v10664_v60 = vld [vmem:[#allocation2 + $0x1710] sm:$0xf0]  ;;  %v11509_v46 = vld [vmem:[#allocation2 + $0x1464] sm:$0xf]  ;;  %v6593_v61 = vpop.f32.mrf.mxu3  ;;  %v10539_v48 = vor.u32 %v11561_v18, %v10536_v26  ;;  %v10948_v25 = vld [vmem:[#allocation2 + $0x2d4] sm:$0xf0]  ;;  %v7823_v18 = vor.u32 %v10884_v8, %v7822_v33 }
 0x4b9   :  { %6834 = vmatpush.bf16.msra.mxu2 %v10571_v62  ;;  %v10328_v47 = vld [vmem:[#allocation2 + $0x1470] sm:$0xf0]  ;;  %v10411_v62 = vor.u32 %v11529_v15, %v10408_v0  ;;  %v11505_v20 = vld [vmem:[#allocation2 + $0x1444] sm:$0xf]  ;;  %v8078_v15 = vld [vmem:[#allocation2 + $0x2c8] sm:$0xf] }
 0x4ba   :  { %6847 = vmatpush.bf16.msra.mxu3 %v10699_v49  ;;  %v10667_v49 = vor.u32 %v11593_v17, %v10664_v60  ;;  %v10312_v58 = vld [vmem:[#allocation2 + $0x1450] sm:$0xf0]  ;;  %v7806_v27 = vld [vmem:[#allocation2 + $0xa8] sm:$0xf]  ;;  %v8079_v26 = vor.u32 %v10948_v25, %v8078_v15  ;;  %v10880_v17 = vld [vmem:[#allocation2 + $0xb4] sm:$0xf0] }
 0x4bb   :  { %6805 = vmatpush.bf16.msrb.mxu0 %v10363_v59  ;;  %v10331_v59 = vor.u32 %v11509_v46, %v10328_v47  ;;  %v10315_v0 = vor.u32 %v11505_v20, %v10312_v58  ;;  %v7934_v60 = vld [vmem:[#allocation2 + $0x1a8] sm:$0xf]  ;;  %v10912_v21 = vld [vmem:[#allocation2 + $0x1b4] sm:$0xf0]  ;;  %v11497_v14 = vld [vmem:[#allocation2 + $0x1404] sm:$0xf]  ;;  %v7807_v32 = vor.u32 %v10880_v17, %v7806_v27 }
 0x4bc   :  { %6822 = vmatpush.bf16.msra.mxu1 %v10427_v42  ;;  %v10916_v42 = vld [vmem:[#allocation2 + $0x1d4] sm:$0xf0]  ;;  %v8062_v46 = vld [vmem:[#allocation2 + $0x2a8] sm:$0xf]  ;;  %v7935_v56 = vor.u32 %v10912_v21, %v7934_v60  ;;  %v10280_v57 = vld [vmem:[#allocation2 + $0x1410] sm:$0xf0] }
 0x4bd   :  { %6835 = vmatpush.bf16.msra.mxu2 %v10555_v54  ;;  %v6554_v54 = vpop.f32.mrf.mxu0  ;;  %v7951_v30 = vor.u32 %v10916_v42, %v7950_v11  ;;  %v10944_v47 = vld [vmem:[#allocation2 + $0x2b4] sm:$0xf0]  ;;  %v7790_v61 = vld [vmem:[#allocation2 + $0x88] sm:$0xf] }
 0x4be   :  { %6848 = vmatpush.bf16.msra.mxu3 %v10683_v34  ;;  %v11501_v34 = vld [vmem:[#allocation2 + $0x1424] sm:$0xf]  ;;  %v7918_v24 = vld [vmem:[#allocation2 + $0x188] sm:$0xf]  ;;  %v10908_v55 = vld [vmem:[#allocation2 + $0x194] sm:$0xf0] }
 0x4bf   :  { %6806 = vmatpush.bf16.msrb.mxu0 %v10347_v10  ;;  %v10296_v10 = vld [vmem:[#allocation2 + $0x1430] sm:$0xf0]  ;;  %v8046_v12 = vld [vmem:[#allocation2 + $0x288] sm:$0xf]  ;;  %v7919_v33 = vor.u32 %v10908_v55, %v7918_v24  ;;  %v10872_v8 = vld [vmem:[#allocation2 + $0x74] sm:$0xf0] }
 0x4c0   :  { %6823 = vmatpush.bf16.msra.mxu1 %v10411_v62  ;;  %v10299_v28 = vor.u32 %v11501_v34, %v10296_v10  ;;  %v10876_v62 = vld [vmem:[#allocation2 + $0x94] sm:$0xf0]  ;;  %v12870_v20 = vpop.f32.mrf.mxu1  ;;  %v7902_v54 = vld [vmem:[#allocation2 + $0x168] sm:$0xf] }
 0x4c1   :  { %6836 = vmatpush.bf16.msra.mxu2 %v10539_v48  ;;  %v8063_v48 = vor.u32 %v10944_v47, %v8062_v46  ;;  %v7791_v58 = vor.u32 %v10876_v62, %v7790_v61  ;;  %v10904_v15 = vld [vmem:[#allocation2 + $0x174] sm:$0xf0]  ;;  %v8030_v25 = vld [vmem:[#allocation2 + $0x268] sm:$0xf] }
 0x4c2   :  { %6849 = vmatpush.bf16.msra.mxu3 %v10667_v49  ;;  %v10940_v49 = vld [vmem:[#allocation2 + $0x294] sm:$0xf0]  ;;  %v7903_v10 = vor.u32 %v10904_v15, %v7902_v54  ;;  %v7758_v27 = vld [vmem:[#allocation2 + $0x48] sm:$0xf] }
 0x4c3   :  { %6807 = vmatpush.bf16.msrb.mxu0 %v10331_v59  ;;  %6824 = vmatmul.bf16.vlgmr.msra.gmra.mxu1 %v12818_v7  ;;  %v11637_v59 = vld [vmem:[#allocation2 + $0x1864] sm:$0xf]  ;;  %v8047_v11 = vor.u32 %v10940_v49, %v8046_v12  ;;  %v7886_v46 = vld [vmem:[#allocation2 + $0x148] sm:$0xf]  ;;  %v10900_v47 = vld [vmem:[#allocation2 + $0x154] sm:$0xf0] }
 0x4c4   :  { %6868 = vmatpush.bf16.msrb.mxu1 %v7839_v63  ;;  %6837 = vmatmul.bf16.vlgmr.msra.gmra.mxu2 %v12816_v6  ;;  %v10840_v63 = vld [vmem:[#allocation2 + $0x1870] sm:$0xf0]  ;;  %v7742_v24 = vld [vmem:[#allocation2 + $0x28] sm:$0xf]  ;;  %v10864_v55 = vld [vmem:[#allocation2 + $0x34] sm:$0xf0] }
 0x4c5   :  { %6881 = vmatpush.bf16.msrb.mxu2 %v7967_v52  ;;  %6850 = vmatmul.bf16.vlgmr.msra.gmra.mxu3 %v12820_v13  ;;  %v10283_v52 = vor.u32 %v11497_v14, %v10280_v57  ;;  %v10843_v42 = vor.u32 %v11637_v59, %v10840_v63  ;;  %v10808_v57 = vld [vmem:[#allocation2 + $0x1830] sm:$0xf0]  ;;  %v7870_v59 = vld [vmem:[#allocation2 + $0x128] sm:$0xf]  ;;  %v10896_v63 = vld [vmem:[#allocation2 + $0x134] sm:$0xf0]  ;;  %v7743_v54 = vor.u32 %v10864_v55, %v7742_v24 }
 0x4c6   :  { %6894 = vmatpush.bf16.msrb.mxu3 %v8095_v1  ;;  %v7774_v1 = vld [vmem:[#allocation2 + $0x68] sm:$0xf]  ;;  %v7871_v15 = vor.u32 %v10896_v63, %v7870_v59 }
 0x4c7   :  { %6808 = vmatpush.bf16.msrb.mxu0 %v10315_v0  ;;  %v10936_v0 = vld [vmem:[#allocation2 + $0x274] sm:$0xf0]  ;;  %v7775_v34 = vor.u32 %v10872_v8, %v7774_v1  ;;  %v12872_v17 = vpop.f32.mrf.mxu2  ;;  %v10792_v1 = vld [vmem:[#allocation2 + $0x1810] sm:$0xf0]  ;;  %v8222_v8 = vld [vmem:[#allocation2 + $0x3e8] sm:$0xf] }
 0x4c8   :  { %6869 = vmatpush.bf16.msrb.mxu1 %v7823_v18  ;;  %v11633_v18 = vld [vmem:[#allocation2 + $0x1844] sm:$0xf]  ;;  %v8031_v60 = vor.u32 %v10936_v0, %v8030_v25  ;;  %v12874_v14 = vpop.f32.mrf.mxu3  ;;  %v6619_v61 = vpop.f32.mrf.mxu1  ;;  %v7726_v0 = vld [vmem:[#allocation2 + $0x8] sm:$0xf] }
 0x4c9   :  { %6882 = vmatpush.bf16.msrb.mxu2 %v7951_v30  ;;  %v10824_v30 = vld [vmem:[#allocation2 + $0x1850] sm:$0xf0]  ;;  %v11048_v61 = vld [vmem:[#allocation2 + $0x5f4] sm:$0xf0]  ;;  %v8206_v55 = vld [vmem:[#allocation2 + $0x3c8] sm:$0xf] }
 0x4ca   :  { %6895 = vmatpush.bf16.msrb.mxu3 %v8079_v26  ;;  %v10868_v26 = vld [vmem:[#allocation2 + $0x54] sm:$0xf0]  ;;  %v10827_v21 = vor.u32 %v11633_v18, %v10824_v30  ;;  %v7854_v30 = vld [vmem:[#allocation2 + $0x108] sm:$0xf] }
 0x4cb   :  { %6809 = vmatpush.bf16.msrb.mxu0 %v10299_v28  ;;  %v8014_v28 = vld [vmem:[#allocation2 + $0x248] sm:$0xf]  ;;  %v7759_v62 = vor.u32 %v10868_v26, %v7758_v27  ;;  %v10860_v18 = vld [vmem:[#allocation2 + $0x14] sm:$0xf0] }
 0x4cc   :  { %6870 = vmatpush.bf16.msrb.mxu1 %v7807_v32  ;;  %v10932_v32 = vld [vmem:[#allocation2 + $0x254] sm:$0xf0] }
 0x4cd   :  { %6883 = vmatpush.bf16.msrb.mxu2 %v7935_v56  ;;  %v11629_v56 = vld [vmem:[#allocation2 + $0x1824] sm:$0xf]  ;;  %v8015_v12 = vor.u32 %v10932_v32, %v8014_v28  ;;  %v10892_v26 = vld [vmem:[#allocation2 + $0x114] sm:$0xf0]  ;;  %v8350_v32 = vld [vmem:[#allocation2 + $0x4e8] sm:$0xf] }
 0x4ce   :  { %6896 = vmatpush.bf16.msrb.mxu3 %v8063_v48  ;;  %v7887_v48 = vor.u32 %v10900_v47, %v7886_v46  ;;  %v10811_v49 = vor.u32 %v11629_v56, %v10808_v57  ;;  %v11016_v56 = vld [vmem:[#allocation2 + $0x4f4] sm:$0xf0]  ;;  %v8478_v57 = vld [vmem:[#allocation2 + $0x5e8] sm:$0xf]  ;;  %v7855_v24 = vor.u32 %v10892_v26, %v7854_v30 }
 0x4cf   :  { %6810 = vmatpush.bf16.msrb.mxu0 %v10283_v52  ;;  %v7998_v52 = vld [vmem:[#allocation2 + $0x228] sm:$0xf]  ;;  %v8351_v63 = vor.u32 %v11016_v56, %v8350_v32 }
 0x4d0   :  { %6871 = vmatpush.bf16.msrb.mxu1 %v7791_v58  ;;  %v10928_v58 = vld [vmem:[#allocation2 + $0x234] sm:$0xf0]  ;;  %v6645_v46 = vpop.f32.mrf.mxu3 }
 0x4d1   :  { %6884 = vmatpush.bf16.msrb.mxu2 %v7919_v33  ;;  %v11625_v33 = vld [vmem:[#allocation2 + $0x1804] sm:$0xf]  ;;  %v11072_v46 = vld [vmem:[#allocation2 + $0x6b4] sm:$0xf0] }
 0x4d2   :  { %6897 = vmatpush.bf16.msrb.mxu3 %v8047_v11  ;;  %6811 = vmatmul.bf16.vlgmr.msrb.gmra.mxu0 %v12814_v4  ;;  %v10984_v11 = vld [vmem:[#allocation2 + $0x3f4] sm:$0xf0]  ;;  %v10795_v27 = vor.u32 %v11625_v33, %v10792_v1  ;;  %v8334_v33 = vld [vmem:[#allocation2 + $0x4c8] sm:$0xf] }
 0x4d3   :  { %6859 = vmatpush.bf16.msra.mxu0 %v10843_v42  ;;  %v6604_v42 = vpop.f32.mrf.mxu0  ;;  %v8223_v47 = vor.u32 %v10984_v11, %v8222_v8  ;;  %v11012_v1 = vld [vmem:[#allocation2 + $0x4d4] sm:$0xf0]  ;;  %v8462_v8 = vld [vmem:[#allocation2 + $0x5c8] sm:$0xf] }
 0x4d4   :  { %6872 = vmatpush.bf16.msrb.mxu1 %v7775_v34  ;;  %v6605_v25 = vadd.f32 %v6604_v42, %v12865_v5  ;;  %v6632_v34 = vpop.f32.mrf.mxu2  ;;  %v8606_v5 = vld [vmem:[#allocation2 + $0x6e8] sm:$0xf]  ;;  %v11044_v42 = vld [vmem:[#allocation2 + $0x5d4] sm:$0xf0] }
 0x4d5   :  { %6885 = vmatpush.bf16.msrb.mxu2 %v7903_v10  ;;  %v7999_v10 = vor.u32 %v10928_v58, %v7998_v52  ;;  %v8463_v30 = vor.u32 %v11044_v42, %v8462_v8  ;;  %v8318_v34 = vld [vmem:[#allocation2 + $0x4a8] sm:$0xf]  ;;  %v11000_v8 = vld [vmem:[#allocation2 + $0x474] sm:$0xf0] }
 0x4d6   :  { %6898 = vmatpush.bf16.msrb.mxu3 %v8031_v60  ;;  %v7982_v60 = vld [vmem:[#allocation2 + $0x208] sm:$0xf]  ;;  %v6618_v28 = vadd.f32 %v12870_v20, %v6605_v25  ;;  %v8479_v20 = vor.u32 %v11048_v61, %v8478_v57 }
 0x4d7   :  { %6860 = vmatpush.bf16.msra.mxu0 %v10827_v21  ;;  %v10924_v21 = vld [vmem:[#allocation2 + $0x214] sm:$0xf0]  ;;  %v8302_v61 = vld [vmem:[#allocation2 + $0x488] sm:$0xf] }
 0x4d8   :  { %6873 = vmatpush.bf16.msrb.mxu1 %v7759_v62  ;;  %v11080_v62 = vld [vmem:[#allocation2 + $0x6f4] sm:$0xf0]  ;;  %v7983_v59 = vor.u32 %v10924_v21, %v7982_v60  ;;  %v8574_v21 = vld [vmem:[#allocation2 + $0x6a8] sm:$0xf] }
 0x4d9   :  { %6886 = vmatpush.bf16.msrb.mxu2 %v7887_v48  ;;  %v7727_v48 = vor.u32 %v10860_v18, %v7726_v0  ;;  %v8607_v52 = vor.u32 %v11080_v62, %v8606_v5  ;;  %v10976_v0 = vld [vmem:[#allocation2 + $0x3b4] sm:$0xf0]  ;;  %v8335_v18 = vor.u32 %v11012_v1, %v8334_v33  ;;  %v8575_v57 = vor.u32 %v11072_v46, %v8574_v21  ;;  %v8430_v62 = vld [vmem:[#allocation2 + $0x588] sm:$0xf] }
 0x4da   :  { %6899 = vmatpush.bf16.msrb.mxu3 %v8015_v12  ;;  %v10980_v12 = vld [vmem:[#allocation2 + $0x3d4] sm:$0xf0]  ;;  %v8286_v1 = vld [vmem:[#allocation2 + $0x468] sm:$0xf] }
 0x4db   :  { %6861 = vmatpush.bf16.msra.mxu0 %v10811_v49  ;;  %v6631_v49 = vadd.f32 %v12872_v17, %v6618_v28  ;;  %v8207_v11 = vor.u32 %v10980_v12, %v8206_v55  ;;  %v6606_v25 = vpop.f32.mrf.mxu0  ;;  %v8190_v17 = vld [vmem:[#allocation2 + $0x3a8] sm:$0xf]  ;;  %v11040_v60 = vld [vmem:[#allocation2 + $0x5b4] sm:$0xf0] }
 0x4dc   :  { %6874 = vmatpush.bf16.msrb.mxu1 %v7743_v54  ;;  %v8590_v54 = vld [vmem:[#allocation2 + $0x6c8] sm:$0xf]  ;;  %v8191_v26 = vor.u32 %v10976_v0, %v8190_v17  ;;  %v10972_v28 = vld [vmem:[#allocation2 + $0x394] sm:$0xf0] }
 0x4dd   :  { %6887 = vmatpush.bf16.msrb.mxu2 %v7871_v15  ;;  %v12881_v58 = vadd.f32 %v12874_v14, %v6631_v49  ;;  %v11076_v15 = vld [vmem:[#allocation2 + $0x6d4] sm:$0xf0]  ;;  %v8558_v55 = vld [vmem:[#allocation2 + $0x688] sm:$0xf] }
 0x4de   :  { %6900 = vmatpush.bf16.msrb.mxu3 %v7999_v10  ;;  %v8591_v14 = vor.u32 %v11076_v15, %v8590_v54  ;;  %v11008_v10 = vld [vmem:[#allocation2 + $0x4b4] sm:$0xf0]  ;;  %v8158_v49 = vld [vmem:[#allocation2 + $0x368] sm:$0xf] }
 0x4df   :  { %6862 = vmatpush.bf16.msra.mxu0 %v10795_v27  ;;  %v8446_v27 = vld [vmem:[#allocation2 + $0x5a8] sm:$0xf]  ;;  %v8319_v32 = vor.u32 %v11008_v10, %v8318_v34  ;;  %v11004_v5 = vld [vmem:[#allocation2 + $0x494] sm:$0xf0] }
 0x4e0   :  { %6875 = vmatpush.bf16.msrb.mxu1 %v7727_v48  ;;  %v8447_v56 = vor.u32 %v11040_v60, %v8446_v27  ;;  %v11068_v12 = vld [vmem:[#allocation2 + $0x694] sm:$0xf0]  ;;  %v8542_v15 = vld [vmem:[#allocation2 + $0x668] sm:$0xf] }
 0x4e1   :  { %6888 = vmatpush.bf16.msrb.mxu2 %v7855_v24  ;;  %v11036_v24 = vld [vmem:[#allocation2 + $0x594] sm:$0xf0]  ;;  %v8559_v33 = vor.u32 %v11068_v12, %v8558_v55  ;;  %v8142_v17 = vld [vmem:[#allocation2 + $0x348] sm:$0xf] }
 0x4e2   :  { %6901 = vmatpush.bf16.msrb.mxu3 %v7983_v59  ;;  %10853 = vmatmul.msk.bf16.vlgmr.msra.gmra.mxu0 %vm491_vm2, %v12827_v22  ;;  %v10968_v59 = vld [vmem:[#allocation2 + $0x374] sm:$0xf0]  ;;  %v8270_v34 = vld [vmem:[#allocation2 + $0x448] sm:$0xf] }
 0x4e3   :  { %6907 = vmatpush.bf16.msrb.mxu0 %v8223_v47  ;;  %6876 = vmatmul.bf16.vlgmr.msrb.gmra.mxu1 %v12722_v38  ;;  %v8174_v47 = vld [vmem:[#allocation2 + $0x388] sm:$0xf]  ;;  %v8159_v42 = vor.u32 %v10968_v59, %v8158_v49  ;;  %v11032_v54 = vld [vmem:[#allocation2 + $0x574] sm:$0xf0] }
 0x4e4   :  { %6920 = vmatpush.bf16.msra.mxu1 %v8351_v63  ;;  %6889 = vmatmul.bf16.vlgmr.msrb.gmra.mxu2 %v12726_v45  ;;  %v8175_v48 = vor.u32 %v10972_v28, %v8174_v47  ;;  %v8303_v63 = vor.u32 %v11004_v5, %v8302_v61  ;;  %v11064_v25 = vld [vmem:[#allocation2 + $0x674] sm:$0xf0]  ;;  %v8398_v27 = vld [vmem:[#allocation2 + $0x548] sm:$0xf] }
 0x4e5   :  { %6933 = vmatpush.bf16.msra.mxu2 %v8479_v20  ;;  %6902 = vmatmul.bf16.vlgmr.msrb.gmra.mxu3 %v12720_v35  ;;  %v12888_v20 = vpop.f32.mrf.mxu1  ;;  %v10964_v0 = vld [vmem:[#allocation2 + $0x354] sm:$0xf0]  ;;  %v8526_v46 = vld [vmem:[#allocation2 + $0x648] sm:$0xf] }
 0x4e6   :  { %6946 = vmatpush.bf16.msra.mxu3 %v8607_v52  ;;  %v8431_v52 = vor.u32 %v11036_v24, %v8430_v62  ;;  %v10996_v10 = vld [vmem:[#allocation2 + $0x454] sm:$0xf0]  ;;  %v8143_v60 = vor.u32 %v10964_v0, %v8142_v17  ;;  %v8382_v55 = vld [vmem:[#allocation2 + $0x528] sm:$0xf] }
 0x4e7   :  { %6908 = vmatpush.bf16.msrb.mxu0 %v8207_v11  ;;  %v8414_v11 = vld [vmem:[#allocation2 + $0x568] sm:$0xf]  ;;  %v11028_v21 = vld [vmem:[#allocation2 + $0x554] sm:$0xf0] }
 0x4e8   :  { %6921 = vmatpush.bf16.msra.mxu1 %v8335_v18  ;;  %v8287_v18 = vor.u32 %v11000_v8, %v8286_v1  ;;  %v11060_v47 = vld [vmem:[#allocation2 + $0x654] sm:$0xf0]  ;;  %v12890_v28 = vpop.f32.mrf.mxu3  ;;  %v8399_v5 = vor.u32 %v11028_v21, %v8398_v27  ;;  %v8510_v59 = vld [vmem:[#allocation2 + $0x628] sm:$0xf] }
 0x4e9   :  { %6934 = vmatpush.bf16.msra.mxu2 %v8463_v30  ;;  %v8415_v30 = vor.u32 %v11032_v54, %v8414_v11  ;;  %v8527_v62 = vor.u32 %v11060_v47, %v8526_v46  ;;  %v10992_v24 = vld [vmem:[#allocation2 + $0x434] sm:$0xf0]  ;;  %v8734_v1 = vld [vmem:[#allocation2 + $0x7e8] sm:$0xf] }
 0x4ea   :  { %6947 = vmatpush.bf16.msra.mxu3 %v8591_v14  ;;  %v8543_v14 = vor.u32 %v11064_v25, %v8542_v15  ;;  %v11024_v49 = vld [vmem:[#allocation2 + $0x534] sm:$0xf0]  ;;  %v8238_v54 = vld [vmem:[#allocation2 + $0x408] sm:$0xf] }
 0x4eb   :  { %6909 = vmatpush.bf16.msrb.mxu0 %v8191_v26  ;;  %v6682_v26 = vpop.f32.mrf.mxu2  ;;  %v10988_v15 = vld [vmem:[#allocation2 + $0x414] sm:$0xf0]  ;;  %v8383_v17 = vor.u32 %v11024_v49, %v8382_v55 }
 0x4ec   :  { %6922 = vmatpush.bf16.msra.mxu1 %v8319_v32  ;;  %v8126_v32 = vld [vmem:[#allocation2 + $0x328] sm:$0xf]  ;;  %v11052_v27 = vld [vmem:[#allocation2 + $0x614] sm:$0xf0] }
 0x4ed   :  { %6935 = vmatpush.bf16.msra.mxu2 %v8447_v56  ;;  %v10960_v56 = vld [vmem:[#allocation2 + $0x334] sm:$0xf0]  ;;  %v6671_v61 = vpop.f32.mrf.mxu1 }
 0x4ee   :  { %6948 = vmatpush.bf16.msra.mxu3 %v8575_v57  ;;  %v8271_v57 = vor.u32 %v10996_v10, %v8270_v34  ;;  %v8127_v12 = vor.u32 %v10960_v56, %v8126_v32  ;;  %v11144_v21 = vld [vmem:[#allocation2 + $0x8f4] sm:$0xf0]  ;;  %v8990_v56 = vld [vmem:[#allocation2 + $0x9e8] sm:$0xf] }
 0x4ef   :  { %6910 = vmatpush.bf16.msrb.mxu0 %v8175_v48  ;;  %v8254_v48 = vld [vmem:[#allocation2 + $0x428] sm:$0xf]  ;;  %v6656_v8 = vpop.f32.mrf.mxu0 }
 0x4f0   :  { %6923 = vmatpush.bf16.msra.mxu1 %v8303_v63  ;;  %v11056_v63 = vld [vmem:[#allocation2 + $0x634] sm:$0xf0]  ;;  %v8255_v11 = vor.u32 %v10992_v24, %v8254_v48  ;;  %v6657_v25 = vadd.f32 %v6656_v8, %v12881_v58  ;;  %v6697_v46 = vpop.f32.mrf.mxu3  ;;  %v9118_v61 = vld [vmem:[#allocation2 + $0xae8] sm:$0xf]  ;;  %v8239_v58 = vor.u32 %v10988_v15, %v8238_v54 }
 0x4f1   :  { %6936 = vmatpush.bf16.msra.mxu2 %v8431_v52  ;;  %v8110_v52 = vld [vmem:[#allocation2 + $0x308] sm:$0xf]  ;;  %v8511_v0 = vor.u32 %v11056_v63, %v8510_v59  ;;  %v11108_v48 = vld [vmem:[#allocation2 + $0x7d4] sm:$0xf0] }
 0x4f2   :  { %6949 = vmatpush.bf16.msra.mxu3 %v8559_v33  ;;  %v10956_v33 = vld [vmem:[#allocation2 + $0x314] sm:$0xf0]  ;;  %v6670_v47 = vadd.f32 %v12888_v20, %v6657_v25  ;;  %v8846_v63 = vld [vmem:[#allocation2 + $0x8c8] sm:$0xf] }
 0x4f3   :  { %6911 = vmatpush.bf16.msrb.mxu0 %v8159_v42  ;;  %v11112_v42 = vld [vmem:[#allocation2 + $0x7f4] sm:$0xf0]  ;;  %v6684_v34 = vpop.f32.mrf.mxu2  ;;  %v8111_v10 = vor.u32 %v10956_v33, %v8110_v52  ;;  %v8974_v8 = vld [vmem:[#allocation2 + $0x9c8] sm:$0xf] }
 0x4f4   :  { %6924 = vmatpush.bf16.msra.mxu1 %v8287_v18  ;;  %v8366_v18 = vld [vmem:[#allocation2 + $0x508] sm:$0xf]  ;;  %v8735_v32 = vor.u32 %v11112_v42, %v8734_v1  ;;  %v6683_v24 = vadd.f32 %v6682_v26, %v6670_v47  ;;  %v11140_v52 = vld [vmem:[#allocation2 + $0x8d4] sm:$0xf0] }
 0x4f5   :  { %6937 = vmatpush.bf16.msra.mxu2 %v8415_v30  ;;  %v11020_v30 = vld [vmem:[#allocation2 + $0x514] sm:$0xf0]  ;;  %v9102_v42 = vld [vmem:[#allocation2 + $0xac8] sm:$0xf] }
 0x4f6   :  { %6950 = vmatpush.bf16.msra.mxu3 %v8543_v14  ;;  %v8494_v14 = vld [vmem:[#allocation2 + $0x608] sm:$0xf]  ;;  %v8367_v55 = vor.u32 %v11020_v30, %v8366_v18  ;;  %v12895_v33 = vadd.f32 %v12890_v28, %v6683_v24  ;;  %v11204_v54 = vld [vmem:[#allocation2 + $0xad4] sm:$0xf0] }
 0x4f7   :  { %6912 = vmatpush.bf16.msrb.mxu0 %v8143_v60  ;;  %v8862_v60 = vld [vmem:[#allocation2 + $0x8e8] sm:$0xf]  ;;  %v11104_v26 = vld [vmem:[#allocation2 + $0x7b4] sm:$0xf0]  ;;  %v6658_v25 = vpop.f32.mrf.mxu0  ;;  %v9103_v28 = vor.u32 %v11204_v54, %v9102_v42 }
 0x4f8   :  { %6925 = vmatpush.bf16.msra.mxu1 %v8271_v57  ;;  %v11176_v57 = vld [vmem:[#allocation2 + $0x9f4] sm:$0xf0]  ;;  %v8863_v49 = vor.u32 %v11144_v21, %v8862_v60  ;;  %v8702_v15 = vld [vmem:[#allocation2 + $0x7a8] sm:$0xf] }
 0x4f9   :  { %6938 = vmatpush.bf16.msra.mxu2 %v8399_v5  ;;  %v11208_v5 = vld [vmem:[#allocation2 + $0xaf4] sm:$0xf0]  ;;  %v8991_v59 = vor.u32 %v11176_v57, %v8990_v56  ;;  %v8830_v18 = vld [vmem:[#allocation2 + $0x8a8] sm:$0xf] }
 0x4fa   :  { %6951 = vmatpush.bf16.msra.mxu3 %v8527_v62  ;;  %v8718_v62 = vld [vmem:[#allocation2 + $0x7c8] sm:$0xf]  ;;  %v9119_v20 = vor.u32 %v11208_v5, %v9118_v61  ;;  %v11136_v30 = vld [vmem:[#allocation2 + $0x8b4] sm:$0xf0] }
 0x4fb   :  { %6913 = vmatpush.bf16.msrb.mxu0 %v8127_v12  ;;  %v8495_v12 = vor.u32 %v11052_v27, %v8494_v14  ;;  %v8719_v1 = vor.u32 %v11108_v48, %v8718_v62  ;;  %v8703_v14 = vor.u32 %v11104_v26, %v8702_v15  ;;  %v8958_v34 = vld [vmem:[#allocation2 + $0x9a8] sm:$0xf]  ;;  %v11200_v60 = vld [vmem:[#allocation2 + $0xab4] sm:$0xf0]  ;;  %v8831_v47 = vor.u32 %v11136_v30, %v8830_v18 }
 0x4fc   :  { %6926 = vmatpush.bf16.msra.mxu1 %v8255_v11  ;;  %v11172_v11 = vld [vmem:[#allocation2 + $0x9d4] sm:$0xf0]  ;;  %v9086_v27 = vld [vmem:[#allocation2 + $0xaa8] sm:$0xf] }
 0x4fd   :  { %6939 = vmatpush.bf16.msra.mxu2 %v8383_v17  ;;  %v8847_v17 = vor.u32 %v11140_v52, %v8846_v63  ;;  %v8686_v21 = vld [vmem:[#allocation2 + $0x788] sm:$0xf]  ;;  %v11100_v46 = vld [vmem:[#allocation2 + $0x794] sm:$0xf0]  ;;  %v9087_v61 = vor.u32 %v11200_v60, %v9086_v27 }
 0x4fe   :  { %6952 = vmatpush.bf16.msra.mxu3 %v8511_v0  ;;  %v8975_v0 = vor.u32 %v11172_v11, %v8974_v8  ;;  %v8814_v56 = vld [vmem:[#allocation2 + $0x888] sm:$0xf]  ;;  %v11132_v57 = vld [vmem:[#allocation2 + $0x894] sm:$0xf0] }
 0x4ff   :  { %6914 = vmatpush.bf16.msrb.mxu0 %v8111_v10  ;;  %v11168_v10 = vld [vmem:[#allocation2 + $0x9b4] sm:$0xf0]  ;;  %v8942_v5 = vld [vmem:[#allocation2 + $0x988] sm:$0xf] }
 0x500   :  { %6927 = vmatpush.bf16.msra.mxu1 %v8239_v58  ;;  %v8687_v58 = vor.u32 %v11100_v46, %v8686_v21  ;;  %v11164_v62 = vld [vmem:[#allocation2 + $0x994] sm:$0xf0]  ;;  %v9070_v48 = vld [vmem:[#allocation2 + $0xa88] sm:$0xf] }
 0x501   :  { %6940 = vmatpush.bf16.msra.mxu2 %v8367_v55  ;;  %v11196_v24 = vld [vmem:[#allocation2 + $0xa94] sm:$0xf0]  ;;  %v8670_v55 = vld [vmem:[#allocation2 + $0x768] sm:$0xf] }
 0x502   :  { %6953 = vmatpush.bf16.msra.mxu3 %v8495_v12  ;;  %6915 = vmatmul.bf16.vlgmr.msrb.gmra.mxu0 %v12724_v44  ;;  %v11096_v12 = vld [vmem:[#allocation2 + $0x774] sm:$0xf0]  ;;  %v8798_v63 = vld [vmem:[#allocation2 + $0x868] sm:$0xf] }
 0x503   :  { %6959 = vmatpush.bf16.msra.mxu0 %v8735_v32  ;;  %6928 = vmatmul.bf16.vlgmr.msra.gmra.mxu1 %v12734_v36  ;;  %v8959_v32 = vor.u32 %v11168_v10, %v8958_v34  ;;  %v11128_v52 = vld [vmem:[#allocation2 + $0x874] sm:$0xf0]  ;;  %v8671_v8 = vor.u32 %v11096_v12, %v8670_v55  ;;  %v8926_v11 = vld [vmem:[#allocation2 + $0x968] sm:$0xf] }
 0x504   :  { %6972 = vmatpush.bf16.msrb.mxu1 %v8863_v49  ;;  %6941 = vmatmul.bf16.vlgmr.msra.gmra.mxu2 %v12738_v40  ;;  %v8815_v49 = vor.u32 %v11132_v57, %v8814_v56  ;;  %v11160_v42 = vld [vmem:[#allocation2 + $0x974] sm:$0xf0]  ;;  %v9054_v54 = vld [vmem:[#allocation2 + $0xa68] sm:$0xf] }
 0x505   :  { %6985 = vmatpush.bf16.msrb.mxu2 %v8991_v59  ;;  %6954 = vmatmul.bf16.vlgmr.msra.gmra.mxu3 %v12732_v23  ;;  %v8943_v59 = vor.u32 %v11164_v62, %v8942_v5  ;;  %v11192_v15 = vld [vmem:[#allocation2 + $0xa74] sm:$0xf0]  ;;  %v8654_v26 = vld [vmem:[#allocation2 + $0x748] sm:$0xf] }
 0x506   :  { %6998 = vmatpush.bf16.msrb.mxu3 %v9119_v20  ;;  %v12901_v20 = vpop.f32.mrf.mxu1  ;;  %v11092_v25 = vld [vmem:[#allocation2 + $0x754] sm:$0xf0]  ;;  %v8782_v18 = vld [vmem:[#allocation2 + $0x848] sm:$0xf] }
 0x507   :  { %6960 = vmatpush.bf16.msra.mxu0 %v8719_v1  ;;  %v9071_v1 = vor.u32 %v11196_v24, %v9070_v48  ;;  %v11124_v30 = vld [vmem:[#allocation2 + $0x854] sm:$0xf0]  ;;  %v8910_v34 = vld [vmem:[#allocation2 + $0x948] sm:$0xf]  ;;  %v6734_v60 = vpop.f32.mrf.mxu2 }
 0x508   :  { %6973 = vmatpush.bf16.msrb.mxu1 %v8847_v17  ;;  %v8799_v17 = vor.u32 %v11128_v52, %v8798_v63  ;;  %v11156_v10 = vld [vmem:[#allocation2 + $0x954] sm:$0xf0]  ;;  %v9038_v27 = vld [vmem:[#allocation2 + $0xa48] sm:$0xf]  ;;  %v8783_v56 = vor.u32 %v11124_v30, %v8782_v18 }
 0x509   :  { %6986 = vmatpush.bf16.msrb.mxu2 %v8975_v0  ;;  %v8927_v0 = vor.u32 %v11160_v42, %v8926_v11  ;;  %v11188_v21 = vld [vmem:[#allocation2 + $0xa54] sm:$0xf0]  ;;  %v8638_v46 = vld [vmem:[#allocation2 + $0x728] sm:$0xf]  ;;  %v8911_v57 = vor.u32 %v11156_v10, %v8910_v34 }
 0x50a   :  { %6999 = vmatpush.bf16.msrb.mxu3 %v9103_v28  ;;  %v9055_v28 = vor.u32 %v11192_v15, %v9054_v54  ;;  %v9039_v62 = vor.u32 %v11188_v21, %v9038_v27  ;;  %v8894_v24 = vld [vmem:[#allocation2 + $0x928] sm:$0xf]  ;;  %v11152_v55 = vld [vmem:[#allocation2 + $0x934] sm:$0xf0] }
 0x50b   :  { %6961 = vmatpush.bf16.msra.mxu0 %v8703_v14  ;;  %v8655_v14 = vor.u32 %v11092_v25, %v8654_v26  ;;  %v9022_v12 = vld [vmem:[#allocation2 + $0xa28] sm:$0xf]  ;;  %v11084_v63 = vld [vmem:[#allocation2 + $0x714] sm:$0xf0]  ;;  %v8895_v42 = vor.u32 %v11152_v55, %v8894_v24 }
 0x50c   :  { %6974 = vmatpush.bf16.msrb.mxu1 %v8831_v47  ;;  %v11088_v47 = vld [vmem:[#allocation2 + $0x734] sm:$0xf0]  ;;  %v9246_v52 = vld [vmem:[#allocation2 + $0xbe8] sm:$0xf] }
 0x50d   :  { %6987 = vmatpush.bf16.msrb.mxu2 %v8959_v32  ;;  %v6747_v32 = vpop.f32.mrf.mxu3  ;;  %v8639_v48 = vor.u32 %v11088_v47, %v8638_v46  ;;  %v8750_v54 = vld [vmem:[#allocation2 + $0x808] sm:$0xf]  ;;  %v11116_v15 = vld [vmem:[#allocation2 + $0x814] sm:$0xf0] }
 0x50e   :  { %7000 = vmatpush.bf16.msrb.mxu3 %v9087_v61  ;;  %v8766_v61 = vld [vmem:[#allocation2 + $0x828] sm:$0xf]  ;;  %v6723_v5 = vpop.f32.mrf.mxu1  ;;  %v11148_v18 = vld [vmem:[#allocation2 + $0x914] sm:$0xf0] }
 0x50f   :  { %6962 = vmatpush.bf16.msra.mxu0 %v8687_v58  ;;  %v11120_v58 = vld [vmem:[#allocation2 + $0x834] sm:$0xf0]  ;;  %v9006_v30 = vld [vmem:[#allocation2 + $0xa08] sm:$0xf] }
 0x510   :  { %6975 = vmatpush.bf16.msrb.mxu1 %v8815_v49  ;;  %v11184_v49 = vld [vmem:[#allocation2 + $0xa34] sm:$0xf0]  ;;  %v8767_v11 = vor.u32 %v11120_v58, %v8766_v61  ;;  %v9374_v10 = vld [vmem:[#allocation2 + $0xce8] sm:$0xf]  ;;  %v8751_v61 = vor.u32 %v11116_v15, %v8750_v54 }
 0x511   :  { %6988 = vmatpush.bf16.msrb.mxu2 %v8943_v59  ;;  %v8622_v59 = vld [vmem:[#allocation2 + $0x708] sm:$0xf]  ;;  %v9023_v25 = vor.u32 %v11184_v49, %v9022_v12  ;;  %v11180_v34 = vld [vmem:[#allocation2 + $0xa14] sm:$0xf0] }
 0x512   :  { %7001 = vmatpush.bf16.msrb.mxu3 %v9071_v1  ;;  %v11240_v1 = vld [vmem:[#allocation2 + $0xbf4] sm:$0xf0]  ;;  %v9502_v47 = vld [vmem:[#allocation2 + $0xde8] sm:$0xf]  ;;  %v9007_v24 = vor.u32 %v11180_v34, %v9006_v30 }
 0x513   :  { %6963 = vmatpush.bf16.msra.mxu0 %v8671_v8  ;;  %v6708_v8 = vpop.f32.mrf.mxu0  ;;  %v11272_v27 = vld [vmem:[#allocation2 + $0xcf4] sm:$0xf0]  ;;  %v9230_v58 = vld [vmem:[#allocation2 + $0xbc8] sm:$0xf] }
 0x514   :  { %6976 = vmatpush.bf16.msrb.mxu1 %v8799_v17  ;;  %v6709_v26 = vadd.f32 %v6708_v8, %v12895_v33  ;;  %v8623_v17 = vor.u32 %v11084_v63, %v8622_v59  ;;  %v11336_v33 = vld [vmem:[#allocation2 + $0xef4] sm:$0xf0]  ;;  %v9375_v55 = vor.u32 %v11272_v27, %v9374_v10  ;;  %v9358_v49 = vld [vmem:[#allocation2 + $0xcc8] sm:$0xf] }
 0x515   :  { %6989 = vmatpush.bf16.msrb.mxu2 %v8927_v0  ;;  %v8878_v0 = vld [vmem:[#allocation2 + $0x908] sm:$0xf]  ;;  %v6749_v21 = vpop.f32.mrf.mxu3  ;;  %v11236_v5 = vld [vmem:[#allocation2 + $0xbd4] sm:$0xf0] }
 0x516   :  { %7002 = vmatpush.bf16.msrb.mxu3 %v9055_v28  ;;  %v6736_v28 = vpop.f32.mrf.mxu2  ;;  %v6722_v46 = vadd.f32 %v12901_v20, %v6709_v26  ;;  %v11268_v59 = vld [vmem:[#allocation2 + $0xcd4] sm:$0xf0]  ;;  %v9214_v54 = vld [vmem:[#allocation2 + $0xba8] sm:$0xf] }
 0x517   :  { %6964 = vmatpush.bf16.msra.mxu0 %v8655_v14  ;;  %v9247_v14 = vor.u32 %v11240_v1, %v9246_v52  ;;  %v9231_v52 = vor.u32 %v11236_v5, %v9230_v58  ;;  %v9486_v1 = vld [vmem:[#allocation2 + $0xdc8] sm:$0xf]  ;;  %v11300_v8 = vld [vmem:[#allocation2 + $0xdd4] sm:$0xf0]  ;;  %v9359_v26 = vor.u32 %v11268_v59, %v9358_v49 }
 0x518   :  { %6977 = vmatpush.bf16.msrb.mxu1 %v8783_v56  ;;  %v11304_v56 = vld [vmem:[#allocation2 + $0xdf4] sm:$0xf0]  ;;  %v9470_v30 = vld [vmem:[#allocation2 + $0xda8] sm:$0xf] }
 0x519   :  { %6990 = vmatpush.bf16.msrb.mxu2 %v8911_v57  ;;  %v9630_v57 = vld [vmem:[#allocation2 + $0xee8] sm:$0xf]  ;;  %v9503_v12 = vor.u32 %v11304_v56, %v9502_v47  ;;  %v11296_v28 = vld [vmem:[#allocation2 + $0xdb4] sm:$0xf0] }
 0x51a   :  { %7003 = vmatpush.bf16.msrb.mxu3 %v9039_v62  ;;  %v6735_v62 = vadd.f32 %v6734_v60, %v6722_v46  ;;  %v9631_v20 = vor.u32 %v11336_v33, %v9630_v57  ;;  %v11232_v60 = vld [vmem:[#allocation2 + $0xbb4] sm:$0xf0]  ;;  %v9198_v10 = vld [vmem:[#allocation2 + $0xb88] sm:$0xf]  ;;  %v9471_v46 = vor.u32 %v11296_v28, %v9470_v30 }
 0x51b   :  { %6965 = vmatpush.bf16.msra.mxu0 %v8639_v48  ;;  %v8879_v48 = vor.u32 %v11148_v18, %v8878_v0  ;;  %v6710_v15 = vpop.f32.mrf.mxu0  ;;  %v9215_v18 = vor.u32 %v11232_v60, %v9214_v54  ;;  %v11328_v34 = vld [vmem:[#allocation2 + $0xeb4] sm:$0xf0]  ;;  %v9326_v47 = vld [vmem:[#allocation2 + $0xc88] sm:$0xf] }
 0x51c   :  { %6978 = vmatpush.bf16.msrb.mxu1 %v8767_v11  ;;  %v12905_v63 = vadd.f32 %v6747_v32, %v6735_v62  ;;  %v9614_v11 = vld [vmem:[#allocation2 + $0xec8] sm:$0xf]  ;;  %v11264_v32 = vld [vmem:[#allocation2 + $0xcb4] sm:$0xf0] }
 0x51d   :  { %6991 = vmatpush.bf16.msrb.mxu2 %v8895_v42  ;;  %v11332_v42 = vld [vmem:[#allocation2 + $0xed4] sm:$0xf0]  ;;  %v9454_v33 = vld [vmem:[#allocation2 + $0xd88] sm:$0xf] }
 0x51e   :  { %7004 = vmatpush.bf16.msrb.mxu3 %v9023_v25  ;;  %v9487_v25 = vor.u32 %v11300_v8, %v9486_v1  ;;  %v9615_v0 = vor.u32 %v11332_v42, %v9614_v11  ;;  %v11228_v27 = vld [vmem:[#allocation2 + $0xb94] sm:$0xf0]  ;;  %v9582_v5 = vld [vmem:[#allocation2 + $0xe88] sm:$0xf] }
 0x51f   :  { %6966 = vmatpush.bf16.msra.mxu0 %v8623_v17  ;;  %v9342_v17 = vld [vmem:[#allocation2 + $0xca8] sm:$0xf]  ;;  %v11260_v56 = vld [vmem:[#allocation2 + $0xc94] sm:$0xf0] }
 0x520   :  { %6979 = vmatpush.bf16.msrb.mxu1 %v8751_v61  ;;  %v9343_v21 = vor.u32 %v11264_v32, %v9342_v17  ;;  %v9199_v61 = vor.u32 %v11228_v27, %v9198_v10  ;;  %v11292_v58 = vld [vmem:[#allocation2 + $0xd94] sm:$0xf0]  ;;  %v9310_v49 = vld [vmem:[#allocation2 + $0xc68] sm:$0xf] }
 0x521   :  { %6992 = vmatpush.bf16.msrb.mxu2 %v8879_v48  ;;  %v11324_v62 = vld [vmem:[#allocation2 + $0xe94] sm:$0xf0]  ;;  %v9182_v48 = vld [vmem:[#allocation2 + $0xb68] sm:$0xf] }
 0x522   :  { %6967 = vmatmul.bf16.vlgmr.msra.gmra.mxu0 %v12736_v37  ;;  %7005 = vmatpush.bf16.msrb.mxu3 %v9007_v24  ;;  %v11224_v24 = vld [vmem:[#allocation2 + $0xb74] sm:$0xf0]  ;;  %v9438_v8 = vld [vmem:[#allocation2 + $0xd68] sm:$0xf] }
 0x523   :  { %7011 = vmatpush.bf16.msrb.mxu0 %v9247_v14  ;;  %v9598_v14 = vld [vmem:[#allocation2 + $0xea8] sm:$0xf]  ;;  %6980 = vmatmul.bf16.vlgmr.msrb.gmra.mxu1 %v12754_v31  ;;  %v11256_v59 = vld [vmem:[#allocation2 + $0xc74] sm:$0xf0]  ;;  %v9183_v1 = vor.u32 %v11224_v24, %v9182_v48 }
 0x524   :  { %7024 = vmatpush.bf16.msra.mxu1 %v9375_v55  ;;  %6993 = vmatmul.bf16.vlgmr.msrb.gmra.mxu2 %v12762_v43  ;;  %v9599_v57 = vor.u32 %v11328_v34, %v9598_v14  ;;  %v9327_v55 = vor.u32 %v11260_v56, %v9326_v47  ;;  %v11288_v11 = vld [vmem:[#allocation2 + $0xd74] sm:$0xf0]  ;;  %v9566_v42 = vld [vmem:[#allocation2 + $0xe68] sm:$0xf] }
 0x525   :  { %7037 = vmatpush.bf16.msra.mxu2 %v9503_v12  ;;  %7006 = vmatmul.bf16.vlgmr.msrb.gmra.mxu3 %v12758_v41  ;;  %v9455_v12 = vor.u32 %v11292_v58, %v9454_v33  ;;  %v11320_v54 = vld [vmem:[#allocation2 + $0xe74] sm:$0xf0]  ;;  %v9166_v60 = vld [vmem:[#allocation2 + $0xb48] sm:$0xf] }
 0x526   :  { %7050 = vmatpush.bf16.msra.mxu3 %v9631_v20  ;;  %v12911_v20 = vpop.f32.mrf.mxu1  ;;  %v11220_v15 = vld [vmem:[#allocation2 + $0xb54] sm:$0xf0]  ;;  %v9294_v17 = vld [vmem:[#allocation2 + $0xc48] sm:$0xf] }
 0x527   :  { %7012 = vmatpush.bf16.msrb.mxu0 %v9231_v52  ;;  %v9583_v52 = vor.u32 %v11324_v62, %v9582_v5  ;;  %v11252_v32 = vld [vmem:[#allocation2 + $0xc54] sm:$0xf0]  ;;  %v9422_v30 = vld [vmem:[#allocation2 + $0xd48] sm:$0xf]  ;;  %v6786_v34 = vpop.f32.mrf.mxu2 }
 0x528   :  { %7025 = vmatpush.bf16.msra.mxu1 %v9359_v26  ;;  %v9311_v26 = vor.u32 %v11256_v59, %v9310_v49  ;;  %v11284_v28 = vld [vmem:[#allocation2 + $0xd54] sm:$0xf0]  ;;  %v9550_v14 = vld [vmem:[#allocation2 + $0xe48] sm:$0xf]  ;;  %v9295_v47 = vor.u32 %v11252_v32, %v9294_v17 }
 0x529   :  { %7038 = vmatpush.bf16.msra.mxu2 %v9487_v25  ;;  %v9439_v25 = vor.u32 %v11288_v11, %v9438_v8  ;;  %v11316_v10 = vld [vmem:[#allocation2 + $0xe54] sm:$0xf0]  ;;  %v9150_v27 = vld [vmem:[#allocation2 + $0xb28] sm:$0xf]  ;;  %v9423_v56 = vor.u32 %v11284_v28, %v9422_v30 }
 0x52a   :  { %7051 = vmatpush.bf16.msra.mxu3 %v9615_v0  ;;  %v9567_v0 = vor.u32 %v11320_v54, %v9566_v42  ;;  %v9551_v58 = vor.u32 %v11316_v10, %v9550_v14  ;;  %v9406_v62 = vld [vmem:[#allocation2 + $0xd28] sm:$0xf]  ;;  %v11280_v48 = vld [vmem:[#allocation2 + $0xd34] sm:$0xf0] }
 0x52b   :  { %7013 = vmatpush.bf16.msrb.mxu0 %v9215_v18  ;;  %v9167_v18 = vor.u32 %v11220_v15, %v9166_v60  ;;  %v9534_v24 = vld [vmem:[#allocation2 + $0xe28] sm:$0xf]  ;;  %v11212_v49 = vld [vmem:[#allocation2 + $0xb14] sm:$0xf0]  ;;  %v9407_v11 = vor.u32 %v11280_v48, %v9406_v62 }
 0x52c   :  { %7026 = vmatpush.bf16.msra.mxu1 %v9343_v21  ;;  %v11216_v21 = vld [vmem:[#allocation2 + $0xb34] sm:$0xf0]  ;;  %v9758_v59 = vld [vmem:[#allocation2 + $0xfe8] sm:$0xf] }
 0x52d   :  { %7039 = vmatpush.bf16.msra.mxu2 %v9471_v46  ;;  %v6799_v46 = vpop.f32.mrf.mxu3  ;;  %v9151_v5 = vor.u32 %v11216_v21, %v9150_v27  ;;  %v9262_v42 = vld [vmem:[#allocation2 + $0xc08] sm:$0xf]  ;;  %v11244_v54 = vld [vmem:[#allocation2 + $0xc14] sm:$0xf0] }
 0x52e   :  { %7052 = vmatpush.bf16.msra.mxu3 %v9599_v57  ;;  %v9278_v57 = vld [vmem:[#allocation2 + $0xc28] sm:$0xf]  ;;  %v6775_v33 = vpop.f32.mrf.mxu1  ;;  %v11276_v17 = vld [vmem:[#allocation2 + $0xd14] sm:$0xf0] }
 0x52f   :  { %7014 = vmatpush.bf16.msrb.mxu0 %v9199_v61  ;;  %v11248_v61 = vld [vmem:[#allocation2 + $0xc34] sm:$0xf0]  ;;  %v9518_v32 = vld [vmem:[#allocation2 + $0xe08] sm:$0xf] }
 0x530   :  { %7027 = vmatpush.bf16.msra.mxu1 %v9327_v55  ;;  %v11312_v55 = vld [vmem:[#allocation2 + $0xe34] sm:$0xf0]  ;;  %v9279_v8 = vor.u32 %v11248_v61, %v9278_v57  ;;  %v9886_v28 = vld [vmem:[#allocation2 + $0x10e8] sm:$0xf]  ;;  %v9263_v57 = vor.u32 %v11244_v54, %v9262_v42 }
 0x531   :  { %7040 = vmatpush.bf16.msra.mxu2 %v9455_v12  ;;  %v9134_v12 = vld [vmem:[#allocation2 + $0xb08] sm:$0xf]  ;;  %v9535_v15 = vor.u32 %v11312_v55, %v9534_v24  ;;  %v11308_v30 = vld [vmem:[#allocation2 + $0xe14] sm:$0xf0] }
 0x532   :  { %7053 = vmatpush.bf16.msra.mxu3 %v9583_v52  ;;  %v11368_v52 = vld [vmem:[#allocation2 + $0xff4] sm:$0xf0]  ;;  %v10014_v21 = vld [vmem:[#allocation2 + $0x11e8] sm:$0xf]  ;;  %v9519_v62 = vor.u32 %v11308_v30, %v9518_v32 }
 0x533   :  { %7015 = vmatpush.bf16.msrb.mxu0 %v9183_v1  ;;  %v6760_v1 = vpop.f32.mrf.mxu0  ;;  %v11400_v14 = vld [vmem:[#allocation2 + $0x10f4] sm:$0xf0]  ;;  %v9742_v61 = vld [vmem:[#allocation2 + $0xfc8] sm:$0xf] }
 0x534   :  { %7028 = vmatpush.bf16.msra.mxu1 %v9311_v26  ;;  %v6761_v60 = vadd.f32 %v6760_v1, %v12905_v63  ;;  %v9135_v26 = vor.u32 %v11212_v49, %v9134_v12  ;;  %v11464_v63 = vld [vmem:[#allocation2 + $0x12f4] sm:$0xf0]  ;;  %v9887_v48 = vor.u32 %v11400_v14, %v9886_v28  ;;  %v9870_v55 = vld [vmem:[#allocation2 + $0x10c8] sm:$0xf] }
 0x535   :  { %7041 = vmatpush.bf16.msra.mxu2 %v9439_v25  ;;  %v9390_v25 = vld [vmem:[#allocation2 + $0xd08] sm:$0xf]  ;;  %v6801_v10 = vpop.f32.mrf.mxu3  ;;  %v11364_v33 = vld [vmem:[#allocation2 + $0xfd4] sm:$0xf0] }
 0x536   :  { %7054 = vmatpush.bf16.msra.mxu3 %v9567_v0  ;;  %v6788_v0 = vpop.f32.mrf.mxu2  ;;  %v6774_v27 = vadd.f32 %v12911_v20, %v6761_v60  ;;  %v11396_v12 = vld [vmem:[#allocation2 + $0x10d4] sm:$0xf0]  ;;  %v9726_v42 = vld [vmem:[#allocation2 + $0xfa8] sm:$0xf] }
 0x537   :  { %7016 = vmatpush.bf16.msrb.mxu0 %v9167_v18  ;;  %v9759_v18 = vor.u32 %v11368_v52, %v9758_v59  ;;  %v9743_v59 = vor.u32 %v11364_v33, %v9742_v61  ;;  %v9998_v52 = vld [vmem:[#allocation2 + $0x11c8] sm:$0xf]  ;;  %v11428_v1 = vld [vmem:[#allocation2 + $0x11d4] sm:$0xf0]  ;;  %v9871_v60 = vor.u32 %v11396_v12, %v9870_v55 }
 0x538   :  { %7029 = vmatpush.bf16.msra.mxu1 %v9295_v47  ;;  %v11432_v47 = vld [vmem:[#allocation2 + $0x11f4] sm:$0xf0]  ;;  %v9982_v32 = vld [vmem:[#allocation2 + $0x11a8] sm:$0xf] }
 0x539   :  { %7042 = vmatpush.bf16.msra.mxu2 %v9423_v56  ;;  %v10142_v56 = vld [vmem:[#allocation2 + $0x12e8] sm:$0xf]  ;;  %v10015_v24 = vor.u32 %v11432_v47, %v10014_v21  ;;  %v11424_v0 = vld [vmem:[#allocation2 + $0x11b4] sm:$0xf0] }
 0x53a   :  { %7055 = vmatpush.bf16.msra.mxu3 %v9551_v58  ;;  %v6787_v58 = vadd.f32 %v6786_v34, %v6774_v27  ;;  %v10143_v20 = vor.u32 %v11464_v63, %v10142_v56  ;;  %v11360_v34 = vld [vmem:[#allocation2 + $0xfb4] sm:$0xf0]  ;;  %v9710_v28 = vld [vmem:[#allocation2 + $0xf88] sm:$0xf]  ;;  %v9983_v27 = vor.u32 %v11424_v0, %v9982_v32 }
 0x53b   :  { %7017 = vmatpush.bf16.msrb.mxu0 %v9151_v5  ;;  %v9391_v5 = vor.u32 %v11276_v17, %v9390_v25  ;;  %v6762_v54 = vpop.f32.mrf.mxu0  ;;  %v9727_v17 = vor.u32 %v11360_v34, %v9726_v42  ;;  %v11456_v30 = vld [vmem:[#allocation2 + $0x12b4] sm:$0xf0]  ;;  %v9838_v21 = vld [vmem:[#allocation2 + $0x1088] sm:$0xf] }
 0x53c   :  { %7030 = vmatpush.bf16.msra.mxu1 %v9279_v8  ;;  %v12915_v49 = vadd.f32 %v6799_v46, %v6787_v58  ;;  %v10126_v8 = vld [vmem:[#allocation2 + $0x12c8] sm:$0xf]  ;;  %v11392_v46 = vld [vmem:[#allocation2 + $0x10b4] sm:$0xf0] }
 0x53d   :  { %7043 = vmatpush.bf16.msra.mxu2 %v9407_v11  ;;  %v11460_v11 = vld [vmem:[#allocation2 + $0x12d4] sm:$0xf0]  ;;  %v9966_v63 = vld [vmem:[#allocation2 + $0x1188] sm:$0xf] }
 0x53e   :  { %7056 = vmatpush.bf16.msra.mxu3 %v9535_v15  ;;  %v9999_v15 = vor.u32 %v11428_v1, %v9998_v52  ;;  %v10127_v25 = vor.u32 %v11460_v11, %v10126_v8  ;;  %v11356_v14 = vld [vmem:[#allocation2 + $0xf94] sm:$0xf0]  ;;  %v10094_v33 = vld [vmem:[#allocation2 + $0x1288] sm:$0xf] }
 0x53f   :  { %7018 = vmatpush.bf16.msrb.mxu0 %v9135_v26  ;;  %v9854_v26 = vld [vmem:[#allocation2 + $0x10a8] sm:$0xf]  ;;  %v11388_v47 = vld [vmem:[#allocation2 + $0x1094] sm:$0xf0] }
 0x540   :  { %7031 = vmatpush.bf16.msra.mxu1 %v9263_v57  ;;  %v9855_v10 = vor.u32 %v11392_v46, %v9854_v26  ;;  %v9711_v57 = vor.u32 %v11356_v14, %v9710_v28  ;;  %v11420_v61 = vld [vmem:[#allocation2 + $0x1194] sm:$0xf0]  ;;  %v9822_v55 = vld [vmem:[#allocation2 + $0x1068] sm:$0xf] }
 0x541   :  { %7044 = vmatpush.bf16.msra.mxu2 %v9391_v5  ;;  %v11452_v58 = vld [vmem:[#allocation2 + $0x1294] sm:$0xf0]  ;;  %v9694_v5 = vld [vmem:[#allocation2 + $0xf68] sm:$0xf] }
 0x542   :  { %7019 = vmatmul.bf16.vlgmr.msrb.gmra.mxu0 %v12766_v16  ;;  %7057 = vmatpush.bf16.msra.mxu3 %v9519_v62  ;;  %v11352_v62 = vld [vmem:[#allocation2 + $0xf74] sm:$0xf0]  ;;  %v9950_v1 = vld [vmem:[#allocation2 + $0x1168] sm:$0xf] }
 0x543   :  { %7063 = vmatpush.bf16.msra.mxu0 %v9759_v18  ;;  %v10110_v18 = vld [vmem:[#allocation2 + $0x12a8] sm:$0xf]  ;;  %7032 = vmatmul.bf16.vlgmr.msra.gmra.mxu1 %v12782_v39  ;;  %v11384_v12 = vld [vmem:[#allocation2 + $0x1074] sm:$0xf0]  ;;  %v9695_v52 = vor.u32 %v11352_v62, %v9694_v5 }
 0x544   :  { %7076 = vmatpush.bf16.msrb.mxu1 %v9887_v48  ;;  %7045 = vmatmul.bf16.vlgmr.msra.gmra.mxu2 %v12790_v53  ;;  %v10111_v56 = vor.u32 %v11456_v30, %v10110_v18  ;;  %v9839_v48 = vor.u32 %v11388_v47, %v9838_v21  ;;  %v11416_v8 = vld [vmem:[#allocation2 + $0x1174] sm:$0xf0]  ;;  %v10078_v11 = vld [vmem:[#allocation2 + $0x1268] sm:$0xf] }
 0x545   :  { %7089 = vmatpush.bf16.msrb.mxu2 %v10015_v24  ;;  %7058 = vmatmul.bf16.vlgmr.msra.gmra.mxu3 %v12786_v50  ;;  %v9967_v24 = vor.u32 %v11420_v61, %v9966_v63  ;;  %v11448_v42 = vld [vmem:[#allocation2 + $0x1274] sm:$0xf0]  ;;  %v9678_v34 = vld [vmem:[#allocation2 + $0xf48] sm:$0xf] }
 0x546   :  { %7102 = vmatpush.bf16.msrb.mxu3 %v10143_v20  ;;  %v12921_v20 = vpop.f32.mrf.mxu1  ;;  %v11348_v54 = vld [vmem:[#allocation2 + $0xf54] sm:$0xf0]  ;;  %v9806_v26 = vld [vmem:[#allocation2 + $0x1048] sm:$0xf] }
 0x547   :  { %7064 = vmatpush.bf16.msra.mxu0 %v9743_v59  ;;  %v10095_v59 = vor.u32 %v11452_v58, %v10094_v33  ;;  %v11380_v46 = vld [vmem:[#allocation2 + $0x1054] sm:$0xf0]  ;;  %v9934_v32 = vld [vmem:[#allocation2 + $0x1148] sm:$0xf]  ;;  %v6838_v30 = vpop.f32.mrf.mxu2 }
 0x548   :  { %7077 = vmatpush.bf16.msrb.mxu1 %v9871_v60  ;;  %v9823_v60 = vor.u32 %v11384_v12, %v9822_v55  ;;  %v11412_v0 = vld [vmem:[#allocation2 + $0x1154] sm:$0xf0]  ;;  %v10062_v18 = vld [vmem:[#allocation2 + $0x1248] sm:$0xf]  ;;  %v9807_v21 = vor.u32 %v11380_v46, %v9806_v26 }
 0x549   :  { %7090 = vmatpush.bf16.msrb.mxu2 %v9999_v15  ;;  %v9951_v15 = vor.u32 %v11416_v8, %v9950_v1  ;;  %v11444_v28 = vld [vmem:[#allocation2 + $0x1254] sm:$0xf0]  ;;  %v9662_v14 = vld [vmem:[#allocation2 + $0xf28] sm:$0xf]  ;;  %v9935_v47 = vor.u32 %v11412_v0, %v9934_v32 }
 0x54a   :  { %7103 = vmatpush.bf16.msrb.mxu3 %v10127_v25  ;;  %v10079_v25 = vor.u32 %v11448_v42, %v10078_v11  ;;  %v10063_v61 = vor.u32 %v11444_v28, %v10062_v18  ;;  %v9918_v58 = vld [vmem:[#allocation2 + $0x1128] sm:$0xf]  ;;  %v11408_v5 = vld [vmem:[#allocation2 + $0x1134] sm:$0xf0] }
 0x54b   :  { %7065 = vmatpush.bf16.msra.mxu0 %v9727_v17  ;;  %v9679_v17 = vor.u32 %v11348_v54, %v9678_v34  ;;  %v10046_v62 = vld [vmem:[#allocation2 + $0x1228] sm:$0xf]  ;;  %v11340_v55 = vld [vmem:[#allocation2 + $0xf14] sm:$0xf0]  ;;  %v9919_v8 = vor.u32 %v11408_v5, %v9918_v58 }
 0x54c   :  { %7078 = vmatpush.bf16.msrb.mxu1 %v9855_v10  ;;  %v11344_v10 = vld [vmem:[#allocation2 + $0xf34] sm:$0xf0]  ;;  %v10270_v12 = vld [vmem:[#allocation2 + $0x13e8] sm:$0xf] }
 0x54d   :  { %7091 = vmatpush.bf16.msrb.mxu2 %v9983_v27  ;;  %v6851_v27 = vpop.f32.mrf.mxu3  ;;  %v9663_v33 = vor.u32 %v11344_v10, %v9662_v14  ;;  %v9774_v11 = vld [vmem:[#allocation2 + $0x1008] sm:$0xf]  ;;  %v11372_v42 = vld [vmem:[#allocation2 + $0x1014] sm:$0xf0] }
 0x54e   :  { %7104 = vmatpush.bf16.msrb.mxu3 %v10111_v56  ;;  %v9790_v56 = vld [vmem:[#allocation2 + $0x1028] sm:$0xf]  ;;  %v6827_v63 = vpop.f32.mrf.mxu1  ;;  %v11404_v26 = vld [vmem:[#allocation2 + $0x1114] sm:$0xf0] }
 0x54f   :  { %7066 = vmatpush.bf16.msra.mxu0 %v9711_v57  ;;  %v11376_v57 = vld [vmem:[#allocation2 + $0x1034] sm:$0xf0]  ;;  %v10030_v46 = vld [vmem:[#allocation2 + $0x1208] sm:$0xf] }
 0x550   :  { %7079 = vmatpush.bf16.msrb.mxu1 %v9839_v48  ;;  %v11440_v48 = vld [vmem:[#allocation2 + $0x1234] sm:$0xf0]  ;;  %v9791_v1 = vor.u32 %v11376_v57, %v9790_v56  ;;  %v10398_v0 = vld [vmem:[#allocation2 + $0x14e8] sm:$0xf]  ;;  %v9775_v56 = vor.u32 %v11372_v42, %v9774_v11 }
 0x551   :  { %7092 = vmatpush.bf16.msrb.mxu2 %v9967_v24  ;;  %v9646_v24 = vld [vmem:[#allocation2 + $0xf08] sm:$0xf]  ;;  %v10047_v54 = vor.u32 %v11440_v48, %v10046_v62  ;;  %v11436_v32 = vld [vmem:[#allocation2 + $0x1214] sm:$0xf0] }
 0x552   :  { %7105 = vmatpush.bf16.msrb.mxu3 %v10095_v59  ;;  %v11496_v59 = vld [vmem:[#allocation2 + $0x13f4] sm:$0xf0]  ;;  %v10526_v10 = vld [vmem:[#allocation2 + $0x15e8] sm:$0xf]  ;;  %v10031_v58 = vor.u32 %v11436_v32, %v10030_v46 }
 0x553   :  { %7067 = vmatpush.bf16.msra.mxu0 %v9695_v52  ;;  %v6812_v52 = vpop.f32.mrf.mxu0  ;;  %v11528_v18 = vld [vmem:[#allocation2 + $0x14f4] sm:$0xf0]  ;;  %v10254_v57 = vld [vmem:[#allocation2 + $0x13c8] sm:$0xf] }
 0x554   :  { %7080 = vmatpush.bf16.msrb.mxu1 %v9823_v60  ;;  %v6813_v34 = vadd.f32 %v6812_v52, %v12915_v49  ;;  %v9647_v60 = vor.u32 %v11340_v55, %v9646_v24  ;;  %v11592_v49 = vld [vmem:[#allocation2 + $0x16f4] sm:$0xf0]  ;;  %v10399_v5 = vor.u32 %v11528_v18, %v10398_v0  ;;  %v10382_v48 = vld [vmem:[#allocation2 + $0x14c8] sm:$0xf] }
 0x555   :  { %7093 = vmatpush.bf16.msrb.mxu2 %v9951_v15  ;;  %v9902_v15 = vld [vmem:[#allocation2 + $0x1108] sm:$0xf]  ;;  %v6853_v28 = vpop.f32.mrf.mxu3  ;;  %v11492_v63 = vld [vmem:[#allocation2 + $0x13d4] sm:$0xf0] }
 0x556   :  { %7106 = vmatpush.bf16.msrb.mxu3 %v10079_v25  ;;  %v6840_v25 = vpop.f32.mrf.mxu2  ;;  %v6826_v14 = vadd.f32 %v12921_v20, %v6813_v34  ;;  %v11524_v24 = vld [vmem:[#allocation2 + $0x14d4] sm:$0xf0]  ;;  %v10238_v42 = vld [vmem:[#allocation2 + $0x13a8] sm:$0xf] }
 0x557   :  { %7068 = vmatpush.bf16.msra.mxu0 %v9679_v17  ;;  %v10271_v17 = vor.u32 %v11496_v59, %v10270_v12  ;;  %v10255_v12 = vor.u32 %v11492_v63, %v10254_v57  ;;  %v10510_v59 = vld [vmem:[#allocation2 + $0x15c8] sm:$0xf]  ;;  %v11556_v52 = vld [vmem:[#allocation2 + $0x15d4] sm:$0xf0]  ;;  %v10383_v34 = vor.u32 %v11524_v24, %v10382_v48 }
 0x558   :  { %7081 = vmatpush.bf16.msrb.mxu1 %v9807_v21  ;;  %v11560_v21 = vld [vmem:[#allocation2 + $0x15f4] sm:$0xf0]  ;;  %v10494_v46 = vld [vmem:[#allocation2 + $0x15a8] sm:$0xf] }
 0x559   :  { %7094 = vmatpush.bf16.msrb.mxu2 %v9935_v47  ;;  %v10654_v47 = vld [vmem:[#allocation2 + $0x16e8] sm:$0xf]  ;;  %v10527_v62 = vor.u32 %v11560_v21, %v10526_v10  ;;  %v11588_v11 = vld [vmem:[#allocation2 + $0x16d4] sm:$0xf0] }
 0x55a   :  { %7107 = vmatpush.bf16.msrb.mxu3 %v10063_v61  ;;  %v6839_v61 = vadd.f32 %v6838_v30, %v6826_v14  ;;  %v10655_v20 = vor.u32 %v11592_v49, %v10654_v47  ;;  %v11488_v30 = vld [vmem:[#allocation2 + $0x13b4] sm:$0xf0]  ;;  %v10222_v0 = vld [vmem:[#allocation2 + $0x1388] sm:$0xf] }
 0x55b   :  { %7069 = vmatpush.bf16.msra.mxu0 %v9663_v33  ;;  %v9903_v33 = vor.u32 %v11404_v26, %v9902_v15  ;;  %v11520_v15 = vld [vmem:[#allocation2 + $0x14b4] sm:$0xf0]  ;;  %v10239_v26 = vor.u32 %v11488_v30, %v10238_v42  ;;  %v10350_v10 = vld [vmem:[#allocation2 + $0x1488] sm:$0xf] }
 0x55c   :  { %7082 = vmatpush.bf16.msrb.mxu1 %v9791_v1  ;;  %v6852_v55 = vadd.f32 %v6851_v27, %v6839_v61  ;;  %v10638_v1 = vld [vmem:[#allocation2 + $0x16c8] sm:$0xf]  ;;  %v11552_v25 = vld [vmem:[#allocation2 + $0x15b4] sm:$0xf0] }
 0x55d   :  { %7095 = vmatpush.bf16.msrb.mxu2 %v9919_v8  ;;  %v6814_v8 = vpop.f32.mrf.mxu0  ;;  %v10639_v27 = vor.u32 %v11588_v11, %v10638_v1  ;;  %v11584_v32 = vld [vmem:[#allocation2 + $0x16b4] sm:$0xf0]  ;;  %v10495_v14 = vor.u32 %v11552_v25, %v10494_v46  ;;  %v10478_v49 = vld [vmem:[#allocation2 + $0x1588] sm:$0xf] }
 0x55e   :  { %7108 = vmatpush.bf16.msrb.mxu3 %v10047_v54  ;;  %v10511_v54 = vor.u32 %v11556_v52, %v10510_v59  ;;  %v11484_v18 = vld [vmem:[#allocation2 + $0x1394] sm:$0xf0]  ;;  %v10606_v63 = vld [vmem:[#allocation2 + $0x1688] sm:$0xf] }
 0x55f   :  { %7070 = vmatpush.bf16.msra.mxu0 %v9647_v60  ;;  %v10366_v60 = vld [vmem:[#allocation2 + $0x14a8] sm:$0xf]  ;;  %v11516_v21 = vld [vmem:[#allocation2 + $0x1494] sm:$0xf0] }
 0x560   :  { %7083 = vmatpush.bf16.msrb.mxu1 %v9775_v56  ;;  %v10367_v28 = vor.u32 %v11520_v15, %v10366_v60  ;;  %v10223_v56 = vor.u32 %v11484_v18, %v10222_v0  ;;  %v11548_v57 = vld [vmem:[#allocation2 + $0x1594] sm:$0xf0]  ;;  %v6877_v48 = vpop.f32.mrf.mxu1  ;;  %v10334_v59 = vld [vmem:[#allocation2 + $0x1468] sm:$0xf] }
 0x561   :  { %7096 = vmatpush.bf16.msrb.mxu2 %v9903_v33  ;;  %v11580_v61 = vld [vmem:[#allocation2 + $0x1694] sm:$0xf0]  ;;  %v10206_v33 = vld [vmem:[#allocation2 + $0x1368] sm:$0xf] }
 0x562   :  { %7071 = vmatmul.bf16.vlgmr.msra.gmra.mxu0 %v12794_v3  ;;  %7109 = vmatpush.bf16.msrb.mxu3 %v10031_v58  ;;  %v11480_v58 = vld [vmem:[#allocation2 + $0x1374] sm:$0xf0]  ;;  %v10607_v8 = vor.u32 %v11580_v61, %v10606_v63  ;;  %v10462_v42 = vld [vmem:[#allocation2 + $0x1568] sm:$0xf] }
 0x563   :  { %7115 = vmatpush.bf16.msrb.mxu0 %v10271_v17  ;;  %v10622_v17 = vld [vmem:[#allocation2 + $0x16a8] sm:$0xf]  ;;  %7084 = vmatmul.bf16.vlgmr.msrb.gmra.mxu1 %v12800_v29  ;;  %v11512_v52 = vld [vmem:[#allocation2 + $0x1474] sm:$0xf0]  ;;  %v10207_v11 = vor.u32 %v11480_v58, %v10206_v33 }
 0x564   :  { %7128 = vmatpush.bf16.msra.mxu1 %v10399_v5  ;;  %7097 = vmatmul.bf16.vlgmr.msrb.gmra.mxu2 %v12804_v9  ;;  %v10623_v47 = vor.u32 %v11584_v32, %v10622_v17  ;;  %v11663_v5 = vld [vmem:[#allocation14] sm:$0xf]  ;;  %v11544_v30 = vld [vmem:[#allocation2 + $0x1574] sm:$0xf0] }
 0x565   :  { %7141 = vmatpush.bf16.msra.mxu2 %v10527_v62  ;;  %7110 = vmatmul.bf16.vlgmr.msrb.gmra.mxu3 %v12802_v19  ;;  %v2289_v62 = vperm.slane %v11663_v5, 2  ;;  %v6864_v24 = vpop.f32.mrf.mxu0  ;;  %v10190_v60 = vld [vmem:[#allocation2 + $0x1348] sm:$0xf]  ;;  %v11476_v15 = vld [vmem:[#allocation2 + $0x1354] sm:$0xf0]  ;;  %v10463_v46 = vor.u32 %v11544_v30, %v10462_v42 }
 0x566   :  { %7154 = vmatpush.bf16.msra.mxu3 %v10655_v20  ;;  %v10351_v20 = vor.u32 %v11516_v21, %v10350_v10  ;;  %v12929_v1 = vadd.f32 %v6864_v24, %v6852_v55  ;;  %v10318_v25 = vld [vmem:[#allocation2 + $0x1448] sm:$0xf]  ;;  %v11508_v17 = vld [vmem:[#allocation2 + $0x1454] sm:$0xf0]  ;;  %v10191_v55 = vor.u32 %v11476_v15, %v10190_v60 }
 0x567   :  { %7116 = vmatpush.bf16.msrb.mxu0 %v10255_v12  ;;  %v10479_v12 = vor.u32 %v11548_v57, %v10478_v49  ;;  %v10446_v0 = vld [vmem:[#allocation2 + $0x1548] sm:$0xf]  ;;  %v11540_v18 = vld [vmem:[#allocation2 + $0x1554] sm:$0xf0]  ;;  %v10319_v63 = vor.u32 %v11508_v17, %v10318_v25 }
 0x568   :  { %7129 = vmatpush.bf16.msra.mxu1 %v10383_v34  ;;  %v10590_v34 = vld [vmem:[#allocation2 + $0x1668] sm:$0xf]  ;;  %v11472_v21 = vld [vmem:[#allocation2 + $0x1334] sm:$0xf0]  ;;  %v6879_v49 = vpop.f32.mrf.mxu1  ;;  %v12933_v57 = vpop.f32.mrf.mxu3  ;;  %v10447_v61 = vor.u32 %v11540_v18, %v10446_v0 }
 0x569   :  { %7142 = vmatpush.bf16.msra.mxu2 %v10511_v54  ;;  %v11576_v54 = vld [vmem:[#allocation2 + $0x1674] sm:$0xf0]  ;;  %v10174_v10 = vld [vmem:[#allocation2 + $0x1328] sm:$0xf]  ;;  %v7968_v49 = vld [vmem:[#allocation2 + $0x1f8] sm:$0xf0] }
 0x56a   :  { %7155 = vmatpush.bf16.msra.mxu3 %v10639_v27  ;;  %v6878_v27 = vadd.f32 %v6877_v48, %v2289_v62  ;;  %v10591_v32 = vor.u32 %v11576_v54, %v10590_v34  ;;  %v10302_v33 = vld [vmem:[#allocation2 + $0x1428] sm:$0xf]  ;;  %v11504_v58 = vld [vmem:[#allocation2 + $0x1434] sm:$0xf0]  ;;  %v10175_v48 = vor.u32 %v11472_v21, %v10174_v10  ;;  %v10918_v10 = vld [vmem:[#allocation2 + $0x1ec] sm:$0xf] }
 0x56b   :  { %7117 = vmatpush.bf16.msrb.mxu0 %v10239_v26  ;;  %v10335_v26 = vor.u32 %v11512_v52, %v10334_v59  ;;  %v10430_v24 = vld [vmem:[#allocation2 + $0x1528] sm:$0xf]  ;;  %v11568_v59 = vld [vmem:[#allocation2 + $0x1634] sm:$0xf0]  ;;  %v10303_v30 = vor.u32 %v11504_v58, %v10302_v33 }
 0x56c   :  { %7130 = vmatpush.bf16.msra.mxu1 %v10367_v28  ;;  %v10574_v28 = vld [vmem:[#allocation2 + $0x1648] sm:$0xf]  ;;  %v11624_v42 = vld [vmem:[#allocation2 + $0x17f4] sm:$0xf0] }
 0x56d   :  { %7143 = vmatpush.bf16.msra.mxu2 %v10495_v14  ;;  %v11572_v14 = vld [vmem:[#allocation2 + $0x1654] sm:$0xf0]  ;;  %v6866_v5 = vpop.f32.mrf.mxu0  ;;  %v10158_v52 = vld [vmem:[#allocation2 + $0x1308] sm:$0xf] }
 0x56e   :  { %7156 = vmatpush.bf16.msra.mxu3 %v10623_v47  ;;  %v6890_v47 = vpop.f32.mrf.mxu2  ;;  %v10575_v62 = vor.u32 %v11572_v14, %v10574_v28  ;;  %v10286_v54 = vld [vmem:[#allocation2 + $0x1408] sm:$0xf]  ;;  %v11500_v60 = vld [vmem:[#allocation2 + $0x1414] sm:$0xf0]  ;;  %v10886_v28 = vld [vmem:[#allocation2 + $0xec] sm:$0xf] }
 0x56f   :  { %7118 = vmatpush.bf16.msrb.mxu0 %v10223_v56  ;;  %v12931_v56 = vadd.f32 %v6890_v47, %v6878_v27  ;;  %v10542_v25 = vld [vmem:[#allocation2 + $0x1608] sm:$0xf]  ;;  %v11640_v0 = vld [vmem:[#allocation2 + $0x1874] sm:$0xf0]  ;;  %v7840_v14 = vld [vmem:[#allocation2 + $0xf8] sm:$0xf0]  ;;  %v10287_v47 = vor.u32 %v11500_v60, %v10286_v54 }
 0x570   :  { %7131 = vmatpush.bf16.msra.mxu1 %v10351_v20  ;;  %v11536_v20 = vld [vmem:[#allocation2 + $0x1534] sm:$0xf0]  ;;  %v6905_v21 = vpop.f32.mrf.mxu3  ;;  %v10814_v60 = vld [vmem:[#allocation2 + $0x1828] sm:$0xf] }
 0x571   :  { %7144 = vmatpush.bf16.msra.mxu2 %v10479_v12  ;;  %v10558_v12 = vld [vmem:[#allocation2 + $0x1628] sm:$0xf]  ;;  %v10431_v34 = vor.u32 %v11536_v20, %v10430_v24  ;;  %v11636_v24 = vld [vmem:[#allocation2 + $0x1854] sm:$0xf0]  ;;  %v7971_v20 = vor.u32 %v10918_v10, %v7968_v49  ;;  %v6904_v21 = vadd.f32 %v12933_v57, %v12931_v56 }
 0x572   :  { %7157 = vmatpush.bf16.msra.mxu3 %v10607_v8  ;;  %v11468_v8 = vld [vmem:[#allocation2 + $0x1314] sm:$0xf0]  ;;  %v10559_v15 = vor.u32 %v11568_v59, %v10558_v12  ;;  %v10882_v59 = vld [vmem:[#allocation2 + $0xcc] sm:$0xf] }
 0x573   :  { %7119 = vmatpush.bf16.msrb.mxu0 %v10207_v11  ;;  %v10782_v11 = vld [vmem:[#allocation2 + $0x17e8] sm:$0xf]  ;;  %v10159_v27 = vor.u32 %v11468_v8, %v10158_v52  ;;  %v7824_v52 = vld [vmem:[#allocation2 + $0xd8] sm:$0xf0]  ;;  %v10914_v8 = vld [vmem:[#allocation2 + $0x1cc] sm:$0xf] }
 0x574   :  { %7132 = vmatpush.bf16.msra.mxu1 %v10335_v26  ;;  %v10414_v26 = vld [vmem:[#allocation2 + $0x1508] sm:$0xf]  ;;  %v10783_v17 = vor.u32 %v11624_v42, %v10782_v11  ;;  %v7952_v11 = vld [vmem:[#allocation2 + $0x1d8] sm:$0xf0]  ;;  %v7827_v54 = vor.u32 %v10882_v59, %v7824_v52  ;;  %v11628_v10 = vld [vmem:[#allocation2 + $0x1814] sm:$0xf0] }
 0x575   :  { %7145 = vmatpush.bf16.msra.mxu2 %v10463_v46  ;;  %v11532_v46 = vld [vmem:[#allocation2 + $0x1514] sm:$0xf0]  ;;  %v10750_v42 = vld [vmem:[#allocation2 + $0x17a8] sm:$0xf] }
 0x576   :  { %7158 = vmatpush.bf16.msra.mxu3 %v10591_v32  ;;  %v11564_v32 = vld [vmem:[#allocation2 + $0x1614] sm:$0xf0]  ;;  %v6892_v18 = vpop.f32.mrf.mxu2  ;;  %v10415_v33 = vor.u32 %v11532_v46, %v10414_v26  ;;  %v10878_v46 = vld [vmem:[#allocation2 + $0xac] sm:$0xf] }
 0x577   :  { %7120 = vmatpush.bf16.msrb.mxu0 %v10191_v55  ;;  %v10846_v55 = vld [vmem:[#allocation2 + $0x1868] sm:$0xf]  ;;  %v10543_v58 = vor.u32 %v11564_v32, %v10542_v25  ;;  %v7808_v25 = vld [vmem:[#allocation2 + $0xb8] sm:$0xf0] }
 0x578   :  { %7133 = vmatpush.bf16.msra.mxu1 %v10319_v63  ;;  %v10766_v63 = vld [vmem:[#allocation2 + $0x17c8] sm:$0xf]  ;;  %v10847_v5 = vor.u32 %v11640_v0, %v10846_v55  ;;  %v7936_v32 = vld [vmem:[#allocation2 + $0x1b8] sm:$0xf0]  ;;  %v11612_v0 = vld [vmem:[#allocation2 + $0x1794] sm:$0xf0] }
 0x579   :  { %7146 = vmatpush.bf16.msra.mxu2 %v10447_v61  ;;  %v11620_v61 = vld [vmem:[#allocation2 + $0x17d4] sm:$0xf0]  ;;  %v10734_v55 = vld [vmem:[#allocation2 + $0x1788] sm:$0xf] }
 0x57a   :  { %7159 = vmatpush.bf16.msra.mxu3 %v10575_v62  ;;  %v7843_v62 = vor.u32 %v10886_v28, %v7840_v14  ;;  %v10767_v12 = vor.u32 %v11620_v61, %v10766_v63  ;;  %v7811_v28 = vor.u32 %v10878_v46, %v7808_v25  ;;  %v10798_v14 = vld [vmem:[#allocation2 + $0x1808] sm:$0xf]  ;;  %v10735_v49 = vor.u32 %v11612_v0, %v10734_v55  ;;  %v10874_v63 = vld [vmem:[#allocation2 + $0x8c] sm:$0xf]  ;;  %v7792_v61 = vld [vmem:[#allocation2 + $0x98] sm:$0xf0] }
 0x57b   :  { %7121 = vmatpush.bf16.msrb.mxu0 %v10175_v48  ;;  %v10830_v48 = vld [vmem:[#allocation2 + $0x1848] sm:$0xf]  ;;  %v10799_v59 = vor.u32 %v11628_v10, %v10798_v14  ;;  %v7795_v52 = vor.u32 %v10874_v63, %v7792_v61  ;;  %v10866_v55 = vld [vmem:[#allocation2 + $0x4c] sm:$0xf]  ;;  %v7760_v0 = vld [vmem:[#allocation2 + $0x58] sm:$0xf0] }
 0x57c   :  { %7134 = vmatpush.bf16.msra.mxu1 %v10303_v30  ;;  %v11616_v30 = vld [vmem:[#allocation2 + $0x17b4] sm:$0xf0]  ;;  %v7888_v14 = vld [vmem:[#allocation2 + $0x158] sm:$0xf0]  ;;  %v10686_v10 = vld [vmem:[#allocation2 + $0x1728] sm:$0xf] }
 0x57d   :  { %7147 = vmatpush.bf16.msra.mxu2 %v10431_v34  ;;  %v10831_v34 = vor.u32 %v11636_v24, %v10830_v48  ;;  %v10751_v26 = vor.u32 %v11616_v30, %v10750_v42  ;;  %v10982_v48 = vld [vmem:[#allocation2 + $0x3ec] sm:$0xf]  ;;  %v8224_v24 = vld [vmem:[#allocation2 + $0x3f8] sm:$0xf0] }
 0x57e   :  { %7160 = vmatpush.bf16.msra.mxu3 %v10559_v15  ;;  %v11632_v15 = vld [vmem:[#allocation2 + $0x1834] sm:$0xf0]  ;;  %v7776_v42 = vld [vmem:[#allocation2 + $0x78] sm:$0xf0]  ;;  %v10902_v30 = vld [vmem:[#allocation2 + $0x16c] sm:$0xf] }
 0x57f   :  { %7122 = vmatpush.bf16.msrb.mxu0 %v10159_v27  ;;  %v7955_v27 = vor.u32 %v10914_v8, %v7952_v11  ;;  %v10815_v18 = vor.u32 %v11632_v15, %v10814_v60  ;;  %v10870_v11 = vld [vmem:[#allocation2 + $0x6c] sm:$0xf]  ;;  %v10702_v60 = vld [vmem:[#allocation2 + $0x1748] sm:$0xf]  ;;  %v11604_v15 = vld [vmem:[#allocation2 + $0x1754] sm:$0xf0] }
 0x580   :  { %7135 = vmatpush.bf16.msra.mxu1 %v10287_v47  ;;  %v7779_v25 = vor.u32 %v10870_v11, %v7776_v42  ;;  %v10974_v63 = vld [vmem:[#allocation2 + $0x3ac] sm:$0xf]  ;;  %v8192_v61 = vld [vmem:[#allocation2 + $0x3b8] sm:$0xf0]  ;;  %v11596_v11 = vld [vmem:[#allocation2 + $0x1714] sm:$0xf0] }
 0x581   :  { %7148 = vmatpush.bf16.msra.mxu2 %v10415_v33  ;;  %v10906_v33 = vld [vmem:[#allocation2 + $0x18c] sm:$0xf] }
 0x582   :  { %7123 = vmatmul.bf16.vlgmr.msrb.gmra.mxu0 %v12806_v51  ;;  %7161 = vmatpush.bf16.msra.mxu3 %v10543_v58  ;;  %v7920_v58 = vld [vmem:[#allocation2 + $0x198] sm:$0xf0]  ;;  %v10970_v42 = vld [vmem:[#allocation2 + $0x38c] sm:$0xf] }
 0x583   :  { %7167 = vmatpush.bf16.msra.mxu0 %v10783_v17  ;;  %v10910_v17 = vld [vmem:[#allocation2 + $0x1ac] sm:$0xf]  ;;  %7136 = vmatmul.bf16.vlgmr.msra.gmra.mxu1 %v12814_v4  ;;  %v7923_v56 = vor.u32 %v10906_v33, %v7920_v58 }
 0x584   :  { %7184 = vmatpush.bf16.msrb.mxu1 %v10847_v5  ;;  %7149 = vmatmul.bf16.vlgmr.msra.gmra.mxu2 %v12818_v7  ;;  %v7939_v47 = vor.u32 %v10910_v17, %v7936_v32  ;;  %v10718_v5 = vld [vmem:[#allocation2 + $0x1768] sm:$0xf]  ;;  %v10703_v32 = vor.u32 %v11604_v15, %v10702_v60  ;;  %v10858_v15 = vld [vmem:[#allocation2 + $0xc] sm:$0xf] }
 0x585   :  { %7193 = vmatpush.bf16.msrb.mxu2 %v7843_v62  ;;  %7162 = vmatmul.bf16.vlgmr.msra.gmra.mxu3 %v12816_v6  ;;  %v11608_v62 = vld [vmem:[#allocation2 + $0x1774] sm:$0xf0] }
 0x586   :  { %7206 = vmatpush.bf16.msrb.mxu3 %v7971_v20  ;;  %v6916_v20 = vpop.f32.mrf.mxu0  ;;  %v10719_v57 = vor.u32 %v11608_v62, %v10718_v5  ;;  %v7763_v62 = vor.u32 %v10866_v55, %v7760_v0  ;;  %v10966_v0 = vld [vmem:[#allocation2 + $0x36c] sm:$0xf] }
 0x587   :  { %7168 = vmatpush.bf16.msra.mxu0 %v10767_v12  ;;  %v6929_v12 = vpop.f32.mrf.mxu1  ;;  %v6917_v8 = vadd.f32 %v6916_v20, %v6904_v21  ;;  %v11600_v21 = vld [vmem:[#allocation2 + $0x1734] sm:$0xf0] }
 0x588   :  { %7185 = vmatpush.bf16.msrb.mxu1 %v10831_v34  ;;  %v8227_v34 = vor.u32 %v10982_v48, %v8224_v24  ;;  %v10862_v48 = vld [vmem:[#allocation2 + $0x2c] sm:$0xf]  ;;  %v10687_v20 = vor.u32 %v11600_v21, %v10686_v10  ;;  %v8160_v21 = vld [vmem:[#allocation2 + $0x378] sm:$0xf0] }
 0x589   :  { %7194 = vmatpush.bf16.msrb.mxu2 %v7827_v54  ;;  %v7904_v54 = vld [vmem:[#allocation2 + $0x178] sm:$0xf0]  ;;  %v6930_v46 = vadd.f32 %v6929_v12, %v6917_v8 }
 0x58a   :  { %7207 = vmatpush.bf16.msrb.mxu3 %v7955_v27  ;;  %v10978_v27 = vld [vmem:[#allocation2 + $0x3cc] sm:$0xf]  ;;  %v7907_v17 = vor.u32 %v10902_v30, %v7904_v54  ;;  %v7744_v12 = vld [vmem:[#allocation2 + $0x38] sm:$0xf0] }
 0x58b   :  { %7169 = vmatpush.bf16.msra.mxu0 %v10751_v26  ;;  %v8208_v26 = vld [vmem:[#allocation2 + $0x3d8] sm:$0xf0]  ;;  %v7747_v60 = vor.u32 %v10862_v48, %v7744_v12 }
 0x58c   :  { %7186 = vmatpush.bf16.msrb.mxu1 %v10815_v18  ;;  %v10898_v18 = vld [vmem:[#allocation2 + $0x14c] sm:$0xf]  ;;  %v8176_v30 = vld [vmem:[#allocation2 + $0x398] sm:$0xf0] }
 0x58d   :  { %7195 = vmatpush.bf16.msrb.mxu2 %v7811_v28  ;;  %v8211_v28 = vor.u32 %v10978_v27, %v8208_v26  ;;  %v7891_v24 = vor.u32 %v10898_v18, %v7888_v14  ;;  %v8096_v54 = vld [vmem:[#allocation2 + $0x2f8] sm:$0xf0]  ;;  %v11014_v18 = vld [vmem:[#allocation2 + $0x4ec] sm:$0xf] }
 0x58e   :  { %7208 = vmatpush.bf16.msrb.mxu3 %v7939_v47  ;;  %v6942_v47 = vpop.f32.mrf.mxu2  ;;  %v6918_v33 = vpop.f32.mrf.mxu0  ;;  %v8336_v12 = vld [vmem:[#allocation2 + $0x4d8] sm:$0xf0] }
 0x58f   :  { %7170 = vmatpush.bf16.msra.mxu0 %v10735_v49  ;;  %v6955_v49 = vpop.f32.mrf.mxu3  ;;  %v6943_v58 = vadd.f32 %v6942_v47, %v6930_v46  ;;  %v6931_v5 = vpop.f32.mrf.mxu1  ;;  %v7728_v46 = vld [vmem:[#allocation2 + $0x18] sm:$0xf0]  ;;  %v11046_v47 = vld [vmem:[#allocation2 + $0x5ec] sm:$0xf] }
 0x590   :  { %7187 = vmatpush.bf16.msrb.mxu1 %v10799_v59  ;;  %v10894_v59 = vld [vmem:[#allocation2 + $0x12c] sm:$0xf]  ;;  %v8080_v33 = vld [vmem:[#allocation2 + $0x2d8] sm:$0xf0] }
 0x591   :  { %7196 = vmatpush.bf16.msrb.mxu2 %v7795_v52  ;;  %v7872_v52 = vld [vmem:[#allocation2 + $0x138] sm:$0xf0]  ;;  %v12941_v8 = vadd.f32 %v6955_v49, %v6943_v58 }
 0x592   :  { %7209 = vmatpush.bf16.msrb.mxu3 %v7923_v56  ;;  %v8195_v56 = vor.u32 %v10974_v63, %v8192_v61  ;;  %v7875_v27 = vor.u32 %v10894_v59, %v7872_v52  ;;  %v8480_v49 = vld [vmem:[#allocation2 + $0x5f8] sm:$0xf0]  ;;  %v7731_v63 = vor.u32 %v10858_v15, %v7728_v46  ;;  %v10946_v61 = vld [vmem:[#allocation2 + $0x2cc] sm:$0xf] }
 0x593   :  { %7171 = vmatpush.bf16.msra.mxu0 %v10719_v57  ;;  %v10670_v57 = vld [vmem:[#allocation2 + $0x1708] sm:$0xf]  ;;  %10854 = vmatmul.msk.bf16.vlgmr.msrb.gmra.mxu1 %vm491_vm2, %v12827_v22  ;;  %v8483_v48 = vor.u32 %v11046_v47, %v8480_v49  ;;  %v8083_v59 = vor.u32 %v10946_v61, %v8080_v33  ;;  %v8144_v52 = vld [vmem:[#allocation2 + $0x358] sm:$0xf0]  ;;  %v11006_v15 = vld [vmem:[#allocation2 + $0x4ac] sm:$0xf] }
 0x594   :  { %7232 = vmatpush.bf16.msra.mxu1 %v8227_v34  ;;  %v10950_v34 = vld [vmem:[#allocation2 + $0x2ec] sm:$0xf]  ;;  %v10671_v26 = vor.u32 %v11596_v11, %v10670_v57  ;;  %v8464_v57 = vld [vmem:[#allocation2 + $0x5d8] sm:$0xf0] }
 0x595   :  { %7197 = vmatpush.bf16.msrb.mxu2 %v7779_v25  ;;  %v10890_v25 = vld [vmem:[#allocation2 + $0x10c] sm:$0xf]  ;;  %v8099_v55 = vor.u32 %v10950_v34, %v8096_v54  ;;  %v8128_v46 = vld [vmem:[#allocation2 + $0x338] sm:$0xf0] }
 0x596   :  { %7210 = vmatpush.bf16.msrb.mxu3 %v7907_v17  ;;  %v7856_v17 = vld [vmem:[#allocation2 + $0x118] sm:$0xf0]  ;;  %v6944_v14 = vpop.f32.mrf.mxu2  ;;  %v10942_v11 = vld [vmem:[#allocation2 + $0x2ac] sm:$0xf] }
 0x597   :  { %7172 = vmatpush.bf16.msra.mxu0 %v10703_v32  ;;  %v8179_v32 = vor.u32 %v10970_v42, %v8176_v30  ;;  %v6957_v10 = vpop.f32.mrf.mxu3  ;;  %v7859_v58 = vor.u32 %v10890_v25, %v7856_v17  ;;  %v8064_v42 = vld [vmem:[#allocation2 + $0x2b8] sm:$0xf0]  ;;  %v11038_v25 = vld [vmem:[#allocation2 + $0x5ac] sm:$0xf] }
 0x598   :  { %7233 = vmatpush.bf16.msra.mxu1 %v8211_v28  ;;  %v8352_v28 = vld [vmem:[#allocation2 + $0x4f8] sm:$0xf0]  ;;  %v11002_v49 = vld [vmem:[#allocation2 + $0x48c] sm:$0xf] }
 0x599   :  { %7198 = vmatpush.bf16.msrb.mxu2 %v7763_v62  ;;  %v8355_v5 = vor.u32 %v11014_v18, %v8352_v28  ;;  %v8163_v62 = vor.u32 %v10966_v0, %v8160_v21  ;;  %v8448_v17 = vld [vmem:[#allocation2 + $0x5b8] sm:$0xf0]  ;;  %v10954_v28 = vld [vmem:[#allocation2 + $0x30c] sm:$0xf] }
 0x59a   :  { %7211 = vmatpush.bf16.msrb.mxu3 %v7891_v24  ;;  %v10962_v24 = vld [vmem:[#allocation2 + $0x34c] sm:$0xf]  ;;  %v8451_v21 = vor.u32 %v11038_v25, %v8448_v17  ;;  %v8112_v47 = vld [vmem:[#allocation2 + $0x318] sm:$0xf0] }
 0x59b   :  { %7173 = vmatpush.bf16.msra.mxu0 %v10687_v20  ;;  %v11010_v20 = vld [vmem:[#allocation2 + $0x4cc] sm:$0xf]  ;;  %v8147_v34 = vor.u32 %v10962_v24, %v8144_v52  ;;  %v8432_v33 = vld [vmem:[#allocation2 + $0x598] sm:$0xf0] }
 0x59c   :  { %7234 = vmatpush.bf16.msra.mxu1 %v8195_v56  ;;  %v11042_v56 = vld [vmem:[#allocation2 + $0x5cc] sm:$0xf]  ;;  %v8339_v30 = vor.u32 %v11010_v20, %v8336_v12  ;;  %v8288_v52 = vld [vmem:[#allocation2 + $0x478] sm:$0xf0] }
 0x59d   :  { %7199 = vmatpush.bf16.msrb.mxu2 %v7747_v60  ;;  %v8467_v54 = vor.u32 %v11042_v56, %v8464_v57  ;;  %v10958_v60 = vld [vmem:[#allocation2 + $0x32c] sm:$0xf]  ;;  %v8272_v25 = vld [vmem:[#allocation2 + $0x458] sm:$0xf0] }
 0x59e   :  { %7212 = vmatpush.bf16.msrb.mxu3 %v7875_v27  ;;  %v8320_v27 = vld [vmem:[#allocation2 + $0x4b8] sm:$0xf0]  ;;  %v8131_v10 = vor.u32 %v10958_v60, %v8128_v46  ;;  %v10994_v46 = vld [vmem:[#allocation2 + $0x44c] sm:$0xf] }
 0x59f   :  { %7174 = vmatpush.bf16.msra.mxu0 %v10671_v26  ;;  %v8067_v26 = vor.u32 %v10942_v11, %v8064_v42  ;;  %v6968_v0 = vpop.f32.mrf.mxu0  ;;  %v8323_v18 = vor.u32 %v11006_v15, %v8320_v27  ;;  %v11030_v11 = vld [vmem:[#allocation2 + $0x56c] sm:$0xf]  ;;  %v8416_v42 = vld [vmem:[#allocation2 + $0x578] sm:$0xf0] }
 0x5a0   :  { %7235 = vmatpush.bf16.msra.mxu1 %v8179_v32  ;;  %v10938_v32 = vld [vmem:[#allocation2 + $0x28c] sm:$0xf]  ;;  %v6969_v14 = vadd.f32 %v6968_v0, %v12941_v8  ;;  %v8115_v8 = vor.u32 %v10954_v28, %v8112_v47  ;;  %v8720_v60 = vld [vmem:[#allocation2 + $0x7d8] sm:$0xf0] }
 0x5a1   :  { %7200 = vmatpush.bf16.msrb.mxu2 %v7731_v63  ;;  %v8304_v63 = vld [vmem:[#allocation2 + $0x498] sm:$0xf0]  ;;  %v11026_v0 = vld [vmem:[#allocation2 + $0x54c] sm:$0xf] }
 0x5a2   :  { %7175 = vmatmul.bf16.vlgmr.msra.gmra.mxu0 %v12820_v13  ;;  %7213 = vmatpush.bf16.msrb.mxu3 %v7859_v58  ;;  %v10934_v58 = vld [vmem:[#allocation2 + $0x26c] sm:$0xf]  ;;  %v8307_v24 = vor.u32 %v11002_v49, %v8304_v63  ;;  %v8704_v49 = vld [vmem:[#allocation2 + $0x7b8] sm:$0xf0]  ;;  %v8275_v63 = vor.u32 %v10994_v46, %v8272_v25 }
 0x5a3   :  { %7219 = vmatpush.bf16.msrb.mxu0 %v8099_v55  ;;  %v8048_v55 = vld [vmem:[#allocation2 + $0x298] sm:$0xf0]  ;;  %v10926_v28 = vld [vmem:[#allocation2 + $0x22c] sm:$0xf] }
 0x5a4   :  { %7236 = vmatpush.bf16.msra.mxu1 %v8163_v62  ;;  %7201 = vmatmul.bf16.vlgmr.msrb.gmra.mxu2 %v12722_v38  ;;  %v8051_v61 = vor.u32 %v10938_v32, %v8048_v55  ;;  %v11034_v38 = vld [vmem:[#allocation2 + $0x58c] sm:$0xf]  ;;  %v8736_v62 = vld [vmem:[#allocation2 + $0x7f8] sm:$0xf0] }
 0x5a5   :  { %7245 = vmatpush.bf16.msra.mxu2 %v8355_v5  ;;  %7214 = vmatmul.bf16.vlgmr.msrb.gmra.mxu3 %v12726_v45  ;;  %v8032_v5 = vld [vmem:[#allocation2 + $0x278] sm:$0xf0]  ;;  %v11110_v45 = vld [vmem:[#allocation2 + $0x7ec] sm:$0xf]  ;;  %v8435_v12 = vor.u32 %v11034_v38, %v8432_v33 }
 0x5a6   :  { %7258 = vmatpush.bf16.msra.mxu3 %v8483_v48  ;;  %v6981_v48 = vpop.f32.mrf.mxu1  ;;  %v8035_v56 = vor.u32 %v10934_v58, %v8032_v5  ;;  %v8739_v57 = vor.u32 %v11110_v45, %v8736_v62  ;;  %v11102_v47 = vld [vmem:[#allocation2 + $0x7ac] sm:$0xf]  ;;  %v8256_v5 = vld [vmem:[#allocation2 + $0x438] sm:$0xf0] }
 0x5a7   :  { %7220 = vmatpush.bf16.msrb.mxu0 %v8083_v59  ;;  %v6982_v20 = vadd.f32 %v6981_v48, %v6969_v14  ;;  %v10998_v59 = vld [vmem:[#allocation2 + $0x46c] sm:$0xf]  ;;  %v6970_v27 = vpop.f32.mrf.mxu0  ;;  %v6994_v17 = vpop.f32.mrf.mxu2  ;;  %v8707_v62 = vor.u32 %v11102_v47, %v8704_v49 }
 0x5a8   :  { %7237 = vmatpush.bf16.msra.mxu1 %v8147_v34  ;;  %v8016_v34 = vld [vmem:[#allocation2 + $0x258] sm:$0xf0]  ;;  %v8291_v15 = vor.u32 %v10998_v59, %v8288_v52  ;;  %v10990_v58 = vld [vmem:[#allocation2 + $0x42c] sm:$0xf] }
 0x5a9   :  { %7246 = vmatpush.bf16.msra.mxu2 %v8339_v30  ;;  %v10930_v30 = vld [vmem:[#allocation2 + $0x24c] sm:$0xf]  ;;  %v6995_v14 = vadd.f32 %v6994_v17, %v6982_v20  ;;  %v8688_v59 = vld [vmem:[#allocation2 + $0x798] sm:$0xf0]  ;;  %v8259_v52 = vor.u32 %v10990_v58, %v8256_v5 }
 0x5aa   :  { %7259 = vmatpush.bf16.msra.mxu3 %v8467_v54  ;;  %v11106_v54 = vld [vmem:[#allocation2 + $0x7cc] sm:$0xf]  ;;  %v8019_v32 = vor.u32 %v10930_v30, %v8016_v34  ;;  %v8368_v34 = vld [vmem:[#allocation2 + $0x518] sm:$0xf0] }
 0x5ab   :  { %7221 = vmatpush.bf16.msrb.mxu0 %v8067_v26  ;;  %v8419_v26 = vor.u32 %v11030_v11, %v8416_v42  ;;  %v8723_v55 = vor.u32 %v11106_v54, %v8720_v60  ;;  %v11022_v48 = vld [vmem:[#allocation2 + $0x52c] sm:$0xf]  ;;  %v8240_v42 = vld [vmem:[#allocation2 + $0x418] sm:$0xf0] }
 0x5ac   :  { %7238 = vmatpush.bf16.msra.mxu1 %v8131_v10  ;;  %v7007_v10 = vpop.f32.mrf.mxu3  ;;  %v10922_v20 = vld [vmem:[#allocation2 + $0x20c] sm:$0xf]  ;;  %v8672_v17 = vld [vmem:[#allocation2 + $0x778] sm:$0xf0] }
 0x5ad   :  { %7247 = vmatpush.bf16.msra.mxu2 %v8323_v18  ;;  %v8400_v18 = vld [vmem:[#allocation2 + $0x558] sm:$0xf0]  ;;  %v12950_v38 = vadd.f32 %v7007_v10, %v6995_v14  ;;  %v11018_v30 = vld [vmem:[#allocation2 + $0x50c] sm:$0xf] }
 0x5ae   :  { %7260 = vmatpush.bf16.msra.mxu3 %v8451_v21  ;;  %v8000_v21 = vld [vmem:[#allocation2 + $0x238] sm:$0xf0]  ;;  %v8403_v33 = vor.u32 %v11026_v0, %v8400_v18  ;;  %v11142_v27 = vld [vmem:[#allocation2 + $0x8ec] sm:$0xf]  ;;  %v8371_v10 = vor.u32 %v11018_v30, %v8368_v34 }
 0x5af   :  { %7222 = vmatpush.bf16.msrb.mxu0 %v8051_v61  ;;  %v6983_v61 = vpop.f32.mrf.mxu1  ;;  %v8003_v45 = vor.u32 %v10926_v28, %v8000_v21  ;;  %v6996_v46 = vpop.f32.mrf.mxu2  ;;  %v11074_v28 = vld [vmem:[#allocation2 + $0x6cc] sm:$0xf]  ;;  %v8592_v14 = vld [vmem:[#allocation2 + $0x6d8] sm:$0xf0] }
 0x5b0   :  { %7239 = vmatpush.bf16.msra.mxu1 %v8115_v8  ;;  %v7984_v8 = vld [vmem:[#allocation2 + $0x218] sm:$0xf0]  ;;  %v11138_v61 = vld [vmem:[#allocation2 + $0x8cc] sm:$0xf]  ;;  %v8595_v58 = vor.u32 %v11074_v28, %v8592_v14 }
 0x5b1   :  { %7248 = vmatpush.bf16.msra.mxu2 %v8307_v24  ;;  %v8384_v24 = vld [vmem:[#allocation2 + $0x538] sm:$0xf0]  ;;  %v7987_v54 = vor.u32 %v10922_v20, %v7984_v8  ;;  %v11066_v30 = vld [vmem:[#allocation2 + $0x68c] sm:$0xf] }
 0x5b2   :  { %7261 = vmatpush.bf16.msra.mxu3 %v8435_v12  ;;  %v11098_v12 = vld [vmem:[#allocation2 + $0x78c] sm:$0xf]  ;;  %v8387_v11 = vor.u32 %v11022_v48, %v8384_v24  ;;  %v8656_v5 = vld [vmem:[#allocation2 + $0x758] sm:$0xf0] }
 0x5b3   :  { %7223 = vmatpush.bf16.msrb.mxu0 %v8035_v56  ;;  %7240 = vmatmul.bf16.vlgmr.msra.gmra.mxu1 %v12724_v44  ;;  %v11078_v56 = vld [vmem:[#allocation2 + $0x6ec] sm:$0xf]  ;;  %v8608_v44 = vld [vmem:[#allocation2 + $0x6f8] sm:$0xf0]  ;;  %v8691_v60 = vor.u32 %v11098_v12, %v8688_v59 }
 0x5b4   :  { %7284 = vmatpush.bf16.msrb.mxu1 %v8739_v57  ;;  %v10986_v57 = vld [vmem:[#allocation2 + $0x40c] sm:$0xf]  ;;  %v8611_v25 = vor.u32 %v11078_v56, %v8608_v44  ;;  %v7009_v0 = vpop.f32.mrf.mxu3  ;;  %v8576_v24 = vld [vmem:[#allocation2 + $0x6b8] sm:$0xf0] }
 0x5b5   :  { %7249 = vmatpush.bf16.msra.mxu2 %v8291_v15  ;;  %v11094_v15 = vld [vmem:[#allocation2 + $0x76c] sm:$0xf]  ;;  %v8243_v18 = vor.u32 %v10986_v57, %v8240_v42  ;;  %v8832_v56 = vld [vmem:[#allocation2 + $0x8b8] sm:$0xf0] }
 0x5b6   :  { %7262 = vmatpush.bf16.msra.mxu3 %v8419_v26  ;;  %v8864_v26 = vld [vmem:[#allocation2 + $0x8f8] sm:$0xf0]  ;;  %v8675_v47 = vor.u32 %v11094_v15, %v8672_v17  ;;  %v11070_v48 = vld [vmem:[#allocation2 + $0x6ac] sm:$0xf] }
 0x5b7   :  { %7224 = vmatpush.bf16.msrb.mxu0 %v8019_v32  ;;  %v11174_v32 = vld [vmem:[#allocation2 + $0x9ec] sm:$0xf]  ;;  %v8867_v21 = vor.u32 %v11142_v27, %v8864_v26  ;;  %v8579_v44 = vor.u32 %v11070_v48, %v8576_v24  ;;  %v8640_v57 = vld [vmem:[#allocation2 + $0x738] sm:$0xf0] }
 0x5b8   :  { %7285 = vmatpush.bf16.msrb.mxu1 %v8723_v55  ;;  %v8992_v55 = vld [vmem:[#allocation2 + $0x9f8] sm:$0xf0]  ;;  %v11086_v59 = vld [vmem:[#allocation2 + $0x72c] sm:$0xf] }
 0x5b9   :  { %7250 = vmatpush.bf16.msra.mxu2 %v8275_v63  ;;  %v8995_v49 = vor.u32 %v11174_v32, %v8992_v55  ;;  %v11090_v63 = vld [vmem:[#allocation2 + $0x74c] sm:$0xf]  ;;  %v8960_v42 = vld [vmem:[#allocation2 + $0x9b8] sm:$0xf0]  ;;  %v8643_v27 = vor.u32 %v11086_v59, %v8640_v57 }
 0x5ba   :  { %7263 = vmatpush.bf16.msra.mxu3 %v8403_v33  ;;  %v8848_v33 = vld [vmem:[#allocation2 + $0x8d8] sm:$0xf0]  ;;  %v8659_v8 = vor.u32 %v11090_v63, %v8656_v5  ;;  %v11162_v55 = vld [vmem:[#allocation2 + $0x98c] sm:$0xf] }
 0x5bb   :  { %7225 = vmatpush.bf16.msrb.mxu0 %v8003_v45  ;;  %v11170_v45 = vld [vmem:[#allocation2 + $0x9cc] sm:$0xf]  ;;  %v8851_v20 = vor.u32 %v11138_v61, %v8848_v33  ;;  %v8560_v34 = vld [vmem:[#allocation2 + $0x698] sm:$0xf0] }
 0x5bc   :  { %7286 = vmatpush.bf16.msrb.mxu1 %v8707_v62  ;;  %v8976_v62 = vld [vmem:[#allocation2 + $0x9d8] sm:$0xf0]  ;;  %v8563_v32 = vor.u32 %v11066_v30, %v8560_v34  ;;  %v11234_v48 = vld [vmem:[#allocation2 + $0xbcc] sm:$0xf] }
 0x5bd   :  { %7251 = vmatpush.bf16.msra.mxu2 %v8259_v52  ;;  %v8979_v12 = vor.u32 %v11170_v45, %v8976_v62  ;;  %v11134_v52 = vld [vmem:[#allocation2 + $0x8ac] sm:$0xf]  ;;  %v8624_v46 = vld [vmem:[#allocation2 + $0x718] sm:$0xf0] }
 0x5be   :  { %7264 = vmatpush.bf16.msra.mxu3 %v8387_v11  ;;  %v11166_v11 = vld [vmem:[#allocation2 + $0x9ac] sm:$0xf]  ;;  %v8816_v17 = vld [vmem:[#allocation2 + $0x898] sm:$0xf0] }
 0x5bf   :  { %7226 = vmatpush.bf16.msrb.mxu0 %v7987_v54  ;;  %v8835_v54 = vor.u32 %v11134_v52, %v8832_v56  ;;  %v7020_v15 = vpop.f32.mrf.mxu0  ;;  %v8963_v26 = vor.u32 %v11166_v11, %v8960_v42  ;;  %v8944_v0 = vld [vmem:[#allocation2 + $0x998] sm:$0xf0]  ;;  %v11058_v45 = vld [vmem:[#allocation2 + $0x64c] sm:$0xf] }
 0x5c0   :  { %7287 = vmatpush.bf16.msrb.mxu1 %v8691_v60  ;;  %v11082_v60 = vld [vmem:[#allocation2 + $0x70c] sm:$0xf]  ;;  %v9248_v28 = vld [vmem:[#allocation2 + $0xbf8] sm:$0xf0] }
 0x5c1   :  { %7252 = vmatpush.bf16.msra.mxu2 %v8243_v18  ;;  %v8544_v18 = vld [vmem:[#allocation2 + $0x678] sm:$0xf0]  ;;  %v11154_v57 = vld [vmem:[#allocation2 + $0x94c] sm:$0xf] }
 0x5c2   :  { %7265 = vmatpush.bf16.msra.mxu3 %v8371_v10  ;;  %7227 = vmatmul.bf16.vlgmr.msrb.gmra.mxu0 %v12720_v35  ;;  %v11062_v35 = vld [vmem:[#allocation2 + $0x66c] sm:$0xf]  ;;  %v7033_v10 = vpop.f32.mrf.mxu1  ;;  %v8800_v63 = vld [vmem:[#allocation2 + $0x878] sm:$0xf0] }
 0x5c3   :  { %7271 = vmatpush.bf16.msra.mxu0 %v8611_v25  ;;  %v11130_v25 = vld [vmem:[#allocation2 + $0x88c] sm:$0xf]  ;;  %v8547_v33 = vor.u32 %v11062_v35, %v8544_v18  ;;  %v8928_v5 = vld [vmem:[#allocation2 + $0x978] sm:$0xf0] }
 0x5c4   :  { %7288 = vmatpush.bf16.msrb.mxu1 %v8675_v47  ;;  %7253 = vmatmul.bf16.vlgmr.msra.gmra.mxu2 %v12734_v36  ;;  %v7021_v36 = vadd.f32 %v7020_v15, %v12950_v38  ;;  %v8819_v14 = vor.u32 %v11130_v25, %v8816_v17  ;;  %v8947_v47 = vor.u32 %v11162_v55, %v8944_v0  ;;  %v8528_v62 = vld [vmem:[#allocation2 + $0x658] sm:$0xf0]  ;;  %v11054_v42 = vld [vmem:[#allocation2 + $0x62c] sm:$0xf] }
 0x5c5   :  { %7297 = vmatpush.bf16.msrb.mxu2 %v8867_v21  ;;  %7266 = vmatmul.bf16.vlgmr.msra.gmra.mxu3 %v12738_v40  ;;  %v11238_v40 = vld [vmem:[#allocation2 + $0xbec] sm:$0xf]  ;;  %v8627_v21 = vor.u32 %v11082_v60, %v8624_v46  ;;  %v9232_v24 = vld [vmem:[#allocation2 + $0xbd8] sm:$0xf0]  ;;  %v8531_v56 = vor.u32 %v11058_v45, %v8528_v62 }
 0x5c6   :  { %7310 = vmatpush.bf16.msrb.mxu3 %v8995_v49  ;;  %v11126_v49 = vld [vmem:[#allocation2 + $0x86c] sm:$0xf]  ;;  %v7034_v61 = vadd.f32 %v7033_v10, %v7021_v36  ;;  %v9251_v38 = vor.u32 %v11238_v40, %v9248_v28  ;;  %v8784_v59 = vld [vmem:[#allocation2 + $0x858] sm:$0xf0] }
 0x5c7   :  { %7272 = vmatpush.bf16.msra.mxu0 %v8595_v58  ;;  %v11158_v58 = vld [vmem:[#allocation2 + $0x96c] sm:$0xf]  ;;  %v7022_v52 = vpop.f32.mrf.mxu0  ;;  %v8912_v11 = vld [vmem:[#allocation2 + $0x958] sm:$0xf0]  ;;  %v7046_v30 = vpop.f32.mrf.mxu2 }
 0x5c8   :  { %7289 = vmatpush.bf16.msrb.mxu1 %v8659_v8  ;;  %v8931_v8 = vor.u32 %v11158_v58, %v8928_v5  ;;  %v8512_v34 = vld [vmem:[#allocation2 + $0x638] sm:$0xf0]  ;;  %v7047_v15 = vadd.f32 %v7046_v30, %v7034_v61  ;;  %v8915_v46 = vor.u32 %v11154_v57, %v8912_v11  ;;  %v11118_v25 = vld [vmem:[#allocation2 + $0x82c] sm:$0xf] }
 0x5c9   :  { %7298 = vmatpush.bf16.msrb.mxu2 %v8851_v20  ;;  %v8803_v20 = vor.u32 %v11126_v49, %v8800_v63  ;;  %v9216_v60 = vld [vmem:[#allocation2 + $0xbb8] sm:$0xf0]  ;;  %v8515_v55 = vor.u32 %v11054_v42, %v8512_v34  ;;  %v11150_v35 = vld [vmem:[#allocation2 + $0x92c] sm:$0xf] }
 0x5ca   :  { %7311 = vmatpush.bf16.msrb.mxu3 %v8979_v12  ;;  %v11122_v12 = vld [vmem:[#allocation2 + $0x84c] sm:$0xf]  ;;  %v8768_v17 = vld [vmem:[#allocation2 + $0x838] sm:$0xf0]  ;;  %v7035_v36 = vpop.f32.mrf.mxu1 }
 0x5cb   :  { %7273 = vmatpush.bf16.msra.mxu0 %v8579_v44  ;;  %v9235_v44 = vor.u32 %v11234_v48, %v9232_v24  ;;  %v8896_v18 = vld [vmem:[#allocation2 + $0x938] sm:$0xf0]  ;;  %v11050_v40 = vld [vmem:[#allocation2 + $0x60c] sm:$0xf] }
 0x5cc   :  { %7290 = vmatpush.bf16.msrb.mxu1 %v8643_v27  ;;  %v7059_v27 = vpop.f32.mrf.mxu3  ;;  %v8496_v28 = vld [vmem:[#allocation2 + $0x618] sm:$0xf0]  ;;  %v8899_v49 = vor.u32 %v11150_v35, %v8896_v18  ;;  %v11114_v63 = vld [vmem:[#allocation2 + $0x80c] sm:$0xf] }
 0x5cd   :  { %7299 = vmatpush.bf16.msrb.mxu2 %v8835_v54  ;;  %v11230_v54 = vld [vmem:[#allocation2 + $0xbac] sm:$0xf]  ;;  %v9200_v10 = vld [vmem:[#allocation2 + $0xb98] sm:$0xf0] }
 0x5ce   :  { %7312 = vmatpush.bf16.msrb.mxu3 %v8963_v26  ;;  %v8787_v26 = vor.u32 %v11122_v12, %v8784_v59  ;;  %v9219_v0 = vor.u32 %v11230_v54, %v9216_v60  ;;  %v8752_v61 = vld [vmem:[#allocation2 + $0x818] sm:$0xf0]  ;;  %v11222_v45 = vld [vmem:[#allocation2 + $0xb6c] sm:$0xf] }
 0x5cf   :  { %7274 = vmatpush.bf16.msra.mxu0 %v8563_v32  ;;  %v12957_v32 = vadd.f32 %v7059_v27, %v7047_v15  ;;  %v8880_v5 = vld [vmem:[#allocation2 + $0x918] sm:$0xf0]  ;;  %v11270_v24 = vld [vmem:[#allocation2 + $0xcec] sm:$0xf]  ;;  %v7048_v12 = vpop.f32.mrf.mxu2  ;;  %v8755_v59 = vor.u32 %v11114_v63, %v8752_v61 }
 0x5d0   :  { %7291 = vmatpush.bf16.msrb.mxu1 %v8627_v21  ;;  %v8771_v21 = vor.u32 %v11118_v25, %v8768_v17  ;;  %v9184_v62 = vld [vmem:[#allocation2 + $0xb78] sm:$0xf0]  ;;  %v11218_v34 = vld [vmem:[#allocation2 + $0xb4c] sm:$0xf] }
 0x5d1   :  { %7300 = vmatpush.bf16.msrb.mxu2 %v8819_v14  ;;  %v11226_v14 = vld [vmem:[#allocation2 + $0xb8c] sm:$0xf]  ;;  %v9504_v52 = vld [vmem:[#allocation2 + $0xdf8] sm:$0xf0]  ;;  %v9187_v42 = vor.u32 %v11222_v45, %v9184_v62 }
 0x5d2   :  { %7313 = vmatpush.bf16.msrb.mxu3 %v8947_v47  ;;  %v9120_v47 = vld [vmem:[#allocation2 + $0xaf8] sm:$0xf0]  ;;  %v9203_v58 = vor.u32 %v11226_v14, %v9200_v10  ;;  %v11266_v27 = vld [vmem:[#allocation2 + $0xccc] sm:$0xf] }
 0x5d3   :  { %7275 = vmatpush.bf16.msra.mxu0 %v8547_v33  ;;  %7292 = vmatmul.bf16.vlgmr.msrb.gmra.mxu1 %v12736_v37  ;;  %v11206_v37 = vld [vmem:[#allocation2 + $0xaec] sm:$0xf]  ;;  %v9168_v54 = vld [vmem:[#allocation2 + $0xb58] sm:$0xf0] }
 0x5d4   :  { %7336 = vmatpush.bf16.msra.mxu1 %v9251_v38  ;;  %v11146_v33 = vld [vmem:[#allocation2 + $0x90c] sm:$0xf]  ;;  %v8499_v38 = vor.u32 %v11050_v40, %v8496_v28  ;;  %v9123_v48 = vor.u32 %v11206_v37, %v9120_v47  ;;  %v7061_v57 = vpop.f32.mrf.mxu3  ;;  %v9488_v25 = vld [vmem:[#allocation2 + $0xdd8] sm:$0xf0] }
 0x5d5   :  { %7301 = vmatpush.bf16.msrb.mxu2 %v8803_v20  ;;  %v9376_v20 = vld [vmem:[#allocation2 + $0xcf8] sm:$0xf0]  ;;  %v8883_v11 = vor.u32 %v11146_v33, %v8880_v5  ;;  %v11198_v17 = vld [vmem:[#allocation2 + $0xaac] sm:$0xf] }
 0x5d6   :  { %7314 = vmatpush.bf16.msrb.mxu3 %v8931_v8  ;;  %v11302_v8 = vld [vmem:[#allocation2 + $0xdec] sm:$0xf]  ;;  %v9379_v30 = vor.u32 %v11270_v24, %v9376_v20  ;;  %v9088_v36 = vld [vmem:[#allocation2 + $0xab8] sm:$0xf0] }
 0x5d7   :  { %7276 = vmatpush.bf16.msra.mxu0 %v8531_v56  ;;  %v11202_v56 = vld [vmem:[#allocation2 + $0xacc] sm:$0xf]  ;;  %v9507_v60 = vor.u32 %v11302_v8, %v9504_v52  ;;  %v9152_v18 = vld [vmem:[#allocation2 + $0xb38] sm:$0xf0]  ;;  %v9091_v28 = vor.u32 %v11198_v17, %v9088_v36 }
 0x5d8   :  { %7337 = vmatpush.bf16.msra.mxu1 %v9235_v44  ;;  %v9104_v44 = vld [vmem:[#allocation2 + $0xad8] sm:$0xf0]  ;;  %v11214_v35 = vld [vmem:[#allocation2 + $0xb2c] sm:$0xf] }
 0x5d9   :  { %7302 = vmatpush.bf16.msrb.mxu2 %v8787_v26  ;;  %v9107_v15 = vor.u32 %v11202_v56, %v9104_v44  ;;  %v9360_v26 = vld [vmem:[#allocation2 + $0xcd8] sm:$0xf0]  ;;  %v11262_v14 = vld [vmem:[#allocation2 + $0xcac] sm:$0xf] }
 0x5da   :  { %7315 = vmatpush.bf16.msrb.mxu3 %v8915_v46  ;;  %v11298_v46 = vld [vmem:[#allocation2 + $0xdcc] sm:$0xf]  ;;  %v9344_v10 = vld [vmem:[#allocation2 + $0xcb8] sm:$0xf0] }
 0x5db   :  { %7277 = vmatpush.bf16.msra.mxu0 %v8515_v55  ;;  %v9171_v55 = vor.u32 %v11218_v34, %v9168_v54  ;;  %v9491_v40 = vor.u32 %v11298_v46, %v9488_v25  ;;  %v9472_v37 = vld [vmem:[#allocation2 + $0xdb8] sm:$0xf0]  ;;  %v9347_v63 = vor.u32 %v11262_v14, %v9344_v10  ;;  %v11210_v61 = vld [vmem:[#allocation2 + $0xb0c] sm:$0xf] }
 0x5dc   :  { %7338 = vmatpush.bf16.msra.mxu1 %v9219_v0  ;;  %v9363_v0 = vor.u32 %v11266_v27, %v9360_v26  ;;  %v9072_v47 = vld [vmem:[#allocation2 + $0xa98] sm:$0xf0]  ;;  %v11258_v45 = vld [vmem:[#allocation2 + $0xc8c] sm:$0xf] }
 0x5dd   :  { %7303 = vmatpush.bf16.msrb.mxu2 %v8771_v21  ;;  %v11294_v21 = vld [vmem:[#allocation2 + $0xdac] sm:$0xf]  ;;  %v9136_v33 = vld [vmem:[#allocation2 + $0xb18] sm:$0xf0] }
 0x5de   :  { %7316 = vmatpush.bf16.msrb.mxu3 %v8899_v49  ;;  %v9155_v49 = vor.u32 %v11214_v35, %v9152_v18  ;;  %v9328_v62 = vld [vmem:[#allocation2 + $0xc98] sm:$0xf0]  ;;  %v11190_v24 = vld [vmem:[#allocation2 + $0xa6c] sm:$0xf] }
 0x5df   :  { %7278 = vmatpush.bf16.msra.mxu0 %v8499_v38  ;;  %v7072_v38 = vpop.f32.mrf.mxu0  ;;  %v9056_v20 = vld [vmem:[#allocation2 + $0xa78] sm:$0xf0]  ;;  %v11366_v8 = vld [vmem:[#allocation2 + $0xfec] sm:$0xf]  ;;  %v9331_v52 = vor.u32 %v11258_v45, %v9328_v62 }
 0x5e0   :  { %7339 = vmatpush.bf16.msra.mxu1 %v9203_v58  ;;  %v9475_v58 = vor.u32 %v11294_v21, %v9472_v37  ;;  %v9760_v12 = vld [vmem:[#allocation2 + $0xff8] sm:$0xf0]  ;;  %v7085_v56 = vpop.f32.mrf.mxu1  ;;  %v9059_v57 = vor.u32 %v11190_v24, %v9056_v20  ;;  %v11362_v27 = vld [vmem:[#allocation2 + $0xfcc] sm:$0xf] }
 0x5e1   :  { %7304 = vmatpush.bf16.msrb.mxu2 %v8755_v59  ;;  %v9139_v59 = vor.u32 %v11210_v61, %v9136_v33  ;;  %v9763_v54 = vor.u32 %v11366_v8, %v9760_v12  ;;  %v9744_v26 = vld [vmem:[#allocation2 + $0xfd8] sm:$0xf0]  ;;  %v11250_v36 = vld [vmem:[#allocation2 + $0xc4c] sm:$0xf] }
 0x5e2   :  { %7279 = vmatmul.bf16.vlgmr.msra.gmra.mxu0 %v12732_v23  ;;  %7317 = vmatpush.bf16.msrb.mxu3 %v8883_v11  ;;  %v11194_v23 = vld [vmem:[#allocation2 + $0xa8c] sm:$0xf]  ;;  %v9747_v18 = vor.u32 %v11362_v27, %v9744_v26  ;;  %v9024_v14 = vld [vmem:[#allocation2 + $0xa38] sm:$0xf0] }
 0x5e3   :  { %7323 = vmatpush.bf16.msrb.mxu0 %v9123_v48  ;;  %v9075_v5 = vor.u32 %v11194_v23, %v9072_v47  ;;  %v11290_v48 = vld [vmem:[#allocation2 + $0xd8c] sm:$0xf]  ;;  %v9728_v37 = vld [vmem:[#allocation2 + $0xfb8] sm:$0xf0] }
 0x5e4   :  { %7340 = vmatpush.bf16.msra.mxu1 %v9187_v42  ;;  %7305 = vmatmul.bf16.vlgmr.msrb.gmra.mxu2 %v12754_v31  ;;  %v7073_v31 = vadd.f32 %v7072_v38, %v12957_v32  ;;  %v11254_v11 = vld [vmem:[#allocation2 + $0xc6c] sm:$0xf]  ;;  %v9312_v42 = vld [vmem:[#allocation2 + $0xc78] sm:$0xf0] }
 0x5e5   :  { %7349 = vmatpush.bf16.msra.mxu2 %v9379_v30  ;;  %7318 = vmatmul.bf16.vlgmr.msrb.gmra.mxu3 %v12762_v43  ;;  %v9456_v43 = vld [vmem:[#allocation2 + $0xd98] sm:$0xf0]  ;;  %v11286_v30 = vld [vmem:[#allocation2 + $0xd6c] sm:$0xf]  ;;  %v9315_v46 = vor.u32 %v11254_v11, %v9312_v42 }
 0x5e6   :  { %7362 = vmatpush.bf16.msra.mxu3 %v9507_v60  ;;  %v9459_v44 = vor.u32 %v11290_v48, %v9456_v43  ;;  %v7086_v34 = vadd.f32 %v7085_v56, %v7073_v31  ;;  %v9440_v32 = vld [vmem:[#allocation2 + $0xd78] sm:$0xf0]  ;;  %v11186_v60 = vld [vmem:[#allocation2 + $0xa4c] sm:$0xf] }
 0x5e7   :  { %7324 = vmatpush.bf16.msrb.mxu0 %v9107_v15  ;;  %v9040_v15 = vld [vmem:[#allocation2 + $0xa58] sm:$0xf0]  ;;  %v9443_v25 = vor.u32 %v11286_v30, %v9440_v32  ;;  %v7074_v35 = vpop.f32.mrf.mxu0  ;;  %v7098_v10 = vpop.f32.mrf.mxu2  ;;  %v11358_v21 = vld [vmem:[#allocation2 + $0xfac] sm:$0xf] }
 0x5e8   :  { %7341 = vmatpush.bf16.msra.mxu1 %v9171_v55  ;;  %v9043_v17 = vor.u32 %v11186_v60, %v9040_v15  ;;  %v9296_v55 = vld [vmem:[#allocation2 + $0xc58] sm:$0xf0]  ;;  %v7099_v23 = vadd.f32 %v7098_v10, %v7086_v34  ;;  %v7111_v47 = vpop.f32.mrf.mxu3  ;;  %v7087_v45 = vpop.f32.mrf.mxu1  ;;  %v9731_v48 = vor.u32 %v11358_v21, %v9728_v37  ;;  %v11178_v31 = vld [vmem:[#allocation2 + $0xa0c] sm:$0xf] }
 0x5e9   :  { %7350 = vmatpush.bf16.msra.mxu2 %v9363_v0  ;;  %v11282_v0 = vld [vmem:[#allocation2 + $0xd4c] sm:$0xf]  ;;  %v9280_v38 = vld [vmem:[#allocation2 + $0xc38] sm:$0xf0] }
 0x5ea   :  { %7363 = vmatpush.bf16.msra.mxu3 %v9491_v40  ;;  %v9424_v40 = vld [vmem:[#allocation2 + $0xd58] sm:$0xf0]  ;;  %v12964_v62 = vadd.f32 %v7111_v47, %v7099_v23  ;;  %v11334_v20 = vld [vmem:[#allocation2 + $0xeec] sm:$0xf] }
 0x5eb   :  { %7325 = vmatpush.bf16.msrb.mxu0 %v9091_v28  ;;  %v11182_v28 = vld [vmem:[#allocation2 + $0xa2c] sm:$0xf]  ;;  %v9427_v61 = vor.u32 %v11282_v0, %v9424_v40  ;;  %v9008_v43 = vld [vmem:[#allocation2 + $0xa18] sm:$0xf0] }
 0x5ec   :  { %7342 = vmatpush.bf16.msra.mxu1 %v9155_v49  ;;  %v9299_v49 = vor.u32 %v11250_v36, %v9296_v55  ;;  %v9027_v33 = vor.u32 %v11182_v28, %v9024_v14  ;;  %v9712_v24 = vld [vmem:[#allocation2 + $0xf98] sm:$0xf0]  ;;  %v9011_v56 = vor.u32 %v11178_v31, %v9008_v43  ;;  %v11350_v34 = vld [vmem:[#allocation2 + $0xf6c] sm:$0xf] }
 0x5ed   :  { %7351 = vmatpush.bf16.msra.mxu2 %v9347_v63  ;;  %v11246_v63 = vld [vmem:[#allocation2 + $0xc2c] sm:$0xf]  ;;  %v9632_v8 = vld [vmem:[#allocation2 + $0xef8] sm:$0xf0] }
 0x5ee   :  { %7364 = vmatpush.bf16.msra.mxu3 %v9475_v58  ;;  %v11278_v58 = vld [vmem:[#allocation2 + $0xd2c] sm:$0xf]  ;;  %v9283_v12 = vor.u32 %v11246_v63, %v9280_v38  ;;  %v9392_v11 = vld [vmem:[#allocation2 + $0xd18] sm:$0xf0]  ;;  %v9635_v30 = vor.u32 %v11334_v20, %v9632_v8 }
 0x5ef   :  { %7326 = vmatpush.bf16.msrb.mxu0 %v9075_v5  ;;  %v9408_v5 = vld [vmem:[#allocation2 + $0xd38] sm:$0xf0]  ;;  %v11430_v15 = vld [vmem:[#allocation2 + $0x11ec] sm:$0xf]  ;;  %v7100_v26 = vpop.f32.mrf.mxu2 }
 0x5f0   :  { %7343 = vmatpush.bf16.msra.mxu1 %v9139_v59  ;;  %v11242_v59 = vld [vmem:[#allocation2 + $0xc0c] sm:$0xf]  ;;  %v9888_v32 = vld [vmem:[#allocation2 + $0x10f8] sm:$0xf0]  ;;  %v7113_v36 = vpop.f32.mrf.mxu3 }
 0x5f1   :  { %7352 = vmatpush.bf16.msra.mxu2 %v9331_v52  ;;  %v9411_v52 = vor.u32 %v11278_v58, %v9408_v5  ;;  %v9696_v60 = vld [vmem:[#allocation2 + $0xf78] sm:$0xf0]  ;;  %v11346_v40 = vld [vmem:[#allocation2 + $0xf4c] sm:$0xf] }
 0x5f2   :  { %7365 = vmatpush.bf16.msra.mxu3 %v9459_v44  ;;  %v9264_v44 = vld [vmem:[#allocation2 + $0xc18] sm:$0xf0]  ;;  %v9699_v35 = vor.u32 %v11350_v34, %v9696_v60  ;;  %v11394_v28 = vld [vmem:[#allocation2 + $0x10cc] sm:$0xf] }
 0x5f3   :  { %7327 = vmatpush.bf16.msrb.mxu0 %v9059_v57  ;;  %7344 = vmatmul.bf16.vlgmr.msra.gmra.mxu1 %v12766_v16  ;;  %v11354_v16 = vld [vmem:[#allocation2 + $0xf8c] sm:$0xf]  ;;  %v10016_v27 = vld [vmem:[#allocation2 + $0x11f8] sm:$0xf0] }
 0x5f4   :  { %7388 = vmatpush.bf16.msrb.mxu1 %v9763_v54  ;;  %v11274_v57 = vld [vmem:[#allocation2 + $0xd0c] sm:$0xf]  ;;  %v9715_v42 = vor.u32 %v11354_v16, %v9712_v24  ;;  %v9872_v14 = vld [vmem:[#allocation2 + $0x10d8] sm:$0xf0] }
 0x5f5   :  { %7353 = vmatpush.bf16.msra.mxu2 %v9315_v46  ;;  %v11398_v54 = vld [vmem:[#allocation2 + $0x10ec] sm:$0xf]  ;;  %v9267_v46 = vor.u32 %v11242_v59, %v9264_v44  ;;  %v9395_v55 = vor.u32 %v11274_v57, %v9392_v11  ;;  %v9680_v21 = vld [vmem:[#allocation2 + $0xf58] sm:$0xf0]  ;;  %v9875_v63 = vor.u32 %v11394_v28, %v9872_v14 }
 0x5f6   :  { %7366 = vmatpush.bf16.msra.mxu3 %v9443_v25  ;;  %v11330_v25 = vld [vmem:[#allocation2 + $0xecc] sm:$0xf]  ;;  %v9891_v0 = vor.u32 %v11398_v54, %v9888_v32  ;;  %v10000_v23 = vld [vmem:[#allocation2 + $0x11d8] sm:$0xf0] }
 0x5f7   :  { %7328 = vmatpush.bf16.msrb.mxu0 %v9043_v17  ;;  %v9616_v17 = vld [vmem:[#allocation2 + $0xed8] sm:$0xf0]  ;;  %v11426_v37 = vld [vmem:[#allocation2 + $0x11cc] sm:$0xf] }
 0x5f8   :  { %7389 = vmatpush.bf16.msrb.mxu1 %v9747_v18  ;;  %v10019_v18 = vor.u32 %v11430_v15, %v10016_v27  ;;  %v9619_v10 = vor.u32 %v11330_v25, %v9616_v17  ;;  %v11326_v47 = vld [vmem:[#allocation2 + $0xeac] sm:$0xf]  ;;  %v9856_v5 = vld [vmem:[#allocation2 + $0x10b8] sm:$0xf0] }
 0x5f9   :  { %7354 = vmatpush.bf16.msra.mxu2 %v9299_v49  ;;  %v9600_v49 = vld [vmem:[#allocation2 + $0xeb8] sm:$0xf0]  ;;  %v11342_v38 = vld [vmem:[#allocation2 + $0xf2c] sm:$0xf] }
 0x5fa   :  { %7367 = vmatpush.bf16.msra.mxu3 %v9427_v61  ;;  %v9683_v61 = vor.u32 %v11346_v40, %v9680_v21  ;;  %v11390_v58 = vld [vmem:[#allocation2 + $0x10ac] sm:$0xf]  ;;  %v9603_v45 = vor.u32 %v11326_v47, %v9600_v49  ;;  %v9584_v16 = vld [vmem:[#allocation2 + $0xe98] sm:$0xf0] }
 0x5fb   :  { %7329 = vmatpush.bf16.msrb.mxu0 %v9027_v33  ;;  %v10003_v33 = vor.u32 %v11426_v37, %v10000_v23  ;;  %v11422_v31 = vld [vmem:[#allocation2 + $0x11ac] sm:$0xf]  ;;  %v9859_v24 = vor.u32 %v11390_v58, %v9856_v5  ;;  %v9648_v59 = vld [vmem:[#allocation2 + $0xf18] sm:$0xf0] }
 0x5fc   :  { %7390 = vmatpush.bf16.msrb.mxu1 %v9731_v48  ;;  %v9664_v48 = vld [vmem:[#allocation2 + $0xf38] sm:$0xf0]  ;;  %v11322_v43 = vld [vmem:[#allocation2 + $0xe8c] sm:$0xf] }
 0x5fd   :  { %7355 = vmatpush.bf16.msra.mxu2 %v9283_v12  ;;  %v11338_v20 = vld [vmem:[#allocation2 + $0xf0c] sm:$0xf]  ;;  %v9667_v8 = vor.u32 %v11342_v38, %v9664_v48  ;;  %v9587_v44 = vor.u32 %v11322_v43, %v9584_v16  ;;  %v9968_v11 = vld [vmem:[#allocation2 + $0x1198] sm:$0xf0] }
 0x5fe   :  { %7368 = vmatpush.bf16.msra.mxu3 %v9411_v52  ;;  %v11386_v52 = vld [vmem:[#allocation2 + $0x108c] sm:$0xf]  ;;  %v10272_v54 = vld [vmem:[#allocation2 + $0x13f8] sm:$0xf0]  ;;  %v9651_v60 = vor.u32 %v11338_v20, %v9648_v59 }
 0x5ff   :  { %7330 = vmatpush.bf16.msrb.mxu0 %v9011_v56  ;;  %v9840_v56 = vld [vmem:[#allocation2 + $0x1098] sm:$0xf0]  ;;  %v11418_v57 = vld [vmem:[#allocation2 + $0x118c] sm:$0xf] }
 0x600   :  { %7391 = vmatpush.bf16.msrb.mxu1 %v9715_v42  ;;  %v11318_v42 = vld [vmem:[#allocation2 + $0xe6c] sm:$0xf]  ;;  %v9843_v32 = vor.u32 %v11386_v52, %v9840_v56  ;;  %v9971_v15 = vor.u32 %v11418_v57, %v9968_v11  ;;  %v9824_v26 = vld [vmem:[#allocation2 + $0x1078] sm:$0xf0] }
 0x601   :  { %7356 = vmatpush.bf16.msra.mxu2 %v9267_v46  ;;  %v11494_v34 = vld [vmem:[#allocation2 + $0x13ec] sm:$0xf]  ;;  %v7137_v46 = vpop.f32.mrf.mxu1  ;;  %v10256_v40 = vld [vmem:[#allocation2 + $0x13d8] sm:$0xf0] }
 0x602   :  { %7331 = vmatmul.bf16.vlgmr.msrb.gmra.mxu0 %v12758_v41  ;;  %7369 = vmatpush.bf16.msra.mxu3 %v9395_v55  ;;  %v9984_v41 = vld [vmem:[#allocation2 + $0x11b8] sm:$0xf0]  ;;  %v11382_v27 = vld [vmem:[#allocation2 + $0x106c] sm:$0xf]  ;;  %v10275_v17 = vor.u32 %v11494_v34, %v10272_v54 }
 0x603   :  { %7375 = vmatpush.bf16.msra.mxu0 %v9635_v30  ;;  %v9987_v12 = vor.u32 %v11422_v31, %v9984_v41  ;;  %v9568_v30 = vld [vmem:[#allocation2 + $0xe78] sm:$0xf0]  ;;  %v11414_v36 = vld [vmem:[#allocation2 + $0x116c] sm:$0xf]  ;;  %v9827_v28 = vor.u32 %v11382_v27, %v9824_v26 }
 0x604   :  { %7392 = vmatpush.bf16.msrb.mxu1 %v9699_v35  ;;  %7357 = vmatmul.bf16.vlgmr.msra.gmra.mxu2 %v12782_v39  ;;  %v7124_v39 = vpop.f32.mrf.mxu0  ;;  %v9571_v25 = vor.u32 %v11318_v42, %v9568_v30  ;;  %v9952_v55 = vld [vmem:[#allocation2 + $0x1178] sm:$0xf0]  ;;  %v11410_v47 = vld [vmem:[#allocation2 + $0x114c] sm:$0xf] }
 0x605   :  { %7401 = vmatpush.bf16.msrb.mxu2 %v9891_v0  ;;  %7370 = vmatmul.bf16.vlgmr.msra.gmra.mxu3 %v12790_v53  ;;  %v7125_v53 = vadd.f32 %v7124_v39, %v12964_v62  ;;  %v11314_v0 = vld [vmem:[#allocation2 + $0xe4c] sm:$0xf]  ;;  %v9552_v62 = vld [vmem:[#allocation2 + $0xe58] sm:$0xf0]  ;;  %v9955_v14 = vor.u32 %v11414_v36, %v9952_v55 }
 0x606   :  { %7414 = vmatpush.bf16.msrb.mxu3 %v10019_v18  ;;  %v11490_v18 = vld [vmem:[#allocation2 + $0x13cc] sm:$0xf]  ;;  %v9808_v21 = vld [vmem:[#allocation2 + $0x1058] sm:$0xf0]  ;;  %v9555_v37 = vor.u32 %v11314_v0, %v9552_v62 }
 0x607   :  { %7376 = vmatpush.bf16.msra.mxu0 %v9619_v10  ;;  %v7138_v35 = vadd.f32 %v7137_v46, %v7125_v53  ;;  %v11378_v10 = vld [vmem:[#allocation2 + $0x104c] sm:$0xf]  ;;  %v10259_v23 = vor.u32 %v11490_v18, %v10256_v40  ;;  %v9936_v49 = vld [vmem:[#allocation2 + $0x1158] sm:$0xf0]  ;;  %v7150_v5 = vpop.f32.mrf.mxu2 }
 0x608   :  { %7393 = vmatpush.bf16.msrb.mxu1 %v9683_v61  ;;  %v11486_v38 = vld [vmem:[#allocation2 + $0x13ac] sm:$0xf]  ;;  %v10240_v58 = vld [vmem:[#allocation2 + $0x13b8] sm:$0xf0]  ;;  %v7163_v31 = vpop.f32.mrf.mxu3  ;;  %v9939_v41 = vor.u32 %v11410_v47, %v9936_v49 }
 0x609   :  { %7402 = vmatpush.bf16.msrb.mxu2 %v9875_v63  ;;  %v11310_v63 = vld [vmem:[#allocation2 + $0xe2c] sm:$0xf]  ;;  %v7151_v48 = vadd.f32 %v7150_v5, %v7138_v35  ;;  %v9792_v16 = vld [vmem:[#allocation2 + $0x1038] sm:$0xf0]  ;;  %v10243_v20 = vor.u32 %v11486_v38, %v10240_v58  ;;  %v7139_v52 = vpop.f32.mrf.mxu1 }
 0x60a   :  { %7415 = vmatpush.bf16.msrb.mxu3 %v10003_v33  ;;  %v9536_v33 = vld [vmem:[#allocation2 + $0xe38] sm:$0xf0]  ;;  %v11374_v43 = vld [vmem:[#allocation2 + $0x102c] sm:$0xf] }
 0x60b   :  { %7377 = vmatpush.bf16.msra.mxu0 %v9603_v45  ;;  %v9811_v45 = vor.u32 %v11378_v10, %v9808_v21  ;;  %v11306_v59 = vld [vmem:[#allocation2 + $0xe0c] sm:$0xf]  ;;  %v12971_v56 = vadd.f32 %v7163_v31, %v7151_v48  ;;  %v9520_v39 = vld [vmem:[#allocation2 + $0xe18] sm:$0xf0] }
 0x60c   :  { %7394 = vmatpush.bf16.msrb.mxu1 %v9667_v8  ;;  %v7126_v61 = vpop.f32.mrf.mxu0  ;;  %v11406_v8 = vld [vmem:[#allocation2 + $0x112c] sm:$0xf]  ;;  %v10224_v57 = vld [vmem:[#allocation2 + $0x1398] sm:$0xf0] }
 0x60d   :  { %7403 = vmatpush.bf16.msrb.mxu2 %v9859_v24  ;;  %v9539_v24 = vor.u32 %v11310_v63, %v9536_v33  ;;  %v11462_v11 = vld [vmem:[#allocation2 + $0x12ec] sm:$0xf]  ;;  %v10144_v42 = vld [vmem:[#allocation2 + $0x12f8] sm:$0xf0] }
 0x60e   :  { %7416 = vmatpush.bf16.msrb.mxu3 %v9987_v12  ;;  %v9920_v12 = vld [vmem:[#allocation2 + $0x1138] sm:$0xf0]  ;;  %v11370_v30 = vld [vmem:[#allocation2 + $0x100c] sm:$0xf]  ;;  %v10147_v46 = vor.u32 %v11462_v11, %v10144_v42 }
 0x60f   :  { %7378 = vmatpush.bf16.msra.mxu0 %v9587_v44  ;;  %v11482_v44 = vld [vmem:[#allocation2 + $0x138c] sm:$0xf]  ;;  %v9923_v53 = vor.u32 %v11406_v8, %v9920_v12  ;;  %v9776_v34 = vld [vmem:[#allocation2 + $0x1018] sm:$0xf0]  ;;  %v7152_v18 = vpop.f32.mrf.mxu2 }
 0x610   :  { %7395 = vmatpush.bf16.msrb.mxu1 %v9651_v60  ;;  %v11402_v54 = vld [vmem:[#allocation2 + $0x110c] sm:$0xf]  ;;  %v10227_v60 = vor.u32 %v11482_v44, %v10224_v57  ;;  %v10208_v26 = vld [vmem:[#allocation2 + $0x1378] sm:$0xf0]  ;;  %v9779_v55 = vor.u32 %v11370_v30, %v9776_v34 }
 0x611   :  { %7404 = vmatpush.bf16.msrb.mxu2 %v9843_v32  ;;  %v9523_v32 = vor.u32 %v11306_v59, %v9520_v39  ;;  %v11478_v27 = vld [vmem:[#allocation2 + $0x136c] sm:$0xf]  ;;  %v10528_v0 = vld [vmem:[#allocation2 + $0x15f8] sm:$0xf0]  ;;  %v7189_v33 = vpop.f32.mrf.mxu1 }
 0x612   :  { %7417 = vmatpush.bf16.msrb.mxu3 %v9971_v15  ;;  %v9904_v15 = vld [vmem:[#allocation2 + $0x1118] sm:$0xf0]  ;;  %v11558_v36 = vld [vmem:[#allocation2 + $0x15ec] sm:$0xf] }
 0x613   :  { %7379 = vmatpush.bf16.msra.mxu0 %v9571_v25  ;;  %7396 = vmatmul.bf16.vlgmr.msrb.gmra.mxu1 %v12794_v3  ;;  %v9795_v3 = vor.u32 %v11374_v43, %v9792_v16  ;;  %v11526_v25 = vld [vmem:[#allocation2 + $0x14ec] sm:$0xf]  ;;  %v10128_v62 = vld [vmem:[#allocation2 + $0x12d8] sm:$0xf0]  ;;  %v9907_v40 = vor.u32 %v11402_v54, %v9904_v15 }
 0x614   :  { %7440 = vmatpush.bf16.msra.mxu1 %v10275_v17  ;;  %v10400_v17 = vld [vmem:[#allocation2 + $0x14f8] sm:$0xf0]  ;;  %v11458_v35 = vld [vmem:[#allocation2 + $0x12cc] sm:$0xf] }
 0x615   :  { %7405 = vmatpush.bf16.msrb.mxu2 %v9827_v28  ;;  %v7165_v28 = vpop.f32.mrf.mxu3  ;;  %v10403_v10 = vor.u32 %v11526_v25, %v10400_v17  ;;  %v11474_v21 = vld [vmem:[#allocation2 + $0x134c] sm:$0xf]  ;;  %v10131_v47 = vor.u32 %v11458_v35, %v10128_v62  ;;  %v10384_v63 = vld [vmem:[#allocation2 + $0x14d8] sm:$0xf0] }
 0x616   :  { %7418 = vmatpush.bf16.msrb.mxu3 %v9955_v14  ;;  %v10211_v14 = vor.u32 %v11478_v27, %v10208_v26  ;;  %v11522_v49 = vld [vmem:[#allocation2 + $0x14cc] sm:$0xf]  ;;  %v10512_v38 = vld [vmem:[#allocation2 + $0x15d8] sm:$0xf0] }
 0x617   :  { %7380 = vmatpush.bf16.msra.mxu0 %v9555_v37  ;;  %v10192_v37 = vld [vmem:[#allocation2 + $0x1358] sm:$0xf0]  ;;  %v11554_v61 = vld [vmem:[#allocation2 + $0x15cc] sm:$0xf]  ;;  %v10387_v48 = vor.u32 %v11522_v49, %v10384_v63 }
 0x618   :  { %7441 = vmatpush.bf16.msra.mxu1 %v10259_v23  ;;  %v10531_v23 = vor.u32 %v11558_v36, %v10528_v0  ;;  %v11454_v58 = vld [vmem:[#allocation2 + $0x12ac] sm:$0xf]  ;;  %v10112_v5 = vld [vmem:[#allocation2 + $0x12b8] sm:$0xf0]  ;;  %v10515_v43 = vor.u32 %v11554_v61, %v10512_v38 }
 0x619   :  { %7406 = vmatpush.bf16.msrb.mxu2 %v9811_v45  ;;  %v10195_v45 = vor.u32 %v11474_v21, %v10192_v37  ;;  %v11470_v31 = vld [vmem:[#allocation2 + $0x132c] sm:$0xf]  ;;  %v10115_v16 = vor.u32 %v11454_v58, %v10112_v5  ;;  %v10496_v12 = vld [vmem:[#allocation2 + $0x15b8] sm:$0xf0]  ;;  %v7191_v34 = vpop.f32.mrf.mxu1  ;;  %v11664_v21 = vld [vmem:[#allocation14] sm:$0xf] }
 0x61a   :  { %7419 = vmatpush.bf16.msrb.mxu3 %v9939_v41  ;;  %v10176_v41 = vld [vmem:[#allocation2 + $0x1338] sm:$0xf0]  ;;  %v11550_v8 = vld [vmem:[#allocation2 + $0x15ac] sm:$0xf]  ;;  %v2290_v37 = vperm.slane %v11664_v21, 3 }
 0x61b   :  { %7381 = vmatpush.bf16.msra.mxu0 %v9539_v24  ;;  %v11518_v24 = vld [vmem:[#allocation2 + $0x14ac] sm:$0xf]  ;;  %v10096_v59 = vld [vmem:[#allocation2 + $0x1298] sm:$0xf0]  ;;  %v10179_v52 = vor.u32 %v11470_v31, %v10176_v41 }
 0x61c   :  { %7442 = vmatpush.bf16.msra.mxu1 %v10243_v20  ;;  %v10368_v20 = vld [vmem:[#allocation2 + $0x14b8] sm:$0xf0]  ;;  %v11466_v44 = vld [vmem:[#allocation2 + $0x130c] sm:$0xf] }
 0x61d   :  { %7407 = vmatpush.bf16.msrb.mxu2 %v9795_v3  ;;  %v10371_v39 = vor.u32 %v11518_v24, %v10368_v20  ;;  %v10160_v57 = vld [vmem:[#allocation2 + $0x1318] sm:$0xf0]  ;;  %v10499_v3 = vor.u32 %v11550_v8, %v10496_v12  ;;  %v11514_v42 = vld [vmem:[#allocation2 + $0x148c] sm:$0xf] }
 0x61e   :  { %7420 = vmatpush.bf16.msrb.mxu3 %v9923_v53  ;;  %v10352_v53 = vld [vmem:[#allocation2 + $0x1498] sm:$0xf0]  ;;  %v11546_v30 = vld [vmem:[#allocation2 + $0x158c] sm:$0xf]  ;;  %v10163_v26 = vor.u32 %v11466_v44, %v10160_v57 }
 0x61f   :  { %7382 = vmatpush.bf16.msra.mxu0 %v9523_v32  ;;  %v10480_v54 = vld [vmem:[#allocation2 + $0x1598] sm:$0xf0]  ;;  %v11622_v15 = vld [vmem:[#allocation2 + $0x17ec] sm:$0xf] }
 0x620   :  { %7443 = vmatpush.bf16.msra.mxu1 %v10227_v60  ;;  %v10080_v32 = vld [vmem:[#allocation2 + $0x1278] sm:$0xf0]  ;;  %v10483_v17 = vor.u32 %v11546_v30, %v10480_v54  ;;  %v11542_v35 = vld [vmem:[#allocation2 + $0x156c] sm:$0xf] }
 0x621   :  { %7408 = vmatpush.bf16.msrb.mxu2 %v9779_v55  ;;  %v10784_v27 = vld [vmem:[#allocation2 + $0x17f8] sm:$0xf0]  ;;  %v11510_v55 = vld [vmem:[#allocation2 + $0x146c] sm:$0xf] }
 0x622   :  { %7383 = vmatmul.bf16.vlgmr.msra.gmra.mxu0 %v12786_v50  ;;  %7421 = vmatpush.bf16.msrb.mxu3 %v9907_v40  ;;  %v11450_v50 = vld [vmem:[#allocation2 + $0x128c] sm:$0xf]  ;;  %v10336_v0 = vld [vmem:[#allocation2 + $0x1478] sm:$0xf0]  ;;  %v10787_v62 = vor.u32 %v11622_v15, %v10784_v27 }
 0x623   :  { %7427 = vmatpush.bf16.msrb.mxu0 %v10147_v46  ;;  %v10099_v11 = vor.u32 %v11450_v50, %v10096_v59  ;;  %v10355_v46 = vor.u32 %v11514_v42, %v10352_v53  ;;  %v10464_v18 = vld [vmem:[#allocation2 + $0x1578] sm:$0xf0]  ;;  %v11442_v40 = vld [vmem:[#allocation2 + $0x124c] sm:$0xf] }
 0x624   :  { %7444 = vmatpush.bf16.msra.mxu1 %v10211_v14  ;;  %7409 = vmatmul.bf16.vlgmr.msrb.gmra.mxu2 %v12800_v29  ;;  %v7176_v29 = vpop.f32.mrf.mxu0  ;;  %v10064_v28 = vld [vmem:[#allocation2 + $0x1258] sm:$0xf0]  ;;  %v11506_v49 = vld [vmem:[#allocation2 + $0x144c] sm:$0xf] }
 0x625   :  { %7453 = vmatpush.bf16.msra.mxu2 %v10403_v10  ;;  %7422 = vmatmul.bf16.vlgmr.msrb.gmra.mxu3 %v12804_v9  ;;  %v11446_v9 = vld [vmem:[#allocation2 + $0x126c] sm:$0xf]  ;;  %v7177_v60 = vadd.f32 %v7176_v29, %v12971_v56  ;;  %v10768_v14 = vld [vmem:[#allocation2 + $0x17d8] sm:$0xf0]  ;;  %v10339_v10 = vor.u32 %v11510_v55, %v10336_v0 }
 0x626   :  { %7466 = vmatpush.bf16.msra.mxu3 %v10531_v23  ;;  %v10083_v36 = vor.u32 %v11446_v9, %v10080_v32  ;;  %v11618_v56 = vld [vmem:[#allocation2 + $0x17cc] sm:$0xf]  ;;  %v10467_v23 = vor.u32 %v11542_v35, %v10464_v18  ;;  %v10320_v63 = vld [vmem:[#allocation2 + $0x1458] sm:$0xf0] }
 0x627   :  { %7428 = vmatpush.bf16.msrb.mxu0 %v10131_v47  ;;  %v12977_v25 = vadd.f32 %v7189_v33, %v7177_v60  ;;  %v10067_v47 = vor.u32 %v11442_v40, %v10064_v28  ;;  %v11538_v61 = vld [vmem:[#allocation2 + $0x154c] sm:$0xf]  ;;  %v10771_v33 = vor.u32 %v11618_v56, %v10768_v14  ;;  %v10448_v38 = vld [vmem:[#allocation2 + $0x1558] sm:$0xf0]  ;;  %v7202_v41 = vpop.f32.mrf.mxu2 }
 0x628   :  { %7445 = vmatpush.bf16.msra.mxu1 %v10195_v45  ;;  %v11438_v58 = vld [vmem:[#allocation2 + $0x122c] sm:$0xf]  ;;  %v10048_v5 = vld [vmem:[#allocation2 + $0x1238] sm:$0xf0]  ;;  %v7203_v24 = vadd.f32 %v7202_v41, %v2290_v37  ;;  %v7215_v20 = vpop.f32.mrf.mxu3  ;;  %v10451_v8 = vor.u32 %v11538_v61, %v10448_v38  ;;  %v7537_v37 = vld [vmem:[%s13200_s9 + $0x78] sm:$0xff] }
 0x629   :  { %7454 = vmatpush.bf16.msra.mxu2 %v10387_v48  ;;  %v11614_v48 = vld [vmem:[#allocation2 + $0x17ac] sm:$0xf]  ;;  %v10752_v31 = vld [vmem:[#allocation2 + $0x17b8] sm:$0xf0]  ;;  %v10051_v12 = vor.u32 %v11438_v58, %v10048_v5 }
 0x62a   :  { %7467 = vmatpush.bf16.msra.mxu3 %v10515_v43  ;;  %v10323_v43 = vor.u32 %v11506_v49, %v10320_v63  ;;  %v10304_v50 = vld [vmem:[#allocation2 + $0x1438] sm:$0xf0]  ;;  %v11534_v59 = vld [vmem:[#allocation2 + $0x152c] sm:$0xf] }
 0x62b   :  { %7429 = vmatpush.bf16.msrb.mxu0 %v10115_v16  ;;  %v11502_v16 = vld [vmem:[#allocation2 + $0x142c] sm:$0xf]  ;;  %v10032_v57 = vld [vmem:[#allocation2 + $0x1218] sm:$0xf0] }
 0x62c   :  { %7446 = vmatpush.bf16.msra.mxu1 %v10179_v52  ;;  %v7178_v45 = vpop.f32.mrf.mxu0  ;;  %v10432_v52 = vld [vmem:[#allocation2 + $0x1538] sm:$0xf0]  ;;  %v11434_v44 = vld [vmem:[#allocation2 + $0x120c] sm:$0xf]  ;;  %v10307_v30 = vor.u32 %v11502_v16, %v10304_v50 }
 0x62d   :  { %7455 = vmatpush.bf16.msra.mxu2 %v10371_v39  ;;  %v10755_v39 = vor.u32 %v11614_v48, %v10752_v31  ;;  %v11590_v42 = vld [vmem:[#allocation2 + $0x16ec] sm:$0xf]  ;;  %v10656_v53 = vld [vmem:[#allocation2 + $0x16f8] sm:$0xf0]  ;;  %v10435_v34 = vor.u32 %v11534_v59, %v10432_v52  ;;  %v10035_v29 = vor.u32 %v11434_v44, %v10032_v57  ;;  %v7533_v59 = vld [vmem:[%s13200_s9 + $0x58] sm:$0xff] }
 0x62e   :  { %7468 = vmatpush.bf16.msra.mxu3 %v10499_v3  ;;  %v11610_v3 = vld [vmem:[#allocation2 + $0x178c] sm:$0xf]  ;;  %v10288_v9 = vld [vmem:[#allocation2 + $0x1418] sm:$0xf0]  ;;  %v10659_v15 = vor.u32 %v11590_v42, %v10656_v53  ;;  %v7531_v53 = vld [vmem:[%s13200_s9 + $0x48] sm:$0xff] }
 0x62f   :  { %7430 = vmatpush.bf16.msrb.mxu0 %v10099_v11  ;;  %v12980_v11 = vadd.f32 %v7215_v20, %v7203_v24  ;;  %v11498_v54 = vld [vmem:[#allocation2 + $0x140c] sm:$0xf]  ;;  %v10416_v27 = vld [vmem:[#allocation2 + $0x1518] sm:$0xf0]  ;;  %v7204_v55 = vpop.f32.mrf.mxu2 }
 0x630   :  { %7447 = vmatpush.bf16.msra.mxu1 %v10163_v26  ;;  %v11530_v32 = vld [vmem:[#allocation2 + $0x150c] sm:$0xf]  ;;  %v12982_v0 = vpop.f32.mrf.mxu1  ;;  %v10291_v35 = vor.u32 %v11498_v54, %v10288_v9  ;;  %v10640_v18 = vld [vmem:[#allocation2 + $0x16d8] sm:$0xf0]  ;;  %v7217_v40 = vpop.f32.mrf.mxu3 }
 0x631   :  { %7456 = vmatpush.bf16.msra.mxu2 %v10355_v46  ;;  %v11638_v26 = vld [vmem:[#allocation2 + $0x186c] sm:$0xf]  ;;  %v10848_v46 = vld [vmem:[#allocation2 + $0x1878] sm:$0xf0]  ;;  %v10419_v28 = vor.u32 %v11530_v32, %v10416_v27  ;;  %v7527_v40 = vld [vmem:[%s13200_s9 + $0x28] sm:$0xff] }
 0x632   :  { %7469 = vmatpush.bf16.msra.mxu3 %v10483_v17  ;;  %v11606_v17 = vld [vmem:[#allocation2 + $0x176c] sm:$0xf]  ;;  %v10851_v56 = vor.u32 %v11638_v26, %v10848_v46  ;;  %v10832_v21 = vld [vmem:[#allocation2 + $0x1858] sm:$0xf0]  ;;  %v7529_v26 = vld [vmem:[%s13200_s9 + $0x38] sm:$0xff] }
 0x633   :  { %7431 = vmatpush.bf16.msrb.mxu0 %v10083_v36  ;;  %7448 = vmatmul.bf16.vlgmr.msra.gmra.mxu1 %v12806_v51  ;;  %v10736_v51 = vld [vmem:[#allocation2 + $0x1798] sm:$0xf0]  ;;  %v11582_v63 = vld [vmem:[#allocation2 + $0x16ac] sm:$0xf]  ;;  %v7567_v46 = vld [vmem:[%s13200_s9 + $0x168] sm:$0xff] }
 0x634   :  { %7492 = vmatpush.bf16.msrb.mxu1 %v10787_v62  ;;  %v10739_v60 = vor.u32 %v11610_v3, %v10736_v51  ;;  %v10720_v36 = vld [vmem:[#allocation2 + $0x1778] sm:$0xf0]  ;;  %v11586_v62 = vld [vmem:[#allocation2 + $0x16cc] sm:$0xf] }
 0x635   :  { %7457 = vmatpush.bf16.msra.mxu2 %v10339_v10  ;;  %v10723_v14 = vor.u32 %v11606_v17, %v10720_v36  ;;  %v11634_v10 = vld [vmem:[#allocation2 + $0x184c] sm:$0xf]  ;;  %v10704_v49 = vld [vmem:[#allocation2 + $0x1758] sm:$0xf0] }
 0x636   :  { %7470 = vmatpush.bf16.msra.mxu3 %v10467_v23  ;;  %v10643_v23 = vor.u32 %v11586_v62, %v10640_v18  ;;  %v10624_v61 = vld [vmem:[#allocation2 + $0x16b8] sm:$0xf0]  ;;  %v10835_v38 = vor.u32 %v11634_v10, %v10832_v21  ;;  %v11630_v5 = vld [vmem:[#allocation2 + $0x182c] sm:$0xf]  ;;  %v7565_v10 = vld [vmem:[%s13200_s9 + $0x158] sm:$0xff] }
 0x637   :  { %7432 = vmatpush.bf16.msrb.mxu0 %v10067_v47  ;;  %v11602_v47 = vld [vmem:[#allocation2 + $0x174c] sm:$0xf]  ;;  %v10816_v45 = vld [vmem:[#allocation2 + $0x1838] sm:$0xf0]  ;;  %v10627_v48 = vor.u32 %v11582_v63, %v10624_v61 }
 0x638   :  { %7493 = vmatpush.bf16.msrb.mxu1 %v10771_v33  ;;  %v7536_v33 = vld [vmem:[%s13200_s9 + $0x70] sm:$0xff]  ;;  %v10707_v58 = vor.u32 %v11602_v47, %v10704_v49  ;;  %v10688_v41 = vld [vmem:[#allocation2 + $0x1738] sm:$0xf0]  ;;  %v7563_v49 = vld [vmem:[%s13200_s9 + $0x148] sm:$0xff] }
 0x639   :  { %7458 = vmatpush.bf16.msra.mxu2 %v10323_v43  ;;  %v11598_v31 = vld [vmem:[#allocation2 + $0x172c] sm:$0xf]  ;;  %v7243_v43 = vpop.f32.mrf.mxu1  ;;  %v10608_v24 = vld [vmem:[#allocation2 + $0x1698] sm:$0xf0] }
 0x63a   :  { %7471 = vmatpush.bf16.msra.mxu3 %v10451_v8  ;;  %v11578_v16 = vld [vmem:[#allocation2 + $0x168c] sm:$0xf]  ;;  %v7534_v20 = vld [vmem:[%s13200_s9 + $0x60] sm:$0xff]  ;;  %v10819_v8 = vor.u32 %v11630_v5, %v10816_v45  ;;  %v7523_v45 = vld [vmem:[%s13200_s9 + $0x8] sm:$0xff]  ;;  %v7518_v43 = vmax.f32 %v12859_v2, 0.0 }
 0x63b   :  { %7433 = vmatpush.bf16.msrb.mxu0 %v10051_v12  ;;  %v11626_v12 = vld [vmem:[#allocation2 + $0x180c] sm:$0xf]  ;;  %v10800_v50 = vld [vmem:[#allocation2 + $0x1818] sm:$0xf0]  ;;  %v10611_v52 = vor.u32 %v11578_v16, %v10608_v24  ;;  %v7549_v2 = vld [vmem:[%s13200_s9 + $0xd8] sm:$0xff] }
 0x63c   :  { %7494 = vmatpush.bf16.msrb.mxu1 %v10755_v39  ;;  %v11594_v39 = vld [vmem:[#allocation2 + $0x170c] sm:$0xf]  ;;  %v10672_v44 = vld [vmem:[#allocation2 + $0x1718] sm:$0xf0]  ;;  %v10803_v51 = vor.u32 %v11626_v12, %v10800_v50  ;;  %v7557_v50 = vld [vmem:[%s13200_s9 + $0x118] sm:$0xff] }
 0x63d   :  { %7459 = vmatpush.bf16.msra.mxu2 %v10307_v30  ;;  %v10592_v57 = vld [vmem:[#allocation2 + $0x1678] sm:$0xf0]  ;;  %v7532_v3 = vld [vmem:[%s13200_s9 + $0x50] sm:$0xff]  ;;  %v10675_v42 = vor.u32 %v11594_v39, %v10672_v44 }
 0x63e   :  { %7472 = vmatpush.bf16.msra.mxu3 %v10435_v34  ;;  %v11570_v54 = vld [vmem:[#allocation2 + $0x164c] sm:$0xf]  ;;  %v10576_v9 = vld [vmem:[#allocation2 + $0x1658] sm:$0xf0] }
 0x63f   :  { %7434 = vmatpush.bf16.msrb.mxu0 %v10035_v29  ;;  %v7228_v34 = vpop.f32.mrf.mxu0  ;;  %v7569_v29 = vld [vmem:[%s13200_s9 + $0x178] sm:$0xff]  ;;  %v11566_v17 = vld [vmem:[#allocation2 + $0x162c] sm:$0xf]  ;;  %v10560_v36 = vld [vmem:[#allocation2 + $0x1638] sm:$0xf0] }
 0x640   :  { %7495 = vmatpush.bf16.msrb.mxu1 %v10739_v60  ;;  %v7229_v32 = vadd.f32 %v7228_v34, %v12980_v11  ;;  %v7530_v60 = vld [vmem:[%s13200_s9 + $0x40] sm:$0xff]  ;;  %v10579_v11 = vor.u32 %v11570_v54, %v10576_v9  ;;  %v11562_v21 = vld [vmem:[#allocation2 + $0x160c] sm:$0xf] }
 0x641   :  { %7460 = vmatpush.bf16.msra.mxu2 %v10291_v35  ;;  %v7566_v18 = vld [vmem:[%s13200_s9 + $0x160] sm:$0xff]  ;;  %v7560_v16 = vld [vmem:[%s13200_s9 + $0x130] sm:$0xff] }
 0x642   :  { %7435 = vmatmul.bf16.vlgmr.msrb.gmra.mxu0 %v12802_v19  ;;  %7473 = vmatpush.bf16.msra.mxu3 %v10419_v28  ;;  %v7535_v19 = vld [vmem:[%s13200_s9 + $0x68] sm:$0xff]  ;;  %v7242_v27 = vadd.f32 %v12982_v0, %v7229_v32  ;;  %v7528_v0 = vld [vmem:[%s13200_s9 + $0x30] sm:$0xff]  ;;  %v10563_v28 = vor.u32 %v11566_v17, %v10560_v36  ;;  %v7562_v5 = vld [vmem:[%s13200_s9 + $0x140] sm:$0xff]  ;;  %v7519_v36 = vmax.f32 %v12929_v1, 0.0 }
 0x643   :  { %7479 = vmatpush.bf16.msra.mxu0 %v10659_v15  ;;  %v7568_v15 = vld [vmem:[%s13200_s9 + $0x170] sm:$0xff]  ;;  %v7550_v24 = vld [vmem:[%s13200_s9 + $0xe0] sm:$0xff] }
 0x644   :  { %7496 = vmatpush.bf16.msrb.mxu1 %v10723_v14  ;;  %7461 = vmatmul.bf16.vlgmr.msra.gmra.mxu2 %v12814_v4  ;;  %v10691_v4 = vor.u32 %v11598_v31, %v10688_v41  ;;  %v7522_v31 = vld [vmem:[%s13200_s9] sm:$0xff]  ;;  %v7551_v41 = vld [vmem:[%s13200_s9 + $0xe8] sm:$0xff]  ;;  %v7556_v39 = vld [vmem:[%s13200_s9 + $0x110] sm:$0xff] }
 0x645   :  { %7509 = vmatpush.bf16.msrb.mxu2 %v10851_v56  ;;  %7474 = vmatmul.bf16.vlgmr.msra.gmra.mxu3 %v12818_v7  ;;  %v11574_v7 = vld [vmem:[#allocation2 + $0x166c] sm:$0xf]  ;;  %v7542_v32 = vld [vmem:[%s13200_s9 + $0xa0] sm:$0xff] }
 0x646   :  { %7590 = vmatpush.msrb.mxu3 %v7537_v37  ;;  %v10595_v30 = vor.u32 %v11574_v7, %v10592_v57  ;;  %v10544_v37 = vld [vmem:[#allocation2 + $0x1618] sm:$0xf0]  ;;  %v7555_v57 = vld [vmem:[%s13200_s9 + $0x108] sm:$0xff]  ;;  %v7584_v1 = vld [vmem:[%s13200_s9 + $0x1f0] sm:$0xff] }
 0x647   :  { %7480 = vmatpush.bf16.msra.mxu0 %v10643_v23  ;;  %v7254_v55 = vpop.f32.mrf.mxu2  ;;  %v7230_v56 = vpop.f32.mrf.mxu0  ;;  %v7564_v23 = vld [vmem:[%s13200_s9 + $0x150] sm:$0xff]  ;;  %v10547_v47 = vor.u32 %v11562_v21, %v10544_v37  ;;  %v7546_v7 = vld [vmem:[%s13200_s9 + $0xc0] sm:$0xff] }
 0x648   :  { %7591 = vmatpush.msrb.mxu3 %v7536_v33  ;;  %7497 = vmatpush.bf16.msrb.mxu1 %v10707_v58  ;;  %v7255_v35 = vadd.f32 %v7254_v55, %v7242_v27  ;;  %v7267_v62 = vpop.f32.mrf.mxu3  ;;  %v7524_v33 = vld [vmem:[%s13200_s9 + $0x10] sm:$0xff]  ;;  %v7538_v17 = vld [vmem:[%s13200_s9 + $0x80] sm:$0xff] }
 0x649   :  { %7510 = vmatpush.bf16.msrb.mxu2 %v10835_v38  ;;  %v7553_v38 = vld [vmem:[%s13200_s9 + $0xf8] sm:$0xff] }
 0x64a   :  { %7592 = vmatpush.msrb.mxu3 %v7535_v19  ;;  %v7268_v14 = vadd.f32 %v7267_v62, %v7255_v35  ;;  %v7552_v19 = vld [vmem:[%s13200_s9 + $0xf0] sm:$0xff] }
 0x64b   :  { %7481 = vmatpush.bf16.msra.mxu0 %v10627_v48  ;;  %v7561_v48 = vld [vmem:[%s13200_s9 + $0x138] sm:$0xff] }
 0x64c   :  { %7593 = vmatpush.msrb.mxu3 %v7534_v20  ;;  %7498 = vmatpush.bf16.msrb.mxu1 %v10691_v4  ;;  %v7548_v4 = vld [vmem:[%s13200_s9 + $0xd0] sm:$0xff] }
 0x64d   :  { %7511 = vmatpush.bf16.msrb.mxu2 %v10819_v8  ;;  %v7558_v8 = vld [vmem:[%s13200_s9 + $0x120] sm:$0xff] }
 0x64e   :  { %7594 = vmatpush.msrb.mxu3 %v7533_v59 }
 0x64f   :  { %7482 = vmatpush.bf16.msra.mxu0 %v10611_v52  ;;  %v7256_v63 = vpop.f32.mrf.mxu2  ;;  %v7547_v52 = vld [vmem:[%s13200_s9 + $0xc8] sm:$0xff] }
 0x650   :  { %7595 = vmatpush.msrb.mxu3 %v7532_v3  ;;  %7499 = vmatpush.bf16.msrb.mxu1 %v10675_v42  ;;  %v7293_v61 = vpop.f32.mrf.mxu1  ;;  %v7269_v58 = vpop.f32.mrf.mxu3  ;;  %v7545_v3 = vld [vmem:[%s13200_s9 + $0xb8] sm:$0xff]  ;;  %v7544_v42 = vld [vmem:[%s13200_s9 + $0xb0] sm:$0xff]  ;;  %v7582_v63 = vld [vmem:[%s13200_s9 + $0x1e0] sm:$0xff] }
 0x651   :  { %7512 = vmatpush.bf16.msrb.mxu2 %v10803_v51  ;;  %v7554_v51 = vld [vmem:[%s13200_s9 + $0x100] sm:$0xff] }
 0x652   :  { %7596 = vmatpush.msrb.mxu3 %v7531_v53  ;;  %v7520_v53 = vmax.f32 %v12977_v25, 0.0  ;;  %v7541_v25 = vld [vmem:[%s13200_s9 + $0x98] sm:$0xff] }
 0x653   :  { %7483 = vmatpush.bf16.msra.mxu0 %v10595_v30  ;;  %7500 = vmatmul.bf16.vlgmr.msrb.gmra.mxu1 %v12820_v13  ;;  %v7526_v13 = vld [vmem:[%s13200_s9 + $0x20] sm:$0xff] }
 0x654   :  { %7630 = vmatpush.msra.mxu1 %v7569_v29  ;;  %7597 = vmatpush.msrb.mxu3 %v7530_v60  ;;  %v7543_v29 = vld [vmem:[%s13200_s9 + $0xa8] sm:$0xff] }
 0x655   :  { %10855 = vmatmul.msk.bf16.vlgmr.msrb.gmra.mxu2 %vm491_vm2, %v12827_v22  ;;  %v7525_v22 = vld [vmem:[%s13200_s9 + $0x18] sm:$0xff] }
 0x656   :  { %7631 = vmatpush.msra.mxu1 %v7568_v15  ;;  %7598 = vmatpush.msrb.mxu3 %v7529_v26  ;;  %v7540_v15 = vld [vmem:[%s13200_s9 + $0x90] sm:$0xff]  ;;  %v7539_v26 = vld [vmem:[%s13200_s9 + $0x88] sm:$0xff] }
 0x657   :  { %7484 = vmatpush.bf16.msra.mxu0 %v10579_v11 }
 0x658   :  { %7632 = vmatpush.msra.mxu1 %v7567_v46  ;;  %7599 = vmatpush.msrb.mxu3 %v7528_v0  ;;  %v7295_v20 = vpop.f32.mrf.mxu1 }
 0x659   :  { %v7573_v20 = vld [vmem:[%s13200_s9 + $0x198] sm:$0xff] }
 0x65a   :  { %7633 = vmatpush.msra.mxu1 %v7566_v18  ;;  %7600 = vmatpush.msrb.mxu3 %v7527_v40 }
 0x65b   :  { %7485 = vmatpush.bf16.msra.mxu0 %v10563_v28 }
 0x65c   :  { %7634 = vmatpush.msra.mxu1 %v7565_v10  ;;  %7601 = vmatpush.msrb.mxu3 %v7526_v13  ;;  %v7585_v13 = vld [vmem:[%s13200_s9 + $0x1f8] sm:$0xff] }
 0x65d   :  { %7650 = vmatpush.msra.mxu2 %v7585_v13 }
 0x65e   :  { %7635 = vmatpush.msra.mxu1 %v7564_v23  ;;  %7602 = vmatpush.msrb.mxu3 %v7525_v22 }
 0x65f   :  { %7486 = vmatpush.bf16.msra.mxu0 %v10547_v47  ;;  %v7280_v12 = vpop.f32.mrf.mxu0  ;;  %7651 = vmatpush.msra.mxu2 %v7584_v1 }
 0x660   :  { %7636 = vmatpush.msra.mxu1 %v7563_v49  ;;  %7603 = vmatpush.msrb.mxu3 %v7524_v33  ;;  %v7281_v59 = vadd.f32 %v7280_v12, %v7268_v14  ;;  %v7583_v49 = vld [vmem:[%s13200_s9 + $0x1e8] sm:$0xff]  ;;  %v7580_v33 = vld [vmem:[%s13200_s9 + $0x1d0] sm:$0xff]  ;;  %v7570_v12 = vld [vmem:[%s13200_s9 + $0x180] sm:$0xff] }
 0x661   :  { %7652 = vmatpush.msra.mxu2 %v7583_v49 }
 0x662   :  { %7637 = vmatpush.msra.mxu1 %v7562_v5  ;;  %7487 = vmatmul.bf16.vlgmr.msra.gmra.mxu0 %v12816_v6  ;;  %v7559_v6 = vld [vmem:[%s13200_s9 + $0x128] sm:$0xff]  ;;  %v7294_v44 = vadd.f32 %v7293_v61, %v7281_v59  ;;  %v7581_v61 = vld [vmem:[%s13200_s9 + $0x1d8] sm:$0xff] }
 0x663   :  { %7610 = vmatpush.msrb.mxu0 %v7553_v38  ;;  %7604 = vmatpush.msrb.mxu3 %v7523_v45  ;;  %v7579_v38 = vld [vmem:[%s13200_s9 + $0x1c8] sm:$0xff] }
 0x664   :  { %7638 = vmatpush.msra.mxu1 %v7561_v48  ;;  %7653 = vmatpush.msra.mxu2 %v7582_v63  ;;  %v7577_v48 = vld [vmem:[%s13200_s9 + $0x1b8] sm:$0xff] }
 0x665   :  { %7611 = vmatpush.msrb.mxu0 %v7552_v19  ;;  %7605 = vmatpush.msrb.mxu3 %v7522_v31  ;;  %v7578_v19 = vld [vmem:[%s13200_s9 + $0x1c0] sm:$0xff]  ;;  %v7576_v31 = vld [vmem:[%s13200_s9 + $0x1b0] sm:$0xff] }
 0x666   :  { %7606 = vmatmul.f32.vlgmr.msrb.gmra.mxu3 %v7518_v43  ;;  %7639 = vmatpush.msra.mxu1 %v7560_v16  ;;  %v7574_v16 = vld [vmem:[%s13200_s9 + $0x1a0] sm:$0xff] }
 0x667   :  { %7612 = vmatpush.msrb.mxu0 %v7551_v41  ;;  %v7282_v30 = vpop.f32.mrf.mxu0  ;;  %v7306_v34 = vpop.f32.mrf.mxu2  ;;  %7654 = vmatpush.msra.mxu2 %v7581_v61  ;;  %v7575_v41 = vld [vmem:[%s13200_s9 + $0x1a8] sm:$0xff] }
 0x668   :  { %7640 = vmatpush.msra.mxu1 %v7559_v6  ;;  %v7319_v54 = vpop.f32.mrf.mxu3  ;;  %v7307_v9 = vadd.f32 %v7306_v34, %v7294_v44 }
 0x669   :  { %7613 = vmatpush.msrb.mxu0 %v7550_v24  ;;  %7655 = vmatpush.msra.mxu2 %v7580_v33 }
 0x66a   :  { %7641 = vmatpush.msra.mxu1 %v7558_v8  ;;  %v7320_v60 = vadd.f32 %v7319_v54, %v7307_v9  ;;  %v7571_v8 = vld [vmem:[%s13200_s9 + $0x188] sm:$0xff] }
 0x66b   :  { %7614 = vmatpush.msrb.mxu0 %v7549_v2  ;;  %7656 = vmatpush.msra.mxu2 %v7579_v38  ;;  %v7572_v2 = vld [vmem:[%s13200_s9 + $0x190] sm:$0xff]  ;;  %s11880_s9 = smov [#allocation17]  }
 0x66c   :  { %7642 = vmatpush.msra.mxu1 %v7557_v50  ;;  %s7677_s3 = sshll.u32 %s11880_s9, 4  ;;  %s7678_s3 = int_to_ptr.vmem [resolvable:$true] %s7677_s3 }
 0x66d   :  { %7615 = vmatpush.msrb.mxu0 %v7548_v4  ;;  %7657 = vmatpush.msra.mxu2 %v7578_v19 }
 0x66e   :  { %7643 = vmatpush.msra.mxu1 %v7556_v39 }
 0x66f   :  { %7616 = vmatpush.msrb.mxu0 %v7547_v52  ;;  %v7308_v11 = vpop.f32.mrf.mxu2  ;;  %7658 = vmatpush.msra.mxu2 %v7577_v48 }
 0x670   :  { %7644 = vmatpush.msra.mxu1 %v7555_v57  ;;  %v7345_v27 = vpop.f32.mrf.mxu1  ;;  %v7321_v46 = vpop.f32.mrf.mxu3 }
 0x671   :  { %7617 = vmatpush.msrb.mxu0 %v7546_v7  ;;  %7659 = vmatpush.msra.mxu2 %v7576_v31  ;;  %v11661_v46 = vld [vmem:[#allocation15] ss:$0 sm:$0xff] }
 0x672   :  { %7645 = vmatpush.msra.mxu1 %v7554_v51 }
 0x673   :  { %7618 = vmatpush.msrb.mxu0 %v7545_v3  ;;  %7646 = vmatmul.f32.vlgmr.msra.gmra.mxu1 %v7520_v53 }
 0x674   :  { %7660 = vmatpush.msra.mxu2 %v7575_v41 }
 0x675   :  { %7619 = vmatpush.msrb.mxu0 %v7544_v42 }
 0x676   :  { %7661 = vmatpush.msra.mxu2 %v7574_v16 }
 0x677   :  { %7620 = vmatpush.msrb.mxu0 %v7543_v29 }
 0x678   :  { %v7347_v55 = vpop.f32.mrf.mxu1  ;;  %7662 = vmatpush.msra.mxu2 %v7573_v20 }
 0x679   :  { %7621 = vmatpush.msrb.mxu0 %v7542_v32 }
 0x67a   :  { %7663 = vmatpush.msra.mxu2 %v7572_v2 }
 0x67b   :  { %7622 = vmatpush.msrb.mxu0 %v7541_v25 }
 0x67c   :  { %7664 = vmatpush.msra.mxu2 %v7571_v8 }
 0x67d   :  { %7623 = vmatpush.msrb.mxu0 %v7540_v15 }
 0x67e   :  { %7665 = vmatpush.msra.mxu2 %v7570_v12 }
 0x67f   :  { %7624 = vmatpush.msrb.mxu0 %v7539_v26  ;;  %v7332_v0 = vpop.f32.mrf.mxu0 }
 0x680   :  { %v7333_v35 = vadd.f32 %v7332_v0, %v7320_v60 }
 0x681   :  { %7625 = vmatpush.msrb.mxu0 %v7538_v17 }
 0x682   :  { %7626 = vmatmul.f32.vlgmr.msrb.gmra.mxu0 %v7519_v36  ;;  %v7346_v62 = vadd.f32 %v7345_v27, %v7333_v35 }
 0x687   :  { %v7334_v18 = vpop.f32.mrf.mxu0  ;;  %v7358_v40 = vpop.f32.mrf.mxu2 }
 0x688   :  { %v7371_v28 = vpop.f32.mrf.mxu3  ;;  %v7359_v6 = vadd.f32 %v7358_v40, %v7346_v62 }
 0x68a   :  { %v7372_v4 = vadd.f32 %v7371_v28, %v7359_v6 }
 0x68f   :  { %v7360_v56 = vpop.f32.mrf.mxu2 }
 0x690   :  { %v7397_v14 = vpop.f32.mrf.mxu1  ;;  %v7373_v10 = vpop.f32.mrf.mxu3 }
 0x698   :  { %v7399_v21 = vpop.f32.mrf.mxu1 }
 0x69f   :  { %v7384_v37 = vpop.f32.mrf.mxu0 }
 0x6a0   :  { %v7385_v50 = vadd.f32 %v7384_v37, %v7372_v4 }
 0x6a2   :  { %v7398_v39 = vadd.f32 %v7397_v14, %v7385_v50 }
 0x6a7   :  { %v7386_v23 = vpop.f32.mrf.mxu0  ;;  %v7410_v22 = vpop.f32.mrf.mxu2 }
 0x6a8   :  { %v7423_v47 = vpop.f32.mrf.mxu3  ;;  %v7411_v7 = vadd.f32 %v7410_v22, %v7398_v39 }
 0x6aa   :  { %v7424_v57 = vadd.f32 %v7423_v47, %v7411_v7 }
 0x6af   :  { %v7412_v5 = vpop.f32.mrf.mxu2 }
 0x6b0   :  { %v7449_v58 = vpop.f32.mrf.mxu1  ;;  %v7425_v45 = vpop.f32.mrf.mxu3 }
 0x6b8   :  { %v7451_v43 = vpop.f32.mrf.mxu1 }
 0x6bf   :  { %v7436_v24 = vpop.f32.mrf.mxu0 }
 0x6c0   :  { %v7437_v42 = vadd.f32 %v7436_v24, %v7424_v57 }
 0x6c2   :  { %v7450_v30 = vadd.f32 %v7449_v58, %v7437_v42 }
 0x6c7   :  { %v7438_v59 = vpop.f32.mrf.mxu0  ;;  %v7462_v52 = vpop.f32.mrf.mxu2 }
 0x6c8   :  { %v7475_v44 = vpop.f32.mrf.mxu3  ;;  %v7463_v34 = vadd.f32 %v7462_v52, %v7450_v30 }
 0x6ca   :  { %v7476_v9 = vadd.f32 %v7475_v44, %v7463_v34 }
 0x6cf   :  { %v7464_v3 = vpop.f32.mrf.mxu2 }
 0x6d0   :  { %v7501_v51 = vpop.f32.mrf.mxu1  ;;  %v7477_v53 = vpop.f32.mrf.mxu3 }
 0x6d8   :  { %v7514_v29 = vpop.f32.mrf.mxu2  ;;  %v7503_v54 = vpop.f32.mrf.mxu1 }
 0x6df   :  { %v7488_v32 = vpop.f32.mrf.mxu0 }
 0x6e0   :  { %v7489_v60 = vadd.f32 %v7488_v32, %v7476_v9  ;;  %v7516_v15 = vpop.f32.mrf.mxu2 }
 0x6e2   :  { %v7502_v25 = vadd.f32 %v7501_v51, %v7489_v60 }
 0x6e4   :  { %v7515_v27 = vadd.f32 %v7514_v29, %v7502_v25 }
 0x6e6   :  { %v7521_v26 = vmax.f32 %v7515_v27, 0.0 }
 0x6e7   :  { %v7490_v11 = vpop.f32.mrf.mxu0 }
 0x6e8   :  { %7666 = vmatmul.f32.vlgmr.msra.gmra.mxu2 %v7521_v26 }
 0x6e9   :  { %v7607_v17 = vpop.f32.mrf.mxu3 }
 0x6ea   :  { %v7608_v55 = vadd.f32 %v11661_v46, %v7607_v17 }
 0x6f0   :  { %v7647_v35 = vpop.f32.mrf.mxu1 }
 0x6ff   :  { %v7627_v36 = vpop.f32.mrf.mxu0 }
 0x700   :  { %v7628_v0 = vadd.f32 %v7627_v36, %v7608_v55 }
 0x702   :  { %v7648_v62 = vadd.f32 %v7647_v35, %v7628_v0 }
 0x76b   :  { %v7667_v18 = vpop.f32.mrf.mxu2 }
 0x76c   :  { %v7668_v40 = vadd.f32 %v7667_v18, %v7648_v62 }
 0x76e   :  { %7671 = vst.msk [vmem:[#allocation17] sm:$0x3] %vm7670_vm10, %v7668_v40 }
 0x76f   :  { %7682 = dma.vmem_to_hbm [thread:$0]  %s7678_s3, 32, %s7680_s19, [#allocation8]  }
 0x770   :  { %11867 = dma.done.wait [#allocation8], 32  }
 0x771   :  { %11868 = vsyncadd [#allocation8], 4294967264 }
 0x772   :  { %7687 = vsyncpa [#allocation7], 1 }
 0x773   :  { %7688 = vsyncpa [#allocation10], 1 }
 0x774   :  { %7689 = vsyncpa [#allocation13], 1 }
 0x775   :  { %7690 = vsyncpa [#allocation16], 1 }
 0x776   :  { %7691 = vsyncpa [#allocation8], 1 }
 0x777   :  { %7692 = vsyncmov [#allocation3] }
 0x77a   :  { %s7693_s1 = vpop.sfrf %7692 }
 0x77b   :  { %p10856_p0 = scmp.ne.s32.totalorder %s7693_s1, 0 }
 0x77d   :  { %7697 = shalt.err (%p10856_p0)  }

</bundles_post_ra>
